<compile_context>
chip_gen: v6e
topology: v6e:2x2x1
jax: 0.10.0
libtpu: 0.0.40
codegen_flags: <defaults>
</compile_context>

<pallas_src>
import functools

import jax
import jax.numpy as jnp
from jax.experimental import pallas as pl
from jax.experimental.pallas import tpu as pltpu


HIDDEN_CONV = [16, 32, 64, 128, 256, 512, 1024]
HIDDEN_LIN = [1024, 512, 256, 128, 64, 24]


# ----------------------------------------------------------------------------
# Weight preparation (pure JAX, runs ONCE at setup time, not per forward call).
# ----------------------------------------------------------------------------
def _im2col(x, k=3, s=2, p=1):
    """(N, C, H, W) -> (N*Ho*Wo, C*k*k); rows ordered (N, Ho, Wo), features (C, kh, kw)."""
    N, C, H, W = x.shape
    xp = jnp.pad(x, ((0, 0), (0, 0), (p, p), (p, p)))
    Ho = (H + 2 * p - k) // s + 1
    Wo = (W + 2 * p - k) // s + 1
    cols = []
    for i in range(k):
        for j in range(k):
            cols.append(xp[:, :, i:i + s * (Ho - 1) + 1:s, j:j + s * (Wo - 1) + 1:s])
    pat = jnp.stack(cols, axis=2)           # (N, C, k*k, Ho, Wo)
    pat = pat.transpose(0, 3, 4, 1, 2)      # (N, Ho, Wo, C, k*k)
    return pat.reshape(N * Ho * Wo, C * k * k), Ho, Wo


def _conv_as_dense(w, H, W):
    """Exact dense equivalent of Conv2d(3x3, s=2, p=1) on a flattened (C*H*W,) input.

    Returns D of shape (Cin*H*W, Cout*Ho*Wo) with flat_out = flat_in @ D.
    Zero-padded taps become zeros, so 1x1 spatial inputs collapse to the center
    tap (K = Cin) and 2x2 inputs to the live 2x2 sub-kernel (K = 4*Cin).
    """
    Cout, Cin = w.shape[0], w.shape[1]
    eye = jnp.eye(Cin * H * W, dtype=jnp.float32).reshape(Cin * H * W, Cin, H, W)
    cols, Ho, Wo = _im2col(eye)
    y = cols @ w.reshape(Cout, -1).T                           # (Cin*H*W*Ho*Wo, Cout)
    D = (y.reshape(Cin * H * W, Ho, Wo, Cout)
          .transpose(0, 3, 1, 2)
          .reshape(Cin * H * W, Cout * Ho * Wo))
    return D, Ho, Wo


def prepare_weights(params, block_size=16, n_kernels=4, compute_dtype=jnp.bfloat16):
    """Fold convs into dense matmuls, cast weights to bf16, regroup the SMoE head."""
    layers = []                    # (W (K,N) bf16, b (1,N) f32), each followed by ReLU
    H = W = block_size
    for (w, b) in params["conv"]:
        D, Ho, Wo = _conv_as_dense(w, H, W)
        bias = jnp.repeat(b, Ho * Wo).reshape(1, -1)           # (1, Cout*Ho*Wo)
        layers.append((D.astype(compute_dtype), bias.astype(jnp.float32)))
        H, W = Ho, Wo
    assert (H, W) == (1, 1), "conv stack must reduce spatial dims to 1x1"
    assert layers[-1][0].shape[1] == HIDDEN_LIN[0]

    lins = params["lin"]
    for (w, b) in lins[:-1]:                                   # hidden linears (ReLU)
        layers.append((w.astype(compute_dtype), b.reshape(1, -1).astype(jnp.float32)))

    # Final 64 -> 6*n_kernels linear: exact column permutation so parameter
    # group j (cx, cy, nu, a11, a21, a22) occupies contiguous output columns
    # [j*K, (j+1)*K).  One matmul in-kernel + static lane slices.
    w5, b5 = lins[-1]
    assert w5.shape[1] == 6 * n_kernels
    wg = jnp.concatenate([w5[:, j::6] for j in range(6)], axis=1).astype(compute_dtype)  # (64, 6K)
    bg = jnp.concatenate([b5[j::6] for j in range(6)])[None, :].astype(jnp.float32)      # (1, 6K)
    return layers, wg, bg


# ----------------------------------------------------------------------------
# Single fused Pallas kernel: 12 matmul+bias(+ReLU) layers -> SMoE gate.
# ----------------------------------------------------------------------------
def _fused_kernel(*refs, n_layers, block_size, n_kernels):
    x_ref = refs[0]
    wg_ref = refs[1 + 2 * n_layers]          # (64, 6K) bf16
    bg_ref = refs[2 + 2 * n_layers]          # (1, 6K)  f32
    o_ref = refs[3 + 2 * n_layers]           # (tm, P)  f32

    h = x_ref[...]                           # (tm, F) f32, stays resident on-chip
    for i in range(n_layers):
        w = refs[1 + 2 * i][...]             # (K_i, N_i) bf16
        b = refs[2 + 2 * i][...]             # (1, N_i)   f32
        h = jnp.dot(h.astype(jnp.bfloat16), w,
                    preferred_element_type=jnp.float32) + b
        h = jnp.maximum(h, 0.0)              # 'la' order: layer -> ReLU

    # SMoE head: one (tm,64)x(64,6K) matmul, no activation on the last layer.
    p = jnp.dot(h.astype(jnp.bfloat16), wg_ref[...],
                preferred_element_type=jnp.float32) + bg_ref[...]      # (tm, 6K)

    K = n_kernels

    def grab(j):                             # parameter group j for all kernels
        return p[:, j * K:(j + 1) * K][:, :, None]                     # (tm, K, 1)

    cx, cy, nu = grab(0), grab(1), grab(2)
    a11, a21, a22 = grab(3), grab(4), grab(5)

    # pixel grid generated in-kernel: gx[p] = (p % bs)/(bs-1), gy[p] = (p // bs)/(bs-1)
    bs = block_size
    P = bs * bs
    pf = jax.lax.broadcasted_iota(jnp.int32, (1, 1, P), 2).astype(jnp.float32)
    row = jnp.floor(pf * (1.0 / bs))
    col = pf - row * bs
    inv = 1.0 / (bs - 1)
    gx = col * inv                           # (1, 1, P)
    gy = row * inv

    dx = gx - cx                             # (tm, K, P)
    dy = gy - cy
    # lower-triangular steering A = [[a11, 0], [a21, a22]];  e = -1/2 ||A d||^2
    y1 = a11 * dx
    y2 = a21 * dx + a22 * dy
    e = -0.5 * (y1 * y1 + y2 * y2)
    m = jnp.max(e, axis=1, keepdims=True)
    z = jnp.exp(e - m)
    gate = z * pl.reciprocal(jnp.sum(z, axis=1, keepdims=True), approx=True)
    o_ref[...] = jnp.sum(gate * nu, axis=1).astype(o_ref.dtype)        # (tm, P)


def _full_spec(a):
    return pl.BlockSpec(a.shape, lambda i, _nd=a.ndim: (0,) * _nd)


def _batch_tile(B, F, P):
    if B <= 512:
        return B
    if (F % 128) or (P % 128):
        return B
    for tm in (512, 256, 128, 64, 32, 16, 8):
        if B % tm == 0:
            return tm
    return B


def elvira2023_forward(prepped, x, block_size=16, n_kernels=4):
    layers, wg, bg = prepped
    assert wg.shape[-1] == 6 * n_kernels
    B = x.shape[0]
    F = x.shape[1] * x.shape[2] * x.shape[3]
    P = block_size * block_size
    xf = x.reshape(B, F).astype(jnp.float32)

    tm = _batch_tile(B, F, P)
    n_b = B // tm

    args = [xf]
    in_specs = [pl.BlockSpec((tm, F), lambda i: (i, 0))]
    for (w, b) in layers:
        args += [w, b]
        in_specs += [_full_spec(w), _full_spec(b)]
    args += [wg, bg]
    in_specs += [_full_spec(wg), _full_spec(bg)]

    out = pl.pallas_call(
        functools.partial(_fused_kernel, n_layers=len(layers),
                          block_size=block_size, n_kernels=n_kernels),
        out_shape=jax.ShapeDtypeStruct((B, P), jnp.float32),
        grid=(n_b,),
        in_specs=in_specs,
        out_specs=pl.BlockSpec((tm, P), lambda i: (i, 0)),
        compiler_params=pltpu.CompilerParams(
            dimension_semantics=("parallel",),   # independent batch tiles (v7x: 2 TCs)
        ),
    )(*args)
    return out.reshape(B, 1, block_size, block_size)


# ----------------------------------------------------------------------------
# Deterministic parameter init + pure-JAX f32 reference (unfused, layer by layer).
# ----------------------------------------------------------------------------
def _uniform(key, shape, bound):
    return jax.random.uniform(key, shape, jnp.float32, -bound, bound)


def init_params(key):
    params = {"conv": [], "lin": []}
    cin = 1
    for cout in HIDDEN_CONV:
        key, kw, kb = jax.random.split(key, 3)
        bound = 1.0 / float(jnp.sqrt(cin * 9))
        params["conv"].append((_uniform(kw, (cout, cin, 3, 3), bound),
                               _uniform(kb, (cout,), bound)))
        cin = cout
    din = HIDDEN_LIN[0]
    for dout in HIDDEN_LIN[1:]:
        key, kw, kb = jax.random.split(key, 3)
        bound = 1.0 / float(jnp.sqrt(din))
        params["lin"].append((_uniform(kw, (din, dout), bound),
                              _uniform(kb, (dout,), bound)))
        din = dout
    return params


def reference_forward(params, x, block_size=16, n_kernels=4):
    """Layer-by-layer f32 reference (same math as the original unfused version)."""
    h = x
    for (w, b) in params["conv"]:
        cols, Ho, Wo = _im2col(h)
        y = jnp.maximum(cols @ w.reshape(w.shape[0], -1).T + b, 0.0)
        h = y.reshape(h.shape[0], Ho, Wo, w.shape[0]).transpose(0, 3, 1, 2)
    B = h.shape[0]
    h = h.reshape(B, -1)
    n_lin = len(params["lin"])
    for i, (w, b) in enumerate(params["lin"]):
        h = h @ w + b
        if i < n_lin - 1:
            h = jnp.maximum(h, 0.0)
    p = h.reshape(B, n_kernels, 6)
    cx, cy, nu, a11, a21, a22 = (p[:, :, i][:, :, None] for i in range(6))
    coords = jnp.linspace(0.0, 1.0, block_size, dtype=jnp.float32)
    yy, xx = jnp.meshgrid(coords, coords, indexing="ij")
    gx = xx.reshape(1, 1, -1)
    gy = yy.reshape(1, 1, -1)
    dx, dy = gx - cx, gy - cy
    y1 = a11 * dx
    y2 = a21 * dx + a22 * dy
    e = -0.5 * (y1 * y1 + y2 * y2)
    e = e - jnp.max(e, axis=1, keepdims=True)
    z = jnp.exp(e)
    gate = z / jnp.sum(z, axis=1, keepdims=True)
    out = jnp.sum(gate * nu, axis=1)
    return out.reshape(B, 1, block_size, block_size)


if __name__ == "__main__":
    block_size, n_kernels = 16, 4
    key = jax.random.PRNGKey(0)
    kp, kx = jax.random.split(key)
    params = init_params(kp)
    x = jax.random.normal(kx, (2, 1, block_size, block_size), jnp.float32)

    # One-time weight preparation (conv->dense folding, bf16 cast, head regroup).
    prepped = prepare_weights(params, block_size=block_size, n_kernels=n_kernels)

    fwd = jax.jit(functools.partial(elvira2023_forward,
                                    block_size=block_size, n_kernels=n_kernels))
    y = fwd(prepped, x)
    jax.block_until_ready(y)

    assert y.shape == (2, 1, block_size, block_size), y.shape
    assert bool(jnp.all(jnp.isfinite(y)))
    y_ref = reference_forward(params, x, block_size=block_size, n_kernels=n_kernels)
    assert bool(jnp.allclose(y, y_ref, rtol=0.1, atol=3e-2)), \
        float(jnp.max(jnp.abs(y - y_ref)))
    print("KERNEL_OK")
</pallas_src>

<mosaic_0001>
module attributes {stable_mosaic.version = 11 : i64} {
  func.func @_fused_kernel(%arg0: i32, %arg1: memref<2x256xf32, #tpu.memory_space<vmem>>, %arg2: memref<256x1024xbf16, #tpu.memory_space<vmem>>, %arg3: memref<1x1024xf32, #tpu.memory_space<vmem>>, %arg4: memref<1024x512xbf16, #tpu.memory_space<vmem>>, %arg5: memref<1x512xf32, #tpu.memory_space<vmem>>, %arg6: memref<512x256xbf16, #tpu.memory_space<vmem>>, %arg7: memref<1x256xf32, #tpu.memory_space<vmem>>, %arg8: memref<256x128xbf16, #tpu.memory_space<vmem>>, %arg9: memref<1x128xf32, #tpu.memory_space<vmem>>, %arg10: memref<128x256xbf16, #tpu.memory_space<vmem>>, %arg11: memref<1x256xf32, #tpu.memory_space<vmem>>, %arg12: memref<256x512xbf16, #tpu.memory_space<vmem>>, %arg13: memref<1x512xf32, #tpu.memory_space<vmem>>, %arg14: memref<512x1024xbf16, #tpu.memory_space<vmem>>, %arg15: memref<1x1024xf32, #tpu.memory_space<vmem>>, %arg16: memref<1024x512xbf16, #tpu.memory_space<vmem>>, %arg17: memref<1x512xf32, #tpu.memory_space<vmem>>, %arg18: memref<512x256xbf16, #tpu.memory_space<vmem>>, %arg19: memref<1x256xf32, #tpu.memory_space<vmem>>, %arg20: memref<256x128xbf16, #tpu.memory_space<vmem>>, %arg21: memref<1x128xf32, #tpu.memory_space<vmem>>, %arg22: memref<128x64xbf16, #tpu.memory_space<vmem>>, %arg23: memref<1x64xf32, #tpu.memory_space<vmem>>, %arg24: memref<64x24xbf16, #tpu.memory_space<vmem>>, %arg25: memref<1x24xf32, #tpu.memory_space<vmem>>, %arg26: memref<2x256xf32, #tpu.memory_space<vmem>>) attributes {dimension_semantics = [#tpu.dimension_semantics<parallel>], iteration_bounds = array<i64: 1>, scalar_prefetch = 0 : i64, scratch_operands = 0 : i64, tpu.core_type = #tpu.core_type<tc>, window_params = [{transform_indices = @transform_0, window_bounds = array<i64: 2, 256>}, {pipeline_mode = #tpu.pipeline_mode<synchronous>, transform_indices = @transform_1, window_bounds = array<i64: 256, 1024>}, {pipeline_mode = #tpu.pipeline_mode<synchronous>, transform_indices = @transform_2, window_bounds = array<i64: 1, 1024>}, {pipeline_mode = #tpu.pipeline_mode<synchronous>, transform_indices = @transform_3, window_bounds = array<i64: 1024, 512>}, {pipeline_mode = #tpu.pipeline_mode<synchronous>, transform_indices = @transform_4, window_bounds = array<i64: 1, 512>}, {pipeline_mode = #tpu.pipeline_mode<synchronous>, transform_indices = @transform_5, window_bounds = array<i64: 512, 256>}, {pipeline_mode = #tpu.pipeline_mode<synchronous>, transform_indices = @transform_6, window_bounds = array<i64: 1, 256>}, {pipeline_mode = #tpu.pipeline_mode<synchronous>, transform_indices = @transform_7, window_bounds = array<i64: 256, 128>}, {pipeline_mode = #tpu.pipeline_mode<synchronous>, transform_indices = @transform_8, window_bounds = array<i64: 1, 128>}, {pipeline_mode = #tpu.pipeline_mode<synchronous>, transform_indices = @transform_9, window_bounds = array<i64: 128, 256>}, {pipeline_mode = #tpu.pipeline_mode<synchronous>, transform_indices = @transform_10, window_bounds = array<i64: 1, 256>}, {pipeline_mode = #tpu.pipeline_mode<synchronous>, transform_indices = @transform_11, window_bounds = array<i64: 256, 512>}, {pipeline_mode = #tpu.pipeline_mode<synchronous>, transform_indices = @transform_12, window_bounds = array<i64: 1, 512>}, {pipeline_mode = #tpu.pipeline_mode<synchronous>, transform_indices = @transform_13, window_bounds = array<i64: 512, 1024>}, {pipeline_mode = #tpu.pipeline_mode<synchronous>, transform_indices = @transform_14, window_bounds = array<i64: 1, 1024>}, {pipeline_mode = #tpu.pipeline_mode<synchronous>, transform_indices = @transform_15, window_bounds = array<i64: 1024, 512>}, {pipeline_mode = #tpu.pipeline_mode<synchronous>, transform_indices = @transform_16, window_bounds = array<i64: 1, 512>}, {pipeline_mode = #tpu.pipeline_mode<synchronous>, transform_indices = @transform_17, window_bounds = array<i64: 512, 256>}, {pipeline_mode = #tpu.pipeline_mode<synchronous>, transform_indices = @transform_18, window_bounds = array<i64: 1, 256>}, {pipeline_mode = #tpu.pipeline_mode<synchronous>, transform_indices = @transform_19, window_bounds = array<i64: 256, 128>}, {pipeline_mode = #tpu.pipeline_mode<synchronous>, transform_indices = @transform_20, window_bounds = array<i64: 1, 128>}, {pipeline_mode = #tpu.pipeline_mode<synchronous>, transform_indices = @transform_21, window_bounds = array<i64: 128, 64>}, {pipeline_mode = #tpu.pipeline_mode<synchronous>, transform_indices = @transform_22, window_bounds = array<i64: 1, 64>}, {pipeline_mode = #tpu.pipeline_mode<synchronous>, transform_indices = @transform_23, window_bounds = array<i64: 64, 24>}, {pipeline_mode = #tpu.pipeline_mode<synchronous>, transform_indices = @transform_24, window_bounds = array<i64: 1, 24>}, {transform_indices = @transform_25, window_bounds = array<i64: 2, 256>}]} {
    %c0 = arith.constant 0 : index
    %c0_0 = arith.constant 0 : index
    %0 = vector.load %arg1[%c0, %c0_0] : memref<2x256xf32, #tpu.memory_space<vmem>>, vector<2x256xf32>
    %c0_1 = arith.constant 0 : index
    %c0_2 = arith.constant 0 : index
    %1 = vector.load %arg2[%c0_1, %c0_2] : memref<256x1024xbf16, #tpu.memory_space<vmem>>, vector<256x1024xbf16>
    %c0_3 = arith.constant 0 : index
    %c0_4 = arith.constant 0 : index
    %2 = vector.load %arg3[%c0_3, %c0_4] : memref<1x1024xf32, #tpu.memory_space<vmem>>, vector<1x1024xf32>
    %3 = arith.truncf %0 : vector<2x256xf32> to vector<2x256xbf16>
    %cst = arith.constant dense<0.000000e+00> : vector<2x1024xf32>
    %4 = tpu.matmul %3, %1, %cst {dimension_numbers = #tpu.dot_dimension_numbers<[1], [0], [0], [1], [0, 0, 1, 1], [], []>} : vector<2x256xbf16>, vector<256x1024xbf16>, vector<2x1024xf32> -> vector<2x1024xf32>
    %5 = vector.broadcast %2 : vector<1x1024xf32> to vector<2x1024xf32>
    %6 = arith.addf %4, %5 : vector<2x1024xf32>
    %cst_5 = arith.constant 0.000000e+00 : f32
    %7 = vector.broadcast %cst_5 : f32 to vector<2x1024xf32>
    %8 = arith.maximumf %6, %7 : vector<2x1024xf32>
    %c0_6 = arith.constant 0 : index
    %c0_7 = arith.constant 0 : index
    %9 = vector.load %arg4[%c0_6, %c0_7] : memref<1024x512xbf16, #tpu.memory_space<vmem>>, vector<1024x512xbf16>
    %c0_8 = arith.constant 0 : index
    %c0_9 = arith.constant 0 : index
    %10 = vector.load %arg5[%c0_8, %c0_9] : memref<1x512xf32, #tpu.memory_space<vmem>>, vector<1x512xf32>
    %11 = arith.truncf %8 : vector<2x1024xf32> to vector<2x1024xbf16>
    %cst_10 = arith.constant dense<0.000000e+00> : vector<2x512xf32>
    %12 = tpu.matmul %11, %9, %cst_10 {dimension_numbers = #tpu.dot_dimension_numbers<[1], [0], [0], [1], [0, 0, 1, 1], [], []>} : vector<2x1024xbf16>, vector<1024x512xbf16>, vector<2x512xf32> -> vector<2x512xf32>
    %13 = vector.broadcast %10 : vector<1x512xf32> to vector<2x512xf32>
    %14 = arith.addf %12, %13 : vector<2x512xf32>
    %cst_11 = arith.constant 0.000000e+00 : f32
    %15 = vector.broadcast %cst_11 : f32 to vector<2x512xf32>
    %16 = arith.maximumf %14, %15 : vector<2x512xf32>
    %c0_12 = arith.constant 0 : index
    %c0_13 = arith.constant 0 : index
    %17 = vector.load %arg6[%c0_12, %c0_13] : memref<512x256xbf16, #tpu.memory_space<vmem>>, vector<512x256xbf16>
    %c0_14 = arith.constant 0 : index
    %c0_15 = arith.constant 0 : index
    %18 = vector.load %arg7[%c0_14, %c0_15] : memref<1x256xf32, #tpu.memory_space<vmem>>, vector<1x256xf32>
    %19 = arith.truncf %16 : vector<2x512xf32> to vector<2x512xbf16>
    %cst_16 = arith.constant dense<0.000000e+00> : vector<2x256xf32>
    %20 = tpu.matmul %19, %17, %cst_16 {dimension_numbers = #tpu.dot_dimension_numbers<[1], [0], [0], [1], [0, 0, 1, 1], [], []>} : vector<2x512xbf16>, vector<512x256xbf16>, vector<2x256xf32> -> vector<2x256xf32>
    %21 = vector.broadcast %18 : vector<1x256xf32> to vector<2x256xf32>
    %22 = arith.addf %20, %21 : vector<2x256xf32>
    %cst_17 = arith.constant 0.000000e+00 : f32
    %23 = vector.broadcast %cst_17 : f32 to vector<2x256xf32>
    %24 = arith.maximumf %22, %23 : vector<2x256xf32>
    %c0_18 = arith.constant 0 : index
    %c0_19 = arith.constant 0 : index
    %25 = vector.load %arg8[%c0_18, %c0_19] : memref<256x128xbf16, #tpu.memory_space<vmem>>, vector<256x128xbf16>
    %c0_20 = arith.constant 0 : index
    %c0_21 = arith.constant 0 : index
    %26 = vector.load %arg9[%c0_20, %c0_21] : memref<1x128xf32, #tpu.memory_space<vmem>>, vector<1x128xf32>
    %27 = arith.truncf %24 : vector<2x256xf32> to vector<2x256xbf16>
    %cst_22 = arith.constant dense<0.000000e+00> : vector<2x128xf32>
    %28 = tpu.matmul %27, %25, %cst_22 {dimension_numbers = #tpu.dot_dimension_numbers<[1], [0], [0], [1], [0, 0, 1, 1], [], []>} : vector<2x256xbf16>, vector<256x128xbf16>, vector<2x128xf32> -> vector<2x128xf32>
    %29 = vector.broadcast %26 : vector<1x128xf32> to vector<2x128xf32>
    %30 = arith.addf %28, %29 : vector<2x128xf32>
    %cst_23 = arith.constant 0.000000e+00 : f32
    %31 = vector.broadcast %cst_23 : f32 to vector<2x128xf32>
    %32 = arith.maximumf %30, %31 : vector<2x128xf32>
    %c0_24 = arith.constant 0 : index
    %c0_25 = arith.constant 0 : index
    %33 = vector.load %arg10[%c0_24, %c0_25] : memref<128x256xbf16, #tpu.memory_space<vmem>>, vector<128x256xbf16>
    %c0_26 = arith.constant 0 : index
    %c0_27 = arith.constant 0 : index
    %34 = vector.load %arg11[%c0_26, %c0_27] : memref<1x256xf32, #tpu.memory_space<vmem>>, vector<1x256xf32>
    %35 = arith.truncf %32 : vector<2x128xf32> to vector<2x128xbf16>
    %cst_28 = arith.constant dense<0.000000e+00> : vector<2x256xf32>
    %36 = tpu.matmul %35, %33, %cst_28 {dimension_numbers = #tpu.dot_dimension_numbers<[1], [0], [0], [1], [0, 0, 1, 1], [], []>} : vector<2x128xbf16>, vector<128x256xbf16>, vector<2x256xf32> -> vector<2x256xf32>
    %37 = vector.broadcast %34 : vector<1x256xf32> to vector<2x256xf32>
    %38 = arith.addf %36, %37 : vector<2x256xf32>
    %cst_29 = arith.constant 0.000000e+00 : f32
    %39 = vector.broadcast %cst_29 : f32 to vector<2x256xf32>
    %40 = arith.maximumf %38, %39 : vector<2x256xf32>
    %c0_30 = arith.constant 0 : index
    %c0_31 = arith.constant 0 : index
    %41 = vector.load %arg12[%c0_30, %c0_31] : memref<256x512xbf16, #tpu.memory_space<vmem>>, vector<256x512xbf16>
    %c0_32 = arith.constant 0 : index
    %c0_33 = arith.constant 0 : index
    %42 = vector.load %arg13[%c0_32, %c0_33] : memref<1x512xf32, #tpu.memory_space<vmem>>, vector<1x512xf32>
    %43 = arith.truncf %40 : vector<2x256xf32> to vector<2x256xbf16>
    %cst_34 = arith.constant dense<0.000000e+00> : vector<2x512xf32>
    %44 = tpu.matmul %43, %41, %cst_34 {dimension_numbers = #tpu.dot_dimension_numbers<[1], [0], [0], [1], [0, 0, 1, 1], [], []>} : vector<2x256xbf16>, vector<256x512xbf16>, vector<2x512xf32> -> vector<2x512xf32>
    %45 = vector.broadcast %42 : vector<1x512xf32> to vector<2x512xf32>
    %46 = arith.addf %44, %45 : vector<2x512xf32>
    %cst_35 = arith.constant 0.000000e+00 : f32
    %47 = vector.broadcast %cst_35 : f32 to vector<2x512xf32>
    %48 = arith.maximumf %46, %47 : vector<2x512xf32>
    %c0_36 = arith.constant 0 : index
    %c0_37 = arith.constant 0 : index
    %49 = vector.load %arg14[%c0_36, %c0_37] : memref<512x1024xbf16, #tpu.memory_space<vmem>>, vector<512x1024xbf16>
    %c0_38 = arith.constant 0 : index
    %c0_39 = arith.constant 0 : index
    %50 = vector.load %arg15[%c0_38, %c0_39] : memref<1x1024xf32, #tpu.memory_space<vmem>>, vector<1x1024xf32>
    %51 = arith.truncf %48 : vector<2x512xf32> to vector<2x512xbf16>
    %cst_40 = arith.constant dense<0.000000e+00> : vector<2x1024xf32>
    %52 = tpu.matmul %51, %49, %cst_40 {dimension_numbers = #tpu.dot_dimension_numbers<[1], [0], [0], [1], [0, 0, 1, 1], [], []>} : vector<2x512xbf16>, vector<512x1024xbf16>, vector<2x1024xf32> -> vector<2x1024xf32>
    %53 = vector.broadcast %50 : vector<1x1024xf32> to vector<2x1024xf32>
    %54 = arith.addf %52, %53 : vector<2x1024xf32>
    %cst_41 = arith.constant 0.000000e+00 : f32
    %55 = vector.broadcast %cst_41 : f32 to vector<2x1024xf32>
    %56 = arith.maximumf %54, %55 : vector<2x1024xf32>
    %c0_42 = arith.constant 0 : index
    %c0_43 = arith.constant 0 : index
    %57 = vector.load %arg16[%c0_42, %c0_43] : memref<1024x512xbf16, #tpu.memory_space<vmem>>, vector<1024x512xbf16>
    %c0_44 = arith.constant 0 : index
    %c0_45 = arith.constant 0 : index
    %58 = vector.load %arg17[%c0_44, %c0_45] : memref<1x512xf32, #tpu.memory_space<vmem>>, vector<1x512xf32>
    %59 = arith.truncf %56 : vector<2x1024xf32> to vector<2x1024xbf16>
    %cst_46 = arith.constant dense<0.000000e+00> : vector<2x512xf32>
    %60 = tpu.matmul %59, %57, %cst_46 {dimension_numbers = #tpu.dot_dimension_numbers<[1], [0], [0], [1], [0, 0, 1, 1], [], []>} : vector<2x1024xbf16>, vector<1024x512xbf16>, vector<2x512xf32> -> vector<2x512xf32>
    %61 = vector.broadcast %58 : vector<1x512xf32> to vector<2x512xf32>
    %62 = arith.addf %60, %61 : vector<2x512xf32>
    %cst_47 = arith.constant 0.000000e+00 : f32
    %63 = vector.broadcast %cst_47 : f32 to vector<2x512xf32>
    %64 = arith.maximumf %62, %63 : vector<2x512xf32>
    %c0_48 = arith.constant 0 : index
    %c0_49 = arith.constant 0 : index
    %65 = vector.load %arg18[%c0_48, %c0_49] : memref<512x256xbf16, #tpu.memory_space<vmem>>, vector<512x256xbf16>
    %c0_50 = arith.constant 0 : index
    %c0_51 = arith.constant 0 : index
    %66 = vector.load %arg19[%c0_50, %c0_51] : memref<1x256xf32, #tpu.memory_space<vmem>>, vector<1x256xf32>
    %67 = arith.truncf %64 : vector<2x512xf32> to vector<2x512xbf16>
    %cst_52 = arith.constant dense<0.000000e+00> : vector<2x256xf32>
    %68 = tpu.matmul %67, %65, %cst_52 {dimension_numbers = #tpu.dot_dimension_numbers<[1], [0], [0], [1], [0, 0, 1, 1], [], []>} : vector<2x512xbf16>, vector<512x256xbf16>, vector<2x256xf32> -> vector<2x256xf32>
    %69 = vector.broadcast %66 : vector<1x256xf32> to vector<2x256xf32>
    %70 = arith.addf %68, %69 : vector<2x256xf32>
    %cst_53 = arith.constant 0.000000e+00 : f32
    %71 = vector.broadcast %cst_53 : f32 to vector<2x256xf32>
    %72 = arith.maximumf %70, %71 : vector<2x256xf32>
    %c0_54 = arith.constant 0 : index
    %c0_55 = arith.constant 0 : index
    %73 = vector.load %arg20[%c0_54, %c0_55] : memref<256x128xbf16, #tpu.memory_space<vmem>>, vector<256x128xbf16>
    %c0_56 = arith.constant 0 : index
    %c0_57 = arith.constant 0 : index
    %74 = vector.load %arg21[%c0_56, %c0_57] : memref<1x128xf32, #tpu.memory_space<vmem>>, vector<1x128xf32>
    %75 = arith.truncf %72 : vector<2x256xf32> to vector<2x256xbf16>
    %cst_58 = arith.constant dense<0.000000e+00> : vector<2x128xf32>
    %76 = tpu.matmul %75, %73, %cst_58 {dimension_numbers = #tpu.dot_dimension_numbers<[1], [0], [0], [1], [0, 0, 1, 1], [], []>} : vector<2x256xbf16>, vector<256x128xbf16>, vector<2x128xf32> -> vector<2x128xf32>
    %77 = vector.broadcast %74 : vector<1x128xf32> to vector<2x128xf32>
    %78 = arith.addf %76, %77 : vector<2x128xf32>
    %cst_59 = arith.constant 0.000000e+00 : f32
    %79 = vector.broadcast %cst_59 : f32 to vector<2x128xf32>
    %80 = arith.maximumf %78, %79 : vector<2x128xf32>
    %c0_60 = arith.constant 0 : index
    %c0_61 = arith.constant 0 : index
    %81 = vector.load %arg22[%c0_60, %c0_61] : memref<128x64xbf16, #tpu.memory_space<vmem>>, vector<128x64xbf16>
    %c0_62 = arith.constant 0 : index
    %c0_63 = arith.constant 0 : index
    %82 = vector.load %arg23[%c0_62, %c0_63] : memref<1x64xf32, #tpu.memory_space<vmem>>, vector<1x64xf32>
    %83 = arith.truncf %80 : vector<2x128xf32> to vector<2x128xbf16>
    %cst_64 = arith.constant dense<0.000000e+00> : vector<2x64xf32>
    %84 = tpu.matmul %83, %81, %cst_64 {dimension_numbers = #tpu.dot_dimension_numbers<[1], [0], [0], [1], [0, 0, 1, 1], [], []>} : vector<2x128xbf16>, vector<128x64xbf16>, vector<2x64xf32> -> vector<2x64xf32>
    %85 = vector.broadcast %82 : vector<1x64xf32> to vector<2x64xf32>
    %86 = arith.addf %84, %85 : vector<2x64xf32>
    %cst_65 = arith.constant 0.000000e+00 : f32
    %87 = vector.broadcast %cst_65 : f32 to vector<2x64xf32>
    %88 = arith.maximumf %86, %87 : vector<2x64xf32>
    %89 = arith.truncf %88 : vector<2x64xf32> to vector<2x64xbf16>
    %c0_66 = arith.constant 0 : index
    %c0_67 = arith.constant 0 : index
    %90 = vector.load %arg24[%c0_66, %c0_67] : memref<64x24xbf16, #tpu.memory_space<vmem>>, vector<64x24xbf16>
    %cst_68 = arith.constant dense<0.000000e+00> : vector<2x24xf32>
    %91 = tpu.matmul %89, %90, %cst_68 {dimension_numbers = #tpu.dot_dimension_numbers<[1], [0], [0], [1], [0, 0, 1, 1], [], []>} : vector<2x64xbf16>, vector<64x24xbf16>, vector<2x24xf32> -> vector<2x24xf32>
    %c0_69 = arith.constant 0 : index
    %c0_70 = arith.constant 0 : index
    %92 = vector.load %arg25[%c0_69, %c0_70] : memref<1x24xf32, #tpu.memory_space<vmem>>, vector<1x24xf32>
    %93 = vector.broadcast %92 : vector<1x24xf32> to vector<2x24xf32>
    %94 = arith.addf %91, %93 : vector<2x24xf32>
    %95 = vector.extract_strided_slice %94 {offsets = [0, 0], sizes = [2, 4], strides = [1, 1]} : vector<2x24xf32> to vector<2x4xf32>
    %96 = vector.shape_cast %95 : vector<2x4xf32> to vector<2x4x1xf32>
    %97 = vector.extract_strided_slice %94 {offsets = [0, 4], sizes = [2, 4], strides = [1, 1]} : vector<2x24xf32> to vector<2x4xf32>
    %98 = vector.shape_cast %97 : vector<2x4xf32> to vector<2x4x1xf32>
    %99 = vector.extract_strided_slice %94 {offsets = [0, 8], sizes = [2, 4], strides = [1, 1]} : vector<2x24xf32> to vector<2x4xf32>
    %100 = vector.shape_cast %99 : vector<2x4xf32> to vector<2x4x1xf32>
    %101 = vector.extract_strided_slice %94 {offsets = [0, 12], sizes = [2, 4], strides = [1, 1]} : vector<2x24xf32> to vector<2x4xf32>
    %102 = vector.shape_cast %101 : vector<2x4xf32> to vector<2x4x1xf32>
    %103 = vector.extract_strided_slice %94 {offsets = [0, 16], sizes = [2, 4], strides = [1, 1]} : vector<2x24xf32> to vector<2x4xf32>
    %104 = vector.shape_cast %103 : vector<2x4xf32> to vector<2x4x1xf32>
    %105 = vector.extract_strided_slice %94 {offsets = [0, 20], sizes = [2, 4], strides = [1, 1]} : vector<2x24xf32> to vector<2x4xf32>
    %106 = vector.shape_cast %105 : vector<2x4xf32> to vector<2x4x1xf32>
    %107 = tpu.iota {dimensions = array<i32: 2>} : vector<1x1x256xi32>
    %108 = arith.sitofp %107 : vector<1x1x256xi32> to vector<1x1x256xf32>
    %cst_71 = arith.constant 6.250000e-02 : f32
    %109 = vector.broadcast %cst_71 : f32 to vector<1x1x256xf32>
    %110 = arith.mulf %108, %109 : vector<1x1x256xf32>
    %111 = math.floor %110 : vector<1x1x256xf32>
    %cst_72 = arith.constant 1.600000e+01 : f32
    %112 = vector.broadcast %cst_72 : f32 to vector<1x1x256xf32>
    %113 = arith.mulf %111, %112 : vector<1x1x256xf32>
    %114 = arith.subf %108, %113 : vector<1x1x256xf32>
    %cst_73 = arith.constant 0.0666666701 : f32
    %115 = vector.broadcast %cst_73 : f32 to vector<1x1x256xf32>
    %116 = arith.mulf %114, %115 : vector<1x1x256xf32>
    %cst_74 = arith.constant 0.0666666701 : f32
    %117 = vector.broadcast %cst_74 : f32 to vector<1x1x256xf32>
    %118 = arith.mulf %111, %117 : vector<1x1x256xf32>
    %119 = vector.broadcast %116 : vector<1x1x256xf32> to vector<2x4x256xf32>
    %120 = vector.broadcast %96 : vector<2x4x1xf32> to vector<2x4x256xf32>
    %121 = arith.subf %119, %120 : vector<2x4x256xf32>
    %122 = vector.broadcast %118 : vector<1x1x256xf32> to vector<2x4x256xf32>
    %123 = vector.broadcast %98 : vector<2x4x1xf32> to vector<2x4x256xf32>
    %124 = arith.subf %122, %123 : vector<2x4x256xf32>
    %125 = vector.broadcast %102 : vector<2x4x1xf32> to vector<2x4x256xf32>
    %126 = arith.mulf %125, %121 : vector<2x4x256xf32>
    %127 = vector.broadcast %104 : vector<2x4x1xf32> to vector<2x4x256xf32>
    %128 = arith.mulf %127, %121 : vector<2x4x256xf32>
    %129 = vector.broadcast %106 : vector<2x4x1xf32> to vector<2x4x256xf32>
    %130 = arith.mulf %129, %124 : vector<2x4x256xf32>
    %131 = arith.addf %128, %130 : vector<2x4x256xf32>
    %132 = arith.mulf %126, %126 : vector<2x4x256xf32>
    %133 = arith.mulf %131, %131 : vector<2x4x256xf32>
    %134 = arith.addf %132, %133 : vector<2x4x256xf32>
    %cst_75 = arith.constant -5.000000e-01 : f32
    %135 = vector.broadcast %cst_75 : f32 to vector<2x4x256xf32>
    %136 = arith.mulf %135, %134 : vector<2x4x256xf32>
    %cst_76 = arith.constant dense<0xFF800000> : vector<2x256xf32>
    %137 = vector.multi_reduction <maximumf>, %136, %cst_76 [1] : vector<2x4x256xf32> to vector<2x256xf32>
    %138 = vector.shape_cast %137 : vector<2x256xf32> to vector<2x1x256xf32>
    %139 = vector.broadcast %138 : vector<2x1x256xf32> to vector<2x4x256xf32>
    %140 = arith.subf %136, %139 : vector<2x4x256xf32>
    %141 = math.exp %140 : vector<2x4x256xf32>
    %cst_77 = arith.constant dense<0.000000e+00> : vector<2x256xf32>
    %142 = vector.multi_reduction <add>, %141, %cst_77 [1] : vector<2x4x256xf32> to vector<2x256xf32>
    %143 = vector.shape_cast %142 : vector<2x256xf32> to vector<2x1x256xf32>
    %144 = tpu.reciprocal %143 {approx = true} : vector<2x1x256xf32> -> vector<2x1x256xf32>
    %145 = vector.broadcast %144 : vector<2x1x256xf32> to vector<2x4x256xf32>
    %146 = arith.mulf %141, %145 : vector<2x4x256xf32>
    %147 = vector.broadcast %100 : vector<2x4x1xf32> to vector<2x4x256xf32>
    %148 = arith.mulf %146, %147 : vector<2x4x256xf32>
    %cst_78 = arith.constant dense<0.000000e+00> : vector<2x256xf32>
    %149 = vector.multi_reduction <add>, %148, %cst_78 [1] : vector<2x4x256xf32> to vector<2x256xf32>
    %c0_79 = arith.constant 0 : index
    %c0_80 = arith.constant 0 : index
    %150 = vector.load %arg26[%c0_79, %c0_80] : memref<2x256xf32, #tpu.memory_space<vmem>>, vector<2x256xf32>
    tpu.vector_store %arg26[%c0_79, %c0_80], %149 {strides = array<i32>} : memref<2x256xf32, #tpu.memory_space<vmem>>, vector<2x256xf32>,
    return
  }
  func.func @transform_0(%arg0: i32) -> (i32, i32) {
    %c0_i32 = arith.constant 0 : i32
    %c0_i32_0 = arith.constant 0 : i32
    return %arg0, %c0_i32 : i32, i32
  }
  func.func @transform_1(%arg0: i32) -> (i32, i32) {
    %c0_i32 = arith.constant 0 : i32
    %c0_i32_0 = arith.constant 0 : i32
    %c0_i32_1 = arith.constant 0 : i32
    return %c0_i32, %c0_i32_0 : i32, i32
  }
  func.func @transform_2(%arg0: i32) -> (i32, i32) {
    %c0_i32 = arith.constant 0 : i32
    %c0_i32_0 = arith.constant 0 : i32
    %c0_i32_1 = arith.constant 0 : i32
    return %c0_i32, %c0_i32_0 : i32, i32
  }
  func.func @transform_3(%arg0: i32) -> (i32, i32) {
    %c0_i32 = arith.constant 0 : i32
    %c0_i32_0 = arith.constant 0 : i32
    %c0_i32_1 = arith.constant 0 : i32
    return %c0_i32, %c0_i32_0 : i32, i32
  }
  func.func @transform_4(%arg0: i32) -> (i32, i32) {
    %c0_i32 = arith.constant 0 : i32
    %c0_i32_0 = arith.constant 0 : i32
    %c0_i32_1 = arith.constant 0 : i32
    return %c0_i32, %c0_i32_0 : i32, i32
  }
  func.func @transform_5(%arg0: i32) -> (i32, i32) {
    %c0_i32 = arith.constant 0 : i32
    %c0_i32_0 = arith.constant 0 : i32
    %c0_i32_1 = arith.constant 0 : i32
    return %c0_i32, %c0_i32_0 : i32, i32
  }
  func.func @transform_6(%arg0: i32) -> (i32, i32) {
    %c0_i32 = arith.constant 0 : i32
    %c0_i32_0 = arith.constant 0 : i32
    %c0_i32_1 = arith.constant 0 : i32
    return %c0_i32, %c0_i32_0 : i32, i32
  }
  func.func @transform_7(%arg0: i32) -> (i32, i32) {
    %c0_i32 = arith.constant 0 : i32
    %c0_i32_0 = arith.constant 0 : i32
    %c0_i32_1 = arith.constant 0 : i32
    return %c0_i32, %c0_i32_0 : i32, i32
  }
  func.func @transform_8(%arg0: i32) -> (i32, i32) {
    %c0_i32 = arith.constant 0 : i32
    %c0_i32_0 = arith.constant 0 : i32
    %c0_i32_1 = arith.constant 0 : i32
    return %c0_i32, %c0_i32_0 : i32, i32
  }
  func.func @transform_9(%arg0: i32) -> (i32, i32) {
    %c0_i32 = arith.constant 0 : i32
    %c0_i32_0 = arith.constant 0 : i32
    %c0_i32_1 = arith.constant 0 : i32
    return %c0_i32, %c0_i32_0 : i32, i32
  }
  func.func @transform_10(%arg0: i32) -> (i32, i32) {
    %c0_i32 = arith.constant 0 : i32
    %c0_i32_0 = arith.constant 0 : i32
    %c0_i32_1 = arith.constant 0 : i32
    return %c0_i32, %c0_i32_0 : i32, i32
  }
  func.func @transform_11(%arg0: i32) -> (i32, i32) {
    %c0_i32 = arith.constant 0 : i32
    %c0_i32_0 = arith.constant 0 : i32
    %c0_i32_1 = arith.constant 0 : i32
    return %c0_i32, %c0_i32_0 : i32, i32
  }
  func.func @transform_12(%arg0: i32) -> (i32, i32) {
    %c0_i32 = arith.constant 0 : i32
    %c0_i32_0 = arith.constant 0 : i32
    %c0_i32_1 = arith.constant 0 : i32
    return %c0_i32, %c0_i32_0 : i32, i32
  }
  func.func @transform_13(%arg0: i32) -> (i32, i32) {
    %c0_i32 = arith.constant 0 : i32
    %c0_i32_0 = arith.constant 0 : i32
    %c0_i32_1 = arith.constant 0 : i32
    return %c0_i32, %c0_i32_0 : i32, i32
  }
  func.func @transform_14(%arg0: i32) -> (i32, i32) {
    %c0_i32 = arith.constant 0 : i32
    %c0_i32_0 = arith.constant 0 : i32
    %c0_i32_1 = arith.constant 0 : i32
    return %c0_i32, %c0_i32_0 : i32, i32
  }
  func.func @transform_15(%arg0: i32) -> (i32, i32) {
    %c0_i32 = arith.constant 0 : i32
    %c0_i32_0 = arith.constant 0 : i32
    %c0_i32_1 = arith.constant 0 : i32
    return %c0_i32, %c0_i32_0 : i32, i32
  }
  func.func @transform_16(%arg0: i32) -> (i32, i32) {
    %c0_i32 = arith.constant 0 : i32
    %c0_i32_0 = arith.constant 0 : i32
    %c0_i32_1 = arith.constant 0 : i32
    return %c0_i32, %c0_i32_0 : i32, i32
  }
  func.func @transform_17(%arg0: i32) -> (i32, i32) {
    %c0_i32 = arith.constant 0 : i32
    %c0_i32_0 = arith.constant 0 : i32
    %c0_i32_1 = arith.constant 0 : i32
    return %c0_i32, %c0_i32_0 : i32, i32
  }
  func.func @transform_18(%arg0: i32) -> (i32, i32) {
    %c0_i32 = arith.constant 0 : i32
    %c0_i32_0 = arith.constant 0 : i32
    %c0_i32_1 = arith.constant 0 : i32
    return %c0_i32, %c0_i32_0 : i32, i32
  }
  func.func @transform_19(%arg0: i32) -> (i32, i32) {
    %c0_i32 = arith.constant 0 : i32
    %c0_i32_0 = arith.constant 0 : i32
    %c0_i32_1 = arith.constant 0 : i32
    return %c0_i32, %c0_i32_0 : i32, i32
  }
  func.func @transform_20(%arg0: i32) -> (i32, i32) {
    %c0_i32 = arith.constant 0 : i32
    %c0_i32_0 = arith.constant 0 : i32
    %c0_i32_1 = arith.constant 0 : i32
    return %c0_i32, %c0_i32_0 : i32, i32
  }
  func.func @transform_21(%arg0: i32) -> (i32, i32) {
    %c0_i32 = arith.constant 0 : i32
    %c0_i32_0 = arith.constant 0 : i32
    %c0_i32_1 = arith.constant 0 : i32
    return %c0_i32, %c0_i32_0 : i32, i32
  }
  func.func @transform_22(%arg0: i32) -> (i32, i32) {
    %c0_i32 = arith.constant 0 : i32
    %c0_i32_0 = arith.constant 0 : i32
    %c0_i32_1 = arith.constant 0 : i32
    return %c0_i32, %c0_i32_0 : i32, i32
  }
  func.func @transform_23(%arg0: i32) -> (i32, i32) {
    %c0_i32 = arith.constant 0 : i32
    %c0_i32_0 = arith.constant 0 : i32
    %c0_i32_1 = arith.constant 0 : i32
    return %c0_i32, %c0_i32_0 : i32, i32
  }
  func.func @transform_24(%arg0: i32) -> (i32, i32) {
    %c0_i32 = arith.constant 0 : i32
    %c0_i32_0 = arith.constant 0 : i32
    %c0_i32_1 = arith.constant 0 : i32
    return %c0_i32, %c0_i32_0 : i32, i32
  }
  func.func @transform_25(%arg0: i32) -> (i32, i32) {
    %c0_i32 = arith.constant 0 : i32
    %c0_i32_0 = arith.constant 0 : i32
    return %arg0, %c0_i32 : i32, i32
  }
}

</mosaic_0001>

<bundles_post_ra>
// kernel: elvira2023_forward.1
= control target key start
LH: loop header
LB: loop body
LE: loop exit
PB: predicated region body
PF: predicated region fallthrough
CT: control target
= control target key end

     0   :  { %s12789_s0 = inlined_call_operand.vmem [shape: f32[2,256], index: 0, kind: input, shape index: {}]   ;;  %s12790_s1 = inlined_call_operand.hbm [shape: bf16[256,1024], index: 1, kind: input, shape index: {}]   ;;  %s12791_s2 = inlined_call_operand.vmem [shape: f32[1,1024], index: 2, kind: input, shape index: {}]   ;;  %s12792_s3 = inlined_call_operand.hbm [shape: bf16[1024,512], index: 3, kind: input, shape index: {}]   ;;  %s12793_s4 = inlined_call_operand.vmem [shape: f32[1,512], index: 4, kind: input, shape index: {}]   ;;  %s12794_s5 = inlined_call_operand.hbm [shape: bf16[512,256], index: 5, kind: input, shape index: {}]   ;;  %s12795_s6 = inlined_call_operand.vmem [shape: f32[1,256], index: 6, kind: input, shape index: {}]   ;;  %s12796_s7 = inlined_call_operand.vmem [shape: bf16[256,128], index: 7, kind: input, shape index: {}]   ;;  %s12797_s8 = inlined_call_operand.vmem [shape: f32[1,128], index: 8, kind: input, shape index: {}]   ;;  %s12798_s9 = inlined_call_operand.hbm [shape: bf16[128,256], index: 9, kind: input, shape index: {}]   ;;  %s12799_s10 = inlined_call_operand.hbm [shape: f32[1,256], index: 10, kind: input, shape index: {}]   ;;  %s12800_s11 = inlined_call_operand.hbm [shape: bf16[256,512], index: 11, kind: input, shape index: {}]   ;;  %s12801_s12 = inlined_call_operand.hbm [shape: f32[1,512], index: 12, kind: input, shape index: {}]   ;;  %s12802_s13 = inlined_call_operand.hbm [shape: bf16[512,1024], index: 13, kind: input, shape index: {}]   ;;  %s12803_s14 = inlined_call_operand.hbm [shape: f32[1,1024], index: 14, kind: input, shape index: {}]   ;;  %s12804_s15 = inlined_call_operand.hbm [shape: bf16[1024,512], index: 15, kind: input, shape index: {}]   ;;  %s12805_s16 = inlined_call_operand.hbm [shape: f32[1,512], index: 16, kind: input, shape index: {}]   ;;  %s12806_s17 = inlined_call_operand.hbm [shape: bf16[512,256], index: 17, kind: input, shape index: {}]   ;;  %s12807_s18 = inlined_call_operand.hbm [shape: f32[1,256], index: 18, kind: input, shape index: {}]   ;;  %s12808_s19 = inlined_call_operand.hbm [shape: bf16[256,128], index: 19, kind: input, shape index: {}]   ;;  %s12809_s20 = inlined_call_operand.hbm [shape: f32[1,128], index: 20, kind: input, shape index: {}]   ;;  %s12810_s21 = inlined_call_operand.vmem [shape: bf16[128,64], index: 21, kind: input, shape index: {}]   ;;  %s12811_s22 = inlined_call_operand.hbm [shape: f32[1,64], index: 22, kind: input, shape index: {}]   ;;  %s12812_s23 = inlined_call_operand.vmem [shape: bf16[64,24], index: 23, kind: input, shape index: {}]   ;;  %s12813_s24 = inlined_call_operand.hbm [shape: f32[1,24], index: 24, kind: input, shape index: {}]   ;;  %s12814_s25 = inlined_call_operand.vmem [shape: f32[2,256], index: 25, kind: output, shape index: {}]  }
   0x1   :  { %12816 = sst [smem:[#allocation37_spill]] %s12789_s0 }
   0x2   :  { %12817 = sst [smem:[#allocation38_spill]] %s12790_s1 }
   0x3   :  { %12818 = sst [smem:[#allocation39_spill]] %s12791_s2 }
   0x4   :  { %12819 = sst [smem:[#allocation40_spill]] %s12792_s3 }
   0x5   :  { %12820 = sst [smem:[#allocation41_spill]] %s12793_s4 }
   0x6   :  { %12821 = sst [smem:[#allocation42_spill]] %s12794_s5 }
   0x7   :  { %12822 = sst [smem:[#allocation43_spill]] %s12795_s6 }
   0x8   :  { %12823 = sst [smem:[#allocation44_spill]] %s12796_s7 }
   0x9   :  { %12824 = sst [smem:[#allocation45_spill]] %s12797_s8 }
   0xa   :  { %12825 = sst [smem:[#allocation46_spill]] %s12798_s9 }
   0xb   :  { %30 = vsyncpa [#allocation3], 0 }
   0xc   :  { %31 = vsyncpa [#allocation5], 0 }
   0xd   :  { %32 = vsyncpa [#allocation8], 0 }
   0xe   :  { %33 = vsyncpa [#allocation11], 0 }
   0xf   :  { %34 = vsyncpa [#allocation14], 0 }
  0x10   :  { %35 = vsyncpa [#allocation17], 0 }
  0x11   :  { %36 = vsyncpa [#allocation20], 0 }
  0x12   :  { %37 = vsyncpa [#allocation23], 0 }
  0x13   :  { %38 = vsyncpa [#allocation26], 0  ;;  %s12211_s29 = smov [#allocation4]  }
  0x14   :  { %s60_s2 = sshll.u32 %s12211_s29, 4  ;;  %s61_s2 = int_to_ptr.vmem [resolvable:$true] %s60_s2 }
  0x15   :  { %s11861_s6 = scalar_lea.vmem %s61_s2, 32768  ;;  %p11866_p1 = scmp.lt.s32.totalorder %s61_s2, %s61_s2 }
  0x16   :  { %p11862_p0 = scmp.ne.s32.totalorder %s61_s2, %s11861_s6  ;;  %p11867_p2 = scmp.lt.s32.totalorder %s11861_s6, %s11861_s6 }
  0x18   :  { %p11868_p3 = por %p11867_p2, %p11866_p1 }
  0x1a   :  { %p11869_p4 = pnand %p11868_p3, %p11862_p0 }
  0x1c   :  { %11872 = shalt.err (!%p11869_p4)
}
  0x1d   :  { %s12212_s30 = smov 256   ;;  %s12213_s7 = smov 16  }
  0x1e   :  { %s12826_s1 = sld [smem:[#allocation40_spill]]  ;;  %s12214_s8 = smov [#allocation7]  }
  0x1f   :  { %s92_s27 = sshll.u32 %s12214_s8, 4  ;;  %s12215_s4 = smov [#allocation10]   ;;  %s93_s27 = int_to_ptr.vmem [resolvable:$true] %s92_s27 }
  0x20   :  { %s114_s28 = sshll.u32 %s12215_s4, 4  ;;  %s11881_s9 = scalar_lea.vmem %s93_s27, 2048  ;;  %s115_s28 = int_to_ptr.vmem [resolvable:$true] %s114_s28 }
  0x21   :  { %p11882_p5 = scmp.ne.s32.totalorder %s93_s27, %s11881_s9  ;;  %p11886_p6 = scmp.lt.s32.totalorder %s93_s27, %s93_s27 }
  0x22   :  { %p11887_p7 = scmp.lt.s32.totalorder %s11881_s9, %s11881_s9 }
  0x24   :  { %66 = dma.hbm_to_vmem [thread:$0]  %s12826_s1, 32768, %s61_s2, [#allocation5], %s12212_s30, %s12212_s30, %s12213_s7  }
  0x25   :  { %p11888_p8 = por %p11887_p7, %p11886_p6 }
  0x27   :  { %p11889_p9 = pnand %p11888_p8, %p11882_p5 }
  0x29   :  { %11892 = shalt.err (!%p11889_p9)
}
  0x2a   :  { %s12216_s5 = smov 128   ;;  %s12217_s0 = smov 8  }
  0x2b   :  { %s12827_s2 = sld [smem:[#allocation46_spill]]  ;;  %s11901_s3 = scalar_lea.vmem %s115_s28, 8192 }
  0x2c   :  { %p11902_p10 = scmp.ne.s32.totalorder %s115_s28, %s11901_s3  ;;  %p11906_p11 = scmp.lt.s32.totalorder %s115_s28, %s115_s28 }
  0x2d   :  { %p11907_p12 = scmp.lt.s32.totalorder %s11901_s3, %s11901_s3 }
  0x2f   :  { %p11908_p13 = por %p11907_p12, %p11906_p11 }
  0x31   :  { %98 = dma.hbm_to_vmem [thread:$0]  %s12827_s2, 2048, %s93_s27, [#allocation8], %s12216_s5, %s12216_s5, %s12217_s0  }
  0x32   :  { %p11909_p0 = pnand %p11908_p13, %p11902_p10 }
  0x34   :  { %11912 = shalt.err (!%p11909_p0)
}
  0x35   :  { %120 = dma.hbm_to_vmem [thread:$0]  %s12800_s11, 8192, %s115_s28, [#allocation11], %s12212_s30, %s12212_s30, %s12213_s7  }
  0x36   :  { %s12218_s8 = smov [#allocation13]   ;;  %s12219_s9 = smov [#allocation16]  }
  0x37   :  { %s136_s4 = sshll.u32 %s12218_s8, 4  ;;  %s158_s27 = sshll.u32 %s12219_s9, 4  ;;  %s137_s4 = int_to_ptr.vmem [resolvable:$true] %s136_s4  ;;  %s159_s27 = int_to_ptr.vmem [resolvable:$true] %s158_s27 }
  0x38   :  { %s11921_s29 = scalar_lea.vmem %s137_s4, 32768  ;;  %p11926_p2 = scmp.lt.s32.totalorder %s137_s4, %s137_s4 }
  0x39   :  { %p11922_p1 = scmp.ne.s32.totalorder %s137_s4, %s11921_s29  ;;  %p11927_p3 = scmp.lt.s32.totalorder %s11921_s29, %s11921_s29 }
  0x3b   :  { %p11928_p4 = por %p11927_p3, %p11926_p2 }
  0x3d   :  { %p11929_p5 = pnand %p11928_p4, %p11922_p1 }
  0x3f   :  { %11932 = shalt.err (!%p11929_p5)
}
  0x40   :  { %s12220_s6 = smov 512   ;;  %s12221_s2 = smov 32  }
  0x41   :  { %142 = dma.hbm_to_vmem [thread:$0]  %s12802_s13, 32768, %s137_s4, [#allocation14], %s12220_s6, %s12220_s6, %s12221_s2  }
  0x42   :  { %s11941_s11 = scalar_lea.vmem %s159_s27, 32768  ;;  %p11946_p7 = scmp.lt.s32.totalorder %s159_s27, %s159_s27 }
  0x43   :  { %p11942_p6 = scmp.ne.s32.totalorder %s159_s27, %s11941_s11  ;;  %p11947_p8 = scmp.lt.s32.totalorder %s11941_s11, %s11941_s11 }
  0x45   :  { %p11948_p9 = por %p11947_p8, %p11946_p7 }
  0x47   :  { %p11949_p10 = pnand %p11948_p9, %p11942_p6 }
  0x49   :  { %11952 = shalt.err (!%p11949_p10)
}
  0x4a   :  { %164 = dma.hbm_to_vmem [thread:$0]  %s12804_s15, 32768, %s159_s27, [#allocation17], %s12212_s30, %s12212_s30, %s12213_s7  }
  0x4b   :  { %s12222_s8 = smov [#allocation19]   ;;  %s12223_s29 = smov [#allocation22]  }
  0x4c   :  { %s180_s9 = sshll.u32 %s12222_s8, 4  ;;  %s202_s13 = sshll.u32 %s12223_s29, 4  ;;  %s181_s9 = int_to_ptr.vmem [resolvable:$true] %s180_s9  ;;  %s203_s13 = int_to_ptr.vmem [resolvable:$true] %s202_s13 }
  0x4d   :  { %s11961_s4 = scalar_lea.vmem %s181_s9, 8192  ;;  %p11966_p12 = scmp.lt.s32.totalorder %s181_s9, %s181_s9 }
  0x4e   :  { %p11962_p11 = scmp.ne.s32.totalorder %s181_s9, %s11961_s4  ;;  %p11967_p13 = scmp.lt.s32.totalorder %s11961_s4, %s11961_s4 }
  0x50   :  { %p11968_p0 = por %p11967_p13, %p11966_p12 }
  0x52   :  { %p11969_p1 = pnand %p11968_p0, %p11962_p11 }
  0x54   :  { %11972 = shalt.err (!%p11969_p1)
}
  0x55   :  { %186 = dma.hbm_to_vmem [thread:$0]  %s12806_s17, 8192, %s181_s9, [#allocation20], %s12216_s5, %s12216_s5, %s12217_s0  }
  0x56   :  { %s11981_s15 = scalar_lea.vmem %s203_s13, 2048  ;;  %p11986_p3 = scmp.lt.s32.totalorder %s203_s13, %s203_s13 }
  0x57   :  { %p11982_p2 = scmp.ne.s32.totalorder %s203_s13, %s11981_s15  ;;  %p11987_p4 = scmp.lt.s32.totalorder %s11981_s15, %s11981_s15 }
  0x59   :  { %p11988_p5 = por %p11987_p4, %p11986_p3 }
  0x5b   :  { %p11989_p6 = pnand %p11988_p5, %p11982_p2 }
  0x5d   :  { %11992 = shalt.err (!%p11989_p6)
}
  0x5e   :  { %s12224_s30 = smov 64   ;;  %s12225_s7 = smov 4  }
  0x5f   :  { %208 = dma.hbm_to_vmem [thread:$0]  %s12808_s19, 2048, %s203_s13, [#allocation23], %s12224_s30, %s12224_s30, %s12225_s7  }
  0x60   :  { %s12226_s28 = smov [#allocation25]   ;;  %s12227_s8 = smov [#allocation2]  }
  0x61   :  { %s227_s1 = sshll.u32 %s12226_s28, 4  ;;  %s46_s29 = sshll.u32 %s12227_s8, 4  ;;  %s228_s1 = int_to_ptr.vmem [resolvable:$true] %s227_s1  ;;  %s47_s29 = int_to_ptr.vmem [resolvable:$true] %s46_s29 }
  0x62   :  { %s12001_s17 = scalar_lea.vmem %s228_s1, 16  ;;  %s12005_s9 = scalar_lea.vmem %s228_s1, 32 }
  0x63   :  { %p12002_p7 = scmp.ne.s32.totalorder %s228_s1, %s12001_s17  ;;  %p12006_p8 = scmp.lt.s32.totalorder %s228_s1, %s228_s1 }
  0x64   :  { %p12007_p9 = scmp.lt.s32.totalorder %s12005_s9, %s12001_s17 }
  0x66   :  { %p12008_p10 = por %p12007_p9, %p12006_p8 }
  0x68   :  { %p12009_p11 = pnand %p12008_p10, %p12002_p7 }
  0x6a   :  { %12012 = shalt.err (!%p12009_p11)
}
  0x6b   :  { %230 = dma.hbm_to_vmem [thread:$0]  %s12811_s22, 16, %s228_s1, [#allocation26]  }
  0x6c   :  { %s12021_s26 = scalar_lea.vmem %s47_s29, 16384  ;;  %p12026_p13 = scmp.lt.s32.totalorder %s47_s29, %s47_s29 }
  0x6d   :  { %p12022_p12 = scmp.ne.s32.totalorder %s47_s29, %s12021_s26  ;;  %p12027_p0 = scmp.lt.s32.totalorder %s12021_s26, %s12021_s26 }
  0x6f   :  { %p12028_p1 = por %p12027_p0, %p12026_p13 }
  0x71   :  { %p12029_p2 = pnand %p12028_p1, %p12022_p12 }
  0x73   :  { %12032 = shalt.err (!%p12029_p2)
}
  0x74   :  { %s12828_s15 = sld [smem:[#allocation38_spill]]  ;;  %s12228_s30 = smov [#allocation6]  }
  0x75   :  { %s74_s7 = sshll.u32 %s12228_s30, 4  ;;  %s12229_s27 = smov [#allocation9]   ;;  %s75_s7 = int_to_ptr.vmem [resolvable:$true] %s74_s7 }
  0x76   :  { %s105_s22 = sshll.u32 %s12229_s27, 4  ;;  %s12041_s11 = scalar_lea.vmem %s75_s7, 8192  ;;  %s106_s22 = int_to_ptr.vmem [resolvable:$true] %s105_s22 }
  0x77   :  { %p12042_p3 = scmp.ne.s32.totalorder %s75_s7, %s12041_s11  ;;  %p12046_p4 = scmp.lt.s32.totalorder %s75_s7, %s75_s7 }
  0x78   :  { %p12047_p5 = scmp.lt.s32.totalorder %s12041_s11, %s12041_s11 }
  0x7a   :  { %52 = dma.hbm_to_vmem [thread:$0]  %s12828_s15, 16384, %s47_s29, [#allocation3], %s12220_s6, %s12220_s6, %s12221_s2  }
  0x7b   :  { %p12048_p6 = por %p12047_p5, %p12046_p4 }
  0x7d   :  { %p12049_p7 = pnand %p12048_p6, %p12042_p3 }
  0x7f   :  { %12052 = shalt.err (!%p12049_p7)
}
  0x80   :  { %s12829_s8 = sld [smem:[#allocation42_spill]]  ;;  %s12061_s6 = scalar_lea.vmem %s106_s22, 32 }
  0x81   :  { %p12062_p8 = scmp.ne.s32.totalorder %s106_s22, %s12061_s6  ;;  %p12066_p9 = scmp.lt.s32.totalorder %s106_s22, %s106_s22 }
  0x82   :  { %p12067_p10 = scmp.lt.s32.totalorder %s12061_s6, %s12061_s6 }
  0x84   :  { %p12068_p11 = por %p12067_p10, %p12066_p9 }
  0x86   :  { %80 = dma.hbm_to_vmem [thread:$0]  %s12829_s8, 8192, %s75_s7, [#allocation5], %s12216_s5, %s12216_s5, %s12217_s0  }
  0x87   :  { %p12069_p12 = pnand %p12068_p11, %p12062_p8 }
  0x89   :  { %12072 = shalt.err (!%p12069_p12)
}
  0x8a   :  { %108 = dma.hbm_to_vmem [thread:$0]  %s12799_s10, 32, %s106_s22, [#allocation8]  }
  0x8b   :  { %s12230_s17 = smov [#allocation12]   ;;  %s12231_s4 = smov [#allocation15]  }
  0x8c   :  { %s127_s9 = sshll.u32 %s12230_s17, 4  ;;  %s149_s3 = sshll.u32 %s12231_s4, 4  ;;  %s128_s9 = int_to_ptr.vmem [resolvable:$true] %s127_s9  ;;  %s150_s3 = int_to_ptr.vmem [resolvable:$true] %s149_s3 }
  0x8d   :  { %s12081_s26 = scalar_lea.vmem %s128_s9, 64  ;;  %p12086_p0 = scmp.lt.s32.totalorder %s128_s9, %s128_s9 }
  0x8e   :  { %p12082_p13 = scmp.ne.s32.totalorder %s128_s9, %s12081_s26  ;;  %p12087_p1 = scmp.lt.s32.totalorder %s12081_s26, %s12081_s26 }
  0x90   :  { %p12088_p2 = por %p12087_p1, %p12086_p0 }
  0x92   :  { %p12089_p3 = pnand %p12088_p2, %p12082_p13 }
  0x94   :  { %12092 = shalt.err (!%p12089_p3)
}
  0x95   :  { %130 = dma.hbm_to_vmem [thread:$0]  %s12801_s12, 64, %s128_s9, [#allocation11]  }
  0x96   :  { %s12101_s19 = scalar_lea.vmem %s150_s3, 128  ;;  %p12106_p5 = scmp.lt.s32.totalorder %s150_s3, %s150_s3 }
  0x97   :  { %p12102_p4 = scmp.ne.s32.totalorder %s150_s3, %s12101_s19  ;;  %p12107_p6 = scmp.lt.s32.totalorder %s12101_s19, %s12101_s19 }
  0x99   :  { %p12108_p7 = por %p12107_p6, %p12106_p5 }
  0x9b   :  { %p12109_p8 = pnand %p12108_p7, %p12102_p4 }
  0x9d   :  { %12112 = shalt.err (!%p12109_p8)
}
  0x9e   :  { %152 = dma.hbm_to_vmem [thread:$0]  %s12803_s14, 128, %s150_s3, [#allocation14]  }
  0x9f   :  { %s12232_s15 = smov [#allocation18]   ;;  %s12233_s7 = smov [#allocation21]  }
  0xa0   :  { %s171_s30 = sshll.u32 %s12232_s15, 4  ;;  %s193_s27 = sshll.u32 %s12233_s7, 4  ;;  %s172_s30 = int_to_ptr.vmem [resolvable:$true] %s171_s30  ;;  %s194_s27 = int_to_ptr.vmem [resolvable:$true] %s193_s27 }
  0xa1   :  { %s12121_s22 = scalar_lea.vmem %s172_s30, 64  ;;  %p12126_p10 = scmp.lt.s32.totalorder %s172_s30, %s172_s30 }
  0xa2   :  { %p12122_p9 = scmp.ne.s32.totalorder %s172_s30, %s12121_s22  ;;  %p12127_p11 = scmp.lt.s32.totalorder %s12121_s22, %s12121_s22 }
  0xa4   :  { %p12128_p12 = por %p12127_p11, %p12126_p10 }
  0xa6   :  { %p12129_p13 = pnand %p12128_p12, %p12122_p9 }
  0xa8   :  { %12132 = shalt.err (!%p12129_p13)
}
  0xa9   :  { %174 = dma.hbm_to_vmem [thread:$0]  %s12805_s16, 64, %s172_s30, [#allocation17]  }
  0xaa   :  { %s12141_s28 = scalar_lea.vmem %s194_s27, 32  ;;  %p12146_p1 = scmp.lt.s32.totalorder %s194_s27, %s194_s27 }
  0xab   :  { %p12142_p0 = scmp.ne.s32.totalorder %s194_s27, %s12141_s28  ;;  %p12147_p2 = scmp.lt.s32.totalorder %s12141_s28, %s12141_s28 }
  0xad   :  { %p12148_p3 = por %p12147_p2, %p12146_p1 }
  0xaf   :  { %p12149_p4 = pnand %p12148_p3, %p12142_p0 }
  0xb1   :  { %12152 = shalt.err (!%p12149_p4)
}
  0xb2   :  { %196 = dma.hbm_to_vmem [thread:$0]  %s12807_s18, 32, %s194_s27, [#allocation20]  }
  0xb3   :  { %s12234_s8 = smov [#allocation24]   ;;  %s12235_s2 = smov [#allocation27]  }
  0xb4   :  { %s215_s6 = sshll.u32 %s12234_s8, 4  ;;  %s239_s29 = sshll.u32 %s12235_s2, 4  ;;  %s216_s6 = int_to_ptr.vmem [resolvable:$true] %s215_s6  ;;  %s240_s29 = int_to_ptr.vmem [resolvable:$true] %s239_s29 }
  0xb5   :  { %s12161_s17 = scalar_lea.vmem %s216_s6, 16  ;;  %s12165_s16 = scalar_lea.vmem %s216_s6, 32 }
  0xb6   :  { %p12162_p5 = scmp.ne.s32.totalorder %s216_s6, %s12161_s17  ;;  %p12166_p6 = scmp.lt.s32.totalorder %s216_s6, %s216_s6 }
  0xb7   :  { %p12167_p7 = scmp.lt.s32.totalorder %s12165_s16, %s12161_s17 }
  0xb9   :  { %p12168_p8 = por %p12167_p7, %p12166_p6 }
  0xbb   :  { %p12169_p9 = pnand %p12168_p8, %p12162_p5 }
  0xbd   :  { %12172 = shalt.err (!%p12169_p9)
}
  0xbe   :  { %218 = dma.hbm_to_vmem [thread:$0]  %s12809_s20, 16, %s216_s6, [#allocation23]  }
  0xbf   :  { %s12181_s3 = scalar_lea.vmem %s240_s29, 16  ;;  %s12185_s18 = scalar_lea.vmem %s240_s29, 32 }
  0xc0   :  { %p12182_p10 = scmp.ne.s32.totalorder %s240_s29, %s12181_s3  ;;  %p12186_p11 = scmp.lt.s32.totalorder %s240_s29, %s240_s29 }
  0xc1   :  { %p12187_p12 = scmp.lt.s32.totalorder %s12185_s18, %s12181_s3 }
  0xc3   :  { %p12188_p13 = por %p12187_p12, %p12186_p11 }
  0xc5   :  { %p12189_p0 = pnand %p12188_p13, %p12182_p10 }
  0xc7   :  { %12192 = shalt.err (!%p12189_p0)
}
  0xc8   :  { %242 = dma.hbm_to_vmem [thread:$0]  %s12813_s24, 16, %s240_s29, [#allocation26]  }
  0xc9   :  { %12193 = dma.done.wait [#allocation3], 16384  }
  0xca   :  { %12194 = vsyncadd [#allocation3], 4294950912 }
  0xcb   :  { %12195 = dma.done.wait [#allocation5], 40960  }
  0xcc   :  { %12196 = vsyncadd [#allocation5], 4294926336 }
  0xcd   :  { %12197 = dma.done.wait [#allocation8], 2080  }
  0xce   :  { %12198 = vsyncadd [#allocation8], 4294965216 }
  0xcf   :  { %12199 = dma.done.wait [#allocation11], 8256  }
  0xd0   :  { %12200 = vsyncadd [#allocation11], 4294959040 }
  0xd1   :  { %12201 = dma.done.wait [#allocation14], 32896  }
  0xd2   :  { %12202 = vsyncadd [#allocation14], 4294934400 }
  0xd3   :  { %12203 = dma.done.wait [#allocation17], 32832  }
  0xd4   :  { %12204 = vsyncadd [#allocation17], 4294934464 }
  0xd5   :  { %12205 = dma.done.wait [#allocation20], 8224  }
  0xd6   :  { %12206 = vsyncadd [#allocation20], 4294959072 }
  0xd7   :  { %12207 = dma.done.wait [#allocation23], 2064  }
  0xd8   :  { %12208 = vsyncadd [#allocation23], 4294965232 }
  0xd9   :  { %12209 = dma.done.wait [#allocation26], 32  }
  0xda   :  { %12210 = vsyncadd [#allocation26], 4294967264  ;;  %v352_v0 = vld [vmem:[#allocation2 + $0x1c0] sm:$0xff]  ;;  %v353_v2 = vld [vmem:[#allocation2 + $0x1c8] sm:$0xff]  ;;  %s12830_s0 = sld [smem:[#allocation37_spill]]  ;;  %vm12238_vm0 = vmmov 0  }
  0xdb   :  { %v356_v1 = vld [vmem:[#allocation2 + $0x1e0] sm:$0xff]  ;;  %v357_v4 = vld [vmem:[#allocation2 + $0x1e8] sm:$0xff]  ;;  %s12831_s13 = sld [smem:[#allocation39_spill]]  ;;  %vm9128_vm1 = vcmask 523264   ;;  %vm9283_vm2 = vcmask 1043456   ;;  %vm9417_vm3 = vcmask 1041409  }
  0xdc   :  { %v9498_v3 = vcombine.high %v352_v0, %v356_v1  ;;  %v9497_v5 = vcombine.low %v352_v0, %v356_v1  ;;  %v344_v6 = vld [vmem:[#allocation2 + $0x180] sm:$0xff]  ;;  %v9500_v8 = vcombine.high %v353_v2, %v357_v4  ;;  %v9499_v9 = vcombine.low %v353_v2, %v357_v4  ;;  %v345_v11 = vld [vmem:[#allocation2 + $0x188] sm:$0xff]  ;;  %s12832_s7 = sld [smem:[#allocation41_spill]] }
  0xdd   :  { %v348_v7 = vld [vmem:[#allocation2 + $0x1a0] sm:$0xff]  ;;  %v349_v12 = vld [vmem:[#allocation2 + $0x1a8] sm:$0xff]  ;;  %s12833_s12 = sld [smem:[#allocation44_spill]]  ;;  %vm9419_vm4 = vcmask 1043459   ;;  %vm9421_vm5 = vcmask 1045509   ;;  %vm9423_vm6 = vcmask 1047559  }
  0xde   :  { %v9490_v10 = vcombine.high %v344_v6, %v348_v7  ;;  %v336_v13 = vld [vmem:[#allocation2 + $0x140] sm:$0xff]  ;;  %1119 = vmatprep.subr.bf16.mxu0 %v9498_v3  ;;  %v9492_v14 = vcombine.high %v345_v11, %v349_v12  ;;  %v337_v16 = vld [vmem:[#allocation2 + $0x148] sm:$0xff]  ;;  %1160 = vmatprep.subr.bf16.mxu1 %v9500_v8  ;;  %v9489_v18 = vcombine.low %v344_v6, %v348_v7  ;;  %s12834_s8 = sld [smem:[#allocation43_spill]] }
  0xdf   :  { %v340_v15 = vld [vmem:[#allocation2 + $0x160] sm:$0xff]  ;;  %v341_v17 = vld [vmem:[#allocation2 + $0x168] sm:$0xff]  ;;  %1120 = vmatpush1.bf16.msra.mxu0 %v9497_v5  ;;  %1161 = vmatpush1.bf16.msra.mxu1 %v9499_v9  ;;  %v9491_v19 = vcombine.low %v345_v11, %v349_v12  ;;  %s12835_s29 = sld [smem:[#allocation45_spill]] }
  0xe0   :  { %1121 = vmatprep.subr.bf16.mxu0 %v9490_v10  ;;  %v9482_v20 = vcombine.high %v336_v13, %v340_v15  ;;  %1162 = vmatprep.subr.bf16.mxu1 %v9492_v14  ;;  %v9484_v21 = vcombine.high %v337_v16, %v341_v17  ;;  %v328_v22 = vld [vmem:[#allocation2 + $0x100] sm:$0xff]  ;;  %v329_v24 = vld [vmem:[#allocation2 + $0x108] sm:$0xff]  ;;  %v9481_v26 = vcombine.low %v336_v13, %v340_v15 }
  0xe1   :  { %v332_v23 = vld [vmem:[#allocation2 + $0x120] sm:$0xff]  ;;  %v333_v25 = vld [vmem:[#allocation2 + $0x128] sm:$0xff]  ;;  %v9483_v27 = vcombine.low %v337_v16, %v341_v17 }
  0xe2   :  { %v9474_v28 = vcombine.high %v328_v22, %v332_v23  ;;  %v9476_v29 = vcombine.high %v329_v24, %v333_v25  ;;  %v320_v30 = vld [vmem:[#allocation2 + $0xc0] sm:$0xff]  ;;  %v321_v32 = vld [vmem:[#allocation2 + $0xc8] sm:$0xff]  ;;  %v9473_v34 = vcombine.low %v328_v22, %v332_v23  ;;  %v9475_v35 = vcombine.low %v329_v24, %v333_v25 }
  0xe3   :  { %1122 = vmatpush1.bf16.msra.mxu0 %v9489_v18  ;;  %1163 = vmatpush1.bf16.msra.mxu1 %v9491_v19  ;;  %v324_v31 = vld [vmem:[#allocation2 + $0xe0] sm:$0xff]  ;;  %v325_v33 = vld [vmem:[#allocation2 + $0xe8] sm:$0xff] }
  0xe4   :  { %1123 = vmatprep.subr.bf16.mxu0 %v9482_v20  ;;  %1164 = vmatprep.subr.bf16.mxu1 %v9484_v21  ;;  %v9466_v36 = vcombine.high %v320_v30, %v324_v31  ;;  %v9468_v37 = vcombine.high %v321_v32, %v325_v33  ;;  %v312_v38 = vld [vmem:[#allocation2 + $0x80] sm:$0xff]  ;;  %v313_v40 = vld [vmem:[#allocation2 + $0x88] sm:$0xff]  ;;  %v9465_v42 = vcombine.low %v320_v30, %v324_v31 }
  0xe5   :  { %v316_v39 = vld [vmem:[#allocation2 + $0xa0] sm:$0xff]  ;;  %v317_v41 = vld [vmem:[#allocation2 + $0xa8] sm:$0xff]  ;;  %v9467_v43 = vcombine.low %v321_v32, %v325_v33 }
  0xe6   :  { %v9458_v44 = vcombine.high %v312_v38, %v316_v39  ;;  %v9460_v45 = vcombine.high %v313_v40, %v317_v41  ;;  %v304_v46 = vld [vmem:[#allocation2 + $0x40] sm:$0xff]  ;;  %v305_v48 = vld [vmem:[#allocation2 + $0x48] sm:$0xff]  ;;  %v9457_v50 = vcombine.low %v312_v38, %v316_v39  ;;  %v9459_v51 = vcombine.low %v313_v40, %v317_v41 }
  0xe7   :  { %1124 = vmatpush1.bf16.msra.mxu0 %v9481_v26  ;;  %1165 = vmatpush1.bf16.msra.mxu1 %v9483_v27  ;;  %v308_v47 = vld [vmem:[#allocation2 + $0x60] sm:$0xff]  ;;  %v309_v49 = vld [vmem:[#allocation2 + $0x68] sm:$0xff] }
  0xe8   :  { %1125 = vmatprep.subr.bf16.mxu0 %v9474_v28  ;;  %1166 = vmatprep.subr.bf16.mxu1 %v9476_v29  ;;  %v9450_v52 = vcombine.high %v304_v46, %v308_v47  ;;  %v12448_v53 = vld.sshfl [vmem:[%s12830_s0] sm:$0x33 pattern:$0x76325410]  ;;  %v9452_v54 = vcombine.high %v305_v48, %v309_v49  ;;  %v297_v58 = vld [vmem:[#allocation2 + $0x8] sm:$0xff]  ;;  %v9449_v60 = vcombine.low %v304_v46, %v308_v47 }
  0xe9   :  { %v296_v55 = vld [vmem:[#allocation2] sm:$0xff]  ;;  %v433_v57 = vcombine.high %v12448_v53, %v12448_v53  ;;  %v301_v59 = vld [vmem:[#allocation2 + $0x28] sm:$0xff]  ;;  %v9451_v62 = vcombine.low %v305_v48, %v309_v49 }
  0xea   :  { %v300_v56 = vld [vmem:[#allocation2 + $0x20] sm:$0xff]  ;;  %v9444_v0 = vcombine.high %v297_v58, %v301_v59  ;;  %v417_v3 = vld [vmem:[#allocation2 + $0x3c8] sm:$0xff]  ;;  %v9443_v6 = vcombine.low %v297_v58, %v301_v59 }
  0xeb   :  { %1126 = vmatpush1.bf16.msra.mxu0 %v9473_v34  ;;  %1167 = vmatpush1.bf16.msra.mxu1 %v9475_v35  ;;  %v12452_v61 = vpack.c.bf16 %v433_v57, %v433_v57  ;;  %v9442_v63 = vcombine.high %v296_v55, %v300_v56  ;;  %v416_v1 = vld [vmem:[#allocation2 + $0x3c0] sm:$0xff]  ;;  %v421_v4 = vld [vmem:[#allocation2 + $0x3e8] sm:$0xff]  ;;  %v9441_v5 = vcombine.low %v296_v55, %v300_v56 }
  0xec   :  { %1127 = vmatprep.subr.bf16.mxu0 %v9466_v36  ;;  %1168 = vmatprep.subr.bf16.mxu1 %v9468_v37  ;;  %v420_v2 = vld [vmem:[#allocation2 + $0x3e0] sm:$0xff]  ;;  %v9564_v8 = vcombine.high %v417_v3, %v421_v4  ;;  %v409_v11 = vld [vmem:[#allocation2 + $0x388] sm:$0xff]  ;;  %v9563_v14 = vcombine.low %v417_v3, %v421_v4  ;;  %v358_v4 = vld [vmem:[#allocation2 + $0x1f0] sm:$0xff] }
  0xed   :  { %1151 = vmatprep.mubr.bf16.mxu0 %v12452_v61  ;;  %1192 = vmatprep.mubr.bf16.mxu1 %v12452_v61  ;;  %v9562_v7 = vcombine.high %v416_v1, %v420_v2  ;;  %v408_v9 = vld [vmem:[#allocation2 + $0x380] sm:$0xff]  ;;  %v413_v12 = vld [vmem:[#allocation2 + $0x3a8] sm:$0xff]  ;;  %v9561_v13 = vcombine.low %v416_v1, %v420_v2  ;;  %v354_v2 = vld [vmem:[#allocation2 + $0x1d0] sm:$0xff] }
  0xee   :  { %v412_v10 = vld [vmem:[#allocation2 + $0x3a0] sm:$0xff]  ;;  %v9556_v16 = vcombine.high %v409_v11, %v413_v12  ;;  %v401_v19 = vld [vmem:[#allocation2 + $0x348] sm:$0xff]  ;;  %v9555_v22 = vcombine.low %v409_v11, %v413_v12  ;;  %v350_v12 = vld [vmem:[#allocation2 + $0x1b0] sm:$0xff] }
  0xef   :  { %1128 = vmatpush1.bf16.msra.mxu0 %v9465_v42  ;;  %1169 = vmatpush1.bf16.msra.mxu1 %v9467_v43  ;;  %v9554_v15 = vcombine.high %v408_v9, %v412_v10  ;;  %v400_v17 = vld [vmem:[#allocation2 + $0x340] sm:$0xff]  ;;  %v405_v20 = vld [vmem:[#allocation2 + $0x368] sm:$0xff]  ;;  %v9553_v21 = vcombine.low %v408_v9, %v412_v10  ;;  %v9502_v9 = vcombine.high %v354_v2, %v358_v4  ;;  %v346_v10 = vld [vmem:[#allocation2 + $0x190] sm:$0xff] }
  0xf0   :  { %1129 = vmatprep.subr.bf16.mxu0 %v9458_v44  ;;  %1170 = vmatprep.subr.bf16.mxu1 %v9460_v45  ;;  %v404_v18 = vld [vmem:[#allocation2 + $0x360] sm:$0xff]  ;;  %v9548_v24 = vcombine.high %v401_v19, %v405_v20  ;;  %v393_v27 = vld [vmem:[#allocation2 + $0x308] sm:$0xff]  ;;  %v9547_v30 = vcombine.low %v401_v19, %v405_v20  ;;  %v338_v19 = vld [vmem:[#allocation2 + $0x150] sm:$0xff] }
  0xf1   :  { %v9546_v23 = vcombine.high %v400_v17, %v404_v18  ;;  %v392_v25 = vld [vmem:[#allocation2 + $0x300] sm:$0xff]  ;;  %v397_v28 = vld [vmem:[#allocation2 + $0x328] sm:$0xff]  ;;  %v9545_v29 = vcombine.low %v400_v17, %v404_v18  ;;  %v9494_v18 = vcombine.high %v346_v10, %v350_v12 }
  0xf2   :  { %v396_v26 = vld [vmem:[#allocation2 + $0x320] sm:$0xff]  ;;  %v9540_v32 = vcombine.high %v393_v27, %v397_v28  ;;  %v385_v35 = vld [vmem:[#allocation2 + $0x2c8] sm:$0xff]  ;;  %v9539_v38 = vcombine.low %v393_v27, %v397_v28  ;;  %v334_v28 = vld [vmem:[#allocation2 + $0x130] sm:$0xff] }
  0xf3   :  { %1130 = vmatpush1.bf16.msra.mxu0 %v9457_v50  ;;  %1171 = vmatpush1.bf16.msra.mxu1 %v9459_v51  ;;  %v9538_v31 = vcombine.high %v392_v25, %v396_v26  ;;  %v384_v33 = vld [vmem:[#allocation2 + $0x2c0] sm:$0xff]  ;;  %v389_v36 = vld [vmem:[#allocation2 + $0x2e8] sm:$0xff]  ;;  %v9537_v37 = vcombine.low %v392_v25, %v396_v26  ;;  %v330_v26 = vld [vmem:[#allocation2 + $0x110] sm:$0xff] }
  0xf4   :  { %1131 = vmatprep.subr.bf16.mxu0 %v9450_v52  ;;  %1172 = vmatprep.subr.bf16.mxu1 %v9452_v54  ;;  %v388_v34 = vld [vmem:[#allocation2 + $0x2e0] sm:$0xff]  ;;  %v9532_v41 = vcombine.high %v385_v35, %v389_v36  ;;  %v377_v43 = vld [vmem:[#allocation2 + $0x288] sm:$0xff]  ;;  %v9531_v46 = vcombine.low %v385_v35, %v389_v36  ;;  %v326_v36 = vld [vmem:[#allocation2 + $0xf0] sm:$0xff] }
  0xf5   :  { %v9530_v39 = vcombine.high %v384_v33, %v388_v34  ;;  %v376_v40 = vld [vmem:[#allocation2 + $0x280] sm:$0xff]  ;;  %v381_v44 = vld [vmem:[#allocation2 + $0x2a8] sm:$0xff]  ;;  %v9529_v45 = vcombine.low %v384_v33, %v388_v34  ;;  %v9478_v33 = vcombine.high %v330_v26, %v334_v28  ;;  %v322_v34 = vld [vmem:[#allocation2 + $0xd0] sm:$0xff] }
  0xf6   :  { %v380_v42 = vld [vmem:[#allocation2 + $0x2a0] sm:$0xff]  ;;  %v9524_v49 = vcombine.high %v377_v43, %v381_v44  ;;  %v369_v51 = vld [vmem:[#allocation2 + $0x248] sm:$0xff]  ;;  %v9523_v55 = vcombine.low %v377_v43, %v381_v44  ;;  %v318_v43 = vld [vmem:[#allocation2 + $0xb0] sm:$0xff] }
  0xf7   :  { %1132 = vmatpush1.bf16.msra.mxu0 %v9449_v60  ;;  %1173 = vmatpush1.bf16.msra.mxu1 %v9451_v62  ;;  %v9522_v47 = vcombine.high %v376_v40, %v380_v42  ;;  %v368_v48 = vld [vmem:[#allocation2 + $0x240] sm:$0xff]  ;;  %v373_v52 = vld [vmem:[#allocation2 + $0x268] sm:$0xff]  ;;  %v9521_v54 = vcombine.low %v376_v40, %v380_v42  ;;  %v314_v42 = vld [vmem:[#allocation2 + $0x90] sm:$0xff] }
  0xf8   :  { %1133 = vmatprep.subr.bf16.mxu0 %v9442_v63  ;;  %1174 = vmatprep.subr.bf16.mxu1 %v9444_v0  ;;  %v372_v50 = vld [vmem:[#allocation2 + $0x260] sm:$0xff]  ;;  %v9516_v58 = vcombine.high %v369_v51, %v373_v52  ;;  %v361_v60 = vld [vmem:[#allocation2 + $0x208] sm:$0xff]  ;;  %v9515_v0 = vcombine.low %v369_v51, %v373_v52  ;;  %v315_v44 = vld [vmem:[#allocation2 + $0x98] sm:$0xff] }
  0xf9   :  { %v9514_v56 = vcombine.high %v368_v48, %v372_v50  ;;  %v360_v57 = vld [vmem:[#allocation2 + $0x200] sm:$0xff]  ;;  %v365_v62 = vld [vmem:[#allocation2 + $0x228] sm:$0xff]  ;;  %v9513_v63 = vcombine.low %v368_v48, %v372_v50  ;;  %v310_v48 = vld [vmem:[#allocation2 + $0x70] sm:$0xff]  ;;  %v9462_v50 = vcombine.high %v314_v42, %v318_v43 }
  0xfa   :  { %v364_v59 = vld [vmem:[#allocation2 + $0x220] sm:$0xff]  ;;  %v9508_v3 = vcombine.high %v361_v60, %v365_v62  ;;  %v307_v51 = vld [vmem:[#allocation2 + $0x58] sm:$0xff] }
  0xfb   :  { %1134 = vmatpush1.bf16.msra.mxu0 %v9441_v5  ;;  %1175 = vmatpush1.bf16.msra.mxu1 %v9443_v6  ;;  %v9506_v1 = vcombine.high %v360_v57, %v364_v59  ;;  %v355_v5 = vld [vmem:[#allocation2 + $0x1d8] sm:$0xff] }
  0xfc   :  { %1135 = vmatprep.subr.bf16.mxu0 %v9562_v7  ;;  %1176 = vmatprep.subr.bf16.mxu1 %v9564_v8  ;;  %v359_v6 = vld [vmem:[#allocation2 + $0x1f8] sm:$0xff]  ;;  %v9505_v7 = vcombine.low %v360_v57, %v364_v59  ;;  %v9507_v8 = vcombine.low %v361_v60, %v365_v62  ;;  %v302_v57 = vld [vmem:[#allocation2 + $0x30] sm:$0xff] }
  0xfd   :  { %v9504_v11 = vcombine.high %v355_v5, %v359_v6  ;;  %v9503_v17 = vcombine.low %v355_v5, %v359_v6  ;;  %v311_v52 = vld [vmem:[#allocation2 + $0x78] sm:$0xff] }
  0xfe   :  { %v299_v60 = vld [vmem:[#allocation2 + $0x18] sm:$0xff] }
  0xff   :  { %1136 = vmatpush2.bf16.msra.mxu0 %v9561_v13  ;;  %1177 = vmatpush2.bf16.msra.mxu1 %v9563_v14  ;;  %v347_v13 = vld [vmem:[#allocation2 + $0x198] sm:$0xff]  ;;  %v12458_v14 = vpack.c.bf16 %v12448_v53, %v12448_v53  ;;  %v9493_v53 = vcombine.low %v346_v10, %v350_v12  ;;  %v414_v10 = vld [vmem:[#allocation2 + $0x3b0] sm:$0xff] }
 0x100   :  { %1137 = vmatprep.subr.bf16.mxu0 %v9554_v15  ;;  %1178 = vmatprep.subr.bf16.mxu1 %v9556_v16  ;;  %v351_v15 = vld [vmem:[#allocation2 + $0x1b8] sm:$0xff]  ;;  %v9501_v16 = vcombine.low %v354_v2, %v358_v4  ;;  %v422_v2 = vld [vmem:[#allocation2 + $0x3f0] sm:$0xff] }
 0x101   :  { %v9496_v20 = vcombine.high %v347_v13, %v351_v15  ;;  %v303_v62 = vld [vmem:[#allocation2 + $0x38] sm:$0xff] }
 0x102   :  { %v419_v5 = vld [vmem:[#allocation2 + $0x3d8] sm:$0xff] }
 0x103   :  { %1138 = vmatpush2.bf16.msra.mxu0 %v9553_v21  ;;  %1179 = vmatpush2.bf16.msra.mxu1 %v9555_v22  ;;  %v342_v21 = vld [vmem:[#allocation2 + $0x170] sm:$0xff]  ;;  %v339_v22 = vld [vmem:[#allocation2 + $0x158] sm:$0xff] }
 0x104   :  { %1139 = vmatprep.subr.bf16.mxu0 %v9546_v23  ;;  %1180 = vmatprep.subr.bf16.mxu1 %v9548_v24  ;;  %v343_v23 = vld [vmem:[#allocation2 + $0x178] sm:$0xff]  ;;  %v9495_v24 = vcombine.low %v347_v13, %v351_v15  ;;  %v9486_v25 = vcombine.high %v338_v19, %v342_v21 }
 0x105   :  { %v9488_v27 = vcombine.high %v339_v22, %v343_v23  ;;  %v423_v6 = vld [vmem:[#allocation2 + $0x3f8] sm:$0xff] }
 0x106   :  { %v411_v13 = vld [vmem:[#allocation2 + $0x398] sm:$0xff] }
 0x107   :  { %1140 = vmatpush2.bf16.msra.mxu0 %v9545_v29  ;;  %1181 = vmatpush2.bf16.msra.mxu1 %v9547_v30  ;;  %v331_v29 = vld [vmem:[#allocation2 + $0x118] sm:$0xff] }
 0x108   :  { %1141 = vmatprep.subr.bf16.mxu0 %v9538_v31  ;;  %1182 = vmatprep.subr.bf16.mxu1 %v9540_v32  ;;  %v335_v30 = vld [vmem:[#allocation2 + $0x138] sm:$0xff]  ;;  %v9485_v31 = vcombine.low %v338_v19, %v342_v21  ;;  %v9487_v32 = vcombine.low %v339_v22, %v343_v23  ;;  %v406_v19 = vld [vmem:[#allocation2 + $0x370] sm:$0xff] }
 0x109   :  { %v9480_v35 = vcombine.high %v331_v29, %v335_v30  ;;  %v9479_v40 = vcombine.low %v331_v29, %v335_v30  ;;  %v415_v15 = vld [vmem:[#allocation2 + $0x3b8] sm:$0xff] }
 0x10a   :  { %v403_v22 = vld [vmem:[#allocation2 + $0x358] sm:$0xff] }
 0x10b   :  { %1142 = vmatpush2.bf16.msra.mxu0 %v9537_v37  ;;  %1183 = vmatpush2.bf16.msra.mxu1 %v9539_v38  ;;  %v323_v37 = vld [vmem:[#allocation2 + $0xd8] sm:$0xff] }
 0x10c   :  { %1143 = vmatprep.subr.bf16.mxu0 %v9530_v39  ;;  %1184 = vmatprep.subr.bf16.mxu1 %v9532_v41  ;;  %v327_v38 = vld [vmem:[#allocation2 + $0xf8] sm:$0xff]  ;;  %v9477_v39 = vcombine.low %v330_v26, %v334_v28  ;;  %v9470_v41 = vcombine.high %v322_v34, %v326_v36  ;;  %v398_v26 = vld [vmem:[#allocation2 + $0x330] sm:$0xff] }
 0x10d   :  { %v407_v23 = vld [vmem:[#allocation2 + $0x378] sm:$0xff] }
 0x10e   :  { %v395_v29 = vld [vmem:[#allocation2 + $0x318] sm:$0xff] }
 0x10f   :  { %1144 = vmatpush2.bf16.msra.mxu0 %v9529_v45  ;;  %1185 = vmatpush2.bf16.msra.mxu1 %v9531_v46  ;;  %v319_v45 = vld [vmem:[#allocation2 + $0xb8] sm:$0xff]  ;;  %v9469_v46 = vcombine.low %v322_v34, %v326_v36  ;;  %v390_v34 = vld [vmem:[#allocation2 + $0x2f0] sm:$0xff] }
 0x110   :  { %1145 = vmatprep.subr.bf16.mxu0 %v9522_v47  ;;  %1186 = vmatprep.subr.bf16.mxu1 %v9524_v49  ;;  %v306_v47 = vld [vmem:[#allocation2 + $0x50] sm:$0xff]  ;;  %v9471_v49 = vcombine.low %v323_v37, %v327_v38  ;;  %v399_v30 = vld [vmem:[#allocation2 + $0x338] sm:$0xff] }
 0x111   :  { %v9454_v59 = vcombine.high %v306_v47, %v310_v48 }
 0x113   :  { %1146 = vmatpush2.bf16.msra.mxu0 %v9521_v54  ;;  %1187 = vmatpush2.bf16.msra.mxu1 %v9523_v55  ;;  %v9464_v54 = vcombine.high %v315_v44, %v319_v45  ;;  %v9461_v55 = vcombine.low %v314_v42, %v318_v43  ;;  %v382_v42 = vld [vmem:[#allocation2 + $0x2b0] sm:$0xff] }
 0x114   :  { %1147 = vmatprep.subr.bf16.mxu0 %v9514_v56  ;;  %1188 = vmatprep.subr.bf16.mxu1 %v9516_v58  ;;  %v298_v56 = vld [vmem:[#allocation2 + $0x10] sm:$0xff]  ;;  %v9463_v58 = vcombine.low %v315_v44, %v319_v45  ;;  %v379_v44 = vld [vmem:[#allocation2 + $0x298] sm:$0xff] }
 0x115   :  { %v9446_v4 = vcombine.high %v298_v56, %v302_v57  ;;  %v383_v45 = vld [vmem:[#allocation2 + $0x2b8] sm:$0xff] }
 0x117   :  { %1148 = vmatpush2.bf16.msra.mxu0 %v9513_v63  ;;  %1189 = vmatpush2.bf16.msra.mxu1 %v9515_v0  ;;  %v9456_v63 = vcombine.high %v307_v51, %v311_v52  ;;  %v9453_v0 = vcombine.low %v306_v47, %v310_v48  ;;  %v370_v48 = vld [vmem:[#allocation2 + $0x250] sm:$0xff] }
 0x118   :  { %1149 = vmatprep.subr.bf16.mxu0 %v9506_v1  ;;  %1190 = vmatprep.subr.bf16.mxu1 %v9508_v3  ;;  %v418_v1 = vld [vmem:[#allocation2 + $0x3d0] sm:$0xff]  ;;  %v9455_v3 = vcombine.low %v307_v51, %v311_v52  ;;  %v371_v52 = vld [vmem:[#allocation2 + $0x258] sm:$0xff] }
 0x119   :  { %v9566_v12 = vcombine.high %v418_v1, %v422_v2 }
 0x11b   :  { %1150 = vmatpush2.bf16.msra.mxu0 %v9505_v7  ;;  %1191 = vmatpush2.bf16.msra.mxu1 %v9507_v8  ;;  %v9448_v7 = vcombine.high %v299_v60, %v303_v62  ;;  %v9445_v8 = vcombine.low %v298_v56, %v302_v57  ;;  %v362_v57 = vld [vmem:[#allocation2 + $0x210] sm:$0xff] }
 0x11c   :  { %1201 = vmatprep.subr.bf16.mxu0 %v9502_v9  ;;  %1242 = vmatprep.subr.bf16.mxu1 %v9504_v11  ;;  %v410_v9 = vld [vmem:[#allocation2 + $0x390] sm:$0xff]  ;;  %v9447_v11 = vcombine.low %v299_v60, %v303_v62  ;;  %v363_v62 = vld [vmem:[#allocation2 + $0x218] sm:$0xff] }
 0x11d   :  { %v9558_v21 = vcombine.high %v410_v9, %v414_v10 }
 0x11e   :  { %1152 = vmatmul.mubr.bf16.vlgmr.msra.gmra.mxu0 %v12458_v14  ;;  %1193 = vmatmul.mubr.bf16.vlgmr.msra.gmra.mxu1 %v12458_v14 }
 0x11f   :  { %1202 = vmatpush1.bf16.msra.mxu0 %v9501_v16  ;;  %1243 = vmatpush1.bf16.msra.mxu1 %v9503_v17  ;;  %v9568_v16 = vcombine.high %v419_v5, %v423_v6  ;;  %v9565_v17 = vcombine.low %v418_v1, %v422_v2 }
 0x120   :  { %1203 = vmatprep.subr.bf16.mxu0 %v9494_v18  ;;  %1244 = vmatprep.subr.bf16.mxu1 %v9496_v20  ;;  %v402_v18 = vld [vmem:[#allocation2 + $0x350] sm:$0xff]  ;;  %v9567_v20 = vcombine.low %v419_v5, %v423_v6 }
 0x121   :  { %1233 = vmatprep.mubr.bf16.mxu0 %v12452_v61  ;;  %1274 = vmatprep.mubr.bf16.mxu1 %v12452_v61  ;;  %v9472_v61 = vcombine.high %v323_v37, %v327_v38  ;;  %v9550_v28 = vcombine.high %v402_v18, %v406_v19  ;;  %v387_v37 = vld [vmem:[#allocation2 + $0x2d8] sm:$0xff]  ;;  %v10715_v5 = vld [vmem:[#allocation4 + $0xe4] ss:$16 sps:$4 sm:$0xff]  }
 0x122   :  { %v391_v38 = vld [vmem:[#allocation2 + $0x2f8] sm:$0xff] }
 0x123   :  { %1204 = vmatpush1.bf16.msra.mxu0 %v9493_v53  ;;  %1245 = vmatpush1.bf16.msra.mxu1 %v9495_v24  ;;  %v9560_v53 = vcombine.high %v411_v13, %v415_v15  ;;  %v9557_v24 = vcombine.low %v410_v9, %v414_v10  ;;  %v10713_v9 = vld [vmem:[#allocation4 + $0xe0] ss:$16 sps:$4 sm:$0xff]  }
 0x124   :  { %1205 = vmatprep.subr.bf16.mxu0 %v9486_v25  ;;  %1246 = vmatprep.subr.bf16.mxu1 %v9488_v27  ;;  %v394_v25 = vld [vmem:[#allocation2 + $0x310] sm:$0xff]  ;;  %v9559_v27 = vcombine.low %v411_v13, %v415_v15 }
 0x125   :  { %v9542_v36 = vcombine.high %v394_v25, %v398_v26  ;;  %v10716_v10 = vld [vmem:[#allocation4 + $0x2e0] ss:$16 sps:$4 sm:$0xff]  }
 0x126   :  { %v10719_v13 = vld [vmem:[#allocation4 + $0xc0] ss:$16 sps:$4 sm:$0xff]  }
 0x127   :  { %1206 = vmatpush1.bf16.msra.mxu0 %v9485_v31  ;;  %1247 = vmatpush1.bf16.msra.mxu1 %v9487_v32  ;;  %v9552_v31 = vcombine.high %v403_v22, %v407_v23  ;;  %v9549_v32 = vcombine.low %v402_v18, %v406_v19  ;;  %v10722_v15 = vld [vmem:[#allocation4 + $0x2c0] ss:$16 sps:$4 sm:$0xff]  }
 0x128   :  { %1207 = vmatprep.subr.bf16.mxu0 %v9478_v33  ;;  %1248 = vmatprep.subr.bf16.mxu1 %v9480_v35  ;;  %v386_v33 = vld [vmem:[#allocation2 + $0x2d0] sm:$0xff]  ;;  %v9551_v35 = vcombine.low %v403_v22, %v407_v23 }
 0x129   :  { %v9534_v43 = vcombine.high %v386_v33, %v390_v34  ;;  %v9533_v47 = vcombine.low %v386_v33, %v390_v34  ;;  %v10725_v18 = vld [vmem:[#allocation4 + $0xa0] ss:$16 sps:$4 sm:$0xff]   ;;  %v10757_v34 = vld [vmem:[#allocation4 + $0x4] ss:$16 sps:$4 sm:$0xff]  }
 0x12a   :  { %v10728_v19 = vld [vmem:[#allocation4 + $0x2a0] ss:$16 sps:$4 sm:$0xff]  }
 0x12b   :  { %1208 = vmatpush1.bf16.msra.mxu0 %v9477_v39  ;;  %1249 = vmatpush1.bf16.msra.mxu1 %v9479_v40  ;;  %v9544_v39 = vcombine.high %v395_v29, %v399_v30  ;;  %v9541_v40 = vcombine.low %v394_v25, %v398_v26  ;;  %v10731_v22 = vld [vmem:[#allocation4 + $0x80] ss:$16 sps:$4 sm:$0xff]   ;;  %v10745_v26 = vld [vmem:[#allocation4 + $0x44] ss:$16 sps:$4 sm:$0xff]  }
 0x12c   :  { %1209 = vmatprep.subr.bf16.mxu0 %v9470_v41  ;;  %1250 = vmatprep.subr.bf16.mxu1 %v9472_v61  ;;  %v378_v41 = vld [vmem:[#allocation2 + $0x290] sm:$0xff]  ;;  %v9543_v61 = vcombine.low %v395_v29, %v399_v30 }
 0x12d   :  { %v9526_v51 = vcombine.high %v378_v41, %v382_v42  ;;  %v9525_v56 = vcombine.low %v378_v41, %v382_v42  ;;  %v10734_v23 = vld [vmem:[#allocation4 + $0x280] ss:$16 sps:$4 sm:$0xff]   ;;  %v10751_v30 = vld [vmem:[#allocation4 + $0x24] ss:$16 sps:$4 sm:$0xff]  }
 0x12e   :  { %v10740_v25 = vld [vmem:[#allocation4 + $0x260] ss:$16 sps:$4 sm:$0xff]   ;;  %v10769_v42 = vld [vmem:[#allocation4 + $0x1c4] ss:$16 sps:$4 sm:$0xff]  }
 0x12f   :  { %1210 = vmatpush1.bf16.msra.mxu0 %v9469_v46  ;;  %1251 = vmatpush1.bf16.msra.mxu1 %v9471_v49  ;;  %v9536_v46 = vcombine.high %v387_v37, %v391_v38  ;;  %v374_v49 = vld [vmem:[#allocation2 + $0x270] sm:$0xff] }
 0x130   :  { %1211 = vmatprep.subr.bf16.mxu0 %v9462_v50  ;;  %1252 = vmatprep.subr.bf16.mxu1 %v9464_v54  ;;  %v9535_v50 = vcombine.low %v387_v37, %v391_v38  ;;  %v375_v54 = vld [vmem:[#allocation2 + $0x278] sm:$0xff]  ;;  %v9518_v60 = vcombine.high %v370_v48, %v374_v49  ;;  %v9517_v1 = vcombine.low %v370_v48, %v374_v49  ;;  %v10746_v29 = vld [vmem:[#allocation4 + $0x240] ss:$16 sps:$4 sm:$0xff]   ;;  %v10763_v38 = vld [vmem:[#allocation4 + $0x1e4] ss:$16 sps:$4 sm:$0xff]  }
 0x131   :  { %v9519_v2 = vcombine.low %v371_v52, %v375_v54  ;;  %v10752_v33 = vld [vmem:[#allocation4 + $0x220] ss:$16 sps:$4 sm:$0xff]   ;;  %v10781_v49 = vld [vmem:[#allocation4 + $0x184] ss:$16 sps:$4 sm:$0xff]  }
 0x132   :  { %v10758_v37 = vld [vmem:[#allocation4 + $0x200] ss:$16 sps:$4 sm:$0xff]  }
 0x133   :  { %1212 = vmatpush1.bf16.msra.mxu0 %v9461_v55  ;;  %1253 = vmatpush1.bf16.msra.mxu1 %v9463_v58  ;;  %v9528_v55 = vcombine.high %v379_v44, %v383_v45  ;;  %v366_v58 = vld [vmem:[#allocation2 + $0x230] sm:$0xff] }
 0x134   :  { %1213 = vmatprep.subr.bf16.mxu0 %v9454_v59  ;;  %1254 = vmatprep.subr.bf16.mxu1 %v9456_v63  ;;  %v9527_v59 = vcombine.low %v379_v44, %v383_v45  ;;  %v367_v63 = vld [vmem:[#allocation2 + $0x238] sm:$0xff]  ;;  %v9509_v6 = vcombine.low %v362_v57, %v366_v58  ;;  %v10764_v41 = vld [vmem:[#allocation4 + $0x3e0] ss:$16 sps:$4 sm:$0xff]   ;;  %v10775_v45 = vld [vmem:[#allocation4 + $0x1a4] ss:$16 sps:$4 sm:$0xff]  }
 0x135   :  { %v10770_v44 = vld [vmem:[#allocation4 + $0x3c0] ss:$16 sps:$4 sm:$0xff]  }
 0x136   :  { %v10776_v48 = vld [vmem:[#allocation4 + $0x3a0] ss:$16 sps:$4 sm:$0xff]  }
 0x137   :  { %1214 = vmatpush1.bf16.msra.mxu0 %v9453_v0  ;;  %1255 = vmatpush1.bf16.msra.mxu1 %v9455_v3  ;;  %v9520_v0 = vcombine.high %v371_v52, %v375_v54  ;;  %v9510_v3 = vcombine.high %v362_v57, %v366_v58  ;;  %v10782_v52 = vld [vmem:[#allocation4 + $0x380] ss:$16 sps:$4 sm:$0xff]   ;;  %v10787_v54 = vld [vmem:[#allocation4 + $0x164] ss:$16 sps:$4 sm:$0xff]  }
 0x138   :  { %1215 = vmatprep.subr.bf16.mxu0 %v9446_v4  ;;  %1256 = vmatprep.subr.bf16.mxu1 %v9448_v7  ;;  %v9512_v4 = vcombine.high %v363_v62, %v367_v63  ;;  %v10718_v7 = vld [vmem:[#allocation4 + $0x2e4] ss:$16 sps:$4 sm:$0xff]   ;;  %v10788_v57 = vld [vmem:[#allocation4 + $0x360] ss:$16 sps:$4 sm:$0xff]  }
 0x139   :  { %v10793_v58 = vld [vmem:[#allocation4 + $0x144] ss:$16 sps:$4 sm:$0xff]  }
 0x13b   :  { %1216 = vmatpush1.bf16.msra.mxu0 %v9445_v8  ;;  %1257 = vmatpush1.bf16.msra.mxu1 %v9447_v11  ;;  %v9511_v8 = vcombine.low %v363_v62, %v367_v63  ;;  %v10721_v11 = vld [vmem:[#allocation4 + $0xc4] ss:$16 sps:$4 sm:$0xff]   ;;  %v10794_v62 = vld [vmem:[#allocation4 + $0x340] ss:$16 sps:$4 sm:$0xff]  }
 0x13c   :  { %1217 = vmatprep.subr.bf16.mxu0 %v9566_v12  ;;  %1258 = vmatprep.subr.bf16.mxu1 %v9568_v16  ;;  %v10724_v12 = vld [vmem:[#allocation4 + $0x2c4] ss:$16 sps:$4 sm:$0xff]  }
 0x13d   :  { %v10727_v16 = vld [vmem:[#allocation4 + $0xa4] ss:$16 sps:$4 sm:$0xff]  }
 0x13e   :  { %v10799_v63 = vld [vmem:[#allocation4 + $0x124] ss:$16 sps:$4 sm:$0xff]  }
 0x13f   :  { %1218 = vmatpush2.bf16.msra.mxu0 %v9565_v17  ;;  %1259 = vmatpush2.bf16.msra.mxu1 %v9567_v20  ;;  %v10730_v17 = vld [vmem:[#allocation4 + $0x2a4] ss:$16 sps:$4 sm:$0xff]  }
 0x140   :  { %1219 = vmatprep.subr.bf16.mxu0 %v9558_v21  ;;  %1260 = vmatprep.subr.bf16.mxu1 %v9560_v53  ;;  %v10733_v20 = vld [vmem:[#allocation4 + $0x84] ss:$16 sps:$4 sm:$0xff]  }
 0x141   :  { %v10736_v21 = vld [vmem:[#allocation4 + $0x284] ss:$16 sps:$4 sm:$0xff]  }
 0x142   :  { %v10739_v53 = vld [vmem:[#allocation4 + $0x64] ss:$16 sps:$4 sm:$0xff]  }
 0x143   :  { %1220 = vmatpush2.bf16.msra.mxu0 %v9557_v24  ;;  %1261 = vmatpush2.bf16.msra.mxu1 %v9559_v27  ;;  %v10742_v24 = vld [vmem:[#allocation4 + $0x264] ss:$16 sps:$4 sm:$0xff]  }
 0x144   :  { %1221 = vmatprep.subr.bf16.mxu0 %v9550_v28  ;;  %1262 = vmatprep.subr.bf16.mxu1 %v9552_v31  ;;  %v10748_v27 = vld [vmem:[#allocation4 + $0x244] ss:$16 sps:$4 sm:$0xff]   ;;  %v10743_v28 = vld [vmem:[#allocation4 + $0x40] ss:$16 sps:$4 sm:$0xff]  }
 0x145   :  { %v10754_v31 = vld [vmem:[#allocation4 + $0x224] ss:$16 sps:$4 sm:$0xff]  }
 0x147   :  { %1222 = vmatpush2.bf16.msra.mxu0 %v9549_v32  ;;  %1263 = vmatpush2.bf16.msra.mxu1 %v9551_v35  ;;  %v10749_v32 = vld [vmem:[#allocation4 + $0x20] ss:$16 sps:$4 sm:$0xff]   ;;  %v10760_v35 = vld [vmem:[#allocation4 + $0x204] ss:$16 sps:$4 sm:$0xff]  }
 0x148   :  { %1223 = vmatprep.subr.bf16.mxu0 %v9542_v36  ;;  %1264 = vmatprep.subr.bf16.mxu1 %v9544_v39  ;;  %v10755_v36 = vld [vmem:[#allocation4] ss:$16 sps:$4 sm:$0xff]   ;;  %v10766_v39 = vld [vmem:[#allocation4 + $0x3e4] ss:$16 sps:$4 sm:$0xff]  }
 0x14b   :  { %1224 = vmatpush2.bf16.msra.mxu0 %v9541_v40  ;;  %1265 = vmatpush2.bf16.msra.mxu1 %v9543_v61  ;;  %v10761_v40 = vld [vmem:[#allocation4 + $0x1e0] ss:$16 sps:$4 sm:$0xff]   ;;  %v10772_v61 = vld [vmem:[#allocation4 + $0x3c4] ss:$16 sps:$4 sm:$0xff]  }
 0x14c   :  { %1225 = vmatprep.subr.bf16.mxu0 %v9534_v43  ;;  %1266 = vmatprep.subr.bf16.mxu1 %v9536_v46  ;;  %v10767_v43 = vld [vmem:[#allocation4 + $0x1c0] ss:$16 sps:$4 sm:$0xff]   ;;  %v10778_v46 = vld [vmem:[#allocation4 + $0x3a4] ss:$16 sps:$4 sm:$0xff]  }
 0x14f   :  { %1226 = vmatpush2.bf16.msra.mxu0 %v9533_v47  ;;  %1267 = vmatpush2.bf16.msra.mxu1 %v9535_v50  ;;  %v10773_v47 = vld [vmem:[#allocation4 + $0x1a0] ss:$16 sps:$4 sm:$0xff]   ;;  %v10784_v50 = vld [vmem:[#allocation4 + $0x384] ss:$16 sps:$4 sm:$0xff]  }
 0x150   :  { %1227 = vmatprep.subr.bf16.mxu0 %v9526_v51  ;;  %1268 = vmatprep.subr.bf16.mxu1 %v9528_v55  ;;  %v10779_v51 = vld [vmem:[#allocation4 + $0x180] ss:$16 sps:$4 sm:$0xff]   ;;  %v10790_v55 = vld [vmem:[#allocation4 + $0x364] ss:$16 sps:$4 sm:$0xff]  }
 0x153   :  { %1228 = vmatpush2.bf16.msra.mxu0 %v9525_v56  ;;  %1269 = vmatpush2.bf16.msra.mxu1 %v9527_v59  ;;  %v10785_v56 = vld [vmem:[#allocation4 + $0x160] ss:$16 sps:$4 sm:$0xff]   ;;  %v10796_v59 = vld [vmem:[#allocation4 + $0x344] ss:$16 sps:$4 sm:$0xff]  }
 0x154   :  { %1229 = vmatprep.subr.bf16.mxu0 %v9518_v60  ;;  %1270 = vmatprep.subr.bf16.mxu1 %v9520_v0  ;;  %v10791_v60 = vld [vmem:[#allocation4 + $0x140] ss:$16 sps:$4 sm:$0xff]   ;;  %v10802_v0 = vld [vmem:[#allocation4 + $0x324] ss:$16 sps:$4 sm:$0xff]  }
 0x157   :  { %1230 = vmatpush2.bf16.msra.mxu0 %v9517_v1  ;;  %1271 = vmatpush2.bf16.msra.mxu1 %v9519_v2  ;;  %v10797_v1 = vld [vmem:[#allocation4 + $0x120] ss:$16 sps:$4 sm:$0xff]  }
 0x158   :  { %1231 = vmatprep.subr.bf16.mxu0 %v9510_v3  ;;  %1272 = vmatprep.subr.bf16.mxu1 %v9512_v4  ;;  %v10800_v2 = vld [vmem:[#allocation4 + $0x320] ss:$16 sps:$4 sm:$0xff]   ;;  %v10805_v3 = vld [vmem:[#allocation4 + $0x104] ss:$16 sps:$4 sm:$0xff]  }
 0x159   :  { %v10808_v4 = vld [vmem:[#allocation4 + $0x304] ss:$16 sps:$4 sm:$0xff]  }
 0x15b   :  { %1232 = vmatpush2.bf16.msra.mxu0 %v9509_v6  ;;  %1273 = vmatpush2.bf16.msra.mxu1 %v9511_v8  ;;  %v10806_v6 = vld [vmem:[#allocation4 + $0x300] ss:$16 sps:$4 sm:$0xff]   ;;  %v10814_v8 = vld [vmem:[#allocation4 + $0x6e4] ss:$16 sps:$4 sm:$0xff]  }
 0x15c   :  { %2857 = vmatprep.subr.bf16.mxu0 %v10715_v5  ;;  %2898 = vmatprep.subr.bf16.mxu1 %v10718_v7  ;;  %v10803_v5 = vld [vmem:[#allocation4 + $0x100] ss:$16 sps:$4 sm:$0xff]   ;;  %v10811_v7 = vld [vmem:[#allocation4 + $0x4e4] ss:$16 sps:$4 sm:$0xff]  }
 0x15e   :  { %1234 = vmatmul.mubr.bf16.vlgmr.msra.gmra.mxu0 %v12458_v14  ;;  %1275 = vmatmul.mubr.bf16.vlgmr.msra.gmra.mxu1 %v12458_v14  ;;  %v10737_v14 = vld [vmem:[#allocation4 + $0x60] ss:$16 sps:$4 sm:$0xff]  }
 0x15f   :  { %2858 = vmatpush1.bf16.msra.mxu0 %v10713_v9  ;;  %2899 = vmatpush1.bf16.msra.mxu1 %v10716_v10  ;;  %v439_v9 = vlaneseq }
 0x160   :  { %2859 = vmatprep.subr.bf16.mxu0 %v10721_v11  ;;  %2900 = vmatprep.subr.bf16.mxu1 %v10724_v12  ;;  %v12472_v11 = vld [vmem:[%s12831_s13] sm:$0xff] }
 0x161   :  { %v12467_v10 = vshrl.u32 %v439_v9, 7 }
 0x163   :  { %2860 = vmatpush1.bf16.msra.mxu0 %v10719_v13  ;;  %2901 = vmatpush1.bf16.msra.mxu1 %v10722_v15  ;;  %v12475_v12 = vsub.s32 0, %v12467_v10  ;;  %v12478_v13 = vsub.s32 2, %v12467_v10  ;;  %v12481_v15 = vsub.s32 1, %v12467_v10 }
 0x164   :  { %2861 = vmatprep.subr.bf16.mxu0 %v10727_v16  ;;  %2902 = vmatprep.subr.bf16.mxu1 %v10730_v17  ;;  %v12484_v16 = vsub.s32 3, %v12467_v10 }
 0x165   :  { %v442_v17 = vrot.slane %v12472_v11, %v12475_v12 }
 0x167   :  { %2862 = vmatpush1.bf16.msra.mxu0 %v10725_v18  ;;  %2903 = vmatpush1.bf16.msra.mxu1 %v10728_v19  ;;  %v450_v18 = vrot.slane %v12472_v11, %v12478_v13  ;;  %v446_v19 = vrot.slane %v12472_v11, %v12481_v15 }
 0x168   :  { %2863 = vmatprep.subr.bf16.mxu0 %v10733_v20  ;;  %2904 = vmatprep.subr.bf16.mxu1 %v10736_v21  ;;  %v454_v21 = vrot.slane %v12472_v11, %v12484_v16 }
 0x16b   :  { %2864 = vmatpush1.bf16.msra.mxu0 %v10731_v22  ;;  %2905 = vmatpush1.bf16.msra.mxu1 %v10734_v23 }
 0x16c   :  { %2865 = vmatprep.subr.bf16.mxu0 %v10739_v53  ;;  %2906 = vmatprep.subr.bf16.mxu1 %v10742_v24 }
 0x16f   :  { %2866 = vmatpush1.bf16.msra.mxu0 %v10737_v14  ;;  %2907 = vmatpush1.bf16.msra.mxu1 %v10740_v25 }
 0x170   :  { %2867 = vmatprep.subr.bf16.mxu0 %v10745_v26  ;;  %2908 = vmatprep.subr.bf16.mxu1 %v10748_v27 }
 0x173   :  { %2868 = vmatpush1.bf16.msra.mxu0 %v10743_v28  ;;  %2909 = vmatpush1.bf16.msra.mxu1 %v10746_v29 }
 0x174   :  { %2869 = vmatprep.subr.bf16.mxu0 %v10751_v30  ;;  %2910 = vmatprep.subr.bf16.mxu1 %v10754_v31 }
 0x177   :  { %2870 = vmatpush1.bf16.msra.mxu0 %v10749_v32  ;;  %2911 = vmatpush1.bf16.msra.mxu1 %v10752_v33  ;;  %v10809_v32 = vld [vmem:[#allocation4 + $0x4e0] ss:$16 sps:$4 sm:$0xff]  }
 0x178   :  { %2871 = vmatprep.subr.bf16.mxu0 %v10757_v34  ;;  %2912 = vmatprep.subr.bf16.mxu1 %v10760_v35  ;;  %v10812_v35 = vld [vmem:[#allocation4 + $0x6e0] ss:$16 sps:$4 sm:$0xff]  }
 0x17b   :  { %2872 = vmatpush1.bf16.msra.mxu0 %v10755_v36  ;;  %2913 = vmatpush1.bf16.msra.mxu1 %v10758_v37  ;;  %v10817_v36 = vld [vmem:[#allocation4 + $0x4c4] ss:$16 sps:$4 sm:$0xff]  }
 0x17c   :  { %2873 = vmatprep.subr.bf16.mxu0 %v10763_v38  ;;  %2914 = vmatprep.subr.bf16.mxu1 %v10766_v39 }
 0x17f   :  { %2874 = vmatpush2.bf16.msra.mxu0 %v10761_v40  ;;  %2915 = vmatpush2.bf16.msra.mxu1 %v10764_v41 }
 0x180   :  { %2875 = vmatprep.subr.bf16.mxu0 %v10769_v42  ;;  %2916 = vmatprep.subr.bf16.mxu1 %v10772_v61  ;;  %v10815_v42 = vld [vmem:[#allocation4 + $0x4c0] ss:$16 sps:$4 sm:$0xff]   ;;  %v10820_v61 = vld [vmem:[#allocation4 + $0x6c4] ss:$16 sps:$4 sm:$0xff]  }
 0x183   :  { %2876 = vmatpush2.bf16.msra.mxu0 %v10767_v43  ;;  %2917 = vmatpush2.bf16.msra.mxu1 %v10770_v44  ;;  %v10818_v43 = vld [vmem:[#allocation4 + $0x6c0] ss:$16 sps:$4 sm:$0xff]   ;;  %v10823_v44 = vld [vmem:[#allocation4 + $0x4a4] ss:$16 sps:$4 sm:$0xff]  }
 0x184   :  { %2877 = vmatprep.subr.bf16.mxu0 %v10775_v45  ;;  %2918 = vmatprep.subr.bf16.mxu1 %v10778_v46  ;;  %v10826_v45 = vld [vmem:[#allocation4 + $0x6a4] ss:$16 sps:$4 sm:$0xff]   ;;  %v10821_v46 = vld [vmem:[#allocation4 + $0x4a0] ss:$16 sps:$4 sm:$0xff]  }
 0x187   :  { %2878 = vmatpush2.bf16.msra.mxu0 %v10773_v47  ;;  %2919 = vmatpush2.bf16.msra.mxu1 %v10776_v48  ;;  %v10824_v47 = vld [vmem:[#allocation4 + $0x6a0] ss:$16 sps:$4 sm:$0xff]   ;;  %v10829_v48 = vld [vmem:[#allocation4 + $0x484] ss:$16 sps:$4 sm:$0xff]  }
 0x188   :  { %2879 = vmatprep.subr.bf16.mxu0 %v10781_v49  ;;  %2920 = vmatprep.subr.bf16.mxu1 %v10784_v50  ;;  %v10827_v49 = vld [vmem:[#allocation4 + $0x480] ss:$16 sps:$4 sm:$0xff]   ;;  %v10832_v50 = vld [vmem:[#allocation4 + $0x684] ss:$16 sps:$4 sm:$0xff]  }
 0x18b   :  { %2880 = vmatpush2.bf16.msra.mxu0 %v10779_v51  ;;  %2921 = vmatpush2.bf16.msra.mxu1 %v10782_v52  ;;  %v10830_v51 = vld [vmem:[#allocation4 + $0x680] ss:$16 sps:$4 sm:$0xff]   ;;  %v10835_v52 = vld [vmem:[#allocation4 + $0x464] ss:$16 sps:$4 sm:$0xff]  }
 0x18c   :  { %2881 = vmatprep.subr.bf16.mxu0 %v10787_v54  ;;  %2922 = vmatprep.subr.bf16.mxu1 %v10790_v55  ;;  %v10833_v54 = vld [vmem:[#allocation4 + $0x460] ss:$16 sps:$4 sm:$0xff]   ;;  %v10838_v55 = vld [vmem:[#allocation4 + $0x664] ss:$16 sps:$4 sm:$0xff]  }
 0x18f   :  { %2882 = vmatpush2.bf16.msra.mxu0 %v10785_v56  ;;  %2923 = vmatpush2.bf16.msra.mxu1 %v10788_v57  ;;  %v10836_v56 = vld [vmem:[#allocation4 + $0x660] ss:$16 sps:$4 sm:$0xff]   ;;  %v10841_v57 = vld [vmem:[#allocation4 + $0x444] ss:$16 sps:$4 sm:$0xff]  }
 0x190   :  { %2883 = vmatprep.subr.bf16.mxu0 %v10793_v58  ;;  %2924 = vmatprep.subr.bf16.mxu1 %v10796_v59  ;;  %v10839_v58 = vld [vmem:[#allocation4 + $0x440] ss:$16 sps:$4 sm:$0xff]   ;;  %v10844_v59 = vld [vmem:[#allocation4 + $0x644] ss:$16 sps:$4 sm:$0xff]  }
 0x193   :  { %2884 = vmatpush2.bf16.msra.mxu0 %v10791_v60  ;;  %2925 = vmatpush2.bf16.msra.mxu1 %v10794_v62  ;;  %v10842_v60 = vld [vmem:[#allocation4 + $0x640] ss:$16 sps:$4 sm:$0xff]   ;;  %v10847_v62 = vld [vmem:[#allocation4 + $0x424] ss:$16 sps:$4 sm:$0xff]  }
 0x194   :  { %2885 = vmatprep.subr.bf16.mxu0 %v10799_v63  ;;  %2926 = vmatprep.subr.bf16.mxu1 %v10802_v0  ;;  %v10845_v63 = vld [vmem:[#allocation4 + $0x420] ss:$16 sps:$4 sm:$0xff]   ;;  %v10850_v0 = vld [vmem:[#allocation4 + $0x624] ss:$16 sps:$4 sm:$0xff]  }
 0x197   :  { %2886 = vmatpush2.bf16.msra.mxu0 %v10797_v1  ;;  %2927 = vmatpush2.bf16.msra.mxu1 %v10800_v2  ;;  %v10848_v1 = vld [vmem:[#allocation4 + $0x620] ss:$16 sps:$4 sm:$0xff]   ;;  %v10853_v2 = vld [vmem:[#allocation4 + $0x404] ss:$16 sps:$4 sm:$0xff]  }
 0x198   :  { %2887 = vmatprep.subr.bf16.mxu0 %v10805_v3  ;;  %2928 = vmatprep.subr.bf16.mxu1 %v10808_v4  ;;  %v10851_v3 = vld [vmem:[#allocation4 + $0x400] ss:$16 sps:$4 sm:$0xff]   ;;  %v10856_v4 = vld [vmem:[#allocation4 + $0x604] ss:$16 sps:$4 sm:$0xff]  }
 0x19b   :  { %2888 = vmatpush2.bf16.msra.mxu0 %v10803_v5  ;;  %2929 = vmatpush2.bf16.msra.mxu1 %v10806_v6  ;;  %v10854_v5 = vld [vmem:[#allocation4 + $0x600] ss:$16 sps:$4 sm:$0xff]   ;;  %v10859_v6 = vld [vmem:[#allocation4 + $0x5e4] ss:$16 sps:$4 sm:$0xff]  }
 0x19c   :  { %2939 = vmatprep.subr.bf16.mxu0 %v10811_v7  ;;  %2980 = vmatprep.subr.bf16.mxu1 %v10814_v8  ;;  %v10857_v7 = vld [vmem:[#allocation4 + $0x5e0] ss:$16 sps:$4 sm:$0xff]   ;;  %v10862_v8 = vld [vmem:[#allocation4 + $0x7e4] ss:$16 sps:$4 sm:$0xff]  }
 0x1de   :  { %v1153_v20 = vpop.f32.mrf.mxu0  ;;  %v1194_v23 = vpop.f32.mrf.mxu1 }
 0x1df   :  { %v1154_v22 = vadd.f32 %v1153_v20, %v442_v17  ;;  %v1195_v53 = vadd.f32 %v1194_v23, %v450_v18  ;;  %v10860_v17 = vld [vmem:[#allocation4 + $0x7e0] ss:$16 sps:$4 sm:$0xff]   ;;  %v10865_v18 = vld [vmem:[#allocation4 + $0x5c4] ss:$16 sps:$4 sm:$0xff]  }
 0x1e0   :  { %v1155_v24 = vpop.f32.mrf.mxu0  ;;  %v1196_v25 = vpop.f32.mrf.mxu1  ;;  %v10868_v20 = vld [vmem:[#allocation4 + $0x7c4] ss:$16 sps:$4 sm:$0xff]   ;;  %v10869_v23 = vld [vmem:[#allocation4 + $0x5a0] ss:$16 sps:$4 sm:$0xff]  }
 0x1e1   :  { %v1156_v14 = vadd.f32 %v1155_v24, %v446_v19  ;;  %v1283_v26 = vmax.f32 %v1154_v22, 0.0  ;;  %v1285_v27 = vmax.f32 %v1195_v53, 0.0  ;;  %v1197_v28 = vadd.f32 %v1196_v25, %v454_v21  ;;  %v10863_v19 = vld [vmem:[#allocation4 + $0x5c0] ss:$16 sps:$4 sm:$0xff]   ;;  %v10871_v22 = vld [vmem:[#allocation4 + $0x5a4] ss:$16 sps:$4 sm:$0xff]  }
 0x1e2   :  { %v1157_v29 = vpop.f32.mrf.mxu0  ;;  %v1198_v31 = vpop.f32.mrf.mxu1  ;;  %v10866_v21 = vld [vmem:[#allocation4 + $0x7c0] ss:$16 sps:$4 sm:$0xff]   ;;  %v10874_v53 = vld [vmem:[#allocation4 + $0x7a4] ss:$16 sps:$4 sm:$0xff]  }
 0x1e3   :  { %v1284_v30 = vmax.f32 %v1156_v14, 0.0  ;;  %v1286_v33 = vmax.f32 %v1197_v28, 0.0  ;;  %v12494_v37 = vpack.c.bf16 %v1285_v27, %v1285_v27  ;;  %v12498_v40 = vpack.c.bf16 %v1283_v26, %v1283_v26  ;;  %v10872_v24 = vld [vmem:[#allocation4 + $0x7a0] ss:$16 sps:$4 sm:$0xff]   ;;  %v10877_v14 = vld [vmem:[#allocation4 + $0x584] ss:$16 sps:$4 sm:$0xff]  }
 0x1e4   :  { %v1158_v34 = vpop.f32.mrf.mxu0  ;;  %v1199_v39 = vpop.f32.mrf.mxu1  ;;  %v10875_v25 = vld [vmem:[#allocation4 + $0x580] ss:$16 sps:$4 sm:$0xff]   ;;  %v10880_v26 = vld [vmem:[#allocation4 + $0x784] ss:$16 sps:$4 sm:$0xff]  }
 0x1e5   :  { %v12496_v38 = vpack.c.bf16 %v1284_v30, %v1284_v30  ;;  %v12500_v41 = vpack.c.bf16 %v1286_v33, %v1286_v33  ;;  %v10878_v27 = vld [vmem:[#allocation4 + $0x780] ss:$16 sps:$4 sm:$0xff]   ;;  %v10883_v28 = vld [vmem:[#allocation4 + $0x564] ss:$16 sps:$4 sm:$0xff]   ;;  %v465_v39 = vsub.s32 6, %v12467_v10 }
 0x1e6   :  { %v10881_v29 = vld [vmem:[#allocation4 + $0x560] ss:$16 sps:$4 sm:$0xff]   ;;  %v10886_v30 = vld [vmem:[#allocation4 + $0x764] ss:$16 sps:$4 sm:$0xff]  }
 0x1e7   :  { %2889 = vmatprep.mubr.bf16.mxu0 %v12496_v38  ;;  %2930 = vmatprep.mubr.bf16.mxu1 %v12500_v41  ;;  %v10884_v31 = vld [vmem:[#allocation4 + $0x760] ss:$16 sps:$4 sm:$0xff]   ;;  %v10892_v34 = vld [vmem:[#allocation4 + $0x744] ss:$16 sps:$4 sm:$0xff]  }
 0x1e8   :  { %2890 = vmatmul.mubr.bf16.vlgmr.msra.gmra.mxu0 %v12498_v40  ;;  %2931 = vmatmul.mubr.bf16.vlgmr.msra.gmra.mxu1 %v12494_v37  ;;  %v10887_v33 = vld [vmem:[#allocation4 + $0x540] ss:$16 sps:$4 sm:$0xff]  }
 0x1e9   :  { %2940 = vmatpush1.bf16.msra.mxu0 %v10809_v32  ;;  %2981 = vmatpush1.bf16.msra.mxu1 %v10812_v35  ;;  %v10889_v32 = vld [vmem:[#allocation4 + $0x544] ss:$16 sps:$4 sm:$0xff]   ;;  %v457_v35 = vsub.s32 4, %v12467_v10 }
 0x1ea   :  { %2941 = vmatprep.subr.bf16.mxu0 %v10817_v36  ;;  %2982 = vmatprep.subr.bf16.mxu1 %v10820_v61  ;;  %v10890_v36 = vld [vmem:[#allocation4 + $0x740] ss:$16 sps:$4 sm:$0xff]   ;;  %v10895_v61 = vld [vmem:[#allocation4 + $0x524] ss:$16 sps:$4 sm:$0xff]  }
 0x1ed   :  { %2942 = vmatpush1.bf16.msra.mxu0 %v10815_v42  ;;  %2983 = vmatpush1.bf16.msra.mxu1 %v10818_v43  ;;  %v461_v42 = vsub.s32 5, %v12467_v10  ;;  %v10898_v43 = vld [vmem:[#allocation4 + $0x724] ss:$16 sps:$4 sm:$0xff]  }
 0x1ee   :  { %2943 = vmatprep.subr.bf16.mxu0 %v10823_v44  ;;  %2984 = vmatprep.subr.bf16.mxu1 %v10826_v45  ;;  %v469_v44 = vsub.s32 7, %v12467_v10  ;;  %v458_v45 = vrot.slane %v12472_v11, %v457_v35 }
 0x1f1   :  { %2944 = vmatpush1.bf16.msra.mxu0 %v10821_v46  ;;  %2985 = vmatpush1.bf16.msra.mxu1 %v10824_v47  ;;  %v10893_v46 = vld [vmem:[#allocation4 + $0x520] ss:$16 sps:$4 sm:$0xff]   ;;  %v466_v47 = vrot.slane %v12472_v11, %v465_v39 }
 0x1f2   :  { %2945 = vmatprep.subr.bf16.mxu0 %v10829_v48  ;;  %2986 = vmatprep.subr.bf16.mxu1 %v10832_v50  ;;  %v462_v48 = vrot.slane %v12472_v11, %v461_v42  ;;  %v10896_v50 = vld [vmem:[#allocation4 + $0x720] ss:$16 sps:$4 sm:$0xff]  }
 0x1f5   :  { %2946 = vmatpush1.bf16.msra.mxu0 %v10827_v49  ;;  %2987 = vmatpush1.bf16.msra.mxu1 %v10830_v51  ;;  %v470_v51 = vrot.slane %v12472_v11, %v469_v44 }
 0x1f6   :  { %2947 = vmatprep.subr.bf16.mxu0 %v10835_v52  ;;  %2988 = vmatprep.subr.bf16.mxu1 %v10838_v55  ;;  %v10901_v52 = vld [vmem:[#allocation4 + $0x504] ss:$16 sps:$4 sm:$0xff]  }
 0x1f9   :  { %2948 = vmatpush1.bf16.msra.mxu0 %v10833_v54  ;;  %2989 = vmatpush1.bf16.msra.mxu1 %v10836_v56  ;;  %v10904_v54 = vld [vmem:[#allocation4 + $0x704] ss:$16 sps:$4 sm:$0xff]  }
 0x1fa   :  { %2949 = vmatprep.subr.bf16.mxu0 %v10841_v57  ;;  %2990 = vmatprep.subr.bf16.mxu1 %v10844_v59  ;;  %v10899_v57 = vld [vmem:[#allocation4 + $0x500] ss:$16 sps:$4 sm:$0xff]  }
 0x1fd   :  { %2950 = vmatpush1.bf16.msra.mxu0 %v10839_v58  ;;  %2991 = vmatpush1.bf16.msra.mxu1 %v10842_v60  ;;  %v10902_v60 = vld [vmem:[#allocation4 + $0x700] ss:$16 sps:$4 sm:$0xff]  }
 0x1fe   :  { %2951 = vmatprep.subr.bf16.mxu0 %v10847_v62  ;;  %2992 = vmatprep.subr.bf16.mxu1 %v10850_v0 }
 0x201   :  { %2952 = vmatpush1.bf16.msra.mxu0 %v10845_v63  ;;  %2993 = vmatpush1.bf16.msra.mxu1 %v10848_v1 }
 0x202   :  { %2953 = vmatprep.subr.bf16.mxu0 %v10853_v2  ;;  %2994 = vmatprep.subr.bf16.mxu1 %v10856_v4  ;;  %v10907_v4 = vld [vmem:[#allocation4 + $0xec] ss:$16 sps:$4 sm:$0xff]  }
 0x205   :  { %2954 = vmatpush1.bf16.msra.mxu0 %v10851_v3  ;;  %2995 = vmatpush1.bf16.msra.mxu1 %v10854_v5 }
 0x206   :  { %2955 = vmatprep.subr.bf16.mxu0 %v10859_v6  ;;  %2996 = vmatprep.subr.bf16.mxu1 %v10862_v8  ;;  %v10905_v6 = vld [vmem:[#allocation4 + $0xe8] ss:$16 sps:$4 sm:$0xff]  }
 0x209   :  { %2956 = vmatpush2.bf16.msra.mxu0 %v10857_v7  ;;  %2997 = vmatpush2.bf16.msra.mxu1 %v10860_v17  ;;  %v10910_v7 = vld [vmem:[#allocation4 + $0x2ec] ss:$16 sps:$4 sm:$0xff]  }
 0x20a   :  { %2957 = vmatprep.subr.bf16.mxu0 %v10865_v18  ;;  %2998 = vmatprep.subr.bf16.mxu1 %v10868_v20  ;;  %v10908_v18 = vld [vmem:[#allocation4 + $0x2e8] ss:$16 sps:$4 sm:$0xff]  }
 0x20d   :  { %2958 = vmatpush2.bf16.msra.mxu0 %v10863_v19  ;;  %2999 = vmatpush2.bf16.msra.mxu1 %v10866_v21 }
 0x20e   :  { %2959 = vmatprep.subr.bf16.mxu0 %v10871_v22  ;;  %3000 = vmatprep.subr.bf16.mxu1 %v10874_v53  ;;  %v10913_v22 = vld [vmem:[#allocation4 + $0xcc] ss:$16 sps:$4 sm:$0xff]  }
 0x211   :  { %2960 = vmatpush2.bf16.msra.mxu0 %v10869_v23  ;;  %3001 = vmatpush2.bf16.msra.mxu1 %v10872_v24  ;;  %v10916_v24 = vld [vmem:[#allocation4 + $0x2cc] ss:$16 sps:$4 sm:$0xff]  }
 0x212   :  { %2961 = vmatprep.subr.bf16.mxu0 %v10877_v14  ;;  %3002 = vmatprep.subr.bf16.mxu1 %v10880_v26  ;;  %v10911_v14 = vld [vmem:[#allocation4 + $0xc8] ss:$16 sps:$4 sm:$0xff]   ;;  %v10919_v26 = vld [vmem:[#allocation4 + $0xac] ss:$16 sps:$4 sm:$0xff]  }
 0x215   :  { %2962 = vmatpush2.bf16.msra.mxu0 %v10875_v25  ;;  %3003 = vmatpush2.bf16.msra.mxu1 %v10878_v27  ;;  %v10914_v25 = vld [vmem:[#allocation4 + $0x2c8] ss:$16 sps:$4 sm:$0xff]   ;;  %v10922_v27 = vld [vmem:[#allocation4 + $0x2ac] ss:$16 sps:$4 sm:$0xff]  }
 0x216   :  { %2963 = vmatprep.subr.bf16.mxu0 %v10883_v28  ;;  %3004 = vmatprep.subr.bf16.mxu1 %v10886_v30  ;;  %v10917_v28 = vld [vmem:[#allocation4 + $0xa8] ss:$16 sps:$4 sm:$0xff]   ;;  %v10925_v30 = vld [vmem:[#allocation4 + $0x8c] ss:$16 sps:$4 sm:$0xff]  }
 0x219   :  { %2964 = vmatpush2.bf16.msra.mxu0 %v10881_v29  ;;  %3005 = vmatpush2.bf16.msra.mxu1 %v10884_v31  ;;  %v10920_v29 = vld [vmem:[#allocation4 + $0x2a8] ss:$16 sps:$4 sm:$0xff]   ;;  %v10928_v31 = vld [vmem:[#allocation4 + $0x28c] ss:$16 sps:$4 sm:$0xff]  }
 0x21a   :  { %2965 = vmatprep.subr.bf16.mxu0 %v10889_v32  ;;  %3006 = vmatprep.subr.bf16.mxu1 %v10892_v34  ;;  %v10923_v32 = vld [vmem:[#allocation4 + $0x88] ss:$16 sps:$4 sm:$0xff]   ;;  %v10931_v34 = vld [vmem:[#allocation4 + $0x6c] ss:$16 sps:$4 sm:$0xff]  }
 0x21d   :  { %2966 = vmatpush2.bf16.msra.mxu0 %v10887_v33  ;;  %3007 = vmatpush2.bf16.msra.mxu1 %v10890_v36  ;;  %v10926_v33 = vld [vmem:[#allocation4 + $0x288] ss:$16 sps:$4 sm:$0xff]   ;;  %v10934_v36 = vld [vmem:[#allocation4 + $0x26c] ss:$16 sps:$4 sm:$0xff]  }
 0x21e   :  { %v1235_v49 = vpop.f32.mrf.mxu0  ;;  %2967 = vmatprep.subr.bf16.mxu0 %v10895_v61  ;;  %v1276_v56 = vpop.f32.mrf.mxu1  ;;  %3008 = vmatprep.subr.bf16.mxu1 %v10898_v43  ;;  %v10937_v61 = vld [vmem:[#allocation4 + $0x4c] ss:$16 sps:$4 sm:$0xff]  }
 0x21f   :  { %v1236_v55 = vadd.f32 %v1235_v49, %v458_v45  ;;  %v1277_v58 = vadd.f32 %v1276_v56, %v466_v47  ;;  %v10940_v43 = vld [vmem:[#allocation4 + $0x24c] ss:$16 sps:$4 sm:$0xff]   ;;  %v10935_v45 = vld [vmem:[#allocation4 + $0x48] ss:$16 sps:$4 sm:$0xff]  }
 0x220   :  { %v1237_v59 = vpop.f32.mrf.mxu0  ;;  %v1278_v63 = vpop.f32.mrf.mxu1  ;;  %v10943_v47 = vld [vmem:[#allocation4 + $0x2c] ss:$16 sps:$4 sm:$0xff]   ;;  %v10941_v49 = vld [vmem:[#allocation4 + $0x28] ss:$16 sps:$4 sm:$0xff]  }
 0x221   :  { %v1238_v62 = vadd.f32 %v1237_v59, %v462_v48  ;;  %2968 = vmatpush2.bf16.msra.mxu0 %v10893_v46  ;;  %v1287_v0 = vmax.f32 %v1236_v55, 0.0  ;;  %v1289_v1 = vmax.f32 %v1277_v58, 0.0  ;;  %v1279_v2 = vadd.f32 %v1278_v63, %v470_v51  ;;  %3009 = vmatpush2.bf16.msra.mxu1 %v10896_v50  ;;  %v10938_v46 = vld [vmem:[#allocation4 + $0x248] ss:$16 sps:$4 sm:$0xff]   ;;  %v10946_v48 = vld [vmem:[#allocation4 + $0x22c] ss:$16 sps:$4 sm:$0xff]  }
 0x222   :  { %v1239_v3 = vpop.f32.mrf.mxu0  ;;  %2969 = vmatprep.subr.bf16.mxu0 %v10901_v52  ;;  %v1280_v5 = vpop.f32.mrf.mxu1  ;;  %3010 = vmatprep.subr.bf16.mxu1 %v10904_v54  ;;  %v10944_v50 = vld [vmem:[#allocation4 + $0x228] ss:$16 sps:$4 sm:$0xff]   ;;  %v10949_v51 = vld [vmem:[#allocation4 + $0xc] ss:$16 sps:$4 sm:$0xff]  }
 0x223   :  { %v1288_v11 = vmax.f32 %v1238_v62, 0.0  ;;  %v1290_v8 = vmax.f32 %v1279_v2, 0.0  ;;  %v12522_v19 = vpack.c.bf16 %v1289_v1, %v1289_v1  ;;  %v12526_v23 = vpack.c.bf16 %v1287_v0, %v1287_v0  ;;  %v10952_v52 = vld [vmem:[#allocation4 + $0x20c] ss:$16 sps:$4 sm:$0xff]   ;;  %v10947_v54 = vld [vmem:[#allocation4 + $0x8] ss:$16 sps:$4 sm:$0xff]  }
 0x224   :  { %v1240_v17 = vpop.f32.mrf.mxu0  ;;  %v1281_v21 = vpop.f32.mrf.mxu1  ;;  %v10950_v55 = vld [vmem:[#allocation4 + $0x208] ss:$16 sps:$4 sm:$0xff]   ;;  %v10955_v56 = vld [vmem:[#allocation4 + $0x1ec] ss:$16 sps:$4 sm:$0xff]  }
 0x225   :  { %v12524_v20 = vpack.c.bf16 %v1288_v11, %v1288_v11  ;;  %2970 = vmatpush2.bf16.msra.mxu0 %v10899_v57  ;;  %v12528_v53 = vpack.c.bf16 %v1290_v8, %v1290_v8  ;;  %3011 = vmatpush2.bf16.msra.mxu1 %v10902_v60  ;;  %v10958_v57 = vld [vmem:[#allocation4 + $0x3ec] ss:$16 sps:$4 sm:$0xff]   ;;  %v10953_v58 = vld [vmem:[#allocation4 + $0x1e8] ss:$16 sps:$4 sm:$0xff]  }
 0x226   :  { %3021 = vmatprep.subr.bf16.mxu0 %v10907_v4  ;;  %3062 = vmatprep.subr.bf16.mxu1 %v10910_v7  ;;  %v10956_v59 = vld [vmem:[#allocation4 + $0x3e8] ss:$16 sps:$4 sm:$0xff]   ;;  %v10961_v60 = vld [vmem:[#allocation4 + $0x1cc] ss:$16 sps:$4 sm:$0xff]  }
 0x227   :  { %2971 = vmatprep.mubr.bf16.mxu0 %v12524_v20  ;;  %3012 = vmatprep.mubr.bf16.mxu1 %v12528_v53  ;;  %v10964_v62 = vld [vmem:[#allocation4 + $0x3cc] ss:$16 sps:$4 sm:$0xff]   ;;  %v10959_v63 = vld [vmem:[#allocation4 + $0x1c8] ss:$16 sps:$4 sm:$0xff]  }
 0x228   :  { %2972 = vmatmul.mubr.bf16.vlgmr.msra.gmra.mxu0 %v12526_v23  ;;  %3013 = vmatmul.mubr.bf16.vlgmr.msra.gmra.mxu1 %v12522_v19  ;;  %v10962_v0 = vld [vmem:[#allocation4 + $0x3c8] ss:$16 sps:$4 sm:$0xff]   ;;  %v10967_v1 = vld [vmem:[#allocation4 + $0x1ac] ss:$16 sps:$4 sm:$0xff]  }
 0x229   :  { %3022 = vmatpush1.bf16.msra.mxu0 %v10905_v6  ;;  %3063 = vmatpush1.bf16.msra.mxu1 %v10908_v18  ;;  %v10970_v2 = vld [vmem:[#allocation4 + $0x3ac] ss:$16 sps:$4 sm:$0xff]   ;;  %v10965_v3 = vld [vmem:[#allocation4 + $0x1a8] ss:$16 sps:$4 sm:$0xff]  }
 0x22a   :  { %3053 = vmatprep.mubr.bf16.mxu0 %v12496_v38  ;;  %3094 = vmatprep.mubr.bf16.mxu1 %v12500_v41  ;;  %v10929_v38 = vld [vmem:[#allocation4 + $0x68] ss:$16 sps:$4 sm:$0xff]   ;;  %v10973_v11 = vld [vmem:[#allocation4 + $0x18c] ss:$16 sps:$4 sm:$0xff]  }
 0x22b   :  { %3023 = vmatprep.subr.bf16.mxu0 %v10913_v22  ;;  %3064 = vmatprep.subr.bf16.mxu1 %v10916_v24  ;;  %v10932_v41 = vld [vmem:[#allocation4 + $0x268] ss:$16 sps:$4 sm:$0xff]   ;;  %v10976_v5 = vld [vmem:[#allocation4 + $0x38c] ss:$16 sps:$4 sm:$0xff]  }
 0x22c   :  { %v10968_v4 = vld [vmem:[#allocation4 + $0x3a8] ss:$16 sps:$4 sm:$0xff]   ;;  %v10979_v8 = vld [vmem:[#allocation4 + $0x16c] ss:$16 sps:$4 sm:$0xff]  }
 0x22d   :  { %3024 = vmatpush1.bf16.msra.mxu0 %v10911_v14  ;;  %3065 = vmatpush1.bf16.msra.mxu1 %v10914_v25  ;;  %v10971_v6 = vld [vmem:[#allocation4 + $0x188] ss:$16 sps:$4 sm:$0xff]   ;;  %v10982_v17 = vld [vmem:[#allocation4 + $0x36c] ss:$16 sps:$4 sm:$0xff]  }
 0x22e   :  { %3025 = vmatprep.subr.bf16.mxu0 %v10919_v26  ;;  %3066 = vmatprep.subr.bf16.mxu1 %v10922_v27  ;;  %v10974_v7 = vld [vmem:[#allocation4 + $0x388] ss:$16 sps:$4 sm:$0xff]   ;;  %v10985_v22 = vld [vmem:[#allocation4 + $0x14c] ss:$16 sps:$4 sm:$0xff]  }
 0x22f   :  { %v10977_v18 = vld [vmem:[#allocation4 + $0x168] ss:$16 sps:$4 sm:$0xff]   ;;  %v10988_v24 = vld [vmem:[#allocation4 + $0x34c] ss:$16 sps:$4 sm:$0xff]  }
 0x230   :  { %v10980_v21 = vld [vmem:[#allocation4 + $0x368] ss:$16 sps:$4 sm:$0xff]   ;;  %v10991_v26 = vld [vmem:[#allocation4 + $0x12c] ss:$16 sps:$4 sm:$0xff]  }
 0x231   :  { %3026 = vmatpush1.bf16.msra.mxu0 %v10917_v28  ;;  %3067 = vmatpush1.bf16.msra.mxu1 %v10920_v29  ;;  %v10983_v14 = vld [vmem:[#allocation4 + $0x148] ss:$16 sps:$4 sm:$0xff]   ;;  %v10994_v27 = vld [vmem:[#allocation4 + $0x32c] ss:$16 sps:$4 sm:$0xff]  }
 0x232   :  { %3027 = vmatprep.subr.bf16.mxu0 %v10925_v30  ;;  %3068 = vmatprep.subr.bf16.mxu1 %v10928_v31  ;;  %v10986_v25 = vld [vmem:[#allocation4 + $0x348] ss:$16 sps:$4 sm:$0xff]   ;;  %v10997_v30 = vld [vmem:[#allocation4 + $0x10c] ss:$16 sps:$4 sm:$0xff]  }
 0x233   :  { %v10989_v28 = vld [vmem:[#allocation4 + $0x128] ss:$16 sps:$4 sm:$0xff]   ;;  %v11000_v31 = vld [vmem:[#allocation4 + $0x30c] ss:$16 sps:$4 sm:$0xff]  }
 0x234   :  { %v10992_v29 = vld [vmem:[#allocation4 + $0x328] ss:$16 sps:$4 sm:$0xff]  }
 0x235   :  { %3028 = vmatpush1.bf16.msra.mxu0 %v10923_v32  ;;  %3069 = vmatpush1.bf16.msra.mxu1 %v10926_v33  ;;  %v10995_v32 = vld [vmem:[#allocation4 + $0x108] ss:$16 sps:$4 sm:$0xff]  }
 0x236   :  { %3029 = vmatprep.subr.bf16.mxu0 %v10931_v34  ;;  %3070 = vmatprep.subr.bf16.mxu1 %v10934_v36  ;;  %v10998_v33 = vld [vmem:[#allocation4 + $0x308] ss:$16 sps:$4 sm:$0xff]   ;;  %v11003_v34 = vld [vmem:[#allocation4 + $0x4ec] ss:$16 sps:$4 sm:$0xff]  }
 0x237   :  { %v11006_v36 = vld [vmem:[#allocation4 + $0x6ec] ss:$16 sps:$4 sm:$0xff]  }
 0x239   :  { %3030 = vmatpush1.bf16.msra.mxu0 %v10929_v38  ;;  %3071 = vmatpush1.bf16.msra.mxu1 %v10932_v41  ;;  %v11001_v38 = vld [vmem:[#allocation4 + $0x4e8] ss:$16 sps:$4 sm:$0xff]  }
 0x23a   :  { %3031 = vmatprep.subr.bf16.mxu0 %v10937_v61  ;;  %3072 = vmatprep.subr.bf16.mxu1 %v10940_v43  ;;  %v11004_v41 = vld [vmem:[#allocation4 + $0x6e8] ss:$16 sps:$4 sm:$0xff]   ;;  %v11009_v61 = vld [vmem:[#allocation4 + $0x4cc] ss:$16 sps:$4 sm:$0xff]  }
 0x23b   :  { %v11012_v43 = vld [vmem:[#allocation4 + $0x6cc] ss:$16 sps:$4 sm:$0xff]  }
 0x23d   :  { %3032 = vmatpush1.bf16.msra.mxu0 %v10935_v45  ;;  %3073 = vmatpush1.bf16.msra.mxu1 %v10938_v46  ;;  %v11007_v45 = vld [vmem:[#allocation4 + $0x4c8] ss:$16 sps:$4 sm:$0xff]  }
 0x23e   :  { %3033 = vmatprep.subr.bf16.mxu0 %v10943_v47  ;;  %3074 = vmatprep.subr.bf16.mxu1 %v10946_v48  ;;  %v11010_v46 = vld [vmem:[#allocation4 + $0x6c8] ss:$16 sps:$4 sm:$0xff]   ;;  %v11015_v47 = vld [vmem:[#allocation4 + $0x4ac] ss:$16 sps:$4 sm:$0xff]  }
 0x23f   :  { %v11018_v48 = vld [vmem:[#allocation4 + $0x6ac] ss:$16 sps:$4 sm:$0xff]  }
 0x241   :  { %3034 = vmatpush1.bf16.msra.mxu0 %v10941_v49  ;;  %3075 = vmatpush1.bf16.msra.mxu1 %v10944_v50  ;;  %v11013_v49 = vld [vmem:[#allocation4 + $0x4a8] ss:$16 sps:$4 sm:$0xff]  }
 0x242   :  { %3035 = vmatprep.subr.bf16.mxu0 %v10949_v51  ;;  %3076 = vmatprep.subr.bf16.mxu1 %v10952_v52  ;;  %v11016_v50 = vld [vmem:[#allocation4 + $0x6a8] ss:$16 sps:$4 sm:$0xff]   ;;  %v11021_v51 = vld [vmem:[#allocation4 + $0x48c] ss:$16 sps:$4 sm:$0xff]  }
 0x243   :  { %v11019_v52 = vld [vmem:[#allocation4 + $0x488] ss:$16 sps:$4 sm:$0xff]  }
 0x245   :  { %3036 = vmatpush1.bf16.msra.mxu0 %v10947_v54  ;;  %3077 = vmatpush1.bf16.msra.mxu1 %v10950_v55  ;;  %v11027_v54 = vld [vmem:[#allocation4 + $0x46c] ss:$16 sps:$4 sm:$0xff]  }
 0x246   :  { %3037 = vmatprep.subr.bf16.mxu0 %v10955_v56  ;;  %3078 = vmatprep.subr.bf16.mxu1 %v10958_v57  ;;  %v11030_v55 = vld [vmem:[#allocation4 + $0x66c] ss:$16 sps:$4 sm:$0xff]  }
 0x247   :  { %v11033_v56 = vld [vmem:[#allocation4 + $0x44c] ss:$16 sps:$4 sm:$0xff]  }
 0x248   :  { %v11036_v57 = vld [vmem:[#allocation4 + $0x64c] ss:$16 sps:$4 sm:$0xff]  }
 0x249   :  { %3038 = vmatpush2.bf16.msra.mxu0 %v10953_v58  ;;  %3079 = vmatpush2.bf16.msra.mxu1 %v10956_v59  ;;  %v11031_v58 = vld [vmem:[#allocation4 + $0x448] ss:$16 sps:$4 sm:$0xff]  }
 0x24a   :  { %3039 = vmatprep.subr.bf16.mxu0 %v10961_v60  ;;  %3080 = vmatprep.subr.bf16.mxu1 %v10964_v62  ;;  %v11034_v59 = vld [vmem:[#allocation4 + $0x648] ss:$16 sps:$4 sm:$0xff]   ;;  %v11039_v60 = vld [vmem:[#allocation4 + $0x42c] ss:$16 sps:$4 sm:$0xff]  }
 0x24b   :  { %v11042_v62 = vld [vmem:[#allocation4 + $0x62c] ss:$16 sps:$4 sm:$0xff]  }
 0x24d   :  { %3040 = vmatpush2.bf16.msra.mxu0 %v10959_v63  ;;  %3081 = vmatpush2.bf16.msra.mxu1 %v10962_v0  ;;  %v11037_v63 = vld [vmem:[#allocation4 + $0x428] ss:$16 sps:$4 sm:$0xff]  }
 0x24e   :  { %3041 = vmatprep.subr.bf16.mxu0 %v10967_v1  ;;  %3082 = vmatprep.subr.bf16.mxu1 %v10970_v2  ;;  %v11040_v0 = vld [vmem:[#allocation4 + $0x628] ss:$16 sps:$4 sm:$0xff]   ;;  %v11045_v1 = vld [vmem:[#allocation4 + $0x40c] ss:$16 sps:$4 sm:$0xff]  }
 0x24f   :  { %v11048_v2 = vld [vmem:[#allocation4 + $0x60c] ss:$16 sps:$4 sm:$0xff]  }
 0x251   :  { %3042 = vmatpush2.bf16.msra.mxu0 %v10965_v3  ;;  %3083 = vmatpush2.bf16.msra.mxu1 %v10968_v4  ;;  %v11043_v3 = vld [vmem:[#allocation4 + $0x408] ss:$16 sps:$4 sm:$0xff]  }
 0x252   :  { %3043 = vmatprep.subr.bf16.mxu0 %v10973_v11  ;;  %3084 = vmatprep.subr.bf16.mxu1 %v10976_v5  ;;  %v11046_v4 = vld [vmem:[#allocation4 + $0x608] ss:$16 sps:$4 sm:$0xff]   ;;  %v11051_v11 = vld [vmem:[#allocation4 + $0x5ec] ss:$16 sps:$4 sm:$0xff]  }
 0x253   :  { %v11054_v5 = vld [vmem:[#allocation4 + $0x7ec] ss:$16 sps:$4 sm:$0xff]  }
 0x255   :  { %3044 = vmatpush2.bf16.msra.mxu0 %v10971_v6  ;;  %3085 = vmatpush2.bf16.msra.mxu1 %v10974_v7  ;;  %v11049_v6 = vld [vmem:[#allocation4 + $0x5e8] ss:$16 sps:$4 sm:$0xff]  }
 0x256   :  { %3045 = vmatprep.subr.bf16.mxu0 %v10979_v8  ;;  %3086 = vmatprep.subr.bf16.mxu1 %v10982_v17  ;;  %v11052_v7 = vld [vmem:[#allocation4 + $0x7e8] ss:$16 sps:$4 sm:$0xff]   ;;  %v11057_v8 = vld [vmem:[#allocation4 + $0x5cc] ss:$16 sps:$4 sm:$0xff]  }
 0x257   :  { %v11060_v17 = vld [vmem:[#allocation4 + $0x7cc] ss:$16 sps:$4 sm:$0xff]  }
 0x259   :  { %3046 = vmatpush2.bf16.msra.mxu0 %v10977_v18  ;;  %3087 = vmatpush2.bf16.msra.mxu1 %v10980_v21  ;;  %v11055_v18 = vld [vmem:[#allocation4 + $0x5c8] ss:$16 sps:$4 sm:$0xff]  }
 0x25a   :  { %3047 = vmatprep.subr.bf16.mxu0 %v10985_v22  ;;  %3088 = vmatprep.subr.bf16.mxu1 %v10988_v24  ;;  %v11058_v21 = vld [vmem:[#allocation4 + $0x7c8] ss:$16 sps:$4 sm:$0xff]   ;;  %v11063_v22 = vld [vmem:[#allocation4 + $0x5ac] ss:$16 sps:$4 sm:$0xff]  }
 0x25b   :  { %v11066_v24 = vld [vmem:[#allocation4 + $0x7ac] ss:$16 sps:$4 sm:$0xff]  }
 0x25d   :  { %3048 = vmatpush2.bf16.msra.mxu0 %v10983_v14  ;;  %3089 = vmatpush2.bf16.msra.mxu1 %v10986_v25  ;;  %v11061_v14 = vld [vmem:[#allocation4 + $0x5a8] ss:$16 sps:$4 sm:$0xff]  }
 0x25e   :  { %3049 = vmatprep.subr.bf16.mxu0 %v10991_v26  ;;  %3090 = vmatprep.subr.bf16.mxu1 %v10994_v27  ;;  %v11064_v25 = vld [vmem:[#allocation4 + $0x7a8] ss:$16 sps:$4 sm:$0xff]   ;;  %v11069_v26 = vld [vmem:[#allocation4 + $0x58c] ss:$16 sps:$4 sm:$0xff]  }
 0x25f   :  { %v11072_v27 = vld [vmem:[#allocation4 + $0x78c] ss:$16 sps:$4 sm:$0xff]  }
 0x261   :  { %3050 = vmatpush2.bf16.msra.mxu0 %v10989_v28  ;;  %3091 = vmatpush2.bf16.msra.mxu1 %v10992_v29  ;;  %v11067_v28 = vld [vmem:[#allocation4 + $0x588] ss:$16 sps:$4 sm:$0xff]  }
 0x262   :  { %3051 = vmatprep.subr.bf16.mxu0 %v10997_v30  ;;  %3092 = vmatprep.subr.bf16.mxu1 %v11000_v31  ;;  %v11070_v29 = vld [vmem:[#allocation4 + $0x788] ss:$16 sps:$4 sm:$0xff]   ;;  %v11075_v30 = vld [vmem:[#allocation4 + $0x56c] ss:$16 sps:$4 sm:$0xff]  }
 0x263   :  { %v11078_v31 = vld [vmem:[#allocation4 + $0x76c] ss:$16 sps:$4 sm:$0xff]  }
 0x265   :  { %3052 = vmatpush2.bf16.msra.mxu0 %v10995_v32  ;;  %3093 = vmatpush2.bf16.msra.mxu1 %v10998_v33  ;;  %v11073_v32 = vld [vmem:[#allocation4 + $0x568] ss:$16 sps:$4 sm:$0xff]  }
 0x266   :  { %3103 = vmatprep.subr.bf16.mxu0 %v11003_v34  ;;  %3144 = vmatprep.subr.bf16.mxu1 %v11006_v36  ;;  %v11076_v33 = vld [vmem:[#allocation4 + $0x768] ss:$16 sps:$4 sm:$0xff]   ;;  %v11081_v34 = vld [vmem:[#allocation4 + $0x54c] ss:$16 sps:$4 sm:$0xff]  }
 0x267   :  { %v11084_v36 = vld [vmem:[#allocation4 + $0x74c] ss:$16 sps:$4 sm:$0xff]  }
 0x268   :  { %3054 = vmatmul.mubr.bf16.vlgmr.msra.gmra.mxu0 %v12498_v40  ;;  %3095 = vmatmul.mubr.bf16.vlgmr.msra.gmra.mxu1 %v12494_v37  ;;  %v11024_v40 = vld [vmem:[#allocation4 + $0x68c] ss:$16 sps:$4 sm:$0xff]   ;;  %v11022_v37 = vld [vmem:[#allocation4 + $0x688] ss:$16 sps:$4 sm:$0xff]  }
 0x269   :  { %3104 = vmatpush1.bf16.msra.mxu0 %v11001_v38  ;;  %3135 = vmatprep.mubr.bf16.mxu0 %v12524_v20  ;;  %v11025_v20 = vld [vmem:[#allocation4 + $0x468] ss:$16 sps:$4 sm:$0xff]  }
 0x26a   :  { %3145 = vmatpush1.bf16.msra.mxu1 %v11004_v41  ;;  %3176 = vmatprep.mubr.bf16.mxu1 %v12528_v53  ;;  %v11028_v53 = vld [vmem:[#allocation4 + $0x668] ss:$16 sps:$4 sm:$0xff]  }
 0x26b   :  { %3105 = vmatprep.subr.bf16.mxu0 %v11009_v61  ;;  %3146 = vmatprep.subr.bf16.mxu1 %v11012_v43  ;;  %v11079_v38 = vld [vmem:[#allocation4 + $0x548] ss:$16 sps:$4 sm:$0xff]   ;;  %v11087_v61 = vld [vmem:[#allocation4 + $0x52c] ss:$16 sps:$4 sm:$0xff]  }
 0x26c   :  { %v11082_v41 = vld [vmem:[#allocation4 + $0x748] ss:$16 sps:$4 sm:$0xff]   ;;  %v11090_v43 = vld [vmem:[#allocation4 + $0x72c] ss:$16 sps:$4 sm:$0xff]  }
 0x26d   :  { %3106 = vmatpush1.bf16.msra.mxu0 %v11007_v45  ;;  %v11085_v45 = vld [vmem:[#allocation4 + $0x528] ss:$16 sps:$4 sm:$0xff]  }
 0x26e   :  { %3147 = vmatpush1.bf16.msra.mxu1 %v11010_v46  ;;  %3107 = vmatprep.subr.bf16.mxu0 %v11015_v47  ;;  %v11088_v46 = vld [vmem:[#allocation4 + $0x728] ss:$16 sps:$4 sm:$0xff]   ;;  %v11093_v47 = vld [vmem:[#allocation4 + $0x50c] ss:$16 sps:$4 sm:$0xff]  }
 0x26f   :  { %3148 = vmatprep.subr.bf16.mxu1 %v11018_v48  ;;  %v11096_v48 = vld [vmem:[#allocation4 + $0x70c] ss:$16 sps:$4 sm:$0xff]  }
 0x271   :  { %3108 = vmatpush1.bf16.msra.mxu0 %v11013_v49  ;;  %v11091_v49 = vld [vmem:[#allocation4 + $0x508] ss:$16 sps:$4 sm:$0xff]  }
 0x272   :  { %3149 = vmatpush1.bf16.msra.mxu1 %v11016_v50  ;;  %3109 = vmatprep.subr.bf16.mxu0 %v11021_v51  ;;  %v11094_v50 = vld [vmem:[#allocation4 + $0x708] ss:$16 sps:$4 sm:$0xff]   ;;  %v11099_v51 = vld [vmem:[#allocation6 + $0x74] ss:$8 sps:$4 sm:$0xff]  }
 0x273   :  { %3150 = vmatprep.subr.bf16.mxu1 %v11024_v40  ;;  %v11097_v40 = vld [vmem:[#allocation6 + $0x70] ss:$8 sps:$4 sm:$0xff]  }
 0x275   :  { %3110 = vmatpush1.bf16.msra.mxu0 %v11019_v52  ;;  %v11102_v52 = vld [vmem:[#allocation6 + $0x64] ss:$8 sps:$4 sm:$0xff]  }
 0x276   :  { %3151 = vmatpush1.bf16.msra.mxu1 %v11022_v37  ;;  %3111 = vmatprep.subr.bf16.mxu0 %v11027_v54 }
 0x277   :  { %3152 = vmatprep.subr.bf16.mxu1 %v11030_v55  ;;  %v11100_v55 = vld [vmem:[#allocation6 + $0x60] ss:$8 sps:$4 sm:$0xff]  }
 0x279   :  { %3112 = vmatpush1.bf16.msra.mxu0 %v11025_v20 }
 0x27a   :  { %3153 = vmatpush1.bf16.msra.mxu1 %v11028_v53  ;;  %3113 = vmatprep.subr.bf16.mxu0 %v11033_v56  ;;  %v11105_v53 = vld [vmem:[#allocation6 + $0x54] ss:$8 sps:$4 sm:$0xff]  }
 0x27b   :  { %3154 = vmatprep.subr.bf16.mxu1 %v11036_v57 }
 0x27d   :  { %3114 = vmatpush1.bf16.msra.mxu0 %v11031_v58 }
 0x27e   :  { %3155 = vmatpush1.bf16.msra.mxu1 %v11034_v59  ;;  %3115 = vmatprep.subr.bf16.mxu0 %v11039_v60  ;;  %v11103_v59 = vld [vmem:[#allocation6 + $0x50] ss:$8 sps:$4 sm:$0xff]  }
 0x27f   :  { %3156 = vmatprep.subr.bf16.mxu1 %v11042_v62 }
 0x281   :  { %3116 = vmatpush1.bf16.msra.mxu0 %v11037_v63  ;;  %v11145_v63 = vld [vmem:[#allocation6 + $0x170] ss:$8 sps:$4 sm:$0xff]  }
 0x282   :  { %3157 = vmatpush1.bf16.msra.mxu1 %v11040_v0  ;;  %3117 = vmatprep.subr.bf16.mxu0 %v11045_v1  ;;  %v11150_v0 = vld [vmem:[#allocation6 + $0x164] ss:$8 sps:$4 sm:$0xff]   ;;  %v11106_v1 = vld [vmem:[#allocation6 + $0x40] ss:$8 sps:$4 sm:$0xff]  }
 0x283   :  { %3158 = vmatprep.subr.bf16.mxu1 %v11048_v2  ;;  %v11111_v2 = vld [vmem:[#allocation6 + $0x34] ss:$8 sps:$4 sm:$0xff]  }
 0x285   :  { %3118 = vmatpush1.bf16.msra.mxu0 %v11043_v3  ;;  %v11148_v3 = vld [vmem:[#allocation6 + $0x160] ss:$8 sps:$4 sm:$0xff]  }
 0x286   :  { %3159 = vmatpush1.bf16.msra.mxu1 %v11046_v4  ;;  %3119 = vmatprep.subr.bf16.mxu0 %v11051_v11  ;;  %v11153_v4 = vld [vmem:[#allocation6 + $0x154] ss:$8 sps:$4 sm:$0xff]   ;;  %v11109_v11 = vld [vmem:[#allocation6 + $0x30] ss:$8 sps:$4 sm:$0xff]  }
 0x287   :  { %3160 = vmatprep.subr.bf16.mxu1 %v11054_v5  ;;  %v11114_v5 = vld [vmem:[#allocation6 + $0x24] ss:$8 sps:$4 sm:$0xff]  }
 0x289   :  { %3120 = vmatpush2.bf16.msra.mxu0 %v11049_v6  ;;  %v11151_v6 = vld [vmem:[#allocation6 + $0x150] ss:$8 sps:$4 sm:$0xff]  }
 0x28a   :  { %3161 = vmatpush2.bf16.msra.mxu1 %v11052_v7  ;;  %3121 = vmatprep.subr.bf16.mxu0 %v11057_v8  ;;  %v11156_v7 = vld [vmem:[#allocation6 + $0x144] ss:$8 sps:$4 sm:$0xff]   ;;  %v11112_v8 = vld [vmem:[#allocation6 + $0x20] ss:$8 sps:$4 sm:$0xff]  }
 0x28b   :  { %3162 = vmatprep.subr.bf16.mxu1 %v11060_v17  ;;  %v11117_v17 = vld [vmem:[#allocation6 + $0x14] ss:$8 sps:$4 sm:$0xff]  }
 0x28d   :  { %3122 = vmatpush2.bf16.msra.mxu0 %v11055_v18  ;;  %v11154_v18 = vld [vmem:[#allocation6 + $0x140] ss:$8 sps:$4 sm:$0xff]  }
 0x28e   :  { %3163 = vmatpush2.bf16.msra.mxu1 %v11058_v21  ;;  %3123 = vmatprep.subr.bf16.mxu0 %v11063_v22  ;;  %v11159_v21 = vld [vmem:[#allocation6 + $0x134] ss:$8 sps:$4 sm:$0xff]   ;;  %v11115_v22 = vld [vmem:[#allocation6 + $0x10] ss:$8 sps:$4 sm:$0xff]  }
 0x28f   :  { %3164 = vmatprep.subr.bf16.mxu1 %v11066_v24  ;;  %v11120_v24 = vld [vmem:[#allocation6 + $0x4] ss:$8 sps:$4 sm:$0xff]  }
 0x291   :  { %3124 = vmatpush2.bf16.msra.mxu0 %v11061_v14  ;;  %v11157_v14 = vld [vmem:[#allocation6 + $0x130] ss:$8 sps:$4 sm:$0xff]  }
 0x292   :  { %3165 = vmatpush2.bf16.msra.mxu1 %v11064_v25  ;;  %3125 = vmatprep.subr.bf16.mxu0 %v11069_v26  ;;  %v11162_v25 = vld [vmem:[#allocation6 + $0x124] ss:$8 sps:$4 sm:$0xff]   ;;  %v11118_v26 = vld [vmem:[#allocation6] ss:$8 sps:$4 sm:$0xff]  }
 0x293   :  { %3166 = vmatprep.subr.bf16.mxu1 %v11072_v27  ;;  %v11123_v27 = vld [vmem:[#allocation6 + $0xf4] ss:$8 sps:$4 sm:$0xff]  }
 0x295   :  { %3126 = vmatpush2.bf16.msra.mxu0 %v11067_v28  ;;  %v11160_v28 = vld [vmem:[#allocation6 + $0x120] ss:$8 sps:$4 sm:$0xff]  }
 0x296   :  { %3167 = vmatpush2.bf16.msra.mxu1 %v11070_v29  ;;  %3127 = vmatprep.subr.bf16.mxu0 %v11075_v30  ;;  %v11165_v29 = vld [vmem:[#allocation6 + $0x114] ss:$8 sps:$4 sm:$0xff]   ;;  %v11121_v30 = vld [vmem:[#allocation6 + $0xf0] ss:$8 sps:$4 sm:$0xff]  }
 0x297   :  { %3168 = vmatprep.subr.bf16.mxu1 %v11078_v31  ;;  %v11126_v31 = vld [vmem:[#allocation6 + $0xe4] ss:$8 sps:$4 sm:$0xff]  }
 0x299   :  { %3128 = vmatpush2.bf16.msra.mxu0 %v11073_v32  ;;  %v11163_v32 = vld [vmem:[#allocation6 + $0x110] ss:$8 sps:$4 sm:$0xff]  }
 0x29a   :  { %3169 = vmatpush2.bf16.msra.mxu1 %v11076_v33  ;;  %3129 = vmatprep.subr.bf16.mxu0 %v11081_v34  ;;  %v11168_v33 = vld [vmem:[#allocation6 + $0x104] ss:$8 sps:$4 sm:$0xff]   ;;  %v11124_v34 = vld [vmem:[#allocation6 + $0xe0] ss:$8 sps:$4 sm:$0xff]  }
 0x29b   :  { %3170 = vmatprep.subr.bf16.mxu1 %v11084_v36  ;;  %v11129_v36 = vld [vmem:[#allocation6 + $0xd4] ss:$8 sps:$4 sm:$0xff]  }
 0x29d   :  { %3130 = vmatpush2.bf16.msra.mxu0 %v11079_v38  ;;  %v11166_v38 = vld [vmem:[#allocation6 + $0x100] ss:$8 sps:$4 sm:$0xff]  }
 0x29e   :  { %3171 = vmatpush2.bf16.msra.mxu1 %v11082_v41  ;;  %3131 = vmatprep.subr.bf16.mxu0 %v11087_v61  ;;  %v11171_v41 = vld [vmem:[#allocation6 + $0x1f4] ss:$8 sps:$4 sm:$0xff]   ;;  %v11127_v61 = vld [vmem:[#allocation6 + $0xd0] ss:$8 sps:$4 sm:$0xff]  }
 0x29f   :  { %3172 = vmatprep.subr.bf16.mxu1 %v11090_v43  ;;  %v11132_v43 = vld [vmem:[#allocation6 + $0xc4] ss:$8 sps:$4 sm:$0xff]  }
 0x2a1   :  { %3132 = vmatpush2.bf16.msra.mxu0 %v11085_v45  ;;  %v11169_v45 = vld [vmem:[#allocation6 + $0x1f0] ss:$8 sps:$4 sm:$0xff]  }
 0x2a2   :  { %3173 = vmatpush2.bf16.msra.mxu1 %v11088_v46  ;;  %3133 = vmatprep.subr.bf16.mxu0 %v11093_v47  ;;  %v11174_v46 = vld [vmem:[#allocation6 + $0x1e4] ss:$8 sps:$4 sm:$0xff]   ;;  %v11130_v47 = vld [vmem:[#allocation6 + $0xc0] ss:$8 sps:$4 sm:$0xff]  }
 0x2a3   :  { %3174 = vmatprep.subr.bf16.mxu1 %v11096_v48  ;;  %v11135_v48 = vld [vmem:[#allocation6 + $0xb4] ss:$8 sps:$4 sm:$0xff]  }
 0x2a5   :  { %3134 = vmatpush2.bf16.msra.mxu0 %v11091_v49  ;;  %v11172_v49 = vld [vmem:[#allocation6 + $0x1e0] ss:$8 sps:$4 sm:$0xff]  }
 0x2a6   :  { %3175 = vmatpush2.bf16.msra.mxu1 %v11094_v50  ;;  %3589 = vmatprep.subr.bf16.mxu0 %v11099_v51  ;;  %v11177_v50 = vld [vmem:[#allocation6 + $0x1d4] ss:$8 sps:$4 sm:$0xff]   ;;  %v11133_v51 = vld [vmem:[#allocation6 + $0xb0] ss:$8 sps:$4 sm:$0xff]  }
 0x2a8   :  { %3136 = vmatmul.mubr.bf16.vlgmr.msra.gmra.mxu0 %v12526_v23  ;;  %v12541_v37 = vpop.f32.mrf.mxu0  ;;  %v12544_v54 = vpop.f32.mrf.mxu1  ;;  %v11108_v23 = vld [vmem:[#allocation6 + $0x44] ss:$8 sps:$4 sm:$0xff]  }
 0x2a9   :  { %3177 = vmatmul.mubr.bf16.vlgmr.msra.gmra.mxu1 %v12522_v19  ;;  %3590 = vmatpush1.bf16.msra.mxu0 %v11097_v40  ;;  %v11147_v19 = vld [vmem:[#allocation6 + $0x174] ss:$8 sps:$4 sm:$0xff]   ;;  %v11138_v40 = vld [vmem:[#allocation6 + $0xa4] ss:$8 sps:$4 sm:$0xff]  }
 0x2aa   :  { %v12546_v20 = vpop.f32.mrf.mxu0  ;;  %3591 = vmatprep.subr.bf16.mxu0 %v11102_v52  ;;  %v12548_v56 = vpop.f32.mrf.mxu1  ;;  %3630 = vmatprep.subr.bf16.mxu1 %v11147_v19  ;;  %v11175_v52 = vld [vmem:[#allocation6 + $0x1d0] ss:$8 sps:$4 sm:$0xff]  }
 0x2ab   :  { %3631 = vmatpush1.bf16.msra.mxu1 %v11145_v63  ;;  %v11181_v63 = vld [vmem:[#allocation6 + $0x1b0] ss:$8 sps:$4 sm:$0xff]  }
 0x2ac   :  { %v2895_v57 = vpop.f32.mrf.mxu0  ;;  %v2936_v58 = vpop.f32.mrf.mxu1  ;;  %3632 = vmatprep.subr.bf16.mxu1 %v11150_v0 }
 0x2ad   :  { %3592 = vmatpush1.bf16.msra.mxu0 %v11100_v55  ;;  %v11180_v55 = vld [vmem:[#allocation6 + $0x1c4] ss:$8 sps:$4 sm:$0xff]   ;;  %v11141_v57 = vld [vmem:[#allocation6 + $0x94] ss:$8 sps:$4 sm:$0xff]   ;;  %v11178_v58 = vld [vmem:[#allocation6 + $0x1c0] ss:$8 sps:$4 sm:$0xff]  }
 0x2ae   :  { %v2896_v60 = vpop.f32.mrf.mxu0  ;;  %3593 = vmatprep.subr.bf16.mxu0 %v11105_v53  ;;  %v2937_v62 = vpop.f32.mrf.mxu1  ;;  %v11136_v53 = vld [vmem:[#allocation6 + $0xa0] ss:$8 sps:$4 sm:$0xff]  }
 0x2af   :  { %3633 = vmatpush1.bf16.msra.mxu1 %v11148_v3  ;;  %v12553_v60 = vld [vmem:[%s12832_s7] sm:$0xf]  ;;  %v11144_v62 = vld [vmem:[#allocation6 + $0x84] ss:$8 sps:$4 sm:$0xff]  }
 0x2b0   :  { %3634 = vmatprep.subr.bf16.mxu1 %v11153_v4  ;;  %v1560_v19 = vrot.slane %v12553_v60, %v12475_v12  ;;  %v1564_v0 = vrot.slane %v12553_v60, %v12481_v15 }
 0x2b1   :  { %3594 = vmatpush1.bf16.msra.mxu0 %v11103_v59  ;;  %v11183_v59 = vld [vmem:[#allocation6 + $0x1b4] ss:$8 sps:$4 sm:$0xff]  }
 0x2b2   :  { %3595 = vmatprep.subr.bf16.mxu0 %v11108_v23  ;;  %v11139_v23 = vld [vmem:[#allocation6 + $0x90] ss:$8 sps:$4 sm:$0xff]   ;;  %v2894_v3 = vadd.f32 %v12546_v20, %v1564_v0 }
 0x2b3   :  { %3635 = vmatpush1.bf16.msra.mxu1 %v11151_v6 }
 0x2b4   :  { %3636 = vmatprep.subr.bf16.mxu1 %v11156_v7  ;;  %v2935_v6 = vadd.f32 %v12548_v56, %v2894_v3  ;;  %v11192_v56 = vld [vmem:[#allocation6 + $0x184] ss:$8 sps:$4 sm:$0xff]  }
 0x2b5   :  { %3596 = vmatpush1.bf16.msra.mxu0 %v11106_v1  ;;  %v11142_v1 = vld [vmem:[#allocation6 + $0x80] ss:$8 sps:$4 sm:$0xff]  }
 0x2b6   :  { %3597 = vmatprep.subr.bf16.mxu0 %v11111_v2  ;;  %v2892_v2 = vadd.f32 %v12541_v37, %v1560_v19  ;;  %v11189_v37 = vld [vmem:[#allocation6 + $0x194] ss:$8 sps:$4 sm:$0xff]  }
 0x2b7   :  { %3637 = vmatpush1.bf16.msra.mxu1 %v11154_v18 }
 0x2b8   :  { %3638 = vmatprep.subr.bf16.mxu1 %v11159_v21  ;;  %v2933_v4 = vadd.f32 %v12544_v54, %v2892_v2 }
 0x2b9   :  { %3598 = vmatpush1.bf16.msra.mxu0 %v11109_v11 }
 0x2ba   :  { %3599 = vmatprep.subr.bf16.mxu0 %v11114_v5  ;;  %v11186_v5 = vld [vmem:[#allocation6 + $0x1a4] ss:$8 sps:$4 sm:$0xff]  }
 0x2bb   :  { %3639 = vmatpush1.bf16.msra.mxu1 %v11157_v14 }
 0x2bc   :  { %3640 = vmatprep.subr.bf16.mxu1 %v11162_v25 }
 0x2bd   :  { %3600 = vmatpush1.bf16.msra.mxu0 %v11112_v8 }
 0x2be   :  { %3601 = vmatprep.subr.bf16.mxu0 %v11117_v17  ;;  %v11184_v17 = vld [vmem:[#allocation6 + $0x1a0] ss:$8 sps:$4 sm:$0xff]  }
 0x2bf   :  { %3641 = vmatpush1.bf16.msra.mxu1 %v11160_v28 }
 0x2c0   :  { %3642 = vmatprep.subr.bf16.mxu1 %v11165_v29 }
 0x2c1   :  { %3602 = vmatpush1.bf16.msra.mxu0 %v11115_v22 }
 0x2c2   :  { %3603 = vmatprep.subr.bf16.mxu0 %v11120_v24 }
 0x2c3   :  { %3643 = vmatpush1.bf16.msra.mxu1 %v11163_v32 }
 0x2c4   :  { %3644 = vmatprep.subr.bf16.mxu1 %v11168_v33 }
 0x2c5   :  { %3604 = vmatpush1.bf16.msra.mxu0 %v11118_v26  ;;  %v11187_v26 = vld [vmem:[#allocation6 + $0x190] ss:$8 sps:$4 sm:$0xff]  }
 0x2c6   :  { %3605 = vmatprep.subr.bf16.mxu0 %v11123_v27 }
 0x2c7   :  { %3645 = vmatpush1.bf16.msra.mxu1 %v11166_v38 }
 0x2c8   :  { %3646 = vmatprep.subr.bf16.mxu1 %v11171_v41 }
 0x2c9   :  { %3606 = vmatpush2.bf16.msra.mxu0 %v11121_v30 }
 0x2ca   :  { %3607 = vmatprep.subr.bf16.mxu0 %v11126_v31  ;;  %v11190_v31 = vld [vmem:[#allocation6 + $0x180] ss:$8 sps:$4 sm:$0xff]  }
 0x2cb   :  { %3647 = vmatpush2.bf16.msra.mxu1 %v11169_v45 }
 0x2cc   :  { %3648 = vmatprep.subr.bf16.mxu1 %v11174_v46  ;;  %v11193_v46 = vld [vmem:[%s12833_s12 + $0x78] sm:$0xff]  }
 0x2cd   :  { %3608 = vmatpush2.bf16.msra.mxu0 %v11124_v34 }
 0x2ce   :  { %3609 = vmatprep.subr.bf16.mxu0 %v11129_v36 }
 0x2cf   :  { %3649 = vmatpush2.bf16.msra.mxu1 %v11172_v49  ;;  %v11196_v49 = vld [vmem:[%s12833_s12 + $0x30] sm:$0xff]  }
 0x2d0   :  { %3650 = vmatprep.subr.bf16.mxu1 %v11177_v50  ;;  %v11197_v50 = vld [vmem:[%s12833_s12 + $0x68] sm:$0xff]  }
 0x2d1   :  { %3610 = vmatpush2.bf16.msra.mxu0 %v11127_v61 }
 0x2d2   :  { %3611 = vmatprep.subr.bf16.mxu0 %v11132_v43 }
 0x2d3   :  { %3651 = vmatpush2.bf16.msra.mxu1 %v11175_v52  ;;  %v11200_v52 = vld [vmem:[%s12833_s12 + $0x20] sm:$0xff]  }
 0x2d4   :  { %3652 = vmatprep.subr.bf16.mxu1 %v11180_v55  ;;  %v11201_v55 = vld [vmem:[%s12833_s12 + $0x58] sm:$0xff]  }
 0x2d5   :  { %3612 = vmatpush2.bf16.msra.mxu0 %v11130_v47  ;;  %v11194_v47 = vld [vmem:[%s12833_s12 + $0x38] sm:$0xff]  }
 0x2d6   :  { %3613 = vmatprep.subr.bf16.mxu0 %v11135_v48  ;;  %v11195_v48 = vld [vmem:[%s12833_s12 + $0x70] sm:$0xff]  }
 0x2d7   :  { %3653 = vmatpush2.bf16.msra.mxu1 %v11178_v58  ;;  %v11204_v58 = vld [vmem:[%s12833_s12 + $0x10] sm:$0xff]  }
 0x2d8   :  { %3654 = vmatprep.subr.bf16.mxu1 %v11183_v59  ;;  %v1568_v59 = vrot.slane %v12553_v60, %v12478_v13 }
 0x2d9   :  { %3614 = vmatpush2.bf16.msra.mxu0 %v11133_v51  ;;  %v11198_v51 = vld [vmem:[%s12833_s12 + $0x28] sm:$0xff]  }
 0x2da   :  { %3615 = vmatprep.subr.bf16.mxu0 %v11138_v40  ;;  %v11199_v40 = vld [vmem:[%s12833_s12 + $0x60] sm:$0xff]  }
 0x2db   :  { %3655 = vmatpush2.bf16.msra.mxu1 %v11181_v63 }
 0x2dc   :  { %3656 = vmatprep.subr.bf16.mxu1 %v11186_v5 }
 0x2dd   :  { %3616 = vmatpush2.bf16.msra.mxu0 %v11136_v53  ;;  %v11202_v53 = vld [vmem:[%s12833_s12 + $0x18] sm:$0xff]  }
 0x2de   :  { %3617 = vmatprep.subr.bf16.mxu0 %v11141_v57  ;;  %v11203_v57 = vld [vmem:[%s12833_s12 + $0x50] sm:$0xff]  }
 0x2df   :  { %3657 = vmatpush2.bf16.msra.mxu1 %v11184_v17 }
 0x2e0   :  { %3658 = vmatprep.subr.bf16.mxu1 %v11189_v37 }
 0x2e1   :  { %3618 = vmatpush2.bf16.msra.mxu0 %v11139_v23  ;;  %v1572_v23 = vrot.slane %v12553_v60, %v12484_v16 }
 0x2e2   :  { %3619 = vmatprep.subr.bf16.mxu0 %v11144_v62 }
 0x2e3   :  { %3659 = vmatpush2.bf16.msra.mxu1 %v11187_v26  ;;  %v11206_v26 = vld [vmem:[%s12833_s12 + $0x8] sm:$0xff]  }
 0x2e4   :  { %3660 = vmatprep.subr.bf16.mxu1 %v11192_v56  ;;  %v11209_v56 = vld [vmem:[#allocation7 + $0x70] ss:$8 sps:$4 sm:$0xff]  }
 0x2e5   :  { %3620 = vmatpush2.bf16.msra.mxu0 %v11142_v1 }
 0x2e6   :  { %10594 = vmatprep.subr.bf16.mxu0 %v11193_v46  ;;  %v3253_v46 = vld [vmem:[%s12834_s8] sm:$0x3] }
 0x2e7   :  { %3661 = vmatpush2.bf16.msra.mxu1 %v11190_v31  ;;  %v11214_v31 = vld [vmem:[#allocation7 + $0x64] ss:$8 sps:$4 sm:$0xff]  }
 0x2e8   :  { %v2973_v11 = vpop.f32.mrf.mxu0  ;;  %v3014_v8 = vpop.f32.mrf.mxu1 }
 0x2e9   :  { %v2974_v7 = vadd.f32 %v2973_v11, %v2933_v4 }
 0x2ea   :  { %v2975_v18 = vpop.f32.mrf.mxu0  ;;  %v3016_v24 = vpop.f32.mrf.mxu1 }
 0x2eb   :  { %v3015_v21 = vadd.f32 %v3014_v8, %v2974_v7  ;;  %v2976_v22 = vadd.f32 %v2975_v18, %v2935_v6 }
 0x2ec   :  { %v2977_v14 = vpop.f32.mrf.mxu0  ;;  %v3018_v20 = vpop.f32.mrf.mxu1 }
 0x2ed   :  { %v3017_v25 = vadd.f32 %v3016_v24, %v2976_v22  ;;  %v3185_v27 = vmax.f32 %v3015_v21, 0.0  ;;  %v11205_v20 = vld [vmem:[%s12833_s12 + $0x48] sm:$0xff]  }
 0x2ee   :  { %v2978_v54 = vpop.f32.mrf.mxu0  ;;  %v3019_v29 = vpop.f32.mrf.mxu1 }
 0x2ef   :  { %v3186_v28 = vmax.f32 %v3017_v25, 0.0  ;;  %v3254_v32 = vpack.c.bf16 %v3185_v27, %v3185_v27  ;;  %v11208_v29 = vld [vmem:[%s12833_s12] sm:$0xff]  }
 0x2f1   :  { %v3255_v30 = vpack.c.bf16 %v3186_v28, %v3186_v28  ;;  %v11207_v28 = vld [vmem:[%s12833_s12 + $0x40] sm:$0xff]  }
 0x2f3   :  { %3621 = vmatprep.mubr.bf16.mxu0 %v3255_v30  ;;  %v11211_v30 = vld [vmem:[#allocation7 + $0x74] ss:$8 sps:$4 sm:$0xff]  }
 0x2f4   :  { %3622 = vmatmul.mubr.bf16.vlgmr.msra.gmra.mxu0 %v3254_v32  ;;  %3960 = vmatprep.subr.bf16.mxu1 %v11211_v30  ;;  %v11212_v32 = vld [vmem:[#allocation7 + $0x60] ss:$8 sps:$4 sm:$0xff]  }
 0x2f5   :  { %10595 = vmatpush3.bf16.msra.mxu0 %v11194_v47  ;;  %v3262_v47 = vrot.slane %v3253_v46, %v12475_v12  ;;  %v11301_v30 = vld [vmem:[#allocation10 + $0x184] ss:$16 sps:$4 sm:$0xff]  }
 0x2f6   :  { %10596 = vmatprep.subr.bf16.mxu0 %v11195_v48  ;;  %v3266_v48 = vrot.slane %v3253_v46, %v12481_v15 }
 0x2f9   :  { %10597 = vmatpush3.bf16.msra.mxu0 %v11196_v49 }
 0x2fa   :  { %10598 = vmatprep.subr.bf16.mxu0 %v11197_v50 }
 0x2fd   :  { %10599 = vmatpush3.bf16.msra.mxu0 %v11198_v51 }
 0x2fe   :  { %10600 = vmatprep.subr.bf16.mxu0 %v11199_v40 }
 0x301   :  { %10601 = vmatpush3.bf16.msra.mxu0 %v11200_v52 }
 0x302   :  { %10602 = vmatprep.subr.bf16.mxu0 %v11201_v55 }
 0x305   :  { %10603 = vmatpush3.bf16.msra.mxu0 %v11202_v53 }
 0x306   :  { %10604 = vmatprep.subr.bf16.mxu0 %v11203_v57 }
 0x309   :  { %10605 = vmatpush3.bf16.msra.mxu0 %v11204_v58 }
 0x30a   :  { %10606 = vmatprep.subr.bf16.mxu0 %v11205_v20  ;;  %v11275_v20 = vld [vmem:[#allocation10] ss:$16 sps:$4 sm:$0xff]  }
 0x30d   :  { %10607 = vmatpush3.bf16.msra.mxu0 %v11206_v26  ;;  %v11283_v26 = vld [vmem:[#allocation10 + $0x1e4] ss:$16 sps:$4 sm:$0xff]  }
 0x30e   :  { %10608 = vmatprep.subr.bf16.mxu0 %v11207_v28  ;;  %v11287_v28 = vld [vmem:[#allocation10 + $0x1c0] ss:$16 sps:$4 sm:$0xff]  }
 0x311   :  { %10609 = vmatpush3.bf16.msra.mxu0 %v11208_v29  ;;  %v11295_v29 = vld [vmem:[#allocation10 + $0x1a4] ss:$16 sps:$4 sm:$0xff]  }
 0x328   :  { %v3055_v33 = vpop.f32.mrf.mxu0  ;;  %v3096_v34 = vpop.f32.mrf.mxu1 }
 0x329   :  { %v3056_v62 = vadd.f32 %v3055_v33, %v1568_v59  ;;  %v11217_v33 = vld [vmem:[#allocation7 + $0x54] ss:$8 sps:$4 sm:$0xff]  }
 0x32a   :  { %v3057_v36 = vpop.f32.mrf.mxu0  ;;  %v3098_v38 = vpop.f32.mrf.mxu1 }
 0x32b   :  { %v3058_v63 = vadd.f32 %v3057_v36, %v1572_v23  ;;  %v3097_v19 = vadd.f32 %v3096_v34, %v3056_v62  ;;  %v11215_v34 = vld [vmem:[#allocation7 + $0x50] ss:$8 sps:$4 sm:$0xff]   ;;  %v11220_v36 = vld [vmem:[#allocation7 + $0x44] ss:$8 sps:$4 sm:$0xff]  }
 0x32c   :  { %v3059_v41 = vpop.f32.mrf.mxu0  ;;  %v3100_v61 = vpop.f32.mrf.mxu1 }
 0x32d   :  { %v3099_v1 = vadd.f32 %v3098_v38, %v3058_v63  ;;  %v11218_v38 = vld [vmem:[#allocation7 + $0x40] ss:$8 sps:$4 sm:$0xff]   ;;  %v11223_v41 = vld [vmem:[#allocation7 + $0x34] ss:$8 sps:$4 sm:$0xff]   ;;  %v11221_v61 = vld [vmem:[#allocation7 + $0x30] ss:$8 sps:$4 sm:$0xff]  }
 0x32e   :  { %v3060_v43 = vpop.f32.mrf.mxu0  ;;  %v3101_v45 = vpop.f32.mrf.mxu1  ;;  %v11229_v63 = vld [vmem:[#allocation7 + $0x14] ss:$8 sps:$4 sm:$0xff]  }
 0x32f   :  { %v11226_v43 = vld [vmem:[#allocation7 + $0x24] ss:$8 sps:$4 sm:$0xff]   ;;  %v11224_v45 = vld [vmem:[#allocation7 + $0x20] ss:$8 sps:$4 sm:$0xff]  }
 0x368   :  { %v3137_v0 = vpop.f32.mrf.mxu0 }
 0x369   :  { %v3138_v2 = vadd.f32 %v3137_v0, %v3097_v19  ;;  %v3178_v3 = vpop.f32.mrf.mxu1  ;;  %v11227_v19 = vld [vmem:[#allocation7 + $0x10] ss:$8 sps:$4 sm:$0xff]   ;;  %v11232_v0 = vld [vmem:[#allocation7 + $0x4] ss:$8 sps:$4 sm:$0xff]  }
 0x36a   :  { %v3139_v4 = vpop.f32.mrf.mxu0 }
 0x36b   :  { %v3179_v11 = vadd.f32 %v3178_v3, %v3138_v2  ;;  %v3140_v5 = vadd.f32 %v3139_v4, %v3099_v1  ;;  %v3180_v6 = vpop.f32.mrf.mxu1  ;;  %v11230_v1 = vld [vmem:[#allocation7] ss:$8 sps:$4 sm:$0xff]   ;;  %v12236_v2 = vmov 0  }
 0x36c   :  { %v3141_v7 = vpop.f32.mrf.mxu0  ;;  %v11233_v3 = vld [vmem:[#allocation10 + $0xe0] ss:$16 sps:$4 sm:$0xff]   ;;  %v11235_v4 = vld [vmem:[#allocation10 + $0xe4] ss:$16 sps:$4 sm:$0xff]  }
 0x36d   :  { %v3181_v8 = vadd.f32 %v3180_v6, %v3140_v5  ;;  %v3182_v17 = vpop.f32.mrf.mxu1  ;;  %v3187_v18 = vmax.f32 %v3179_v11, 0.0  ;;  %v11238_v11 = vld [vmem:[#allocation10 + $0xec] ss:$16 sps:$4 sm:$0xff]   ;;  %v11241_v5 = vld [vmem:[#allocation10 + $0xc4] ss:$16 sps:$4 sm:$0xff]   ;;  %4411 = vmatprep.subr.bf16.mxu0 %v11235_v4 }
 0x36e   :  { %v3142_v21 = vpop.f32.mrf.mxu0  ;;  %v11239_v6 = vld [vmem:[#allocation10 + $0xc0] ss:$16 sps:$4 sm:$0xff]   ;;  %v11247_v7 = vld [vmem:[#allocation10 + $0xa4] ss:$16 sps:$4 sm:$0xff]   ;;  %v11292_v4 = vld [vmem:[#allocation10 + $0x1cc] ss:$16 sps:$4 sm:$0xff]  }
 0x36f   :  { %v3188_v22 = vmax.f32 %v3181_v8, 0.0  ;;  %v3183_v24 = vpop.f32.mrf.mxu1  ;;  %v3256_v60 = vpack.c.bf16 %v3187_v18, %v3187_v18  ;;  %v11245_v8 = vld [vmem:[#allocation10 + $0xa0] ss:$16 sps:$4 sm:$0xff]   ;;  %v11253_v17 = vld [vmem:[#allocation10 + $0x84] ss:$16 sps:$4 sm:$0xff]  }
 0x370   :  { %v11251_v18 = vld [vmem:[#allocation10 + $0x80] ss:$16 sps:$4 sm:$0xff]   ;;  %v11259_v21 = vld [vmem:[#allocation10 + $0x64] ss:$16 sps:$4 sm:$0xff]  }
 0x371   :  { %v3257_v14 = vpack.c.bf16 %v3188_v22, %v3188_v22  ;;  %v11257_v22 = vld [vmem:[#allocation10 + $0x60] ss:$16 sps:$4 sm:$0xff]   ;;  %v11265_v24 = vld [vmem:[#allocation10 + $0x44] ss:$16 sps:$4 sm:$0xff]  }
 0x373   :  { %3662 = vmatprep.mubr.bf16.mxu1 %v3257_v14  ;;  %v11263_v14 = vld [vmem:[#allocation10 + $0x40] ss:$16 sps:$4 sm:$0xff]  }
 0x374   :  { %3663 = vmatmul.mubr.bf16.vlgmr.msra.gmra.mxu1 %v3256_v60  ;;  %v11271_v60 = vld [vmem:[#allocation10 + $0x24] ss:$16 sps:$4 sm:$0xff]  }
 0x375   :  { %3961 = vmatpush1.bf16.msra.mxu1 %v11209_v56  ;;  %3992 = vmatprep.mubr.bf16.mxu1 %v12236_v2  ;;  %v11293_v56 = vld [vmem:[#allocation10 + $0x1a0] ss:$16 sps:$4 sm:$0xff]   ;;  %v11286_v2 = vld [vmem:[#allocation10 + $0x1ec] ss:$16 sps:$4 sm:$0xff]  }
 0x376   :  { %3962 = vmatprep.subr.bf16.mxu1 %v11214_v31  ;;  %v11299_v31 = vld [vmem:[#allocation10 + $0x180] ss:$16 sps:$4 sm:$0xff]  }
 0x379   :  { %3963 = vmatpush1.bf16.msra.mxu1 %v11212_v32  ;;  %v11307_v32 = vld [vmem:[#allocation10 + $0x164] ss:$16 sps:$4 sm:$0xff]  }
 0x37a   :  { %3964 = vmatprep.subr.bf16.mxu1 %v11217_v33  ;;  %v11305_v33 = vld [vmem:[#allocation10 + $0x160] ss:$16 sps:$4 sm:$0xff]  }
 0x37d   :  { %3965 = vmatpush1.bf16.msra.mxu1 %v11215_v34  ;;  %v11313_v34 = vld [vmem:[#allocation10 + $0x144] ss:$16 sps:$4 sm:$0xff]  }
 0x37e   :  { %3966 = vmatprep.subr.bf16.mxu1 %v11220_v36  ;;  %v11311_v36 = vld [vmem:[#allocation10 + $0x140] ss:$16 sps:$4 sm:$0xff]  }
 0x381   :  { %3967 = vmatpush1.bf16.msra.mxu1 %v11218_v38 }
 0x382   :  { %3968 = vmatprep.subr.bf16.mxu1 %v11223_v41  ;;  %v9889_v41 = vld [vmem:[%s12835_s29] ss:$0 sm:$0xff] }
 0x385   :  { %3969 = vmatpush1.bf16.msra.mxu1 %v11221_v61 }
 0x386   :  { %3970 = vmatprep.subr.bf16.mxu1 %v11226_v43 }
 0x389   :  { %3971 = vmatpush1.bf16.msra.mxu1 %v11224_v45 }
 0x38a   :  { %3972 = vmatprep.subr.bf16.mxu1 %v11229_v63  ;;  %v11274_v63 = vld [vmem:[#allocation10 + $0x2c] ss:$16 sps:$4 sm:$0xff]  }
 0x38d   :  { %3973 = vmatpush1.bf16.msra.mxu1 %v11227_v19  ;;  %v11272_v19 = vld [vmem:[#allocation10 + $0x28] ss:$16 sps:$4 sm:$0xff]  }
 0x38e   :  { %3974 = vmatprep.subr.bf16.mxu1 %v11232_v0  ;;  %v11280_v0 = vld [vmem:[#allocation10 + $0xc] ss:$16 sps:$4 sm:$0xff]  }
 0x391   :  { %3975 = vmatpush1.bf16.msra.mxu1 %v11230_v1  ;;  %v11278_v1 = vld [vmem:[#allocation10 + $0x8] ss:$16 sps:$4 sm:$0xff]  }
 0x392   :  { %4452 = vmatprep.subr.bf16.mxu1 %v11238_v11  ;;  %v11290_v11 = vld [vmem:[#allocation10 + $0x1c8] ss:$16 sps:$4 sm:$0xff]  }
 0x3b4   :  { %v3623_v37 = vpop.f32.mrf.mxu0 }
 0x3b5   :  { %v3624_v49 = vadd.f32 %v3623_v37, %v3262_v47  ;;  %v11269_v37 = vld [vmem:[#allocation10 + $0x20] ss:$16 sps:$4 sm:$0xff]  }
 0x3b6   :  { %v3625_v25 = vpop.f32.mrf.mxu0 }
 0x3b7   :  { %v3626_v51 = vadd.f32 %v3625_v25, %v3266_v48  ;;  %v11277_v25 = vld [vmem:[#allocation10 + $0x4] ss:$16 sps:$4 sm:$0xff]  }
 0x3b8   :  { %v3627_v27 = vpop.f32.mrf.mxu0 }
 0x3b9   :  { %v11281_v27 = vld [vmem:[#allocation10 + $0x1e0] ss:$16 sps:$4 sm:$0xff]  }
 0x3ba   :  { %v3628_v54 = vpop.f32.mrf.mxu0 }
 0x3bb   :  { %v11289_v54 = vld [vmem:[#allocation10 + $0x1c4] ss:$16 sps:$4 sm:$0xff]  }
 0x434   :  { %v3664_v50 = vpop.f32.mrf.mxu1 }
 0x435   :  { %v3665_v40 = vadd.f32 %v3664_v50, %v3624_v49  ;;  %v11236_v49 = vld [vmem:[#allocation10 + $0xe8] ss:$16 sps:$4 sm:$0xff]  }
 0x436   :  { %v3666_v52 = vpop.f32.mrf.mxu1 }
 0x437   :  { %v3667_v55 = vadd.f32 %v3666_v52, %v3626_v51  ;;  %v3671_v53 = vmax.f32 %v3665_v40, 0.0  ;;  %v11244_v51 = vld [vmem:[#allocation10 + $0xcc] ss:$16 sps:$4 sm:$0xff]   ;;  %v11242_v40 = vld [vmem:[#allocation10 + $0xc8] ss:$16 sps:$4 sm:$0xff]  }
 0x438   :  { %v3668_v57 = vpop.f32.mrf.mxu1  ;;  %v11250_v52 = vld [vmem:[#allocation10 + $0xac] ss:$16 sps:$4 sm:$0xff]  }
 0x439   :  { %v3672_v58 = vmax.f32 %v3667_v55, 0.0  ;;  %v3706_v62 = vpack.c.bf16 %v3671_v53, %v3671_v53  ;;  %v11248_v55 = vld [vmem:[#allocation10 + $0xa8] ss:$16 sps:$4 sm:$0xff]   ;;  %v11256_v53 = vld [vmem:[#allocation10 + $0x8c] ss:$16 sps:$4 sm:$0xff]  }
 0x43a   :  { %v3669_v59 = vpop.f32.mrf.mxu1  ;;  %v11254_v57 = vld [vmem:[#allocation10 + $0x88] ss:$16 sps:$4 sm:$0xff]  }
 0x43b   :  { %v3707_v23 = vpack.c.bf16 %v3672_v58, %v3672_v58  ;;  %v11262_v58 = vld [vmem:[#allocation10 + $0x6c] ss:$16 sps:$4 sm:$0xff]   ;;  %v11260_v59 = vld [vmem:[#allocation10 + $0x68] ss:$16 sps:$4 sm:$0xff]  }
 0x43d   :  { %3842 = vmatprep.mubr.bf16.mxu0 %v3707_v23  ;;  %v11268_v23 = vld [vmem:[#allocation10 + $0x4c] ss:$16 sps:$4 sm:$0xff]  }
 0x43e   :  { %3843 = vmatmul.mubr.bf16.vlgmr.msra.gmra.mxu0 %v3706_v62  ;;  %v11266_v62 = vld [vmem:[#allocation10 + $0x48] ss:$16 sps:$4 sm:$0xff]  }
 0x43f   :  { %4412 = vmatpush1.bf16.msra.mxu0 %v11233_v3  ;;  %v11284_v3 = vld [vmem:[#allocation10 + $0x1e8] ss:$16 sps:$4 sm:$0xff]  }
 0x440   :  { %4413 = vmatprep.subr.bf16.mxu0 %v11241_v5  ;;  %v11298_v5 = vld [vmem:[#allocation10 + $0x1ac] ss:$16 sps:$4 sm:$0xff]  }
 0x443   :  { %4414 = vmatpush1.bf16.msra.mxu0 %v11239_v6  ;;  %v11296_v6 = vld [vmem:[#allocation10 + $0x1a8] ss:$16 sps:$4 sm:$0xff]  }
 0x444   :  { %4415 = vmatprep.subr.bf16.mxu0 %v11247_v7  ;;  %v11304_v7 = vld [vmem:[#allocation10 + $0x18c] ss:$16 sps:$4 sm:$0xff]  }
 0x447   :  { %4416 = vmatpush1.bf16.msra.mxu0 %v11245_v8  ;;  %v11302_v8 = vld [vmem:[#allocation10 + $0x188] ss:$16 sps:$4 sm:$0xff]  }
 0x448   :  { %4417 = vmatprep.subr.bf16.mxu0 %v11253_v17  ;;  %v11310_v17 = vld [vmem:[#allocation10 + $0x16c] ss:$16 sps:$4 sm:$0xff]  }
 0x44b   :  { %4418 = vmatpush1.bf16.msra.mxu0 %v11251_v18  ;;  %v11308_v18 = vld [vmem:[#allocation10 + $0x168] ss:$16 sps:$4 sm:$0xff]  }
 0x44c   :  { %4419 = vmatprep.subr.bf16.mxu0 %v11259_v21  ;;  %v11316_v21 = vld [vmem:[#allocation10 + $0x14c] ss:$16 sps:$4 sm:$0xff]  }
 0x44f   :  { %4420 = vmatpush1.bf16.msra.mxu0 %v11257_v22  ;;  %v11314_v22 = vld [vmem:[#allocation10 + $0x148] ss:$16 sps:$4 sm:$0xff]  }
 0x450   :  { %4421 = vmatprep.subr.bf16.mxu0 %v11265_v24  ;;  %v11319_v24 = vld [vmem:[#allocation10 + $0x124] ss:$16 sps:$4 sm:$0xff]  }
 0x453   :  { %4422 = vmatpush1.bf16.msra.mxu0 %v11263_v14  ;;  %v11322_v14 = vld [vmem:[#allocation10 + $0x12c] ss:$16 sps:$4 sm:$0xff]  }
 0x454   :  { %4423 = vmatprep.subr.bf16.mxu0 %v11271_v60  ;;  %v11317_v60 = vld [vmem:[#allocation10 + $0x120] ss:$16 sps:$4 sm:$0xff]  }
 0x457   :  { %4424 = vmatpush1.bf16.msra.mxu0 %v11269_v37  ;;  %v11320_v37 = vld [vmem:[#allocation10 + $0x128] ss:$16 sps:$4 sm:$0xff]  }
 0x458   :  { %4425 = vmatprep.subr.bf16.mxu0 %v11277_v25  ;;  %v11325_v25 = vld [vmem:[#allocation10 + $0x104] ss:$16 sps:$4 sm:$0xff]  }
 0x45b   :  { %4426 = vmatpush1.bf16.msra.mxu0 %v11275_v20  ;;  %v11328_v20 = vld [vmem:[#allocation10 + $0x10c] ss:$16 sps:$4 sm:$0xff]  }
 0x45c   :  { %4427 = vmatprep.subr.bf16.mxu0 %v11283_v26  ;;  %v11323_v26 = vld [vmem:[#allocation10 + $0x100] ss:$16 sps:$4 sm:$0xff]  }
 0x45f   :  { %4428 = vmatpush2.bf16.msra.mxu0 %v11281_v27  ;;  %v11326_v27 = vld [vmem:[#allocation10 + $0x108] ss:$16 sps:$4 sm:$0xff]  }
 0x460   :  { %4429 = vmatprep.subr.bf16.mxu0 %v11289_v54  ;;  %v4553_v54 = vld [vmem:[#allocation13 + $0x1c0] sm:$0xff] }
 0x463   :  { %4430 = vmatpush2.bf16.msra.mxu0 %v11287_v28  ;;  %v4557_v28 = vld [vmem:[#allocation13 + $0x1e0] sm:$0xff] }
 0x464   :  { %4431 = vmatprep.subr.bf16.mxu0 %v11295_v29  ;;  %v4681_v29 = vld [vmem:[#allocation13 + $0x5c0] sm:$0xff] }
 0x467   :  { %4432 = vmatpush2.bf16.msra.mxu0 %v11293_v56  ;;  %v10042_v56 = vcombine.low %v4553_v54, %v4557_v28 }
 0x468   :  { %4433 = vmatprep.subr.bf16.mxu0 %v11301_v30  ;;  %v10043_v30 = vcombine.high %v4553_v54, %v4557_v28  ;;  %v4645_v54 = vld [vmem:[#allocation13 + $0x4a0] sm:$0xff] }
 0x46b   :  { %4434 = vmatpush2.bf16.msra.mxu0 %v11299_v31  ;;  %v4685_v31 = vld [vmem:[#allocation13 + $0x5e0] sm:$0xff] }
 0x46c   :  { %4435 = vmatprep.subr.bf16.mxu0 %v11307_v32  ;;  %v10170_v32 = vcombine.low %v4681_v29, %v4685_v31 }
 0x46f   :  { %4436 = vmatpush2.bf16.msra.mxu0 %v11305_v33  ;;  %v10171_v33 = vcombine.high %v4681_v29, %v4685_v31  ;;  %v4505_v31 = vld [vmem:[#allocation13 + $0x40] sm:$0xff] }
 0x470   :  { %4437 = vmatprep.subr.bf16.mxu0 %v11313_v34  ;;  %v3867_v34 = vld [vmem:[#allocation9] sm:$0x3] }
 0x473   :  { %4438 = vmatpush2.bf16.msra.mxu0 %v11311_v36  ;;  %v3873_v36 = vrot.slane %v3867_v34, %v12475_v12 }
 0x474   :  { %4439 = vmatprep.subr.bf16.mxu0 %v11319_v24  ;;  %v4653_v24 = vld [vmem:[#allocation13 + $0x4e0] sm:$0xff] }
 0x477   :  { %4440 = vmatpush2.bf16.msra.mxu0 %v11317_v60 }
 0x478   :  { %4441 = vmatprep.subr.bf16.mxu0 %v11325_v25 }
 0x47b   :  { %4442 = vmatpush2.bf16.msra.mxu0 %v11323_v26  ;;  %v4517_v26 = vld [vmem:[#allocation13 + $0xa0] sm:$0xff] }
 0x47c   :  { %6079 = vmatprep.subr.bf16.mxu0 %v10043_v30 }
 0x4fe   :  { %v10610_v38 = vpop.f32.mrf.mxu0 }
 0x500   :  { %v10611_v61 = vpop.f32.mrf.mxu0 }
 0x501   :  { %v10612_v43 = vadd.f32 %v10611_v61, %v10610_v38  ;;  %v3877_v38 = vrot.slane %v3867_v34, %v12481_v15  ;;  %v4637_v34 = vld [vmem:[#allocation13 + $0x460] sm:$0xff] }
 0x502   :  { %v10613_v45 = vpop.f32.mrf.mxu0 }
 0x503   :  { %v3845_v46 = vadd.f32 %v10612_v43, %v9889_v41 }
 0x504   :  { %v10614_v47 = vpop.f32.mrf.mxu0 }
 0x505   :  { %v3850_v48 = vmax.f32 %v3845_v46, 0.0 }
 0x507   :  { %v3868_v50 = vpack.c.bf16 %v3850_v48, %v3850_v48  ;;  %v4545_v48 = vld [vmem:[#allocation13 + $0x180] sm:$0xff] }
 0x509   :  { %3993 = vmatmul.mubr.bf16.vlgmr.msra.gmra.mxu1 %v3868_v50  ;;  %v4549_v50 = vld [vmem:[#allocation13 + $0x1a0] sm:$0xff] }
 0x50a   :  { %4453 = vmatpush1.bf16.msra.mxu1 %v11236_v49 }
 0x50b   :  { %4454 = vmatprep.subr.bf16.mxu1 %v11244_v51  ;;  %v4673_v51 = vld [vmem:[#allocation13 + $0x580] sm:$0xff] }
 0x50e   :  { %4455 = vmatpush1.bf16.msra.mxu1 %v11242_v40  ;;  %v4677_v40 = vld [vmem:[#allocation13 + $0x5a0] sm:$0xff] }
 0x50f   :  { %4456 = vmatprep.subr.bf16.mxu1 %v11250_v52 }
 0x512   :  { %4457 = vmatpush1.bf16.msra.mxu1 %v11248_v55 }
 0x513   :  { %4458 = vmatprep.subr.bf16.mxu1 %v11256_v53 }
 0x516   :  { %4459 = vmatpush1.bf16.msra.mxu1 %v11254_v57  ;;  %v10035_v57 = vcombine.high %v4545_v48, %v4549_v50 }
 0x517   :  { %4460 = vmatprep.subr.bf16.mxu1 %v11262_v58  ;;  %v10163_v58 = vcombine.high %v4673_v51, %v4677_v40 }
 0x51a   :  { %4461 = vmatpush1.bf16.msra.mxu1 %v11260_v59  ;;  %v4537_v59 = vld [vmem:[#allocation13 + $0x140] sm:$0xff] }
 0x51b   :  { %4462 = vmatprep.subr.bf16.mxu1 %v11268_v23  ;;  %v4541_v23 = vld [vmem:[#allocation13 + $0x160] sm:$0xff] }
 0x51e   :  { %4463 = vmatpush1.bf16.msra.mxu1 %v11266_v62  ;;  %v4665_v62 = vld [vmem:[#allocation13 + $0x540] sm:$0xff] }
 0x51f   :  { %4464 = vmatprep.subr.bf16.mxu1 %v11274_v63  ;;  %v4669_v63 = vld [vmem:[#allocation13 + $0x560] sm:$0xff] }
 0x522   :  { %4465 = vmatpush1.bf16.msra.mxu1 %v11272_v19  ;;  %v10034_v19 = vcombine.low %v4545_v48, %v4549_v50 }
 0x523   :  { %4466 = vmatprep.subr.bf16.mxu1 %v11280_v0  ;;  %v10162_v0 = vcombine.low %v4673_v51, %v4677_v40  ;;  %v4617_v40 = vld [vmem:[#allocation13 + $0x3c0] sm:$0xff] }
 0x526   :  { %4467 = vmatpush1.bf16.msra.mxu1 %v11278_v1  ;;  %v10027_v1 = vcombine.high %v4537_v59, %v4541_v23 }
 0x527   :  { %4468 = vmatprep.subr.bf16.mxu1 %v11286_v2  ;;  %v10155_v2 = vcombine.high %v4665_v62, %v4669_v63 }
 0x52a   :  { %4469 = vmatpush2.bf16.msra.mxu1 %v11284_v3  ;;  %v4529_v3 = vld [vmem:[#allocation13 + $0x100] sm:$0xff] }
 0x52b   :  { %4470 = vmatprep.subr.bf16.mxu1 %v11292_v4  ;;  %v4533_v4 = vld [vmem:[#allocation13 + $0x120] sm:$0xff] }
 0x52e   :  { %4471 = vmatpush2.bf16.msra.mxu1 %v11290_v11  ;;  %v4657_v11 = vld [vmem:[#allocation13 + $0x500] sm:$0xff] }
 0x52f   :  { %4472 = vmatprep.subr.bf16.mxu1 %v11298_v5  ;;  %v4661_v5 = vld [vmem:[#allocation13 + $0x520] sm:$0xff] }
 0x530   :  { %v10146_v60 = vcombine.low %v4657_v11, %v4661_v5 }
 0x532   :  { %4473 = vmatpush2.bf16.msra.mxu1 %v11296_v6  ;;  %v10026_v6 = vcombine.low %v4537_v59, %v4541_v23 }
 0x533   :  { %4474 = vmatprep.subr.bf16.mxu1 %v11304_v7  ;;  %v10154_v7 = vcombine.low %v4665_v62, %v4669_v63  ;;  %v4609_v62 = vld [vmem:[#allocation13 + $0x380] sm:$0xff] }
 0x534   :  { %v4613_v63 = vld [vmem:[#allocation13 + $0x3a0] sm:$0xff] }
 0x536   :  { %4475 = vmatpush2.bf16.msra.mxu1 %v11302_v8  ;;  %v10019_v8 = vcombine.high %v4529_v3, %v4533_v4 }
 0x537   :  { %4476 = vmatprep.subr.bf16.mxu1 %v11310_v17  ;;  %v10147_v17 = vcombine.high %v4657_v11, %v4661_v5  ;;  %v4601_v11 = vld [vmem:[#allocation13 + $0x340] sm:$0xff] }
 0x538   :  { %v4605_v5 = vld [vmem:[#allocation13 + $0x360] sm:$0xff] }
 0x53a   :  { %4477 = vmatpush2.bf16.msra.mxu1 %v11308_v18  ;;  %v4521_v18 = vld [vmem:[#allocation13 + $0xc0] sm:$0xff] }
 0x53b   :  { %4478 = vmatprep.subr.bf16.mxu1 %v11316_v21  ;;  %v4525_v21 = vld [vmem:[#allocation13 + $0xe0] sm:$0xff] }
 0x53c   :  { %v10010_v28 = vcombine.low %v4521_v18, %v4525_v21 }
 0x53e   :  { %4479 = vmatpush2.bf16.msra.mxu1 %v11314_v22  ;;  %v4649_v22 = vld [vmem:[#allocation13 + $0x4c0] sm:$0xff] }
 0x53f   :  { %4480 = vmatprep.subr.bf16.mxu1 %v11322_v14  ;;  %v10018_v14 = vcombine.low %v4529_v3, %v4533_v4  ;;  %v10139_v25 = vcombine.high %v4649_v22, %v4653_v24  ;;  %v10138_v29 = vcombine.low %v4649_v22, %v4653_v24  ;;  %v10099_v3 = vcombine.high %v4609_v62, %v4613_v63  ;;  %v4593_v22 = vld [vmem:[#allocation13 + $0x300] sm:$0xff] }
 0x540   :  { %v4597_v24 = vld [vmem:[#allocation13 + $0x320] sm:$0xff] }
 0x542   :  { %4481 = vmatpush2.bf16.msra.mxu1 %v11320_v37  ;;  %v10011_v37 = vcombine.high %v4521_v18, %v4525_v21  ;;  %v10091_v18 = vcombine.high %v4601_v11, %v4605_v5 }
 0x543   :  { %4482 = vmatprep.subr.bf16.mxu1 %v11328_v20  ;;  %v4513_v20 = vld [vmem:[#allocation13 + $0x80] sm:$0xff] }
 0x546   :  { %4483 = vmatpush2.bf16.msra.mxu1 %v11326_v27  ;;  %v4641_v27 = vld [vmem:[#allocation13 + $0x480] sm:$0xff] }
 0x547   :  { %6120 = vmatprep.subr.bf16.mxu1 %v10171_v33  ;;  %v10131_v30 = vcombine.high %v4641_v27, %v4645_v54  ;;  %v4633_v33 = vld [vmem:[#allocation13 + $0x440] sm:$0xff] }
 0x5c9   :  { %v3994_v41 = vpop.f32.mrf.mxu1 }
 0x5ca   :  { %v3995_v61 = vadd.f32 %v3994_v41, %v3873_v36  ;;  %v10002_v36 = vcombine.low %v4513_v20, %v4517_v26 }
 0x5cb   :  { %v3996_v43 = vpop.f32.mrf.mxu1 }
 0x5cc   :  { %v3997_v45 = vadd.f32 %v3996_v43, %v3877_v38  ;;  %v4001_v46 = vmax.f32 %v3995_v61, 0.0  ;;  %v10130_v38 = vcombine.low %v4641_v27, %v4645_v54  ;;  %v10123_v61 = vcombine.high %v4633_v33, %v4637_v34  ;;  %v4497_v43 = vld [vmem:[#allocation13] sm:$0xff] }
 0x5cd   :  { %v3998_v47 = vpop.f32.mrf.mxu1  ;;  %v4585_v27 = vld [vmem:[#allocation13 + $0x2c0] sm:$0xff] }
 0x5ce   :  { %v4002_v49 = vmax.f32 %v3997_v45, 0.0  ;;  %v4068_v53 = vpack.c.bf16 %v4001_v46, %v4001_v46  ;;  %v4501_v45 = vld [vmem:[#allocation13 + $0x20] sm:$0xff] }
 0x5cf   :  { %v3999_v52 = vpop.f32.mrf.mxu1  ;;  %v4625_v46 = vld [vmem:[#allocation13 + $0x400] sm:$0xff]  ;;  %v9987_v50 = vcombine.high %v4497_v43, %v4501_v45 }
 0x5d0   :  { %v4069_v55 = vpack.c.bf16 %v4002_v49, %v4002_v49  ;;  %v4629_v47 = vld [vmem:[#allocation13 + $0x420] sm:$0xff]  ;;  %v10122_v49 = vcombine.low %v4633_v33, %v4637_v34 }
 0x5d1   :  { %v10115_v51 = vcombine.high %v4625_v46, %v4629_v47  ;;  %v4621_v52 = vld [vmem:[#allocation13 + $0x3e0] sm:$0xff] }
 0x5d2   :  { %4443 = vmatprep.mubr.bf16.mxu0 %v4069_v55  ;;  %4484 = vmatprep.mubr.bf16.mxu1 %v4069_v55  ;;  %v4745_v55 = vld [vmem:[#allocation13 + $0x7c0] sm:$0xff]  ;;  %v10107_v59 = vcombine.high %v4617_v40, %v4621_v52 }
 0x5d3   :  { %4444 = vmatmul.mubr.bf16.vlgmr.msra.gmra.mxu0 %v4068_v53  ;;  %4485 = vmatmul.mubr.bf16.vlgmr.msra.gmra.mxu1 %v4068_v53  ;;  %v4749_v53 = vld [vmem:[#allocation13 + $0x7e0] sm:$0xff] }
 0x5d4   :  { %6080 = vmatpush1.bf16.msra.mxu0 %v10042_v56  ;;  %6121 = vmatpush1.bf16.msra.mxu1 %v10170_v32  ;;  %v10003_v56 = vcombine.high %v4513_v20, %v4517_v26  ;;  %v4509_v32 = vld [vmem:[#allocation13 + $0x60] sm:$0xff]  ;;  %v10235_v23 = vcombine.high %v4745_v55, %v4749_v53  ;;  %v10083_v20 = vcombine.high %v4593_v22, %v4597_v24 }
 0x5d5   :  { %6081 = vmatprep.subr.bf16.mxu0 %v10035_v57  ;;  %6122 = vmatprep.subr.bf16.mxu1 %v10163_v58  ;;  %v9995_v41 = vcombine.high %v4505_v31, %v4509_v32  ;;  %v9994_v48 = vcombine.low %v4505_v31, %v4509_v32  ;;  %v9986_v57 = vcombine.low %v4497_v43, %v4501_v45  ;;  %v4589_v54 = vld [vmem:[#allocation13 + $0x2e0] sm:$0xff] }
 0x5d6   :  { %v10114_v58 = vcombine.low %v4625_v46, %v4629_v47  ;;  %v10075_v31 = vcombine.high %v4585_v27, %v4589_v54  ;;  %v4577_v33 = vld [vmem:[#allocation13 + $0x280] sm:$0xff] }
 0x5d7   :  { %v4581_v34 = vld [vmem:[#allocation13 + $0x2a0] sm:$0xff] }
 0x5d8   :  { %6082 = vmatpush1.bf16.msra.mxu0 %v10034_v19  ;;  %6123 = vmatpush1.bf16.msra.mxu1 %v10162_v0  ;;  %v4737_v19 = vld [vmem:[#allocation13 + $0x780] sm:$0xff]  ;;  %v10067_v43 = vcombine.high %v4577_v33, %v4581_v34  ;;  %v10066_v46 = vcombine.low %v4577_v33, %v4581_v34 }
 0x5d9   :  { %6083 = vmatprep.subr.bf16.mxu0 %v10027_v1  ;;  %6124 = vmatprep.subr.bf16.mxu1 %v10155_v2  ;;  %v4741_v0 = vld [vmem:[#allocation13 + $0x7a0] sm:$0xff]  ;;  %v10106_v1 = vcombine.low %v4617_v40, %v4621_v52  ;;  %v10234_v2 = vcombine.low %v4745_v55, %v4749_v53 }
 0x5da   :  { %v10227_v4 = vcombine.high %v4737_v19, %v4741_v0  ;;  %v4701_v40 = vld [vmem:[#allocation13 + $0x660] sm:$0xff] }
 0x5dc   :  { %6084 = vmatpush1.bf16.msra.mxu0 %v10026_v6  ;;  %6125 = vmatpush1.bf16.msra.mxu1 %v10154_v7  ;;  %v4729_v6 = vld [vmem:[#allocation13 + $0x740] sm:$0xff] }
 0x5dd   :  { %6085 = vmatprep.subr.bf16.mxu0 %v10019_v8  ;;  %6126 = vmatprep.subr.bf16.mxu1 %v10147_v17  ;;  %v4733_v7 = vld [vmem:[#allocation13 + $0x760] sm:$0xff]  ;;  %v10098_v8 = vcombine.low %v4609_v62, %v4613_v63  ;;  %v10226_v17 = vcombine.low %v4737_v19, %v4741_v0 }
 0x5de   :  { %v10219_v21 = vcombine.high %v4729_v6, %v4733_v7  ;;  %v4693_v62 = vld [vmem:[#allocation13 + $0x620] sm:$0xff] }
 0x5e0   :  { %6086 = vmatpush1.bf16.msra.mxu0 %v10018_v14  ;;  %6127 = vmatpush1.bf16.msra.mxu1 %v10146_v60  ;;  %v4721_v14 = vld [vmem:[#allocation13 + $0x700] sm:$0xff] }
 0x5e1   :  { %6087 = vmatprep.subr.bf16.mxu0 %v10011_v37  ;;  %6128 = vmatprep.subr.bf16.mxu1 %v10139_v25  ;;  %v4725_v60 = vld [vmem:[#allocation13 + $0x720] sm:$0xff]  ;;  %v10090_v37 = vcombine.low %v4601_v11, %v4605_v5  ;;  %v10218_v25 = vcombine.low %v4729_v6, %v4733_v7  ;;  %v4686_v5 = vld [vmem:[#allocation13 + $0x5e8] sm:$0xff] }
 0x5e2   :  { %v10211_v26 = vcombine.high %v4721_v14, %v4725_v60 }
 0x5e4   :  { %6088 = vmatpush1.bf16.msra.mxu0 %v10010_v28  ;;  %6129 = vmatpush1.bf16.msra.mxu1 %v10138_v29  ;;  %v4713_v28 = vld [vmem:[#allocation13 + $0x6c0] sm:$0xff] }
 0x5e5   :  { %6089 = vmatprep.subr.bf16.mxu0 %v10003_v56  ;;  %6130 = vmatprep.subr.bf16.mxu1 %v10131_v30  ;;  %v4717_v29 = vld [vmem:[#allocation13 + $0x6e0] sm:$0xff]  ;;  %v10082_v56 = vcombine.low %v4593_v22, %v4597_v24  ;;  %v10210_v30 = vcombine.low %v4721_v14, %v4725_v60 }
 0x5e6   :  { %v10203_v32 = vcombine.high %v4713_v28, %v4717_v29 }
 0x5e8   :  { %6090 = vmatpush1.bf16.msra.mxu0 %v10002_v36  ;;  %6131 = vmatpush1.bf16.msra.mxu1 %v10130_v38  ;;  %v4705_v36 = vld [vmem:[#allocation13 + $0x680] sm:$0xff] }
 0x5e9   :  { %6091 = vmatprep.subr.bf16.mxu0 %v9995_v41  ;;  %6132 = vmatprep.subr.bf16.mxu1 %v10123_v61  ;;  %v4709_v38 = vld [vmem:[#allocation13 + $0x6a0] sm:$0xff]  ;;  %v10074_v41 = vcombine.low %v4585_v27, %v4589_v54  ;;  %v10202_v61 = vcombine.low %v4713_v28, %v4717_v29 }
 0x5ea   :  { %v10195_v45 = vcombine.high %v4705_v36, %v4709_v38  ;;  %v10194_v47 = vcombine.low %v4705_v36, %v4709_v38  ;;  %v4550_v36 = vld [vmem:[#allocation13 + $0x1a8] sm:$0xff] }
 0x5eb   :  { %v4674_v38 = vld [vmem:[#allocation13 + $0x588] sm:$0xff] }
 0x5ec   :  { %6092 = vmatpush1.bf16.msra.mxu0 %v9994_v48  ;;  %6133 = vmatpush1.bf16.msra.mxu1 %v10122_v49  ;;  %v4569_v48 = vld [vmem:[#allocation13 + $0x240] sm:$0xff] }
 0x5ed   :  { %6093 = vmatprep.subr.bf16.mxu0 %v9987_v50  ;;  %6134 = vmatprep.subr.bf16.mxu1 %v10115_v51  ;;  %v4573_v49 = vld [vmem:[#allocation13 + $0x260] sm:$0xff] }
 0x5ee   :  { %v4697_v50 = vld [vmem:[#allocation13 + $0x640] sm:$0xff]  ;;  %v10059_v51 = vcombine.high %v4569_v48, %v4573_v49  ;;  %v10058_v52 = vcombine.low %v4569_v48, %v4573_v49 }
 0x5ef   :  { %v10186_v55 = vcombine.low %v4697_v50, %v4701_v40  ;;  %v10187_v53 = vcombine.high %v4697_v50, %v4701_v40  ;;  %v4542_v50 = vld [vmem:[#allocation13 + $0x168] sm:$0xff] }
 0x5f0   :  { %6094 = vmatpush1.bf16.msra.mxu0 %v9986_v57  ;;  %6135 = vmatpush1.bf16.msra.mxu1 %v10114_v58  ;;  %v4561_v57 = vld [vmem:[#allocation13 + $0x200] sm:$0xff]  ;;  %v4670_v40 = vld [vmem:[#allocation13 + $0x568] sm:$0xff] }
 0x5f1   :  { %6095 = vmatprep.subr.bf16.mxu0 %v10107_v59  ;;  %6136 = vmatprep.subr.bf16.mxu1 %v10235_v23  ;;  %v4565_v58 = vld [vmem:[#allocation13 + $0x220] sm:$0xff] }
 0x5f2   :  { %v4689_v59 = vld [vmem:[#allocation13 + $0x600] sm:$0xff]  ;;  %v10051_v23 = vcombine.high %v4561_v57, %v4565_v58  ;;  %v10050_v63 = vcombine.low %v4561_v57, %v4565_v58  ;;  %v4530_v58 = vld [vmem:[#allocation13 + $0x108] sm:$0xff] }
 0x5f3   :  { %v10178_v19 = vcombine.low %v4689_v59, %v4693_v62  ;;  %v10179_v0 = vcombine.high %v4689_v59, %v4693_v62  ;;  %v4534_v59 = vld [vmem:[#allocation13 + $0x128] sm:$0xff] }
 0x5f4   :  { %6096 = vmatpush2.bf16.msra.mxu0 %v10106_v1  ;;  %6137 = vmatpush2.bf16.msra.mxu1 %v10234_v2  ;;  %v4554_v1 = vld [vmem:[#allocation13 + $0x1c8] sm:$0xff] }
 0x5f5   :  { %6097 = vmatprep.subr.bf16.mxu0 %v10099_v3  ;;  %6138 = vmatprep.subr.bf16.mxu1 %v10227_v4  ;;  %v4558_v2 = vld [vmem:[#allocation13 + $0x1e8] sm:$0xff] }
 0x5f6   :  { %v4682_v3 = vld [vmem:[#allocation13 + $0x5c8] sm:$0xff]  ;;  %v10044_v4 = vcombine.low %v4554_v1, %v4558_v2  ;;  %v10045_v11 = vcombine.high %v4554_v1, %v4558_v2 }
 0x5f7   :  { %v10172_v6 = vcombine.low %v4682_v3, %v4686_v5  ;;  %v10173_v7 = vcombine.high %v4682_v3, %v4686_v5  ;;  %v4662_v62 = vld [vmem:[#allocation13 + $0x528] sm:$0xff]  ;;  %v10020_v5 = vcombine.low %v4530_v58, %v4534_v59 }
 0x5f8   :  { %6098 = vmatpush2.bf16.msra.mxu0 %v10098_v8  ;;  %6139 = vmatpush2.bf16.msra.mxu1 %v10226_v17  ;;  %v4067_v8 = vld [vmem:[#allocation12] sm:$0xf]  ;;  %v4522_v2 = vld [vmem:[#allocation13 + $0xc8] sm:$0xff] }
 0x5f9   :  { %6099 = vmatprep.subr.bf16.mxu0 %v10091_v18  ;;  %6140 = vmatprep.subr.bf16.mxu1 %v10219_v21  ;;  %v4074_v17 = vrot.slane %v4067_v8, %v12475_v12  ;;  %v4082_v18 = vrot.slane %v4067_v8, %v12478_v13  ;;  %v4078_v21 = vrot.slane %v4067_v8, %v12481_v15  ;;  %v4526_v3 = vld [vmem:[#allocation13 + $0xe8] sm:$0xff] }
 0x5fa   :  { %v4086_v22 = vrot.slane %v4067_v8, %v12484_v16 }
 0x5fc   :  { %6100 = vmatpush2.bf16.msra.mxu0 %v10090_v37  ;;  %6141 = vmatpush2.bf16.msra.mxu1 %v10218_v25 }
 0x5fd   :  { %6101 = vmatprep.subr.bf16.mxu0 %v10083_v20  ;;  %6142 = vmatprep.subr.bf16.mxu1 %v10211_v26 }
 0x600   :  { %6102 = vmatpush2.bf16.msra.mxu0 %v10082_v56  ;;  %6143 = vmatpush2.bf16.msra.mxu1 %v10210_v30 }
 0x601   :  { %6103 = vmatprep.subr.bf16.mxu0 %v10075_v31  ;;  %6144 = vmatprep.subr.bf16.mxu1 %v10203_v32  ;;  %v4546_v32 = vld [vmem:[#allocation13 + $0x188] sm:$0xff] }
 0x602   :  { %v10037_v48 = vcombine.high %v4546_v32, %v4550_v36 }
 0x604   :  { %6104 = vmatpush2.bf16.msra.mxu0 %v10074_v41  ;;  %6145 = vmatpush2.bf16.msra.mxu1 %v10202_v61  ;;  %v4678_v41 = vld [vmem:[#allocation13 + $0x5a8] sm:$0xff] }
 0x605   :  { %6105 = vmatprep.subr.bf16.mxu0 %v10067_v43  ;;  %6146 = vmatprep.subr.bf16.mxu1 %v10195_v45  ;;  %v10165_v49 = vcombine.high %v4674_v38, %v4678_v41 }
 0x608   :  { %6106 = vmatpush2.bf16.msra.mxu0 %v10066_v46  ;;  %6147 = vmatpush2.bf16.msra.mxu1 %v10194_v47  ;;  %v4538_v47 = vld [vmem:[#allocation13 + $0x148] sm:$0xff] }
 0x609   :  { %6107 = vmatprep.subr.bf16.mxu0 %v10059_v51  ;;  %6148 = vmatprep.subr.bf16.mxu1 %v10187_v53  ;;  %v4666_v51 = vld [vmem:[#allocation13 + $0x548] sm:$0xff]  ;;  %v10029_v53 = vcombine.high %v4538_v47, %v4542_v50 }
 0x60a   :  { %v10157_v57 = vcombine.high %v4666_v51, %v4670_v40 }
 0x60c   :  { %6108 = vmatpush2.bf16.msra.mxu0 %v10058_v52  ;;  %6149 = vmatpush2.bf16.msra.mxu1 %v10186_v55  ;;  %v10036_v52 = vcombine.low %v4546_v32, %v4550_v36  ;;  %v10164_v55 = vcombine.low %v4674_v38, %v4678_v41  ;;  %v4626_v32 = vld [vmem:[#allocation13 + $0x408] sm:$0xff] }
 0x60d   :  { %6109 = vmatprep.subr.bf16.mxu0 %v10051_v23  ;;  %6150 = vmatprep.subr.bf16.mxu1 %v10179_v0  ;;  %v4658_v23 = vld [vmem:[#allocation13 + $0x508] sm:$0xff]  ;;  %v10021_v0 = vcombine.high %v4530_v58, %v4534_v59 }
 0x60e   :  { %v10149_v1 = vcombine.high %v4658_v23, %v4662_v62  ;;  %v4738_v58 = vld [vmem:[#allocation13 + $0x788] sm:$0xff] }
 0x60f   :  { %v4742_v59 = vld [vmem:[#allocation13 + $0x7a8] sm:$0xff] }
 0x610   :  { %6110 = vmatpush2.bf16.msra.mxu0 %v10050_v63  ;;  %6151 = vmatpush2.bf16.msra.mxu1 %v10178_v19  ;;  %v10028_v63 = vcombine.low %v4538_v47, %v4542_v50  ;;  %v10156_v19 = vcombine.low %v4666_v51, %v4670_v40  ;;  %v4618_v47 = vld [vmem:[#allocation13 + $0x3c8] sm:$0xff] }
 0x611   :  { %6161 = vmatprep.subr.bf16.mxu0 %v10045_v11  ;;  %6202 = vmatprep.subr.bf16.mxu1 %v10173_v7  ;;  %v4654_v11 = vld [vmem:[#allocation13 + $0x4e8] sm:$0xff]  ;;  %v10013_v7 = vcombine.high %v4522_v2, %v4526_v3 }
 0x612   :  { %v4750_v50 = vld [vmem:[#allocation13 + $0x7e8] sm:$0xff] }
 0x693   :  { %v4445_v24 = vpop.f32.mrf.mxu0  ;;  %v4486_v14 = vpop.f32.mrf.mxu1 }
 0x694   :  { %v4446_v60 = vadd.f32 %v4445_v24, %v4074_v17  ;;  %v4487_v37 = vadd.f32 %v4486_v14, %v4082_v18  ;;  %v4514_v17 = vld [vmem:[#allocation13 + $0x88] sm:$0xff]  ;;  %v10012_v24 = vcombine.low %v4522_v2, %v4526_v3 }
 0x695   :  { %v4447_v25 = vpop.f32.mrf.mxu0  ;;  %v4488_v20 = vpop.f32.mrf.mxu1  ;;  %v4518_v18 = vld [vmem:[#allocation13 + $0xa8] sm:$0xff] }
 0x696   :  { %v4448_v26 = vadd.f32 %v4447_v25, %v4078_v21  ;;  %v4489_v27 = vadd.f32 %v4488_v20, %v4086_v22  ;;  %v4493_v54 = vmax.f32 %v4446_v60, 0.0  ;;  %v4495_v28 = vmax.f32 %v4487_v37, 0.0  ;;  %v4642_v21 = vld [vmem:[#allocation13 + $0x488] sm:$0xff] }
 0x697   :  { %v4449_v29 = vpop.f32.mrf.mxu0  ;;  %v4490_v56 = vpop.f32.mrf.mxu1  ;;  %v4646_v22 = vld [vmem:[#allocation13 + $0x4a8] sm:$0xff]  ;;  %v10005_v60 = vcombine.high %v4514_v17, %v4518_v18 }
 0x698   :  { %v4494_v30 = vmax.f32 %v4448_v26, 0.0  ;;  %v4496_v31 = vmax.f32 %v4489_v27, 0.0  ;;  %v12633_v45 = vpack.c.bf16 %v4493_v54, %v4493_v54  ;;  %v12635_v46 = vpack.c.bf16 %v4495_v28, %v4495_v28  ;;  %v4506_v25 = vld [vmem:[#allocation13 + $0x48] sm:$0xff] }
 0x699   :  { %v4450_v33 = vpop.f32.mrf.mxu0  ;;  %v4491_v34 = vpop.f32.mrf.mxu1  ;;  %v10133_v37 = vcombine.high %v4642_v21, %v4646_v22  ;;  %v4510_v20 = vld [vmem:[#allocation13 + $0x68] sm:$0xff]  ;;  %v10004_v54 = vcombine.low %v4514_v17, %v4518_v18  ;;  %v10132_v28 = vcombine.low %v4642_v21, %v4646_v22 }
 0x69a   :  { %v12629_v61 = vpack.c.bf16 %v4494_v30, %v4494_v30  ;;  %v12631_v43 = vpack.c.bf16 %v4496_v31, %v4496_v31  ;;  %v4634_v26 = vld [vmem:[#allocation13 + $0x448] sm:$0xff]  ;;  %v9997_v29 = vcombine.high %v4506_v25, %v4510_v20  ;;  %v9996_v34 = vcombine.low %v4506_v25, %v4510_v20 }
 0x69b   :  { %v4638_v27 = vld [vmem:[#allocation13 + $0x468] sm:$0xff] }
 0x69c   :  { %6111 = vmatprep.mubr.bf16.mxu0 %v12629_v61  ;;  %6152 = vmatprep.mubr.bf16.mxu1 %v12631_v43  ;;  %v10125_v56 = vcombine.high %v4634_v26, %v4638_v27  ;;  %v4498_v30 = vld [vmem:[#allocation13 + $0x8] sm:$0xff]  ;;  %v10124_v36 = vcombine.low %v4634_v26, %v4638_v27 }
 0x69d   :  { %6112 = vmatmul.mubr.bf16.vlgmr.msra.gmra.mxu0 %v12633_v45  ;;  %6153 = vmatmul.mubr.bf16.vlgmr.msra.gmra.mxu1 %v12635_v46  ;;  %v4502_v31 = vld [vmem:[#allocation13 + $0x28] sm:$0xff] }
 0x69e   :  { %6162 = vmatpush1.bf16.msra.mxu0 %v10044_v4  ;;  %6203 = vmatpush1.bf16.msra.mxu1 %v10172_v6  ;;  %v4650_v4 = vld [vmem:[#allocation13 + $0x4c8] sm:$0xff]  ;;  %v10148_v6 = vcombine.low %v4658_v23, %v4662_v62  ;;  %v9989_v38 = vcombine.high %v4498_v30, %v4502_v31  ;;  %v9988_v51 = vcombine.low %v4498_v30, %v4502_v31 }
 0x69f   :  { %6193 = vmatprep.mubr.bf16.mxu0 %v12629_v61  ;;  %6234 = vmatprep.mubr.bf16.mxu1 %v12631_v43  ;;  %v10141_v8 = vcombine.high %v4650_v4, %v4654_v11  ;;  %v10140_v14 = vcombine.low %v4650_v4, %v4654_v11  ;;  %v4630_v33 = vld [vmem:[#allocation13 + $0x428] sm:$0xff]  ;;  %v10228_v11 = vcombine.low %v4738_v58, %v4742_v59 }
 0x6a0   :  { %6163 = vmatprep.subr.bf16.mxu0 %v10037_v48  ;;  %6204 = vmatprep.subr.bf16.mxu1 %v10165_v49  ;;  %v10117_v41 = vcombine.high %v4626_v32, %v4630_v33  ;;  %v4622_v48 = vld [vmem:[#allocation13 + $0x3e8] sm:$0xff]  ;;  %v10116_v40 = vcombine.low %v4626_v32, %v4630_v33 }
 0x6a1   :  { %v4746_v49 = vld [vmem:[#allocation13 + $0x7c8] sm:$0xff]  ;;  %v10108_v23 = vcombine.low %v4618_v47, %v4622_v48 }
 0x6a2   :  { %6164 = vmatpush1.bf16.msra.mxu0 %v10036_v52  ;;  %6205 = vmatpush1.bf16.msra.mxu1 %v10164_v55  ;;  %v10109_v52 = vcombine.high %v4618_v47, %v4622_v48  ;;  %v10237_v55 = vcombine.high %v4746_v49, %v4750_v50  ;;  %v10236_v62 = vcombine.low %v4746_v49, %v4750_v50  ;;  %v4730_v2 = vld [vmem:[#allocation13 + $0x748] sm:$0xff] }
 0x6a3   :  { %6165 = vmatprep.subr.bf16.mxu0 %v10029_v53  ;;  %6206 = vmatprep.subr.bf16.mxu1 %v10157_v57  ;;  %v4610_v53 = vld [vmem:[#allocation13 + $0x388] sm:$0xff] }
 0x6a4   :  { %v4614_v57 = vld [vmem:[#allocation13 + $0x3a8] sm:$0xff] }
 0x6a5   :  { %v4734_v3 = vld [vmem:[#allocation13 + $0x768] sm:$0xff]  ;;  %v10100_v4 = vcombine.low %v4610_v53, %v4614_v57 }
 0x6a6   :  { %6166 = vmatpush1.bf16.msra.mxu0 %v10028_v63  ;;  %6207 = vmatpush1.bf16.msra.mxu1 %v10156_v19  ;;  %v10101_v63 = vcombine.high %v4610_v53, %v4614_v57  ;;  %v10229_v19 = vcombine.high %v4738_v58, %v4742_v59  ;;  %v4722_v17 = vld [vmem:[#allocation13 + $0x708] sm:$0xff]  ;;  %v10220_v22 = vcombine.low %v4730_v2, %v4734_v3 }
 0x6a7   :  { %6167 = vmatprep.subr.bf16.mxu0 %v10021_v0  ;;  %6208 = vmatprep.subr.bf16.mxu1 %v10149_v1  ;;  %v4602_v0 = vld [vmem:[#allocation13 + $0x348] sm:$0xff] }
 0x6a8   :  { %v4606_v1 = vld [vmem:[#allocation13 + $0x368] sm:$0xff] }
 0x6a9   :  { %v4726_v18 = vld [vmem:[#allocation13 + $0x728] sm:$0xff]  ;;  %v10092_v21 = vcombine.low %v4602_v0, %v4606_v1 }
 0x6aa   :  { %6168 = vmatpush1.bf16.msra.mxu0 %v10020_v5  ;;  %6209 = vmatpush1.bf16.msra.mxu1 %v10148_v6  ;;  %v10093_v5 = vcombine.high %v4602_v0, %v4606_v1  ;;  %v10221_v6 = vcombine.high %v4730_v2, %v4734_v3  ;;  %v4714_v25 = vld [vmem:[#allocation13 + $0x6c8] sm:$0xff]  ;;  %v10212_v27 = vcombine.low %v4722_v17, %v4726_v18  ;;  %v4683_v0 = vld [vmem:[#allocation13 + $0x5d0] sm:$0xff] }
 0x6ab   :  { %6169 = vmatprep.subr.bf16.mxu0 %v10013_v7  ;;  %6210 = vmatprep.subr.bf16.mxu1 %v10141_v8  ;;  %v4594_v7 = vld [vmem:[#allocation13 + $0x308] sm:$0xff]  ;;  %v4687_v1 = vld [vmem:[#allocation13 + $0x5f0] sm:$0xff] }
 0x6ac   :  { %v4598_v8 = vld [vmem:[#allocation13 + $0x328] sm:$0xff] }
 0x6ad   :  { %v4718_v20 = vld [vmem:[#allocation13 + $0x6e8] sm:$0xff]  ;;  %v10084_v26 = vcombine.low %v4594_v7, %v4598_v8 }
 0x6ae   :  { %6170 = vmatpush1.bf16.msra.mxu0 %v10012_v24  ;;  %6211 = vmatpush1.bf16.msra.mxu1 %v10140_v14  ;;  %v10085_v24 = vcombine.high %v4594_v7, %v4598_v8  ;;  %v10213_v14 = vcombine.high %v4722_v17, %v4726_v18  ;;  %v4706_v30 = vld [vmem:[#allocation13 + $0x688] sm:$0xff]  ;;  %v10204_v33 = vcombine.low %v4714_v25, %v4718_v20  ;;  %v4675_v7 = vld [vmem:[#allocation13 + $0x590] sm:$0xff] }
 0x6af   :  { %6171 = vmatprep.subr.bf16.mxu0 %v10005_v60  ;;  %6212 = vmatprep.subr.bf16.mxu1 %v10133_v37  ;;  %v4586_v60 = vld [vmem:[#allocation13 + $0x2c8] sm:$0xff]  ;;  %v4679_v8 = vld [vmem:[#allocation13 + $0x5b0] sm:$0xff]  ;;  %v10174_v18 = vcombine.low %v4683_v0, %v4687_v1 }
 0x6b0   :  { %v4590_v37 = vld [vmem:[#allocation13 + $0x2e8] sm:$0xff] }
 0x6b1   :  { %v4710_v31 = vld [vmem:[#allocation13 + $0x6a8] sm:$0xff]  ;;  %v10076_v32 = vcombine.low %v4586_v60, %v4590_v37 }
 0x6b2   :  { %6172 = vmatpush1.bf16.msra.mxu0 %v10004_v54  ;;  %6213 = vmatpush1.bf16.msra.mxu1 %v10132_v28  ;;  %v10077_v54 = vcombine.high %v4586_v60, %v4590_v37  ;;  %v10205_v28 = vcombine.high %v4714_v25, %v4718_v20  ;;  %v4698_v47 = vld [vmem:[#allocation13 + $0x648] sm:$0xff]  ;;  %v10196_v50 = vcombine.low %v4706_v30, %v4710_v31  ;;  %v4667_v60 = vld [vmem:[#allocation13 + $0x550] sm:$0xff] }
 0x6b3   :  { %6173 = vmatprep.subr.bf16.mxu0 %v9997_v29  ;;  %6214 = vmatprep.subr.bf16.mxu1 %v10125_v56  ;;  %v4578_v29 = vld [vmem:[#allocation13 + $0x288] sm:$0xff]  ;;  %v4671_v37 = vld [vmem:[#allocation13 + $0x570] sm:$0xff]  ;;  %v10166_v20 = vcombine.low %v4675_v7, %v4679_v8 }
 0x6b4   :  { %v4582_v56 = vld [vmem:[#allocation13 + $0x2a8] sm:$0xff] }
 0x6b5   :  { %v4702_v48 = vld [vmem:[#allocation13 + $0x668] sm:$0xff]  ;;  %v10068_v49 = vcombine.low %v4578_v29, %v4582_v56 }
 0x6b6   :  { %6174 = vmatpush1.bf16.msra.mxu0 %v9996_v34  ;;  %6215 = vmatpush1.bf16.msra.mxu1 %v10124_v36  ;;  %v10069_v34 = vcombine.high %v4578_v29, %v4582_v56  ;;  %v10197_v36 = vcombine.high %v4706_v30, %v4710_v31  ;;  %v4690_v53 = vld [vmem:[#allocation13 + $0x608] sm:$0xff]  ;;  %v10188_v59 = vcombine.low %v4698_v47, %v4702_v48  ;;  %v4659_v29 = vld [vmem:[#allocation13 + $0x510] sm:$0xff] }
 0x6b7   :  { %6175 = vmatprep.subr.bf16.mxu0 %v9989_v38  ;;  %6216 = vmatprep.subr.bf16.mxu1 %v10117_v41  ;;  %v4570_v38 = vld [vmem:[#allocation13 + $0x248] sm:$0xff]  ;;  %v4663_v56 = vld [vmem:[#allocation13 + $0x530] sm:$0xff]  ;;  %v10158_v31 = vcombine.low %v4667_v60, %v4671_v37 }
 0x6b8   :  { %v4574_v41 = vld [vmem:[#allocation13 + $0x268] sm:$0xff] }
 0x6b9   :  { %v4694_v57 = vld [vmem:[#allocation13 + $0x628] sm:$0xff]  ;;  %v10060_v58 = vcombine.low %v4570_v38, %v4574_v41 }
 0x6ba   :  { %6176 = vmatpush1.bf16.msra.mxu0 %v9988_v51  ;;  %6217 = vmatpush1.bf16.msra.mxu1 %v10116_v40  ;;  %v10061_v51 = vcombine.high %v4570_v38, %v4574_v41  ;;  %v10189_v40 = vcombine.high %v4698_v47, %v4702_v48  ;;  %v10180_v3 = vcombine.low %v4690_v53, %v4694_v57  ;;  %v4651_v38 = vld [vmem:[#allocation13 + $0x4d0] sm:$0xff] }
 0x6bb   :  { %6177 = vmatprep.subr.bf16.mxu0 %v10109_v52  ;;  %6218 = vmatprep.subr.bf16.mxu1 %v10237_v55  ;;  %v4562_v52 = vld [vmem:[#allocation13 + $0x208] sm:$0xff]  ;;  %v4655_v41 = vld [vmem:[#allocation13 + $0x4f0] sm:$0xff]  ;;  %v10150_v48 = vcombine.low %v4659_v29, %v4663_v56 }
 0x6bc   :  { %v4566_v55 = vld [vmem:[#allocation13 + $0x228] sm:$0xff] }
 0x6bd   :  { %v10052_v2 = vcombine.low %v4562_v52, %v4566_v55 }
 0x6be   :  { %6178 = vmatpush2.bf16.msra.mxu0 %v10108_v23  ;;  %6219 = vmatpush2.bf16.msra.mxu1 %v10236_v62  ;;  %v10053_v23 = vcombine.high %v4562_v52, %v4566_v55  ;;  %v10181_v62 = vcombine.high %v4690_v53, %v4694_v57  ;;  %v4643_v52 = vld [vmem:[#allocation13 + $0x490] sm:$0xff]  ;;  %v10142_v57 = vcombine.low %v4651_v38, %v4655_v41 }
 0x6bf   :  { %6179 = vmatprep.subr.bf16.mxu0 %v10101_v63  ;;  %6220 = vmatprep.subr.bf16.mxu1 %v10229_v19  ;;  %v4555_v63 = vld [vmem:[#allocation13 + $0x1d0] sm:$0xff] }
 0x6c0   :  { %v4559_v19 = vld [vmem:[#allocation13 + $0x1f0] sm:$0xff] }
 0x6c1   :  { %v10046_v17 = vcombine.low %v4555_v63, %v4559_v19  ;;  %v4647_v55 = vld [vmem:[#allocation13 + $0x4b0] sm:$0xff] }
 0x6c2   :  { %6180 = vmatpush2.bf16.msra.mxu0 %v10100_v4  ;;  %6221 = vmatpush2.bf16.msra.mxu1 %v10228_v11  ;;  %v10047_v4 = vcombine.high %v4555_v63, %v4559_v19  ;;  %v10175_v11 = vcombine.high %v4683_v0, %v4687_v1  ;;  %v4635_v63 = vld [vmem:[#allocation13 + $0x450] sm:$0xff]  ;;  %v10134_v1 = vcombine.low %v4643_v52, %v4647_v55 }
 0x6c3   :  { %6181 = vmatprep.subr.bf16.mxu0 %v10093_v5  ;;  %6222 = vmatprep.subr.bf16.mxu1 %v10221_v6  ;;  %v4547_v5 = vld [vmem:[#allocation13 + $0x190] sm:$0xff] }
 0x6c4   :  { %v4551_v6 = vld [vmem:[#allocation13 + $0x1b0] sm:$0xff] }
 0x6c5   :  { %v10038_v25 = vcombine.low %v4547_v5, %v4551_v6  ;;  %v4639_v19 = vld [vmem:[#allocation13 + $0x470] sm:$0xff] }
 0x6c6   :  { %6182 = vmatpush2.bf16.msra.mxu0 %v10092_v21  ;;  %6223 = vmatpush2.bf16.msra.mxu1 %v10220_v22  ;;  %v10039_v21 = vcombine.high %v4547_v5, %v4551_v6  ;;  %v10167_v22 = vcombine.high %v4675_v7, %v4679_v8  ;;  %v4627_v5 = vld [vmem:[#allocation13 + $0x410] sm:$0xff]  ;;  %v10126_v8 = vcombine.low %v4635_v63, %v4639_v19 }
 0x6c7   :  { %6183 = vmatprep.subr.bf16.mxu0 %v10085_v24  ;;  %6224 = vmatprep.subr.bf16.mxu1 %v10213_v14  ;;  %v4539_v24 = vld [vmem:[#allocation13 + $0x150] sm:$0xff] }
 0x6c8   :  { %v4543_v14 = vld [vmem:[#allocation13 + $0x170] sm:$0xff] }
 0x6c9   :  { %v10030_v30 = vcombine.low %v4539_v24, %v4543_v14  ;;  %v4631_v6 = vld [vmem:[#allocation13 + $0x430] sm:$0xff] }
 0x6ca   :  { %6184 = vmatpush2.bf16.msra.mxu0 %v10084_v26  ;;  %6225 = vmatpush2.bf16.msra.mxu1 %v10212_v27  ;;  %v10031_v26 = vcombine.high %v4539_v24, %v4543_v14  ;;  %v10159_v27 = vcombine.high %v4667_v60, %v4671_v37  ;;  %v4747_v24 = vld [vmem:[#allocation13 + $0x7d0] sm:$0xff]  ;;  %v10118_v37 = vcombine.low %v4627_v5, %v4631_v6 }
 0x6cb   :  { %6185 = vmatprep.subr.bf16.mxu0 %v10077_v54  ;;  %6226 = vmatprep.subr.bf16.mxu1 %v10205_v28  ;;  %v4531_v54 = vld [vmem:[#allocation13 + $0x110] sm:$0xff] }
 0x6cc   :  { %v4535_v28 = vld [vmem:[#allocation13 + $0x130] sm:$0xff] }
 0x6cd   :  { %v10022_v47 = vcombine.low %v4531_v54, %v4535_v28  ;;  %v4751_v14 = vld [vmem:[#allocation13 + $0x7f0] sm:$0xff] }
 0x6ce   :  { %6186 = vmatpush2.bf16.msra.mxu0 %v10076_v32  ;;  %6227 = vmatpush2.bf16.msra.mxu1 %v10204_v33  ;;  %v10023_v32 = vcombine.high %v4531_v54, %v4535_v28  ;;  %v10151_v33 = vcombine.high %v4659_v29, %v4663_v56  ;;  %v4739_v54 = vld [vmem:[#allocation13 + $0x790] sm:$0xff]  ;;  %v10238_v56 = vcombine.low %v4747_v24, %v4751_v14 }
 0x6cf   :  { %6187 = vmatprep.subr.bf16.mxu0 %v10069_v34  ;;  %6228 = vmatprep.subr.bf16.mxu1 %v10197_v36  ;;  %v4523_v34 = vld [vmem:[#allocation13 + $0xd0] sm:$0xff] }
 0x6d0   :  { %v4527_v36 = vld [vmem:[#allocation13 + $0xf0] sm:$0xff] }
 0x6d1   :  { %v10014_v53 = vcombine.low %v4523_v34, %v4527_v36  ;;  %v4743_v28 = vld [vmem:[#allocation13 + $0x7b0] sm:$0xff] }
 0x6d2   :  { %6188 = vmatpush2.bf16.msra.mxu0 %v10068_v49  ;;  %6229 = vmatpush2.bf16.msra.mxu1 %v10196_v50  ;;  %v10015_v49 = vcombine.high %v4523_v34, %v4527_v36  ;;  %v10143_v50 = vcombine.high %v4651_v38, %v4655_v41  ;;  %v4731_v34 = vld [vmem:[#allocation13 + $0x750] sm:$0xff]  ;;  %v10230_v41 = vcombine.low %v4739_v54, %v4743_v28 }
 0x6d3   :  { %6189 = vmatprep.subr.bf16.mxu0 %v10061_v51  ;;  %6230 = vmatprep.subr.bf16.mxu1 %v10189_v40  ;;  %v4515_v51 = vld [vmem:[#allocation13 + $0x90] sm:$0xff] }
 0x6d4   :  { %v4519_v40 = vld [vmem:[#allocation13 + $0xb0] sm:$0xff] }
 0x6d5   :  { %v10006_v0 = vcombine.low %v4515_v51, %v4519_v40  ;;  %v4735_v36 = vld [vmem:[#allocation13 + $0x770] sm:$0xff] }
 0x6d6   :  { %6190 = vmatpush2.bf16.msra.mxu0 %v10060_v58  ;;  %6231 = vmatpush2.bf16.msra.mxu1 %v10188_v59  ;;  %v10007_v58 = vcombine.high %v4515_v51, %v4519_v40  ;;  %v10135_v59 = vcombine.high %v4643_v52, %v4647_v55  ;;  %v4723_v51 = vld [vmem:[#allocation13 + $0x710] sm:$0xff]  ;;  %v10222_v55 = vcombine.low %v4731_v34, %v4735_v36 }
 0x6d7   :  { %6191 = vmatprep.subr.bf16.mxu0 %v10053_v23  ;;  %6232 = vmatprep.subr.bf16.mxu1 %v10181_v62  ;;  %v4507_v23 = vld [vmem:[#allocation13 + $0x50] sm:$0xff] }
 0x6d8   :  { %v4511_v62 = vld [vmem:[#allocation13 + $0x70] sm:$0xff] }
 0x6d9   :  { %v9998_v7 = vcombine.low %v4507_v23, %v4511_v62  ;;  %v4727_v40 = vld [vmem:[#allocation13 + $0x730] sm:$0xff] }
 0x6da   :  { %6192 = vmatpush2.bf16.msra.mxu0 %v10052_v2  ;;  %6233 = vmatpush2.bf16.msra.mxu1 %v10180_v3  ;;  %v9999_v2 = vcombine.high %v4507_v23, %v4511_v62  ;;  %v10127_v3 = vcombine.high %v4635_v63, %v4639_v19  ;;  %v4715_v23 = vld [vmem:[#allocation13 + $0x6d0] sm:$0xff]  ;;  %v10214_v19 = vcombine.low %v4723_v51, %v4727_v40 }
 0x6db   :  { %6243 = vmatprep.subr.bf16.mxu0 %v10047_v4  ;;  %6284 = vmatprep.subr.bf16.mxu1 %v10175_v11  ;;  %v4499_v4 = vld [vmem:[#allocation13 + $0x10] sm:$0xff] }
 0x6dc   :  { %v4503_v11 = vld [vmem:[#allocation13 + $0x30] sm:$0xff] }
 0x6dd   :  { %6194 = vmatmul.mubr.bf16.vlgmr.msra.gmra.mxu0 %v12633_v45  ;;  %6235 = vmatmul.mubr.bf16.vlgmr.msra.gmra.mxu1 %v12635_v46  ;;  %v9990_v60 = vcombine.low %v4499_v4, %v4503_v11  ;;  %v4719_v62 = vld [vmem:[#allocation13 + $0x6f0] sm:$0xff] }
 0x6de   :  { %6244 = vmatpush1.bf16.msra.mxu0 %v10046_v17  ;;  %6275 = vmatprep.mubr.bf16.mxu0 %v12629_v61  ;;  %v9991_v17 = vcombine.high %v4499_v4, %v4503_v11  ;;  %v4707_v4 = vld [vmem:[#allocation13 + $0x690] sm:$0xff] }
 0x6df   :  { %6285 = vmatpush1.bf16.msra.mxu1 %v10174_v18  ;;  %6316 = vmatprep.mubr.bf16.mxu1 %v12631_v43  ;;  %v10119_v18 = vcombine.high %v4627_v5, %v4631_v6  ;;  %v4711_v11 = vld [vmem:[#allocation13 + $0x6b0] sm:$0xff]  ;;  %v10206_v6 = vcombine.low %v4715_v23, %v4719_v62 }
 0x6e0   :  { %6245 = vmatprep.subr.bf16.mxu0 %v10039_v21  ;;  %6286 = vmatprep.subr.bf16.mxu1 %v10167_v22  ;;  %v4619_v21 = vld [vmem:[#allocation13 + $0x3d0] sm:$0xff] }
 0x6e1   :  { %v4623_v22 = vld [vmem:[#allocation13 + $0x3f0] sm:$0xff] }
 0x6e2   :  { %6246 = vmatpush1.bf16.msra.mxu0 %v10038_v25  ;;  %v10111_v25 = vcombine.high %v4619_v21, %v4623_v22  ;;  %v10110_v29 = vcombine.low %v4619_v21, %v4623_v22  ;;  %v4699_v21 = vld [vmem:[#allocation13 + $0x650] sm:$0xff] }
 0x6e3   :  { %6287 = vmatpush1.bf16.msra.mxu1 %v10166_v20  ;;  %6247 = vmatprep.subr.bf16.mxu0 %v10031_v26  ;;  %v10239_v20 = vcombine.high %v4747_v24, %v4751_v14  ;;  %v4611_v26 = vld [vmem:[#allocation13 + $0x390] sm:$0xff]  ;;  %v10198_v14 = vcombine.low %v4707_v4, %v4711_v11 }
 0x6e4   :  { %6288 = vmatprep.subr.bf16.mxu1 %v10159_v27  ;;  %v4615_v27 = vld [vmem:[#allocation13 + $0x3b0] sm:$0xff] }
 0x6e5   :  { %v10102_v38 = vcombine.low %v4611_v26, %v4615_v27  ;;  %v4703_v22 = vld [vmem:[#allocation13 + $0x670] sm:$0xff] }
 0x6e6   :  { %6248 = vmatpush1.bf16.msra.mxu0 %v10030_v30  ;;  %v10103_v30 = vcombine.high %v4611_v26, %v4615_v27  ;;  %v4691_v26 = vld [vmem:[#allocation13 + $0x610] sm:$0xff] }
 0x6e7   :  { %6289 = vmatpush1.bf16.msra.mxu1 %v10158_v31  ;;  %6249 = vmatprep.subr.bf16.mxu0 %v10023_v32  ;;  %v10231_v31 = vcombine.high %v4739_v54, %v4743_v28  ;;  %v4603_v32 = vld [vmem:[#allocation13 + $0x350] sm:$0xff]  ;;  %v10190_v28 = vcombine.low %v4699_v21, %v4703_v22 }
 0x6e8   :  { %6290 = vmatprep.subr.bf16.mxu1 %v10151_v33  ;;  %v4607_v33 = vld [vmem:[#allocation13 + $0x370] sm:$0xff] }
 0x6e9   :  { %v10094_v52 = vcombine.low %v4603_v32, %v4607_v33  ;;  %v4695_v27 = vld [vmem:[#allocation13 + $0x630] sm:$0xff] }
 0x6ea   :  { %6250 = vmatpush1.bf16.msra.mxu0 %v10022_v47  ;;  %v10095_v47 = vcombine.high %v4603_v32, %v4607_v33  ;;  %v4684_v32 = vld [vmem:[#allocation13 + $0x5d8] sm:$0xff] }
 0x6eb   :  { %6291 = vmatpush1.bf16.msra.mxu1 %v10150_v48  ;;  %6251 = vmatprep.subr.bf16.mxu0 %v10015_v49  ;;  %v10223_v48 = vcombine.high %v4731_v34, %v4735_v36  ;;  %v4595_v49 = vld [vmem:[#allocation13 + $0x310] sm:$0xff]  ;;  %v4688_v33 = vld [vmem:[#allocation13 + $0x5f8] sm:$0xff]  ;;  %v10182_v36 = vcombine.low %v4691_v26, %v4695_v27 }
 0x6ec   :  { %6292 = vmatprep.subr.bf16.mxu1 %v10143_v50  ;;  %v4599_v50 = vld [vmem:[#allocation13 + $0x330] sm:$0xff] }
 0x6ed   :  { %v10086_v63 = vcombine.low %v4595_v49, %v4599_v50 }
 0x6ee   :  { %6252 = vmatpush1.bf16.msra.mxu0 %v10014_v53  ;;  %v10087_v53 = vcombine.high %v4595_v49, %v4599_v50  ;;  %v4676_v50 = vld [vmem:[#allocation13 + $0x598] sm:$0xff] }
 0x6ef   :  { %6293 = vmatpush1.bf16.msra.mxu1 %v10142_v57  ;;  %6253 = vmatprep.subr.bf16.mxu0 %v10007_v58  ;;  %v10215_v57 = vcombine.high %v4723_v51, %v4727_v40  ;;  %v4587_v58 = vld [vmem:[#allocation13 + $0x2d0] sm:$0xff]  ;;  %v4680_v51 = vld [vmem:[#allocation13 + $0x5b8] sm:$0xff]  ;;  %v10176_v40 = vcombine.low %v4684_v32, %v4688_v33 }
 0x6f0   :  { %6294 = vmatprep.subr.bf16.mxu1 %v10135_v59  ;;  %v4591_v59 = vld [vmem:[#allocation13 + $0x2f0] sm:$0xff] }
 0x6f1   :  { %v10078_v5 = vcombine.low %v4587_v58, %v4591_v59 }
 0x6f2   :  { %6254 = vmatpush1.bf16.msra.mxu0 %v10006_v0  ;;  %v10079_v0 = vcombine.high %v4587_v58, %v4591_v59  ;;  %v4668_v58 = vld [vmem:[#allocation13 + $0x558] sm:$0xff] }
 0x6f3   :  { %6295 = vmatpush1.bf16.msra.mxu1 %v10134_v1  ;;  %6255 = vmatprep.subr.bf16.mxu0 %v9999_v2  ;;  %v10207_v1 = vcombine.high %v4715_v23, %v4719_v62  ;;  %v4579_v2 = vld [vmem:[#allocation13 + $0x290] sm:$0xff]  ;;  %v4672_v59 = vld [vmem:[#allocation13 + $0x578] sm:$0xff]  ;;  %v10168_v62 = vcombine.low %v4676_v50, %v4680_v51 }
 0x6f4   :  { %6296 = vmatprep.subr.bf16.mxu1 %v10127_v3  ;;  %v4583_v3 = vld [vmem:[#allocation13 + $0x2b0] sm:$0xff] }
 0x6f5   :  { %v10070_v24 = vcombine.low %v4579_v2, %v4583_v3 }
 0x6f6   :  { %6256 = vmatpush1.bf16.msra.mxu0 %v9998_v7  ;;  %v10071_v7 = vcombine.high %v4579_v2, %v4583_v3  ;;  %v4660_v2 = vld [vmem:[#allocation13 + $0x518] sm:$0xff] }
 0x6f7   :  { %6297 = vmatpush1.bf16.msra.mxu1 %v10126_v8  ;;  %6257 = vmatprep.subr.bf16.mxu0 %v9991_v17  ;;  %v10199_v8 = vcombine.high %v4707_v4, %v4711_v11  ;;  %v4571_v17 = vld [vmem:[#allocation13 + $0x250] sm:$0xff]  ;;  %v4664_v3 = vld [vmem:[#allocation13 + $0x538] sm:$0xff]  ;;  %v10160_v11 = vcombine.low %v4668_v58, %v4672_v59 }
 0x6f8   :  { %6298 = vmatprep.subr.bf16.mxu1 %v10119_v18  ;;  %v4575_v18 = vld [vmem:[#allocation13 + $0x270] sm:$0xff] }
 0x6f9   :  { %v10062_v54 = vcombine.low %v4571_v17, %v4575_v18 }
 0x6fa   :  { %6258 = vmatpush1.bf16.msra.mxu0 %v9990_v60  ;;  %v10063_v60 = vcombine.high %v4571_v17, %v4575_v18  ;;  %v4656_v17 = vld [vmem:[#allocation13 + $0x4f8] sm:$0xff]  ;;  %v10152_v18 = vcombine.low %v4660_v2, %v4664_v3 }
 0x6fb   :  { %6299 = vmatpush1.bf16.msra.mxu1 %v10118_v37  ;;  %6259 = vmatprep.subr.bf16.mxu0 %v10111_v25  ;;  %v10191_v37 = vcombine.high %v4699_v21, %v4703_v22  ;;  %v4563_v25 = vld [vmem:[#allocation13 + $0x210] sm:$0xff] }
 0x6fc   :  { %6300 = vmatprep.subr.bf16.mxu1 %v10239_v20  ;;  %v4567_v20 = vld [vmem:[#allocation13 + $0x230] sm:$0xff] }
 0x6fd   :  { %v10054_v34 = vcombine.low %v4563_v25, %v4567_v20 }
 0x6fe   :  { %6260 = vmatpush2.bf16.msra.mxu0 %v10110_v29  ;;  %v10055_v29 = vcombine.high %v4563_v25, %v4567_v20 }
 0x6ff   :  { %6301 = vmatpush2.bf16.msra.mxu1 %v10238_v56  ;;  %6261 = vmatprep.subr.bf16.mxu0 %v10103_v30  ;;  %v10183_v56 = vcombine.high %v4691_v26, %v4695_v27  ;;  %v4556_v30 = vld [vmem:[#allocation13 + $0x1d8] sm:$0xff] }
 0x700   :  { %6302 = vmatprep.subr.bf16.mxu1 %v10231_v31  ;;  %v4560_v31 = vld [vmem:[#allocation13 + $0x1f8] sm:$0xff] }
 0x701   :  { %v10048_v49 = vcombine.low %v4556_v30, %v4560_v31 }
 0x702   :  { %6262 = vmatpush2.bf16.msra.mxu0 %v10102_v38  ;;  %v10049_v38 = vcombine.high %v4556_v30, %v4560_v31 }
 0x703   :  { %6303 = vmatpush2.bf16.msra.mxu1 %v10230_v41  ;;  %6263 = vmatprep.subr.bf16.mxu0 %v10095_v47  ;;  %v10177_v41 = vcombine.high %v4684_v32, %v4688_v33  ;;  %v4548_v47 = vld [vmem:[#allocation13 + $0x198] sm:$0xff] }
 0x704   :  { %6304 = vmatprep.subr.bf16.mxu1 %v10223_v48  ;;  %v4552_v48 = vld [vmem:[#allocation13 + $0x1b8] sm:$0xff] }
 0x705   :  { %v10040_v23 = vcombine.low %v4548_v47, %v4552_v48 }
 0x706   :  { %6264 = vmatpush2.bf16.msra.mxu0 %v10094_v52  ;;  %v10041_v52 = vcombine.high %v4548_v47, %v4552_v48 }
 0x707   :  { %6305 = vmatpush2.bf16.msra.mxu1 %v10222_v55  ;;  %6265 = vmatprep.subr.bf16.mxu0 %v10087_v53  ;;  %v4540_v55 = vld [vmem:[#allocation13 + $0x158] sm:$0xff] }
 0x708   :  { %6306 = vmatprep.subr.bf16.mxu1 %v10215_v57  ;;  %v4544_v53 = vld [vmem:[#allocation13 + $0x178] sm:$0xff]  ;;  %v10169_v57 = vcombine.high %v4676_v50, %v4680_v51 }
 0x709   :  { %v10032_v4 = vcombine.low %v4540_v55, %v4544_v53  ;;  %v4620_v51 = vld [vmem:[#allocation13 + $0x3d8] sm:$0xff] }
 0x70a   :  { %6266 = vmatpush2.bf16.msra.mxu0 %v10086_v63  ;;  %v10033_v63 = vcombine.high %v4540_v55, %v4544_v53  ;;  %v4752_v55 = vld [vmem:[#allocation13 + $0x7f8] sm:$0xff] }
 0x70b   :  { %6307 = vmatpush2.bf16.msra.mxu1 %v10214_v19  ;;  %6267 = vmatprep.subr.bf16.mxu0 %v10079_v0  ;;  %v10161_v19 = vcombine.high %v4668_v58, %v4672_v59  ;;  %v4532_v0 = vld [vmem:[#allocation13 + $0x118] sm:$0xff] }
 0x70c   :  { %6308 = vmatprep.subr.bf16.mxu1 %v10207_v1  ;;  %v4536_v1 = vld [vmem:[#allocation13 + $0x138] sm:$0xff] }
 0x70e   :  { %6268 = vmatpush2.bf16.msra.mxu0 %v10078_v5  ;;  %v10025_v5 = vcombine.high %v4532_v0, %v4536_v1 }
 0x70f   :  { %6309 = vmatpush2.bf16.msra.mxu1 %v10206_v6  ;;  %6269 = vmatprep.subr.bf16.mxu0 %v10071_v7  ;;  %v4524_v6 = vld [vmem:[#allocation13 + $0xd8] sm:$0xff] }
 0x710   :  { %6310 = vmatprep.subr.bf16.mxu1 %v10199_v8  ;;  %v4528_v7 = vld [vmem:[#allocation13 + $0xf8] sm:$0xff] }
 0x711   :  { %v4652_v8 = vld [vmem:[#allocation13 + $0x4d8] sm:$0xff]  ;;  %v10017_v21 = vcombine.high %v4524_v6, %v4528_v7  ;;  %v10016_v25 = vcombine.low %v4524_v6, %v4528_v7 }
 0x712   :  { %6270 = vmatpush2.bf16.msra.mxu0 %v10070_v24  ;;  %v10145_v22 = vcombine.high %v4652_v8, %v4656_v17  ;;  %v4516_v24 = vld [vmem:[#allocation13 + $0x98] sm:$0xff]  ;;  %v10144_v20 = vcombine.low %v4652_v8, %v4656_v17 }
 0x713   :  { %6311 = vmatpush2.bf16.msra.mxu1 %v10198_v14  ;;  %6271 = vmatprep.subr.bf16.mxu0 %v10063_v60  ;;  %v4520_v14 = vld [vmem:[#allocation13 + $0xb8] sm:$0xff] }
 0x714   :  { %6312 = vmatprep.subr.bf16.mxu1 %v10191_v37  ;;  %v4644_v60 = vld [vmem:[#allocation13 + $0x498] sm:$0xff]  ;;  %v10009_v26 = vcombine.high %v4516_v24, %v4520_v14  ;;  %v10008_v30 = vcombine.low %v4516_v24, %v4520_v14 }
 0x715   :  { %v4648_v37 = vld [vmem:[#allocation13 + $0x4b8] sm:$0xff] }
 0x716   :  { %6272 = vmatpush2.bf16.msra.mxu0 %v10062_v54  ;;  %v10137_v27 = vcombine.high %v4644_v60, %v4648_v37  ;;  %v4508_v54 = vld [vmem:[#allocation13 + $0x58] sm:$0xff]  ;;  %v10136_v31 = vcombine.low %v4644_v60, %v4648_v37 }
 0x717   :  { %6313 = vmatpush2.bf16.msra.mxu1 %v10190_v28  ;;  %6273 = vmatprep.subr.bf16.mxu0 %v10055_v29  ;;  %v4512_v28 = vld [vmem:[#allocation13 + $0x78] sm:$0xff] }
 0x718   :  { %6314 = vmatprep.subr.bf16.mxu1 %v10183_v56  ;;  %v4636_v29 = vld [vmem:[#allocation13 + $0x458] sm:$0xff]  ;;  %v10001_v32 = vcombine.high %v4508_v54, %v4512_v28  ;;  %v10000_v47 = vcombine.low %v4508_v54, %v4512_v28 }
 0x719   :  { %v4640_v56 = vld [vmem:[#allocation13 + $0x478] sm:$0xff] }
 0x71a   :  { %6274 = vmatpush2.bf16.msra.mxu0 %v10054_v34  ;;  %v10129_v33 = vcombine.high %v4636_v29, %v4640_v56  ;;  %v4500_v34 = vld [vmem:[#allocation13 + $0x18] sm:$0xff]  ;;  %v10128_v48 = vcombine.low %v4636_v29, %v4640_v56 }
 0x71b   :  { %6315 = vmatpush2.bf16.msra.mxu1 %v10182_v36  ;;  %6325 = vmatprep.subr.bf16.mxu0 %v10049_v38  ;;  %v4504_v36 = vld [vmem:[#allocation13 + $0x38] sm:$0xff] }
 0x71c   :  { %6366 = vmatprep.subr.bf16.mxu1 %v10177_v41  ;;  %v4628_v38 = vld [vmem:[#allocation13 + $0x418] sm:$0xff]  ;;  %v9992_v53 = vcombine.low %v4500_v34, %v4504_v36 }
 0x71d   :  { %6276 = vmatmul.mubr.bf16.vlgmr.msra.gmra.mxu0 %v12633_v45  ;;  %v4632_v41 = vld [vmem:[#allocation13 + $0x438] sm:$0xff] }
 0x71e   :  { %6317 = vmatmul.mubr.bf16.vlgmr.msra.gmra.mxu1 %v12635_v46  ;;  %6326 = vmatpush1.bf16.msra.mxu0 %v10048_v49  ;;  %v9993_v49 = vcombine.high %v4500_v34, %v4504_v36  ;;  %v10121_v50 = vcombine.high %v4628_v38, %v4632_v41 }
 0x71f   :  { %6357 = vmatprep.mubr.bf16.mxu0 %v12629_v61  ;;  %6367 = vmatpush1.bf16.msra.mxu1 %v10176_v40  ;;  %v10153_v61 = vcombine.high %v4660_v2, %v4664_v3  ;;  %v4624_v40 = vld [vmem:[#allocation13 + $0x3f8] sm:$0xff] }
 0x720   :  { %6398 = vmatprep.mubr.bf16.mxu1 %v12631_v43  ;;  %6327 = vmatprep.subr.bf16.mxu0 %v10041_v52  ;;  %v10024_v43 = vcombine.low %v4532_v0, %v4536_v1  ;;  %v4748_v52 = vld [vmem:[#allocation13 + $0x7d8] sm:$0xff]  ;;  %v10113_v58 = vcombine.high %v4620_v51, %v4624_v40  ;;  %v10112_v0 = vcombine.low %v4620_v51, %v4624_v40 }
 0x721   :  { %6368 = vmatprep.subr.bf16.mxu1 %v10169_v57  ;;  %v10120_v57 = vcombine.low %v4628_v38, %v4632_v41  ;;  %v10241_v59 = vcombine.high %v4748_v52, %v4752_v55  ;;  %v10240_v1 = vcombine.low %v4748_v52, %v4752_v55 }
 0x722   :  { %6328 = vmatpush1.bf16.msra.mxu0 %v10040_v23  ;;  %v4612_v23 = vld [vmem:[#allocation13 + $0x398] sm:$0xff] }
 0x723   :  { %6369 = vmatpush1.bf16.msra.mxu1 %v10168_v62  ;;  %6329 = vmatprep.subr.bf16.mxu0 %v10033_v63  ;;  %v4616_v62 = vld [vmem:[#allocation13 + $0x3b8] sm:$0xff] }
 0x724   :  { %6370 = vmatprep.subr.bf16.mxu1 %v10161_v19  ;;  %v4740_v63 = vld [vmem:[#allocation13 + $0x798] sm:$0xff]  ;;  %v10105_v2 = vcombine.high %v4612_v23, %v4616_v62  ;;  %v10104_v6 = vcombine.low %v4612_v23, %v4616_v62 }
 0x725   :  { %v4744_v19 = vld [vmem:[#allocation13 + $0x7b8] sm:$0xff] }
 0x726   :  { %6330 = vmatpush1.bf16.msra.mxu0 %v10032_v4  ;;  %v10233_v3 = vcombine.high %v4740_v63, %v4744_v19  ;;  %v4604_v4 = vld [vmem:[#allocation13 + $0x358] sm:$0xff]  ;;  %v10232_v7 = vcombine.low %v4740_v63, %v4744_v19 }
 0x727   :  { %6371 = vmatpush1.bf16.msra.mxu1 %v10160_v11  ;;  %6331 = vmatprep.subr.bf16.mxu0 %v10025_v5  ;;  %v4608_v11 = vld [vmem:[#allocation13 + $0x378] sm:$0xff] }
 0x728   :  { %6372 = vmatprep.subr.bf16.mxu1 %v10153_v61  ;;  %v4732_v5 = vld [vmem:[#allocation13 + $0x758] sm:$0xff]  ;;  %v10097_v8 = vcombine.high %v4604_v4, %v4608_v11  ;;  %v10096_v24 = vcombine.low %v4604_v4, %v4608_v11  ;;  %v12651_v11 = vld [vmem:[#allocation15] sm:$0xff] }
 0x729   :  { %v4736_v61 = vld [vmem:[#allocation13 + $0x778] sm:$0xff] }
 0x72a   :  { %6332 = vmatpush1.bf16.msra.mxu0 %v10024_v43  ;;  %v10225_v17 = vcombine.high %v4732_v5, %v4736_v61  ;;  %v4596_v43 = vld [vmem:[#allocation13 + $0x318] sm:$0xff]  ;;  %v10224_v14 = vcombine.low %v4732_v5, %v4736_v61 }
 0x72b   :  { %6373 = vmatpush1.bf16.msra.mxu1 %v10152_v18  ;;  %6333 = vmatprep.subr.bf16.mxu0 %v10017_v21  ;;  %v4600_v18 = vld [vmem:[#allocation13 + $0x338] sm:$0xff] }
 0x72c   :  { %6374 = vmatprep.subr.bf16.mxu1 %v10145_v22  ;;  %v4724_v21 = vld [vmem:[#allocation13 + $0x718] sm:$0xff]  ;;  %v10089_v60 = vcombine.high %v4596_v43, %v4600_v18  ;;  %v10088_v54 = vcombine.low %v4596_v43, %v4600_v18 }
 0x72d   :  { %v4728_v22 = vld [vmem:[#allocation13 + $0x738] sm:$0xff] }
 0x72e   :  { %6334 = vmatpush1.bf16.msra.mxu0 %v10016_v25  ;;  %v10217_v37 = vcombine.high %v4724_v21, %v4728_v22  ;;  %v4588_v25 = vld [vmem:[#allocation13 + $0x2d8] sm:$0xff]  ;;  %v10216_v28 = vcombine.low %v4724_v21, %v4728_v22 }
 0x72f   :  { %6375 = vmatpush1.bf16.msra.mxu1 %v10144_v20  ;;  %6335 = vmatprep.subr.bf16.mxu0 %v10009_v26  ;;  %v4592_v20 = vld [vmem:[#allocation13 + $0x2f8] sm:$0xff] }
 0x730   :  { %6376 = vmatprep.subr.bf16.mxu1 %v10137_v27  ;;  %v4716_v26 = vld [vmem:[#allocation13 + $0x6d8] sm:$0xff]  ;;  %v10081_v29 = vcombine.high %v4588_v25, %v4592_v20  ;;  %v10080_v34 = vcombine.low %v4588_v25, %v4592_v20 }
 0x731   :  { %v4720_v27 = vld [vmem:[#allocation13 + $0x6f8] sm:$0xff] }
 0x732   :  { %6336 = vmatpush1.bf16.msra.mxu0 %v10008_v30  ;;  %v10209_v56 = vcombine.high %v4716_v26, %v4720_v27  ;;  %v4580_v30 = vld [vmem:[#allocation13 + $0x298] sm:$0xff]  ;;  %v10208_v36 = vcombine.low %v4716_v26, %v4720_v27 }
 0x733   :  { %6377 = vmatpush1.bf16.msra.mxu1 %v10136_v31  ;;  %6337 = vmatprep.subr.bf16.mxu0 %v10001_v32  ;;  %v4584_v31 = vld [vmem:[#allocation13 + $0x2b8] sm:$0xff] }
 0x734   :  { %6378 = vmatprep.subr.bf16.mxu1 %v10129_v33  ;;  %v4708_v32 = vld [vmem:[#allocation13 + $0x698] sm:$0xff]  ;;  %v10073_v38 = vcombine.high %v4580_v30, %v4584_v31  ;;  %v10072_v51 = vcombine.low %v4580_v30, %v4584_v31 }
 0x735   :  { %v4712_v33 = vld [vmem:[#allocation13 + $0x6b8] sm:$0xff] }
 0x736   :  { %6338 = vmatpush1.bf16.msra.mxu0 %v10000_v47  ;;  %v10201_v41 = vcombine.high %v4708_v32, %v4712_v33  ;;  %v4572_v47 = vld [vmem:[#allocation13 + $0x258] sm:$0xff]  ;;  %v10200_v40 = vcombine.low %v4708_v32, %v4712_v33 }
 0x737   :  { %6379 = vmatpush1.bf16.msra.mxu1 %v10128_v48  ;;  %6339 = vmatprep.subr.bf16.mxu0 %v9993_v49  ;;  %v4576_v48 = vld [vmem:[#allocation13 + $0x278] sm:$0xff] }
 0x738   :  { %6380 = vmatprep.subr.bf16.mxu1 %v10121_v50  ;;  %v4700_v49 = vld [vmem:[#allocation13 + $0x658] sm:$0xff]  ;;  %v10065_v52 = vcombine.high %v4572_v47, %v4576_v48  ;;  %v10064_v23 = vcombine.low %v4572_v47, %v4576_v48 }
 0x739   :  { %v4704_v50 = vld [vmem:[#allocation13 + $0x678] sm:$0xff] }
 0x73a   :  { %6340 = vmatpush1.bf16.msra.mxu0 %v9992_v53  ;;  %v10193_v55 = vcombine.high %v4700_v49, %v4704_v50  ;;  %v4564_v53 = vld [vmem:[#allocation13 + $0x218] sm:$0xff]  ;;  %v10192_v62 = vcombine.low %v4700_v49, %v4704_v50 }
 0x73b   :  { %6381 = vmatpush1.bf16.msra.mxu1 %v10120_v57  ;;  %6341 = vmatprep.subr.bf16.mxu0 %v10113_v58  ;;  %v4568_v57 = vld [vmem:[#allocation13 + $0x238] sm:$0xff] }
 0x73c   :  { %6382 = vmatprep.subr.bf16.mxu1 %v10241_v59  ;;  %v4692_v58 = vld [vmem:[#allocation13 + $0x618] sm:$0xff]  ;;  %v10057_v63 = vcombine.high %v4564_v53, %v4568_v57 }
 0x73d   :  { %v4696_v59 = vld [vmem:[#allocation13 + $0x638] sm:$0xff] }
 0x73e   :  { %6342 = vmatpush2.bf16.msra.mxu0 %v10112_v0  ;;  %v10185_v19 = vcombine.high %v4692_v58, %v4696_v59  ;;  %v10056_v0 = vcombine.low %v4564_v53, %v4568_v57  ;;  %v11329_v4 = vld [vmem:[#allocation16 + $0xe0] ss:$16 sps:$4 sm:$0xff]   ;;  %v11334_v5 = vld [vmem:[#allocation16 + $0xc4] ss:$16 sps:$4 sm:$0xff]  }
 0x73f   :  { %6383 = vmatpush2.bf16.msra.mxu1 %v10240_v1  ;;  %6343 = vmatprep.subr.bf16.mxu0 %v10105_v2  ;;  %v10184_v1 = vcombine.low %v4692_v58, %v4696_v59  ;;  %v11331_v2 = vld [vmem:[#allocation16 + $0xe4] ss:$16 sps:$4 sm:$0xff]   ;;  %v11341_v61 = vld [vmem:[#allocation16 + $0x2e0] ss:$16 sps:$4 sm:$0xff]  }
 0x740   :  { %6384 = vmatprep.subr.bf16.mxu1 %v10233_v3  ;;  %v11343_v3 = vld [vmem:[#allocation16 + $0x2e4] ss:$16 sps:$4 sm:$0xff]   ;;  %v11332_v43 = vld [vmem:[#allocation16 + $0xc0] ss:$16 sps:$4 sm:$0xff]  }
 0x741   :  { %v11337_v22 = vld [vmem:[#allocation16 + $0xa4] ss:$16 sps:$4 sm:$0xff]   ;;  %v11335_v20 = vld [vmem:[#allocation16 + $0xa0] ss:$16 sps:$4 sm:$0xff]  }
 0x742   :  { %6344 = vmatpush2.bf16.msra.mxu0 %v10104_v6  ;;  %v4766_v6 = vrot.slane %v12651_v11, %v12481_v15  ;;  %v11338_v30 = vld [vmem:[#allocation16 + $0x80] ss:$16 sps:$4 sm:$0xff]   ;;  %v11346_v31 = vld [vmem:[#allocation16 + $0x64] ss:$16 sps:$4 sm:$0xff]  }
 0x743   :  { %6385 = vmatpush2.bf16.msra.mxu1 %v10232_v7  ;;  %6345 = vmatprep.subr.bf16.mxu0 %v10097_v8  ;;  %v11349_v7 = vld [vmem:[#allocation16 + $0x2c4] ss:$16 sps:$4 sm:$0xff]   ;;  %v11359_v32 = vld [vmem:[#allocation16 + $0x280] ss:$16 sps:$4 sm:$0xff]  }
 0x744   :  { %6386 = vmatprep.subr.bf16.mxu1 %v10225_v17  ;;  %v11367_v33 = vld [vmem:[#allocation16 + $0x264] ss:$16 sps:$4 sm:$0xff]   ;;  %v11350_v47 = vld [vmem:[#allocation16 + $0x40] ss:$16 sps:$4 sm:$0xff]  }
 0x745   :  { %v11358_v48 = vld [vmem:[#allocation16 + $0x24] ss:$16 sps:$4 sm:$0xff]   ;;  %v11371_v49 = vld [vmem:[#allocation16 + $0x240] ss:$16 sps:$4 sm:$0xff]  }
 0x746   :  { %6346 = vmatpush2.bf16.msra.mxu0 %v10096_v24  ;;  %v11347_v24 = vld [vmem:[#allocation16 + $0x2c0] ss:$16 sps:$4 sm:$0xff]   ;;  %v11379_v50 = vld [vmem:[#allocation16 + $0x224] ss:$16 sps:$4 sm:$0xff]  }
 0x747   :  { %6387 = vmatpush2.bf16.msra.mxu1 %v10224_v14  ;;  %6347 = vmatprep.subr.bf16.mxu0 %v10089_v60  ;;  %v11355_v60 = vld [vmem:[#allocation16 + $0x2a4] ss:$16 sps:$4 sm:$0xff]   ;;  %v11362_v53 = vld [vmem:[#allocation16] ss:$16 sps:$4 sm:$0xff]  }
 0x748   :  { %6388 = vmatprep.subr.bf16.mxu1 %v10217_v37  ;;  %v11370_v57 = vld [vmem:[#allocation16 + $0x1e4] ss:$16 sps:$4 sm:$0xff]   ;;  %v11383_v58 = vld [vmem:[#allocation16 + $0x200] ss:$16 sps:$4 sm:$0xff]  }
 0x749   :  { %v11391_v59 = vld [vmem:[#allocation16 + $0x3e4] ss:$16 sps:$4 sm:$0xff]  }
 0x74a   :  { %6348 = vmatpush2.bf16.msra.mxu0 %v10088_v54  ;;  %v11353_v54 = vld [vmem:[#allocation16 + $0x2a0] ss:$16 sps:$4 sm:$0xff]  }
 0x74b   :  { %6389 = vmatpush2.bf16.msra.mxu1 %v10216_v28  ;;  %6349 = vmatprep.subr.bf16.mxu0 %v10081_v29  ;;  %v11361_v29 = vld [vmem:[#allocation16 + $0x284] ss:$16 sps:$4 sm:$0xff]  }
 0x74c   :  { %6390 = vmatprep.subr.bf16.mxu1 %v10209_v56 }
 0x74e   :  { %6350 = vmatpush2.bf16.msra.mxu0 %v10080_v34  ;;  %v11344_v34 = vld [vmem:[#allocation16 + $0x60] ss:$16 sps:$4 sm:$0xff]  }
 0x74f   :  { %6391 = vmatpush2.bf16.msra.mxu1 %v10208_v36  ;;  %6351 = vmatprep.subr.bf16.mxu0 %v10073_v38  ;;  %v11352_v36 = vld [vmem:[#allocation16 + $0x44] ss:$16 sps:$4 sm:$0xff]   ;;  %v11365_v38 = vld [vmem:[#allocation16 + $0x260] ss:$16 sps:$4 sm:$0xff]  }
 0x750   :  { %6392 = vmatprep.subr.bf16.mxu1 %v10201_v41  ;;  %v11373_v41 = vld [vmem:[#allocation16 + $0x244] ss:$16 sps:$4 sm:$0xff]  }
 0x752   :  { %6352 = vmatpush2.bf16.msra.mxu0 %v10072_v51  ;;  %v11356_v51 = vld [vmem:[#allocation16 + $0x20] ss:$16 sps:$4 sm:$0xff]  }
 0x753   :  { %6393 = vmatpush2.bf16.msra.mxu1 %v10200_v40  ;;  %6353 = vmatprep.subr.bf16.mxu0 %v10065_v52  ;;  %v11364_v40 = vld [vmem:[#allocation16 + $0x4] ss:$16 sps:$4 sm:$0xff]   ;;  %v11377_v52 = vld [vmem:[#allocation16 + $0x220] ss:$16 sps:$4 sm:$0xff]  }
 0x754   :  { %6394 = vmatprep.subr.bf16.mxu1 %v10193_v55  ;;  %v11385_v55 = vld [vmem:[#allocation16 + $0x204] ss:$16 sps:$4 sm:$0xff]  }
 0x756   :  { %6354 = vmatpush2.bf16.msra.mxu0 %v10064_v23  ;;  %v11368_v23 = vld [vmem:[#allocation16 + $0x1e0] ss:$16 sps:$4 sm:$0xff]  }
 0x757   :  { %6395 = vmatpush2.bf16.msra.mxu1 %v10192_v62  ;;  %6355 = vmatprep.subr.bf16.mxu0 %v10057_v63  ;;  %v11376_v62 = vld [vmem:[#allocation16 + $0x1c4] ss:$16 sps:$4 sm:$0xff]   ;;  %v11389_v63 = vld [vmem:[#allocation16 + $0x3e0] ss:$16 sps:$4 sm:$0xff]  }
 0x758   :  { %6396 = vmatprep.subr.bf16.mxu1 %v10185_v19  ;;  %v11397_v19 = vld [vmem:[#allocation16 + $0x3c4] ss:$16 sps:$4 sm:$0xff]  }
 0x75a   :  { %6356 = vmatpush2.bf16.msra.mxu0 %v10056_v0  ;;  %v11374_v0 = vld [vmem:[#allocation16 + $0x1c0] ss:$16 sps:$4 sm:$0xff]  }
 0x75b   :  { %6397 = vmatpush2.bf16.msra.mxu1 %v10184_v1  ;;  %7981 = vmatprep.subr.bf16.mxu0 %v11331_v2  ;;  %v11382_v1 = vld [vmem:[#allocation16 + $0x1a4] ss:$16 sps:$4 sm:$0xff]   ;;  %v11395_v2 = vld [vmem:[#allocation16 + $0x3c0] ss:$16 sps:$4 sm:$0xff]  }
 0x75c   :  { %8022 = vmatprep.subr.bf16.mxu1 %v11343_v3  ;;  %v11403_v3 = vld [vmem:[#allocation16 + $0x3a4] ss:$16 sps:$4 sm:$0xff]  }
 0x75d   :  { %6358 = vmatmul.mubr.bf16.vlgmr.msra.gmra.mxu0 %v12633_v45  ;;  %v12656_v8 = vpop.f32.mrf.mxu0  ;;  %v12658_v17 = vpop.f32.mrf.mxu1 }
 0x75e   :  { %6399 = vmatmul.mubr.bf16.vlgmr.msra.gmra.mxu1 %v12635_v46  ;;  %7982 = vmatpush1.bf16.msra.mxu0 %v11329_v4  ;;  %v11340_v46 = vld [vmem:[#allocation16 + $0x84] ss:$16 sps:$4 sm:$0xff]   ;;  %v11380_v4 = vld [vmem:[#allocation16 + $0x1a0] ss:$16 sps:$4 sm:$0xff]  }
 0x75f   :  { %v6115_v18 = vpop.f32.mrf.mxu0  ;;  %v6156_v21 = vpop.f32.mrf.mxu1  ;;  %7983 = vmatprep.subr.bf16.mxu0 %v11334_v5  ;;  %8023 = vmatpush1.bf16.msra.mxu1 %v11341_v61  ;;  %v11388_v5 = vld [vmem:[#allocation16 + $0x184] ss:$16 sps:$4 sm:$0xff]   ;;  %v11401_v61 = vld [vmem:[#allocation16 + $0x3a0] ss:$16 sps:$4 sm:$0xff]  }
 0x760   :  { %v6116_v14 = vadd.f32 %v6115_v18, %v4766_v6  ;;  %8024 = vmatprep.subr.bf16.mxu1 %v11349_v7  ;;  %v11409_v6 = vld [vmem:[#allocation16 + $0x384] ss:$16 sps:$4 sm:$0xff]   ;;  %v11386_v7 = vld [vmem:[#allocation16 + $0x180] ss:$16 sps:$4 sm:$0xff]  }
 0x761   :  { %v6117_v37 = vpop.f32.mrf.mxu0  ;;  %v6158_v25 = vpop.f32.mrf.mxu1  ;;  %v11407_v18 = vld [vmem:[#allocation16 + $0x380] ss:$16 sps:$4 sm:$0xff]  }
 0x762   :  { %v6157_v45 = vadd.f32 %v6156_v21, %v6116_v14  ;;  %7984 = vmatpush1.bf16.msra.mxu0 %v11332_v43  ;;  %v11394_v43 = vld [vmem:[#allocation16 + $0x164] ss:$16 sps:$4 sm:$0xff]   ;;  %v11398_v25 = vld [vmem:[#allocation16 + $0x140] ss:$16 sps:$4 sm:$0xff]  }
 0x763   :  { %v6118_v26 = vpop.f32.mrf.mxu0  ;;  %v6159_v27 = vpop.f32.mrf.mxu1  ;;  %7985 = vmatprep.subr.bf16.mxu0 %v11337_v22  ;;  %8025 = vmatpush1.bf16.msra.mxu1 %v11347_v24  ;;  %v11415_v21 = vld [vmem:[#allocation16 + $0x364] ss:$16 sps:$4 sm:$0xff]   ;;  %v11392_v22 = vld [vmem:[#allocation16 + $0x160] ss:$16 sps:$4 sm:$0xff]   ;;  %v4762_v24 = vrot.slane %v12651_v11, %v12475_v12 }
 0x764   :  { %v6408_v28 = vmax.f32 %v6157_v45, 0.0  ;;  %8026 = vmatprep.subr.bf16.mxu1 %v11355_v60  ;;  %v11400_v14 = vld [vmem:[#allocation16 + $0x144] ss:$16 sps:$4 sm:$0xff]   ;;  %v11413_v60 = vld [vmem:[#allocation16 + $0x360] ss:$16 sps:$4 sm:$0xff]  }
 0x765   :  { %v11418_v37 = vld [vmem:[#allocation16 + $0x344] ss:$16 sps:$4 sm:$0xff]   ;;  %v6114_v45 = vadd.f32 %v12656_v8, %v4762_v24  ;;  %v11416_v26 = vld [vmem:[#allocation16 + $0x340] ss:$16 sps:$4 sm:$0xff]  }
 0x766   :  { %v12661_v56 = vpack.c.bf16 %v6408_v28, %v6408_v28  ;;  %7986 = vmatpush1.bf16.msra.mxu0 %v11335_v20  ;;  %v11406_v20 = vld [vmem:[#allocation16 + $0x124] ss:$16 sps:$4 sm:$0xff]   ;;  %v11422_v8 = vld [vmem:[#allocation16 + $0x300] ss:$16 sps:$4 sm:$0xff]  }
 0x767   :  { %7987 = vmatprep.subr.bf16.mxu0 %v11340_v46  ;;  %8027 = vmatpush1.bf16.msra.mxu1 %v11353_v54  ;;  %v11421_v27 = vld [vmem:[#allocation16 + $0x324] ss:$16 sps:$4 sm:$0xff]   ;;  %v11404_v46 = vld [vmem:[#allocation16 + $0x120] ss:$16 sps:$4 sm:$0xff]   ;;  %v6155_v54 = vadd.f32 %v12658_v17, %v6114_v45 }
 0x768   :  { %8013 = vmatprep.mubr.bf16.mxu0 %v12661_v56  ;;  %8028 = vmatprep.subr.bf16.mxu1 %v11361_v29  ;;  %v11412_v28 = vld [vmem:[#allocation16 + $0x104] ss:$16 sps:$4 sm:$0xff]   ;;  %v11419_v29 = vld [vmem:[#allocation16 + $0x320] ss:$16 sps:$4 sm:$0xff]  }
 0x769   :  { %v11425_v17 = vld [vmem:[#allocation16 + $0x4e0] ss:$16 sps:$4 sm:$0xff]  }
 0x76a   :  { %7988 = vmatpush1.bf16.msra.mxu0 %v11338_v30  ;;  %v11424_v30 = vld [vmem:[#allocation16 + $0x304] ss:$16 sps:$4 sm:$0xff]   ;;  %v11440_v24 = vld [vmem:[#allocation16 + $0x440] ss:$16 sps:$4 sm:$0xff]  }
 0x76b   :  { %7989 = vmatprep.subr.bf16.mxu0 %v11346_v31  ;;  %8029 = vmatpush1.bf16.msra.mxu1 %v11359_v32  ;;  %v11410_v31 = vld [vmem:[#allocation16 + $0x100] ss:$16 sps:$4 sm:$0xff]   ;;  %v6407_v32 = vmax.f32 %v6155_v54, 0.0  ;;  %v11451_v54 = vld [vmem:[#allocation16 + $0x5e4] ss:$16 sps:$4 sm:$0xff]  }
 0x76c   :  { %8030 = vmatprep.subr.bf16.mxu1 %v11367_v33  ;;  %v11427_v33 = vld [vmem:[#allocation16 + $0x4e4] ss:$16 sps:$4 sm:$0xff]   ;;  %v11491_v45 = vld [vmem:[#allocation16 + $0x680] ss:$16 sps:$4 sm:$0xff]  }
 0x76e   :  { %7990 = vmatpush1.bf16.msra.mxu0 %v11344_v34  ;;  %v11475_v34 = vld [vmem:[#allocation16 + $0x6e4] ss:$16 sps:$4 sm:$0xff]  }
 0x76f   :  { %7991 = vmatprep.subr.bf16.mxu0 %v11352_v36  ;;  %8031 = vmatpush1.bf16.msra.mxu1 %v11365_v38  ;;  %v4770_v36 = vrot.slane %v12651_v11, %v12478_v13  ;;  %v12670_v38 = vpack.c.bf16 %v6407_v32, %v6407_v32  ;;  %v11511_v32 = vld [vmem:[#allocation16 + $0x624] ss:$16 sps:$4 sm:$0xff]  }
 0x770   :  { %8032 = vmatprep.subr.bf16.mxu1 %v11373_v41  ;;  %v11430_v41 = vld [vmem:[#allocation16 + $0x4c4] ss:$16 sps:$4 sm:$0xff]  }
 0x772   :  { %7992 = vmatpush1.bf16.msra.mxu0 %v11350_v47  ;;  %v4774_v47 = vrot.slane %v12651_v11, %v12484_v16 }
 0x773   :  { %7993 = vmatprep.subr.bf16.mxu0 %v11358_v48  ;;  %8033 = vmatpush1.bf16.msra.mxu1 %v11371_v49 }
 0x774   :  { %8034 = vmatprep.subr.bf16.mxu1 %v11379_v50 }
 0x776   :  { %7994 = vmatpush1.bf16.msra.mxu0 %v11356_v51  ;;  %v11428_v51 = vld [vmem:[#allocation16 + $0x4c0] ss:$16 sps:$4 sm:$0xff]  }
 0x777   :  { %7995 = vmatprep.subr.bf16.mxu0 %v11364_v40  ;;  %8035 = vmatpush1.bf16.msra.mxu1 %v11377_v52 }
 0x778   :  { %8036 = vmatprep.subr.bf16.mxu1 %v11385_v55  ;;  %v11433_v55 = vld [vmem:[#allocation16 + $0x4a4] ss:$16 sps:$4 sm:$0xff]  }
 0x77a   :  { %7996 = vmatpush1.bf16.msra.mxu0 %v11362_v53 }
 0x77b   :  { %7997 = vmatprep.subr.bf16.mxu0 %v11370_v57  ;;  %8037 = vmatpush1.bf16.msra.mxu1 %v11383_v58 }
 0x77c   :  { %8038 = vmatprep.subr.bf16.mxu1 %v11391_v59 }
 0x77e   :  { %7998 = vmatpush2.bf16.msra.mxu0 %v11368_v23 }
 0x77f   :  { %7999 = vmatprep.subr.bf16.mxu0 %v11376_v62  ;;  %8039 = vmatpush2.bf16.msra.mxu1 %v11389_v63  ;;  %v11431_v62 = vld [vmem:[#allocation16 + $0x4a0] ss:$16 sps:$4 sm:$0xff]  }
 0x780   :  { %8040 = vmatprep.subr.bf16.mxu1 %v11397_v19 }
 0x782   :  { %8000 = vmatpush2.bf16.msra.mxu0 %v11374_v0 }
 0x783   :  { %8001 = vmatprep.subr.bf16.mxu0 %v11382_v1  ;;  %8041 = vmatpush2.bf16.msra.mxu1 %v11395_v2  ;;  %v11436_v1 = vld [vmem:[#allocation16 + $0x484] ss:$16 sps:$4 sm:$0xff]  }
 0x784   :  { %8042 = vmatprep.subr.bf16.mxu1 %v11403_v3 }
 0x786   :  { %8002 = vmatpush2.bf16.msra.mxu0 %v11380_v4  ;;  %v11434_v4 = vld [vmem:[#allocation16 + $0x480] ss:$16 sps:$4 sm:$0xff]  }
 0x787   :  { %8003 = vmatprep.subr.bf16.mxu0 %v11388_v5  ;;  %8043 = vmatpush2.bf16.msra.mxu1 %v11401_v61  ;;  %v11473_v5 = vld [vmem:[#allocation16 + $0x6e0] ss:$16 sps:$4 sm:$0xff]  }
 0x788   :  { %8044 = vmatprep.subr.bf16.mxu1 %v11409_v6  ;;  %v11439_v6 = vld [vmem:[#allocation16 + $0x464] ss:$16 sps:$4 sm:$0xff]  }
 0x78a   :  { %8004 = vmatpush2.bf16.msra.mxu0 %v11386_v7  ;;  %v11481_v7 = vld [vmem:[#allocation16 + $0x6c4] ss:$16 sps:$4 sm:$0xff]  }
 0x78b   :  { %8005 = vmatprep.subr.bf16.mxu0 %v11394_v43  ;;  %8045 = vmatpush2.bf16.msra.mxu1 %v11407_v18  ;;  %v11437_v43 = vld [vmem:[#allocation16 + $0x460] ss:$16 sps:$4 sm:$0xff]  }
 0x78c   :  { %8046 = vmatprep.subr.bf16.mxu1 %v11415_v21  ;;  %v11479_v18 = vld [vmem:[#allocation16 + $0x6c0] ss:$16 sps:$4 sm:$0xff]   ;;  %v11442_v21 = vld [vmem:[#allocation16 + $0x444] ss:$16 sps:$4 sm:$0xff]  }
 0x78e   :  { %8006 = vmatpush2.bf16.msra.mxu0 %v11392_v22  ;;  %v11487_v22 = vld [vmem:[#allocation16 + $0x6a4] ss:$16 sps:$4 sm:$0xff]  }
 0x78f   :  { %8007 = vmatprep.subr.bf16.mxu0 %v11400_v14  ;;  %8047 = vmatpush2.bf16.msra.mxu1 %v11413_v60  ;;  %v11485_v14 = vld [vmem:[#allocation16 + $0x6a0] ss:$16 sps:$4 sm:$0xff]   ;;  %v11445_v60 = vld [vmem:[#allocation16 + $0x424] ss:$16 sps:$4 sm:$0xff]  }
 0x790   :  { %8048 = vmatprep.subr.bf16.mxu1 %v11418_v37  ;;  %v11493_v37 = vld [vmem:[#allocation16 + $0x684] ss:$16 sps:$4 sm:$0xff]  }
 0x792   :  { %8008 = vmatpush2.bf16.msra.mxu0 %v11398_v25  ;;  %v11443_v25 = vld [vmem:[#allocation16 + $0x420] ss:$16 sps:$4 sm:$0xff]  }
 0x793   :  { %8009 = vmatprep.subr.bf16.mxu0 %v11406_v20  ;;  %8049 = vmatpush2.bf16.msra.mxu1 %v11416_v26  ;;  %v11448_v20 = vld [vmem:[#allocation16 + $0x404] ss:$16 sps:$4 sm:$0xff]  }
 0x794   :  { %8050 = vmatprep.subr.bf16.mxu1 %v11421_v27  ;;  %v11499_v26 = vld [vmem:[#allocation16 + $0x664] ss:$16 sps:$4 sm:$0xff]   ;;  %v11446_v27 = vld [vmem:[#allocation16 + $0x400] ss:$16 sps:$4 sm:$0xff]  }
 0x796   :  { %8010 = vmatpush2.bf16.msra.mxu0 %v11404_v46  ;;  %v11497_v46 = vld [vmem:[#allocation16 + $0x660] ss:$16 sps:$4 sm:$0xff]  }
 0x797   :  { %8011 = vmatprep.subr.bf16.mxu0 %v11412_v28  ;;  %8051 = vmatpush2.bf16.msra.mxu1 %v11419_v29  ;;  %v11505_v28 = vld [vmem:[#allocation16 + $0x644] ss:$16 sps:$4 sm:$0xff]   ;;  %v11449_v29 = vld [vmem:[#allocation16 + $0x5e0] ss:$16 sps:$4 sm:$0xff]  }
 0x798   :  { %8052 = vmatprep.subr.bf16.mxu1 %v11424_v30  ;;  %v11503_v30 = vld [vmem:[#allocation16 + $0x640] ss:$16 sps:$4 sm:$0xff]  }
 0x79a   :  { %8012 = vmatpush2.bf16.msra.mxu0 %v11410_v31  ;;  %v11454_v31 = vld [vmem:[#allocation16 + $0x5c4] ss:$16 sps:$4 sm:$0xff]  }
 0x79b   :  { %8053 = vmatpush2.bf16.msra.mxu1 %v11422_v8  ;;  %8063 = vmatprep.subr.bf16.mxu0 %v11427_v33  ;;  %v11452_v8 = vld [vmem:[#allocation16 + $0x5c0] ss:$16 sps:$4 sm:$0xff]  }
 0x79c   :  { %8104 = vmatprep.subr.bf16.mxu1 %v11475_v34  ;;  %v11509_v33 = vld [vmem:[#allocation16 + $0x620] ss:$16 sps:$4 sm:$0xff]   ;;  %v11457_v34 = vld [vmem:[#allocation16 + $0x5a4] ss:$16 sps:$4 sm:$0xff]  }
 0x79d   :  { %v6195_v48 = vpop.f32.mrf.mxu0  ;;  %v6236_v49 = vpop.f32.mrf.mxu1  ;;  %8014 = vmatmul.mubr.bf16.vlgmr.msra.gmra.mxu0 %v12670_v38 }
 0x79e   :  { %v6196_v50 = vadd.f32 %v6195_v48, %v4770_v36  ;;  %8064 = vmatpush1.bf16.msra.mxu0 %v11425_v17  ;;  %v11517_v36 = vld [vmem:[#allocation16 + $0x604] ss:$16 sps:$4 sm:$0xff]   ;;  %v11455_v17 = vld [vmem:[#allocation16 + $0x5a0] ss:$16 sps:$4 sm:$0xff]  }
 0x79f   :  { %v6197_v40 = vpop.f32.mrf.mxu0  ;;  %v6238_v52 = vpop.f32.mrf.mxu1  ;;  %8065 = vmatprep.subr.bf16.mxu0 %v11430_v41  ;;  %v11515_v41 = vld [vmem:[#allocation16 + $0x600] ss:$16 sps:$4 sm:$0xff]   ;;  %v11523_v48 = vld [vmem:[#allocation16 + $0x7e4] ss:$16 sps:$4 sm:$0xff]  }
 0x7a0   :  { %v6237_v53 = vadd.f32 %v6236_v49, %v6196_v50  ;;  %v6198_v57 = vadd.f32 %v6197_v40, %v4774_v47  ;;  %v11460_v47 = vld [vmem:[#allocation16 + $0x584] ss:$16 sps:$4 sm:$0xff]   ;;  %v11458_v49 = vld [vmem:[#allocation16 + $0x580] ss:$16 sps:$4 sm:$0xff]  }
 0x7a1   :  { %v6199_v58 = vpop.f32.mrf.mxu0  ;;  %v6240_v59 = vpop.f32.mrf.mxu1  ;;  %v11521_v50 = vld [vmem:[#allocation16 + $0x7e0] ss:$16 sps:$4 sm:$0xff]   ;;  %v11529_v40 = vld [vmem:[#allocation16 + $0x7c4] ss:$16 sps:$4 sm:$0xff]  }
 0x7a2   :  { %v6239_v23 = vadd.f32 %v6238_v52, %v6198_v57  ;;  %8066 = vmatpush1.bf16.msra.mxu0 %v11428_v51  ;;  %v6409_v63 = vmax.f32 %v6237_v53, 0.0  ;;  %v11463_v51 = vld [vmem:[#allocation16 + $0x564] ss:$16 sps:$4 sm:$0xff]   ;;  %v11461_v52 = vld [vmem:[#allocation16 + $0x560] ss:$16 sps:$4 sm:$0xff]  }
 0x7a3   :  { %v6200_v19 = vpop.f32.mrf.mxu0  ;;  %v6241_v0 = vpop.f32.mrf.mxu1  ;;  %8067 = vmatprep.subr.bf16.mxu0 %v11433_v55  ;;  %v11527_v55 = vld [vmem:[#allocation16 + $0x7c0] ss:$16 sps:$4 sm:$0xff]   ;;  %v11466_v53 = vld [vmem:[#allocation16 + $0x544] ss:$16 sps:$4 sm:$0xff]  }
 0x7a4   :  { %v6410_v2 = vmax.f32 %v6239_v23, 0.0  ;;  %v12677_v61 = vpack.c.bf16 %v6409_v63, %v6409_v63  ;;  %v11535_v57 = vld [vmem:[#allocation16 + $0x7a4] ss:$16 sps:$4 sm:$0xff]   ;;  %v11464_v58 = vld [vmem:[#allocation16 + $0x540] ss:$16 sps:$4 sm:$0xff]  }
 0x7a5   :  { %v11533_v59 = vld [vmem:[#allocation16 + $0x7a0] ss:$16 sps:$4 sm:$0xff]   ;;  %v11469_v23 = vld [vmem:[#allocation16 + $0x524] ss:$16 sps:$4 sm:$0xff]  }
 0x7a6   :  { %v12675_v3 = vpack.c.bf16 %v6410_v2, %v6410_v2  ;;  %8068 = vmatpush1.bf16.msra.mxu0 %v11431_v62  ;;  %v11541_v62 = vld [vmem:[#allocation16 + $0x784] ss:$16 sps:$4 sm:$0xff]   ;;  %v11467_v63 = vld [vmem:[#allocation16 + $0x520] ss:$16 sps:$4 sm:$0xff]  }
 0x7a7   :  { %8069 = vmatprep.subr.bf16.mxu0 %v11436_v1  ;;  %v11539_v19 = vld [vmem:[#allocation16 + $0x780] ss:$16 sps:$4 sm:$0xff]   ;;  %v11472_v0 = vld [vmem:[#allocation16 + $0x504] ss:$16 sps:$4 sm:$0xff]  }
 0x7a8   :  { %8054 = vmatprep.mubr.bf16.mxu1 %v12675_v3  ;;  %v11547_v1 = vld [vmem:[#allocation16 + $0x764] ss:$16 sps:$4 sm:$0xff]   ;;  %v11470_v2 = vld [vmem:[#allocation16 + $0x500] ss:$16 sps:$4 sm:$0xff]  }
 0x7a9   :  { %8055 = vmatmul.mubr.bf16.vlgmr.msra.gmra.mxu1 %v12677_v61 }
 0x7aa   :  { %8070 = vmatpush1.bf16.msra.mxu0 %v11434_v4  ;;  %8105 = vmatpush1.bf16.msra.mxu1 %v11473_v5  ;;  %v11545_v4 = vld [vmem:[#allocation16 + $0x760] ss:$16 sps:$4 sm:$0xff]   ;;  %v11478_v5 = vld [vmem:[#allocation16 + $0xec] ss:$16 sps:$4 sm:$0xff]  }
 0x7ab   :  { %8071 = vmatprep.subr.bf16.mxu0 %v11439_v6  ;;  %8106 = vmatprep.subr.bf16.mxu1 %v11481_v7  ;;  %v11553_v6 = vld [vmem:[#allocation16 + $0x744] ss:$16 sps:$4 sm:$0xff]   ;;  %v4778_v7 = vrot.slane %v12651_v11, %v457_v35 }
 0x7ae   :  { %8072 = vmatpush1.bf16.msra.mxu0 %v11437_v43  ;;  %8107 = vmatpush1.bf16.msra.mxu1 %v11479_v18  ;;  %v11551_v43 = vld [vmem:[#allocation16 + $0x740] ss:$16 sps:$4 sm:$0xff]   ;;  %v11559_v18 = vld [vmem:[#allocation16 + $0x724] ss:$16 sps:$4 sm:$0xff]  }
 0x7af   :  { %8073 = vmatprep.subr.bf16.mxu0 %v11442_v21  ;;  %8108 = vmatprep.subr.bf16.mxu1 %v11487_v22  ;;  %v4782_v21 = vrot.slane %v12651_v11, %v461_v42  ;;  %v11571_v42 = vld [vmem:[#allocation16 + $0x2ec] ss:$16 sps:$4 sm:$0xff]  }
 0x7b2   :  { %8074 = vmatpush1.bf16.msra.mxu0 %v11440_v24  ;;  %8109 = vmatpush1.bf16.msra.mxu1 %v11485_v14 }
 0x7b3   :  { %8075 = vmatprep.subr.bf16.mxu0 %v11445_v60  ;;  %8110 = vmatprep.subr.bf16.mxu1 %v11493_v37  ;;  %v11557_v60 = vld [vmem:[#allocation16 + $0x720] ss:$16 sps:$4 sm:$0xff]  }
 0x7b6   :  { %8076 = vmatpush1.bf16.msra.mxu0 %v11443_v25  ;;  %8111 = vmatpush1.bf16.msra.mxu1 %v11491_v45  ;;  %v11565_v25 = vld [vmem:[#allocation16 + $0x704] ss:$16 sps:$4 sm:$0xff]  }
 0x7b7   :  { %8077 = vmatprep.subr.bf16.mxu0 %v11448_v20  ;;  %8112 = vmatprep.subr.bf16.mxu1 %v11499_v26 }
 0x7ba   :  { %8078 = vmatpush1.bf16.msra.mxu0 %v11446_v27  ;;  %8113 = vmatpush1.bf16.msra.mxu1 %v11497_v46 }
 0x7bb   :  { %8079 = vmatprep.subr.bf16.mxu0 %v11451_v54  ;;  %8114 = vmatprep.subr.bf16.mxu1 %v11505_v28  ;;  %v11563_v54 = vld [vmem:[#allocation16 + $0x700] ss:$16 sps:$4 sm:$0xff]  }
 0x7be   :  { %8080 = vmatpush2.bf16.msra.mxu0 %v11449_v29  ;;  %8115 = vmatpush1.bf16.msra.mxu1 %v11503_v30 }
 0x7bf   :  { %8081 = vmatprep.subr.bf16.mxu0 %v11454_v31  ;;  %8116 = vmatprep.subr.bf16.mxu1 %v11511_v32 }
 0x7c2   :  { %8082 = vmatpush2.bf16.msra.mxu0 %v11452_v8  ;;  %8117 = vmatpush1.bf16.msra.mxu1 %v11509_v33  ;;  %v11476_v8 = vld [vmem:[#allocation16 + $0xe8] ss:$16 sps:$4 sm:$0xff]  }
 0x7c3   :  { %8083 = vmatprep.subr.bf16.mxu0 %v11457_v34  ;;  %8118 = vmatprep.subr.bf16.mxu1 %v11517_v36  ;;  %v11484_v34 = vld [vmem:[#allocation16 + $0xcc] ss:$16 sps:$4 sm:$0xff]   ;;  %v11482_v36 = vld [vmem:[#allocation16 + $0xc8] ss:$16 sps:$4 sm:$0xff]  }
 0x7c6   :  { %8084 = vmatpush2.bf16.msra.mxu0 %v11455_v17  ;;  %8119 = vmatpush1.bf16.msra.mxu1 %v11515_v41  ;;  %v11490_v17 = vld [vmem:[#allocation16 + $0xac] ss:$16 sps:$4 sm:$0xff]   ;;  %v11488_v41 = vld [vmem:[#allocation16 + $0xa8] ss:$16 sps:$4 sm:$0xff]  }
 0x7c7   :  { %8085 = vmatprep.subr.bf16.mxu0 %v11460_v47  ;;  %8120 = vmatprep.subr.bf16.mxu1 %v11523_v48  ;;  %v11496_v47 = vld [vmem:[#allocation16 + $0x8c] ss:$16 sps:$4 sm:$0xff]   ;;  %v11494_v48 = vld [vmem:[#allocation16 + $0x88] ss:$16 sps:$4 sm:$0xff]  }
 0x7ca   :  { %8086 = vmatpush2.bf16.msra.mxu0 %v11458_v49  ;;  %8121 = vmatpush2.bf16.msra.mxu1 %v11521_v50  ;;  %v11502_v49 = vld [vmem:[#allocation16 + $0x6c] ss:$16 sps:$4 sm:$0xff]   ;;  %v11500_v50 = vld [vmem:[#allocation16 + $0x68] ss:$16 sps:$4 sm:$0xff]  }
 0x7cb   :  { %8087 = vmatprep.subr.bf16.mxu0 %v11463_v51  ;;  %8122 = vmatprep.subr.bf16.mxu1 %v11529_v40  ;;  %v11508_v51 = vld [vmem:[#allocation16 + $0x4c] ss:$16 sps:$4 sm:$0xff]   ;;  %v11506_v40 = vld [vmem:[#allocation16 + $0x48] ss:$16 sps:$4 sm:$0xff]  }
 0x7ce   :  { %8088 = vmatpush2.bf16.msra.mxu0 %v11461_v52  ;;  %8123 = vmatpush2.bf16.msra.mxu1 %v11527_v55  ;;  %v11514_v52 = vld [vmem:[#allocation16 + $0x2c] ss:$16 sps:$4 sm:$0xff]  }
 0x7cf   :  { %8089 = vmatprep.subr.bf16.mxu0 %v11466_v53  ;;  %8124 = vmatprep.subr.bf16.mxu1 %v11535_v57  ;;  %v11520_v55 = vld [vmem:[#allocation16 + $0xc] ss:$16 sps:$4 sm:$0xff]   ;;  %v11518_v53 = vld [vmem:[#allocation16 + $0x8] ss:$16 sps:$4 sm:$0xff]  }
 0x7d0   :  { %v11526_v57 = vld [vmem:[#allocation16 + $0x1ec] ss:$16 sps:$4 sm:$0xff]  }
 0x7d2   :  { %8090 = vmatpush2.bf16.msra.mxu0 %v11464_v58  ;;  %8125 = vmatpush2.bf16.msra.mxu1 %v11533_v59  ;;  %v11524_v58 = vld [vmem:[#allocation16 + $0x1e8] ss:$16 sps:$4 sm:$0xff]   ;;  %v11532_v59 = vld [vmem:[#allocation16 + $0x1cc] ss:$16 sps:$4 sm:$0xff]  }
 0x7d3   :  { %8091 = vmatprep.subr.bf16.mxu0 %v11469_v23  ;;  %8126 = vmatprep.subr.bf16.mxu1 %v11541_v62  ;;  %v11530_v23 = vld [vmem:[#allocation16 + $0x1c8] ss:$16 sps:$4 sm:$0xff]   ;;  %v11538_v62 = vld [vmem:[#allocation16 + $0x1ac] ss:$16 sps:$4 sm:$0xff]  }
 0x7d6   :  { %8092 = vmatpush2.bf16.msra.mxu0 %v11467_v63  ;;  %8127 = vmatpush2.bf16.msra.mxu1 %v11539_v19  ;;  %v11536_v63 = vld [vmem:[#allocation16 + $0x1a8] ss:$16 sps:$4 sm:$0xff]   ;;  %v11544_v19 = vld [vmem:[#allocation16 + $0x18c] ss:$16 sps:$4 sm:$0xff]  }
 0x7d7   :  { %8093 = vmatprep.subr.bf16.mxu0 %v11472_v0  ;;  %8128 = vmatprep.subr.bf16.mxu1 %v11547_v1  ;;  %v11542_v0 = vld [vmem:[#allocation16 + $0x188] ss:$16 sps:$4 sm:$0xff]   ;;  %v11550_v1 = vld [vmem:[#allocation16 + $0x16c] ss:$16 sps:$4 sm:$0xff]  }
 0x7da   :  { %8094 = vmatpush2.bf16.msra.mxu0 %v11470_v2  ;;  %8129 = vmatpush2.bf16.msra.mxu1 %v11545_v4  ;;  %v11548_v2 = vld [vmem:[#allocation16 + $0x168] ss:$16 sps:$4 sm:$0xff]   ;;  %v11556_v4 = vld [vmem:[#allocation16 + $0x14c] ss:$16 sps:$4 sm:$0xff]  }
 0x7db   :  { %8145 = vmatprep.subr.bf16.mxu0 %v11478_v5  ;;  %8130 = vmatprep.subr.bf16.mxu1 %v11553_v6  ;;  %v11554_v5 = vld [vmem:[#allocation16 + $0x148] ss:$16 sps:$4 sm:$0xff]   ;;  %v4786_v6 = vrot.slane %v12651_v11, %v465_v39 }
 0x7dd   :  { %v6277_v22 = vpop.f32.mrf.mxu0 }
 0x7de   :  { %v6278_v24 = vadd.f32 %v6277_v22, %v4778_v7  ;;  %v6318_v14 = vpop.f32.mrf.mxu1  ;;  %8131 = vmatpush2.bf16.msra.mxu1 %v11551_v43  ;;  %v11562_v7 = vld [vmem:[#allocation16 + $0x12c] ss:$16 sps:$4 sm:$0xff]   ;;  %v4790_v43 = vrot.slane %v12651_v11, %v469_v44 }
 0x7df   :  { %v6279_v37 = vpop.f32.mrf.mxu0  ;;  %8132 = vmatprep.subr.bf16.mxu1 %v11559_v18  ;;  %v11574_v44 = vld [vmem:[#allocation16 + $0x4ec] ss:$16 sps:$4 sm:$0xff]  }
 0x7e0   :  { %v6319_v45 = vadd.f32 %v6318_v14, %v6278_v24  ;;  %v6280_v35 = vadd.f32 %v6279_v37, %v4782_v21  ;;  %v6320_v20 = vpop.f32.mrf.mxu1  ;;  %v11560_v24 = vld [vmem:[#allocation16 + $0x128] ss:$16 sps:$4 sm:$0xff]  }
 0x7e1   :  { %v6281_v26 = vpop.f32.mrf.mxu0 }
 0x7e2   :  { %v6321_v27 = vadd.f32 %v6320_v20, %v6280_v35  ;;  %v6322_v46 = vpop.f32.mrf.mxu1  ;;  %8133 = vmatpush2.bf16.msra.mxu1 %v11557_v60  ;;  %v6411_v28 = vmax.f32 %v6319_v45, 0.0  ;;  %v11568_v60 = vld [vmem:[#allocation16 + $0x10c] ss:$16 sps:$4 sm:$0xff]   ;;  %v11566_v26 = vld [vmem:[#allocation16 + $0x108] ss:$16 sps:$4 sm:$0xff]  }
 0x7e3   :  { %v6282_v29 = vpop.f32.mrf.mxu0  ;;  %8134 = vmatprep.subr.bf16.mxu1 %v11565_v25 }
 0x7e4   :  { %v6412_v30 = vmax.f32 %v6321_v27, 0.0  ;;  %v6323_v31 = vpop.f32.mrf.mxu1  ;;  %v12689_v33 = vpack.c.bf16 %v6411_v28, %v6411_v28  ;;  %v11569_v29 = vld [vmem:[#allocation16 + $0x2e8] ss:$16 sps:$4 sm:$0xff]  }
 0x7e5   :  { %v11577_v31 = vld [vmem:[#allocation16 + $0x2cc] ss:$16 sps:$4 sm:$0xff]  }
 0x7e6   :  { %v12687_v32 = vpack.c.bf16 %v6412_v30, %v6412_v30  ;;  %8135 = vmatpush2.bf16.msra.mxu1 %v11563_v54 }
 0x7e7   :  { %8186 = vmatprep.subr.bf16.mxu1 %v11571_v42  ;;  %v11572_v42 = vld [vmem:[#allocation16 + $0x4e8] ss:$16 sps:$4 sm:$0xff]  }
 0x7e8   :  { %8095 = vmatprep.mubr.bf16.mxu0 %v12687_v32 }
 0x7e9   :  { %8096 = vmatmul.mubr.bf16.vlgmr.msra.gmra.mxu0 %v12689_v33 }
 0x7ea   :  { %8146 = vmatpush1.bf16.msra.mxu0 %v11476_v8  ;;  %8177 = vmatprep.mubr.bf16.mxu0 %v12661_v56  ;;  %v11512_v56 = vld [vmem:[#allocation16 + $0x28] ss:$16 sps:$4 sm:$0xff]   ;;  %v11580_v8 = vld [vmem:[#allocation16 + $0x4cc] ss:$16 sps:$4 sm:$0xff]  }
 0x7eb   :  { %8147 = vmatprep.subr.bf16.mxu0 %v11484_v34  ;;  %v11575_v34 = vld [vmem:[#allocation16 + $0x2c8] ss:$16 sps:$4 sm:$0xff]  }
 0x7ee   :  { %8148 = vmatpush1.bf16.msra.mxu0 %v11482_v36  ;;  %v11578_v36 = vld [vmem:[#allocation16 + $0x4c8] ss:$16 sps:$4 sm:$0xff]  }
 0x7ef   :  { %8149 = vmatprep.subr.bf16.mxu0 %v11490_v17  ;;  %v11583_v17 = vld [vmem:[#allocation16 + $0x2ac] ss:$16 sps:$4 sm:$0xff]  }
 0x7f2   :  { %8150 = vmatpush1.bf16.msra.mxu0 %v11488_v41  ;;  %v11586_v41 = vld [vmem:[#allocation16 + $0x4ac] ss:$16 sps:$4 sm:$0xff]  }
 0x7f3   :  { %8151 = vmatprep.subr.bf16.mxu0 %v11496_v47  ;;  %v11581_v47 = vld [vmem:[#allocation16 + $0x2a8] ss:$16 sps:$4 sm:$0xff]  }
 0x7f6   :  { %8152 = vmatpush1.bf16.msra.mxu0 %v11494_v48  ;;  %v11584_v48 = vld [vmem:[#allocation16 + $0x4a8] ss:$16 sps:$4 sm:$0xff]  }
 0x7f7   :  { %8153 = vmatprep.subr.bf16.mxu0 %v11502_v49  ;;  %v11592_v49 = vld [vmem:[#allocation16 + $0x48c] ss:$16 sps:$4 sm:$0xff]  }
 0x7fa   :  { %8154 = vmatpush1.bf16.msra.mxu0 %v11500_v50  ;;  %v11587_v50 = vld [vmem:[#allocation16 + $0x288] ss:$16 sps:$4 sm:$0xff]  }
 0x7fb   :  { %8155 = vmatprep.subr.bf16.mxu0 %v11508_v51  ;;  %v11590_v51 = vld [vmem:[#allocation16 + $0x488] ss:$16 sps:$4 sm:$0xff]  }
 0x7fe   :  { %8156 = vmatpush1.bf16.msra.mxu0 %v11506_v40  ;;  %v11593_v40 = vld [vmem:[#allocation16 + $0x268] ss:$16 sps:$4 sm:$0xff]  }
 0x7ff   :  { %8157 = vmatprep.subr.bf16.mxu0 %v11514_v52  ;;  %v11596_v52 = vld [vmem:[#allocation16 + $0x468] ss:$16 sps:$4 sm:$0xff]  }
 0x802   :  { %8158 = vmatpush1.bf16.msra.mxu0 %v11512_v56  ;;  %v11601_v56 = vld [vmem:[#allocation16 + $0x24c] ss:$16 sps:$4 sm:$0xff]  }
 0x803   :  { %8159 = vmatprep.subr.bf16.mxu0 %v11520_v55  ;;  %v11604_v55 = vld [vmem:[#allocation16 + $0x44c] ss:$16 sps:$4 sm:$0xff]  }
 0x806   :  { %8160 = vmatpush1.bf16.msra.mxu0 %v11518_v53  ;;  %v11599_v53 = vld [vmem:[#allocation16 + $0x248] ss:$16 sps:$4 sm:$0xff]  }
 0x807   :  { %8161 = vmatprep.subr.bf16.mxu0 %v11526_v57  ;;  %v11602_v57 = vld [vmem:[#allocation16 + $0x448] ss:$16 sps:$4 sm:$0xff]  }
 0x80a   :  { %8162 = vmatpush2.bf16.msra.mxu0 %v11524_v58  ;;  %v11607_v58 = vld [vmem:[#allocation16 + $0x22c] ss:$16 sps:$4 sm:$0xff]  }
 0x80b   :  { %8163 = vmatprep.subr.bf16.mxu0 %v11532_v59  ;;  %v11610_v59 = vld [vmem:[#allocation16 + $0x42c] ss:$16 sps:$4 sm:$0xff]  }
 0x80e   :  { %8164 = vmatpush2.bf16.msra.mxu0 %v11530_v23  ;;  %v11605_v23 = vld [vmem:[#allocation16 + $0x228] ss:$16 sps:$4 sm:$0xff]  }
 0x80f   :  { %8165 = vmatprep.subr.bf16.mxu0 %v11538_v62  ;;  %v11608_v62 = vld [vmem:[#allocation16 + $0x428] ss:$16 sps:$4 sm:$0xff]  }
 0x812   :  { %8166 = vmatpush2.bf16.msra.mxu0 %v11536_v63  ;;  %v11613_v63 = vld [vmem:[#allocation16 + $0x20c] ss:$16 sps:$4 sm:$0xff]  }
 0x813   :  { %8167 = vmatprep.subr.bf16.mxu0 %v11544_v19  ;;  %v11616_v19 = vld [vmem:[#allocation16 + $0x40c] ss:$16 sps:$4 sm:$0xff]  }
 0x816   :  { %8168 = vmatpush2.bf16.msra.mxu0 %v11542_v0  ;;  %v11611_v0 = vld [vmem:[#allocation16 + $0x208] ss:$16 sps:$4 sm:$0xff]  }
 0x817   :  { %8169 = vmatprep.subr.bf16.mxu0 %v11550_v1  ;;  %v11614_v1 = vld [vmem:[#allocation16 + $0x408] ss:$16 sps:$4 sm:$0xff]  }
 0x81a   :  { %8170 = vmatpush2.bf16.msra.mxu0 %v11548_v2  ;;  %v11619_v2 = vld [vmem:[#allocation16 + $0x3ec] ss:$16 sps:$4 sm:$0xff]  }
 0x81b   :  { %8171 = vmatprep.subr.bf16.mxu0 %v11556_v4  ;;  %v11622_v4 = vld [vmem:[#allocation16 + $0x5ec] ss:$16 sps:$4 sm:$0xff]  }
 0x81d   :  { %v6359_v18 = vpop.f32.mrf.mxu0 }
 0x81e   :  { %v6360_v21 = vadd.f32 %v6359_v18, %v4786_v6  ;;  %v6400_v22 = vpop.f32.mrf.mxu1  ;;  %8172 = vmatpush2.bf16.msra.mxu0 %v11554_v5  ;;  %v11617_v5 = vld [vmem:[#allocation16 + $0x3e8] ss:$16 sps:$4 sm:$0xff]  }
 0x81f   :  { %v6361_v14 = vpop.f32.mrf.mxu0  ;;  %8173 = vmatprep.subr.bf16.mxu0 %v11562_v7  ;;  %v11620_v6 = vld [vmem:[#allocation16 + $0x5e8] ss:$16 sps:$4 sm:$0xff]   ;;  %v11625_v7 = vld [vmem:[#allocation16 + $0x3cc] ss:$16 sps:$4 sm:$0xff]  }
 0x820   :  { %v6401_v37 = vadd.f32 %v6400_v22, %v6360_v21  ;;  %v6362_v25 = vadd.f32 %v6361_v14, %v4790_v43  ;;  %v6402_v45 = vpop.f32.mrf.mxu1  ;;  %v11628_v43 = vld [vmem:[#allocation16 + $0x5cc] ss:$16 sps:$4 sm:$0xff]   ;;  %v11623_v18 = vld [vmem:[#allocation16 + $0x3c8] ss:$16 sps:$4 sm:$0xff]  }
 0x821   :  { %v6363_v35 = vpop.f32.mrf.mxu0  ;;  %v11626_v21 = vld [vmem:[#allocation16 + $0x5c8] ss:$16 sps:$4 sm:$0xff]   ;;  %v11631_v22 = vld [vmem:[#allocation16 + $0x3ac] ss:$16 sps:$4 sm:$0xff]  }
 0x822   :  { %v6403_v20 = vadd.f32 %v6402_v45, %v6362_v25  ;;  %v6404_v39 = vpop.f32.mrf.mxu1  ;;  %8174 = vmatpush2.bf16.msra.mxu0 %v11560_v24  ;;  %v6413_v27 = vmax.f32 %v6401_v37, 0.0  ;;  %v11634_v24 = vld [vmem:[#allocation16 + $0x5ac] ss:$16 sps:$4 sm:$0xff]   ;;  %v11629_v14 = vld [vmem:[#allocation16 + $0x3a8] ss:$16 sps:$4 sm:$0xff]  }
 0x823   :  { %v6364_v46 = vpop.f32.mrf.mxu0  ;;  %8175 = vmatprep.subr.bf16.mxu0 %v11568_v60  ;;  %v11632_v60 = vld [vmem:[#allocation16 + $0x5a8] ss:$16 sps:$4 sm:$0xff]   ;;  %v11637_v37 = vld [vmem:[#allocation16 + $0x38c] ss:$16 sps:$4 sm:$0xff]  }
 0x824   :  { %v6414_v11 = vmax.f32 %v6403_v20, 0.0  ;;  %v6405_v54 = vpop.f32.mrf.mxu1  ;;  %v12702_v30 = vpack.c.bf16 %v6413_v27, %v6413_v27  ;;  %v11640_v25 = vld [vmem:[#allocation16 + $0x58c] ss:$16 sps:$4 sm:$0xff]   ;;  %v11635_v45 = vld [vmem:[#allocation16 + $0x388] ss:$16 sps:$4 sm:$0xff]  }
 0x825   :  { %v11638_v35 = vld [vmem:[#allocation16 + $0x588] ss:$16 sps:$4 sm:$0xff]   ;;  %v11643_v20 = vld [vmem:[#allocation16 + $0x36c] ss:$16 sps:$4 sm:$0xff]  }
 0x826   :  { %v12700_v28 = vpack.c.bf16 %v6414_v11, %v6414_v11  ;;  %8176 = vmatpush2.bf16.msra.mxu0 %v11566_v26  ;;  %v11646_v39 = vld [vmem:[#allocation16 + $0x56c] ss:$16 sps:$4 sm:$0xff]   ;;  %v11641_v26 = vld [vmem:[#allocation16 + $0x368] ss:$16 sps:$4 sm:$0xff]  }
 0x827   :  { %8227 = vmatprep.subr.bf16.mxu0 %v11574_v44  ;;  %v11644_v27 = vld [vmem:[#allocation16 + $0x568] ss:$16 sps:$4 sm:$0xff]   ;;  %v11649_v46 = vld [vmem:[#allocation16 + $0x34c] ss:$16 sps:$4 sm:$0xff]  }
 0x828   :  { %8136 = vmatprep.mubr.bf16.mxu1 %v12700_v28  ;;  %v11652_v44 = vld [vmem:[#allocation16 + $0x54c] ss:$16 sps:$4 sm:$0xff]   ;;  %v11647_v11 = vld [vmem:[#allocation16 + $0x348] ss:$16 sps:$4 sm:$0xff]  }
 0x829   :  { %8178 = vmatmul.mubr.bf16.vlgmr.msra.gmra.mxu0 %v12670_v38  ;;  %8137 = vmatmul.mubr.bf16.vlgmr.msra.gmra.mxu1 %v12702_v30  ;;  %v11589_v38 = vld [vmem:[#allocation16 + $0x28c] ss:$16 sps:$4 sm:$0xff]   ;;  %v11650_v54 = vld [vmem:[#allocation16 + $0x548] ss:$16 sps:$4 sm:$0xff]  }
 0x82a   :  { %8187 = vmatpush1.bf16.msra.mxu1 %v11569_v29  ;;  %8228 = vmatpush1.bf16.msra.mxu0 %v11572_v42  ;;  %v11655_v29 = vld [vmem:[#allocation16 + $0x32c] ss:$16 sps:$4 sm:$0xff]  }
 0x82b   :  { %8259 = vmatprep.mubr.bf16.mxu0 %v12687_v32  ;;  %8218 = vmatprep.mubr.bf16.mxu1 %v12675_v3  ;;  %v11595_v32 = vld [vmem:[#allocation16 + $0x26c] ss:$16 sps:$4 sm:$0xff]  }
 0x82c   :  { %8188 = vmatprep.subr.bf16.mxu1 %v11577_v31  ;;  %8229 = vmatprep.subr.bf16.mxu0 %v11580_v8  ;;  %v11598_v3 = vld [vmem:[#allocation16 + $0x46c] ss:$16 sps:$4 sm:$0xff]   ;;  %v11653_v8 = vld [vmem:[#allocation16 + $0x328] ss:$16 sps:$4 sm:$0xff]  }
 0x82d   :  { %v11658_v42 = vld [vmem:[#allocation16 + $0x52c] ss:$16 sps:$4 sm:$0xff]  }
 0x82e   :  { %8189 = vmatpush1.bf16.msra.mxu1 %v11575_v34  ;;  %8230 = vmatpush1.bf16.msra.mxu0 %v11578_v36  ;;  %v11656_v34 = vld [vmem:[#allocation16 + $0x528] ss:$16 sps:$4 sm:$0xff]  }
 0x82f   :  { %8190 = vmatprep.subr.bf16.mxu1 %v11583_v17  ;;  %8231 = vmatprep.subr.bf16.mxu0 %v11586_v41  ;;  %v11661_v17 = vld [vmem:[#allocation16 + $0x30c] ss:$16 sps:$4 sm:$0xff]  }
 0x830   :  { %v11664_v41 = vld [vmem:[#allocation16 + $0x50c] ss:$16 sps:$4 sm:$0xff]  }
 0x832   :  { %8191 = vmatpush1.bf16.msra.mxu1 %v11581_v47  ;;  %8232 = vmatpush1.bf16.msra.mxu0 %v11584_v48  ;;  %v12709_v47 = vld [vmem:[#allocation18] sm:$0xf] }
 0x833   :  { %8192 = vmatprep.subr.bf16.mxu1 %v11589_v38  ;;  %8233 = vmatprep.subr.bf16.mxu0 %v11592_v49  ;;  %v11659_v38 = vld [vmem:[#allocation16 + $0x308] ss:$16 sps:$4 sm:$0xff]  }
 0x834   :  { %v11662_v49 = vld [vmem:[#allocation16 + $0x508] ss:$16 sps:$4 sm:$0xff]  }
 0x836   :  { %8193 = vmatpush1.bf16.msra.mxu1 %v11587_v50  ;;  %8234 = vmatpush1.bf16.msra.mxu0 %v11590_v51  ;;  %v11667_v51 = vld [vmem:[#allocation16 + $0x6ec] ss:$16 sps:$4 sm:$0xff]  }
 0x837   :  { %8194 = vmatprep.subr.bf16.mxu1 %v11595_v32  ;;  %8235 = vmatprep.subr.bf16.mxu0 %v11598_v3  ;;  %v11715_v32 = vld [vmem:[#allocation19 + $0x74] ss:$8 sps:$4 sm:$0xff]   ;;  %v6684_v3 = vrot.slane %v12709_v47, %v12475_v12 }
 0x83a   :  { %8195 = vmatpush1.bf16.msra.mxu1 %v11593_v40  ;;  %8236 = vmatpush1.bf16.msra.mxu0 %v11596_v52  ;;  %v6688_v40 = vrot.slane %v12709_v47, %v12481_v15  ;;  %v11665_v52 = vld [vmem:[#allocation16 + $0x6e8] ss:$16 sps:$4 sm:$0xff]  }
 0x83b   :  { %8196 = vmatprep.subr.bf16.mxu1 %v11601_v56  ;;  %8237 = vmatprep.subr.bf16.mxu0 %v11604_v55  ;;  %v11670_v56 = vld [vmem:[#allocation16 + $0x6cc] ss:$16 sps:$4 sm:$0xff]  }
 0x83c   :  { %v11713_v55 = vld [vmem:[#allocation19 + $0x70] ss:$8 sps:$4 sm:$0xff]  }
 0x83e   :  { %8197 = vmatpush1.bf16.msra.mxu1 %v11599_v53  ;;  %8238 = vmatpush1.bf16.msra.mxu0 %v11602_v57  ;;  %v11718_v57 = vld [vmem:[#allocation19 + $0x64] ss:$8 sps:$4 sm:$0xff]  }
 0x83f   :  { %8198 = vmatprep.subr.bf16.mxu1 %v11607_v58  ;;  %8239 = vmatprep.subr.bf16.mxu0 %v11610_v59 }
 0x842   :  { %8199 = vmatpush1.bf16.msra.mxu1 %v11605_v23  ;;  %8240 = vmatpush1.bf16.msra.mxu0 %v11608_v62  ;;  %v11668_v62 = vld [vmem:[#allocation16 + $0x6c8] ss:$16 sps:$4 sm:$0xff]  }
 0x843   :  { %8200 = vmatprep.subr.bf16.mxu1 %v11613_v63  ;;  %8241 = vmatprep.subr.bf16.mxu0 %v11616_v19  ;;  %v11673_v19 = vld [vmem:[#allocation16 + $0x6ac] ss:$16 sps:$4 sm:$0xff]  }
 0x846   :  { %8201 = vmatpush1.bf16.msra.mxu1 %v11611_v0  ;;  %8242 = vmatpush1.bf16.msra.mxu0 %v11614_v1  ;;  %v11716_v0 = vld [vmem:[#allocation19 + $0x60] ss:$8 sps:$4 sm:$0xff]  }
 0x847   :  { %8202 = vmatprep.subr.bf16.mxu1 %v11619_v2  ;;  %8243 = vmatprep.subr.bf16.mxu0 %v11622_v4  ;;  %v11721_v2 = vld [vmem:[#allocation19 + $0x54] ss:$8 sps:$4 sm:$0xff]  }
 0x84a   :  { %8203 = vmatpush2.bf16.msra.mxu1 %v11617_v5  ;;  %8244 = vmatpush2.bf16.msra.mxu0 %v11620_v6  ;;  %v11676_v5 = vld [vmem:[#allocation16 + $0x68c] ss:$16 sps:$4 sm:$0xff]  }
 0x84b   :  { %8204 = vmatprep.subr.bf16.mxu1 %v11625_v7  ;;  %8245 = vmatprep.subr.bf16.mxu0 %v11628_v43  ;;  %v11719_v6 = vld [vmem:[#allocation19 + $0x50] ss:$8 sps:$4 sm:$0xff]   ;;  %v11674_v7 = vld [vmem:[#allocation16 + $0x688] ss:$16 sps:$4 sm:$0xff]  }
 0x84c   :  { %v11679_v43 = vld [vmem:[#allocation16 + $0x66c] ss:$16 sps:$4 sm:$0xff]  }
 0x84e   :  { %8205 = vmatpush2.bf16.msra.mxu1 %v11623_v18  ;;  %8246 = vmatpush2.bf16.msra.mxu0 %v11626_v21  ;;  %v11722_v18 = vld [vmem:[#allocation19 + $0x40] ss:$8 sps:$4 sm:$0xff]   ;;  %v11727_v21 = vld [vmem:[#allocation19 + $0x34] ss:$8 sps:$4 sm:$0xff]  }
 0x84f   :  { %8206 = vmatprep.subr.bf16.mxu1 %v11631_v22  ;;  %8247 = vmatprep.subr.bf16.mxu0 %v11634_v24  ;;  %v11677_v22 = vld [vmem:[#allocation16 + $0x668] ss:$16 sps:$4 sm:$0xff]   ;;  %v11682_v24 = vld [vmem:[#allocation16 + $0x64c] ss:$16 sps:$4 sm:$0xff]  }
 0x852   :  { %8207 = vmatpush2.bf16.msra.mxu1 %v11629_v14  ;;  %8248 = vmatpush2.bf16.msra.mxu0 %v11632_v60  ;;  %v11725_v14 = vld [vmem:[#allocation19 + $0x30] ss:$8 sps:$4 sm:$0xff]   ;;  %v11730_v60 = vld [vmem:[#allocation19 + $0x24] ss:$8 sps:$4 sm:$0xff]  }
 0x853   :  { %8208 = vmatprep.subr.bf16.mxu1 %v11637_v37  ;;  %8249 = vmatprep.subr.bf16.mxu0 %v11640_v25  ;;  %v11680_v37 = vld [vmem:[#allocation16 + $0x648] ss:$16 sps:$4 sm:$0xff]   ;;  %v11685_v25 = vld [vmem:[#allocation16 + $0x62c] ss:$16 sps:$4 sm:$0xff]  }
 0x856   :  { %8209 = vmatpush2.bf16.msra.mxu1 %v11635_v45  ;;  %8250 = vmatpush2.bf16.msra.mxu0 %v11638_v35  ;;  %v11728_v45 = vld [vmem:[#allocation19 + $0x20] ss:$8 sps:$4 sm:$0xff]   ;;  %v11733_v35 = vld [vmem:[#allocation19 + $0x14] ss:$8 sps:$4 sm:$0xff]  }
 0x857   :  { %8210 = vmatprep.subr.bf16.mxu1 %v11643_v20  ;;  %8251 = vmatprep.subr.bf16.mxu0 %v11646_v39  ;;  %v11683_v20 = vld [vmem:[#allocation16 + $0x628] ss:$16 sps:$4 sm:$0xff]   ;;  %v11688_v39 = vld [vmem:[#allocation16 + $0x60c] ss:$16 sps:$4 sm:$0xff]  }
 0x85a   :  { %8211 = vmatpush2.bf16.msra.mxu1 %v11641_v26  ;;  %8252 = vmatpush2.bf16.msra.mxu0 %v11644_v27  ;;  %v11731_v26 = vld [vmem:[#allocation19 + $0x10] ss:$8 sps:$4 sm:$0xff]   ;;  %v11736_v27 = vld [vmem:[#allocation19 + $0x4] ss:$8 sps:$4 sm:$0xff]  }
 0x85b   :  { %8212 = vmatprep.subr.bf16.mxu1 %v11649_v46  ;;  %8253 = vmatprep.subr.bf16.mxu0 %v11652_v44  ;;  %v11686_v46 = vld [vmem:[#allocation16 + $0x608] ss:$16 sps:$4 sm:$0xff]   ;;  %v11691_v44 = vld [vmem:[#allocation16 + $0x7ec] ss:$16 sps:$4 sm:$0xff]  }
 0x85d   :  { %v8015_v31 = vpop.f32.mrf.mxu0 }
 0x85e   :  { %8213 = vmatpush2.bf16.msra.mxu1 %v11647_v11  ;;  %8254 = vmatpush2.bf16.msra.mxu0 %v11650_v54  ;;  %v8016_v53 = vadd.f32 %v8015_v31, %v6684_v3  ;;  %v11734_v11 = vld [vmem:[#allocation19] ss:$8 sps:$4 sm:$0xff]   ;;  %v11739_v54 = vld [vmem:[#allocation19 + $0xf4] ss:$8 sps:$4 sm:$0xff]   ;;  %v11737_v31 = vld [vmem:[#allocation19 + $0xf0] ss:$8 sps:$4 sm:$0xff]  }
 0x85f   :  { %v8017_v36 = vpop.f32.mrf.mxu0  ;;  %8214 = vmatprep.subr.bf16.mxu1 %v11655_v29  ;;  %8255 = vmatprep.subr.bf16.mxu0 %v11658_v42  ;;  %v11689_v29 = vld [vmem:[#allocation16 + $0x7e8] ss:$16 sps:$4 sm:$0xff]   ;;  %v11694_v42 = vld [vmem:[#allocation16 + $0x7cc] ss:$16 sps:$4 sm:$0xff]  }
 0x860   :  { %v8018_v59 = vadd.f32 %v8017_v36, %v6688_v40  ;;  %v11697_v36 = vld [vmem:[#allocation16 + $0x7ac] ss:$16 sps:$4 sm:$0xff]   ;;  %v11751_v40 = vld [vmem:[#allocation19 + $0xb4] ss:$8 sps:$4 sm:$0xff]  }
 0x861   :  { %v8019_v48 = vpop.f32.mrf.mxu0  ;;  %v11746_v3 = vld [vmem:[#allocation19 + $0xc0] ss:$8 sps:$4 sm:$0xff]  }
 0x862   :  { %8215 = vmatpush2.bf16.msra.mxu1 %v11653_v8  ;;  %8256 = vmatpush2.bf16.msra.mxu0 %v11656_v34  ;;  %v11742_v8 = vld [vmem:[#allocation19 + $0xe4] ss:$8 sps:$4 sm:$0xff]  }
 0x863   :  { %v8020_v50 = vpop.f32.mrf.mxu0  ;;  %8216 = vmatprep.subr.bf16.mxu1 %v11661_v17  ;;  %8257 = vmatprep.subr.bf16.mxu0 %v11664_v41  ;;  %v11692_v34 = vld [vmem:[#allocation16 + $0x7c8] ss:$16 sps:$4 sm:$0xff]   ;;  %v11740_v17 = vld [vmem:[#allocation19 + $0xe0] ss:$8 sps:$4 sm:$0xff]  }
 0x864   :  { %v11745_v41 = vld [vmem:[#allocation19 + $0xd4] ss:$8 sps:$4 sm:$0xff]   ;;  %v11748_v50 = vld [vmem:[#allocation19 + $0xc4] ss:$8 sps:$4 sm:$0xff]  }
 0x865   :  { %v11695_v48 = vld [vmem:[#allocation16 + $0x7a8] ss:$16 sps:$4 sm:$0xff]  }
 0x866   :  { %8217 = vmatpush2.bf16.msra.mxu1 %v11659_v38  ;;  %8258 = vmatpush2.bf16.msra.mxu0 %v11662_v49  ;;  %v11700_v38 = vld [vmem:[#allocation16 + $0x78c] ss:$16 sps:$4 sm:$0xff]  }
 0x867   :  { %8268 = vmatprep.subr.bf16.mxu1 %v11667_v51  ;;  %8713 = vmatprep.subr.bf16.mxu0 %v11715_v32  ;;  %v11743_v49 = vld [vmem:[#allocation19 + $0xd0] ss:$8 sps:$4 sm:$0xff]   ;;  %v11698_v51 = vld [vmem:[#allocation16 + $0x788] ss:$16 sps:$4 sm:$0xff]  }
 0x868   :  { %v11703_v32 = vld [vmem:[#allocation16 + $0x76c] ss:$16 sps:$4 sm:$0xff]  }
 0x869   :  { %8219 = vmatmul.mubr.bf16.vlgmr.msra.gmra.mxu1 %v12677_v61  ;;  %8260 = vmatmul.mubr.bf16.vlgmr.msra.gmra.mxu0 %v12689_v33  ;;  %v8056_v58 = vpop.f32.mrf.mxu1  ;;  %v11671_v33 = vld [vmem:[#allocation16 + $0x6a8] ss:$16 sps:$4 sm:$0xff]  }
 0x86a   :  { %v12717_v23 = vadd.f32 %v8056_v58, %v8016_v53  ;;  %8269 = vmatpush1.bf16.msra.mxu1 %v11665_v52  ;;  %8300 = vmatprep.mubr.bf16.mxu1 %v12700_v28  ;;  %v11724_v28 = vld [vmem:[#allocation19 + $0x44] ss:$8 sps:$4 sm:$0xff]   ;;  %v11709_v58 = vld [vmem:[#allocation16 + $0x72c] ss:$16 sps:$4 sm:$0xff]  }
 0x86b   :  { %v8058_v63 = vpop.f32.mrf.mxu1  ;;  %8270 = vmatprep.subr.bf16.mxu1 %v11670_v56  ;;  %8714 = vmatpush1.bf16.msra.mxu0 %v11713_v55  ;;  %v11701_v52 = vld [vmem:[#allocation16 + $0x768] ss:$16 sps:$4 sm:$0xff]   ;;  %v11706_v56 = vld [vmem:[#allocation16 + $0x74c] ss:$16 sps:$4 sm:$0xff]  }
 0x86c   :  { %v12720_v1 = vadd.f32 %v8058_v63, %v8018_v59  ;;  %8715 = vmatprep.subr.bf16.mxu0 %v11718_v57  ;;  %v11749_v55 = vld [vmem:[#allocation19 + $0xb0] ss:$8 sps:$4 sm:$0xff]   ;;  %v11754_v53 = vld [vmem:[#allocation19 + $0xa4] ss:$8 sps:$4 sm:$0xff]   ;;  %v11752_v59 = vld [vmem:[#allocation19 + $0xa0] ss:$8 sps:$4 sm:$0xff]  }
 0x86d   :  { %v8060_v61 = vpop.f32.mrf.mxu1  ;;  %v11704_v57 = vld [vmem:[#allocation16 + $0x748] ss:$16 sps:$4 sm:$0xff]  }
 0x86e   :  { %8271 = vmatpush1.bf16.msra.mxu1 %v11668_v62  ;;  %v11757_v62 = vld [vmem:[#allocation19 + $0x94] ss:$8 sps:$4 sm:$0xff]  }
 0x86f   :  { %v8061_v4 = vpop.f32.mrf.mxu1  ;;  %8272 = vmatprep.subr.bf16.mxu1 %v11673_v19  ;;  %8716 = vmatpush1.bf16.msra.mxu0 %v11716_v0  ;;  %v11707_v63 = vld [vmem:[#allocation16 + $0x728] ss:$16 sps:$4 sm:$0xff]   ;;  %v11712_v19 = vld [vmem:[#allocation16 + $0x70c] ss:$16 sps:$4 sm:$0xff]  }
 0x870   :  { %8717 = vmatprep.subr.bf16.mxu0 %v11721_v2  ;;  %v11755_v0 = vld [vmem:[#allocation19 + $0x90] ss:$8 sps:$4 sm:$0xff]   ;;  %v11760_v2 = vld [vmem:[#allocation19 + $0x84] ss:$8 sps:$4 sm:$0xff]  }
 0x871   :  { %v11710_v61 = vld [vmem:[#allocation16 + $0x708] ss:$16 sps:$4 sm:$0xff]  }
 0x872   :  { %8273 = vmatpush1.bf16.msra.mxu1 %v11671_v33  ;;  %v11758_v33 = vld [vmem:[#allocation19 + $0x80] ss:$8 sps:$4 sm:$0xff]  }
 0x873   :  { %8274 = vmatprep.subr.bf16.mxu1 %v11676_v5  ;;  %8718 = vmatpush1.bf16.msra.mxu0 %v11719_v6 }
 0x874   :  { %8719 = vmatprep.subr.bf16.mxu0 %v11724_v28 }
 0x876   :  { %8275 = vmatpush1.bf16.msra.mxu1 %v11674_v7 }
 0x877   :  { %8276 = vmatprep.subr.bf16.mxu1 %v11679_v43  ;;  %8720 = vmatpush1.bf16.msra.mxu0 %v11722_v18  ;;  %v11761_v43 = vld [vmem:[#allocation19 + $0x170] ss:$8 sps:$4 sm:$0xff]   ;;  %v11763_v18 = vld [vmem:[#allocation19 + $0x174] ss:$8 sps:$4 sm:$0xff]  }
 0x878   :  { %8721 = vmatprep.subr.bf16.mxu0 %v11727_v21  ;;  %v11766_v21 = vld [vmem:[#allocation19 + $0x164] ss:$8 sps:$4 sm:$0xff]  }
 0x87a   :  { %8277 = vmatpush1.bf16.msra.mxu1 %v11677_v22  ;;  %v11764_v22 = vld [vmem:[#allocation19 + $0x160] ss:$8 sps:$4 sm:$0xff]  }
 0x87b   :  { %8278 = vmatprep.subr.bf16.mxu1 %v11682_v24  ;;  %8722 = vmatpush1.bf16.msra.mxu0 %v11725_v14  ;;  %v11769_v24 = vld [vmem:[#allocation19 + $0x154] ss:$8 sps:$4 sm:$0xff]   ;;  %v11767_v14 = vld [vmem:[#allocation19 + $0x150] ss:$8 sps:$4 sm:$0xff]  }
 0x87c   :  { %8723 = vmatprep.subr.bf16.mxu0 %v11730_v60  ;;  %v11772_v60 = vld [vmem:[#allocation19 + $0x144] ss:$8 sps:$4 sm:$0xff]  }
 0x87e   :  { %8279 = vmatpush1.bf16.msra.mxu1 %v11680_v37  ;;  %v11773_v37 = vld [vmem:[#allocation19 + $0x130] ss:$8 sps:$4 sm:$0xff]  }
 0x87f   :  { %8280 = vmatprep.subr.bf16.mxu1 %v11685_v25  ;;  %8724 = vmatpush1.bf16.msra.mxu0 %v11728_v45  ;;  %v11778_v25 = vld [vmem:[#allocation19 + $0x124] ss:$8 sps:$4 sm:$0xff]   ;;  %v11776_v45 = vld [vmem:[#allocation19 + $0x120] ss:$8 sps:$4 sm:$0xff]  }
 0x880   :  { %8725 = vmatprep.subr.bf16.mxu0 %v11733_v35  ;;  %v11781_v35 = vld [vmem:[#allocation19 + $0x114] ss:$8 sps:$4 sm:$0xff]  }
 0x882   :  { %8281 = vmatpush1.bf16.msra.mxu1 %v11683_v20  ;;  %v11779_v20 = vld [vmem:[#allocation19 + $0x110] ss:$8 sps:$4 sm:$0xff]  }
 0x883   :  { %8282 = vmatprep.subr.bf16.mxu1 %v11688_v39  ;;  %8726 = vmatpush1.bf16.msra.mxu0 %v11731_v26  ;;  %v11784_v39 = vld [vmem:[#allocation19 + $0x104] ss:$8 sps:$4 sm:$0xff]   ;;  %v11782_v26 = vld [vmem:[#allocation19 + $0x100] ss:$8 sps:$4 sm:$0xff]  }
 0x884   :  { %8727 = vmatprep.subr.bf16.mxu0 %v11736_v27  ;;  %v11787_v27 = vld [vmem:[#allocation19 + $0x1f4] ss:$8 sps:$4 sm:$0xff]  }
 0x886   :  { %8283 = vmatpush1.bf16.msra.mxu1 %v11686_v46  ;;  %v11785_v46 = vld [vmem:[#allocation19 + $0x1f0] ss:$8 sps:$4 sm:$0xff]  }
 0x887   :  { %8284 = vmatprep.subr.bf16.mxu1 %v11691_v44  ;;  %8728 = vmatpush1.bf16.msra.mxu0 %v11734_v11  ;;  %v11790_v44 = vld [vmem:[#allocation19 + $0x1e4] ss:$8 sps:$4 sm:$0xff]   ;;  %v11788_v11 = vld [vmem:[#allocation19 + $0x1e0] ss:$8 sps:$4 sm:$0xff]  }
 0x888   :  { %8729 = vmatprep.subr.bf16.mxu0 %v11739_v54  ;;  %v11793_v54 = vld [vmem:[#allocation19 + $0x1d4] ss:$8 sps:$4 sm:$0xff]  }
 0x88a   :  { %8285 = vmatpush2.bf16.msra.mxu1 %v11689_v29  ;;  %v11791_v29 = vld [vmem:[#allocation19 + $0x1d0] ss:$8 sps:$4 sm:$0xff]  }
 0x88b   :  { %8286 = vmatprep.subr.bf16.mxu1 %v11694_v42  ;;  %8730 = vmatpush2.bf16.msra.mxu0 %v11737_v31  ;;  %v11796_v42 = vld [vmem:[#allocation19 + $0x1c4] ss:$8 sps:$4 sm:$0xff]   ;;  %v11794_v31 = vld [vmem:[#allocation19 + $0x1c0] ss:$8 sps:$4 sm:$0xff]  }
 0x88c   :  { %8731 = vmatprep.subr.bf16.mxu0 %v11742_v8  ;;  %v11799_v8 = vld [vmem:[#allocation19 + $0x1b4] ss:$8 sps:$4 sm:$0xff]  }
 0x88e   :  { %8287 = vmatpush2.bf16.msra.mxu1 %v11692_v34  ;;  %v11797_v34 = vld [vmem:[#allocation19 + $0x1b0] ss:$8 sps:$4 sm:$0xff]  }
 0x88f   :  { %8288 = vmatprep.subr.bf16.mxu1 %v11697_v36  ;;  %8732 = vmatpush2.bf16.msra.mxu0 %v11740_v17  ;;  %v11802_v36 = vld [vmem:[#allocation19 + $0x1a4] ss:$8 sps:$4 sm:$0xff]   ;;  %v11800_v17 = vld [vmem:[#allocation19 + $0x1a0] ss:$8 sps:$4 sm:$0xff]  }
 0x890   :  { %8733 = vmatprep.subr.bf16.mxu0 %v11745_v41 }
 0x892   :  { %8289 = vmatpush2.bf16.msra.mxu1 %v11695_v48 }
 0x893   :  { %8290 = vmatprep.subr.bf16.mxu1 %v11700_v38  ;;  %8734 = vmatpush2.bf16.msra.mxu0 %v11743_v49 }
 0x894   :  { %8735 = vmatprep.subr.bf16.mxu0 %v11748_v50  ;;  %v11805_v50 = vld [vmem:[#allocation19 + $0x194] ss:$8 sps:$4 sm:$0xff]  }
 0x896   :  { %8291 = vmatpush2.bf16.msra.mxu1 %v11698_v51 }
 0x897   :  { %8292 = vmatprep.subr.bf16.mxu1 %v11703_v32  ;;  %8736 = vmatpush2.bf16.msra.mxu0 %v11746_v3  ;;  %v11803_v3 = vld [vmem:[#allocation19 + $0x190] ss:$8 sps:$4 sm:$0xff]  }
 0x898   :  { %8737 = vmatprep.subr.bf16.mxu0 %v11751_v40 }
 0x89a   :  { %8293 = vmatpush2.bf16.msra.mxu1 %v11701_v52 }
 0x89b   :  { %8294 = vmatprep.subr.bf16.mxu1 %v11706_v56  ;;  %8738 = vmatpush2.bf16.msra.mxu0 %v11749_v55 }
 0x89c   :  { %8739 = vmatprep.subr.bf16.mxu0 %v11754_v53 }
 0x89e   :  { %8295 = vmatpush2.bf16.msra.mxu1 %v11704_v57  ;;  %v11808_v57 = vld [vmem:[#allocation19 + $0x184] ss:$8 sps:$4 sm:$0xff]  }
 0x89f   :  { %8296 = vmatprep.subr.bf16.mxu1 %v11709_v58  ;;  %8740 = vmatpush2.bf16.msra.mxu0 %v11752_v59 }
 0x8a0   :  { %8741 = vmatprep.subr.bf16.mxu0 %v11757_v62  ;;  %v11806_v62 = vld [vmem:[#allocation19 + $0x180] ss:$8 sps:$4 sm:$0xff]  }
 0x8a2   :  { %8297 = vmatpush2.bf16.msra.mxu1 %v11707_v63 }
 0x8a3   :  { %8298 = vmatprep.subr.bf16.mxu1 %v11712_v19  ;;  %8742 = vmatpush2.bf16.msra.mxu0 %v11755_v0  ;;  %v6692_v19 = vrot.slane %v12709_v47, %v12478_v13  ;;  %v11814_v13 = vld [vmem:[#allocation22 + $0x28] sm:$0xff]  }
 0x8a4   :  { %8743 = vmatprep.subr.bf16.mxu0 %v11760_v2 }
 0x8a6   :  { %8299 = vmatpush2.bf16.msra.mxu1 %v11710_v61 }
 0x8a7   :  { %8744 = vmatpush2.bf16.msra.mxu0 %v11758_v33  ;;  %8754 = vmatprep.subr.bf16.mxu1 %v11763_v18 }
 0x8a9   :  { %8301 = vmatmul.mubr.bf16.vlgmr.msra.gmra.mxu1 %v12702_v30  ;;  %v8097_v4 = vpop.f32.mrf.mxu0  ;;  %v11770_v30 = vld [vmem:[#allocation19 + $0x140] ss:$8 sps:$4 sm:$0xff]  }
 0x8aa   :  { %v12724_v5 = vadd.f32 %v8097_v4, %v12717_v23  ;;  %8755 = vmatpush1.bf16.msra.mxu1 %v11761_v43  ;;  %v11775_v23 = vld [vmem:[#allocation19 + $0x134] ss:$8 sps:$4 sm:$0xff]  }
 0x8ab   :  { %v8099_v6 = vpop.f32.mrf.mxu0  ;;  %8756 = vmatprep.subr.bf16.mxu1 %v11766_v21  ;;  %v11809_v21 = vld [vmem:[#allocation22 + $0x78] sm:$0xff]  }
 0x8ac   :  { %v8100_v38 = vadd.f32 %v8099_v6, %v12720_v1  ;;  %10616 = vmatprep.subr.bf16.mxu0 %v11809_v21 }
 0x8ad   :  { %v8101_v28 = vpop.f32.mrf.mxu0 }
 0x8ae   :  { %8757 = vmatpush1.bf16.msra.mxu1 %v11764_v22  ;;  %v11810_v22 = vld [vmem:[#allocation22 + $0x38] sm:$0xff]  }
 0x8af   :  { %v8102_v7 = vpop.f32.mrf.mxu0  ;;  %8758 = vmatprep.subr.bf16.mxu1 %v11769_v24  ;;  %v11811_v24 = vld [vmem:[#allocation22 + $0x70] sm:$0xff]  }
 0x8b2   :  { %8759 = vmatpush1.bf16.msra.mxu1 %v11767_v14  ;;  %v11812_v14 = vld [vmem:[#allocation22 + $0x30] sm:$0xff]  }
 0x8b3   :  { %8760 = vmatprep.subr.bf16.mxu1 %v11772_v60  ;;  %v11813_v60 = vld [vmem:[#allocation22 + $0x68] sm:$0xff]  }
 0x8b6   :  { %8761 = vmatpush1.bf16.msra.mxu1 %v11770_v30  ;;  %v11815_v30 = vld [vmem:[#allocation22 + $0x60] sm:$0xff]  }
 0x8b7   :  { %8762 = vmatprep.subr.bf16.mxu1 %v11775_v23  ;;  %v11816_v23 = vld [vmem:[#allocation22 + $0x20] sm:$0xff]  }
 0x8ba   :  { %8763 = vmatpush1.bf16.msra.mxu1 %v11773_v37  ;;  %v11817_v37 = vld [vmem:[#allocation22 + $0x58] sm:$0xff]  }
 0x8bb   :  { %8764 = vmatprep.subr.bf16.mxu1 %v11778_v25  ;;  %v11818_v25 = vld [vmem:[#allocation22 + $0x18] sm:$0xff]  }
 0x8be   :  { %8765 = vmatpush1.bf16.msra.mxu1 %v11776_v45  ;;  %v11819_v45 = vld [vmem:[#allocation22 + $0x50] sm:$0xff]  }
 0x8bf   :  { %8766 = vmatprep.subr.bf16.mxu1 %v11781_v35  ;;  %v11820_v35 = vld [vmem:[#allocation22 + $0x10] sm:$0xff]  }
 0x8c2   :  { %8767 = vmatpush1.bf16.msra.mxu1 %v11779_v20  ;;  %v6696_v20 = vrot.slane %v12709_v47, %v12484_v16  ;;  %v11823_v47 = vld [vmem:[#allocation22 + $0x40] sm:$0xff]  }
 0x8c3   :  { %8768 = vmatprep.subr.bf16.mxu1 %v11784_v39 }
 0x8c6   :  { %8769 = vmatpush1.bf16.msra.mxu1 %v11782_v26 }
 0x8c7   :  { %8770 = vmatprep.subr.bf16.mxu1 %v11787_v27 }
 0x8ca   :  { %8771 = vmatpush2.bf16.msra.mxu1 %v11785_v46 }
 0x8cb   :  { %8772 = vmatprep.subr.bf16.mxu1 %v11790_v44 }
 0x8ce   :  { %8773 = vmatpush2.bf16.msra.mxu1 %v11788_v11 }
 0x8cf   :  { %8774 = vmatprep.subr.bf16.mxu1 %v11793_v54 }
 0x8d2   :  { %8775 = vmatpush2.bf16.msra.mxu1 %v11791_v29 }
 0x8d3   :  { %8776 = vmatprep.subr.bf16.mxu1 %v11796_v42 }
 0x8d6   :  { %8777 = vmatpush2.bf16.msra.mxu1 %v11794_v31 }
 0x8d7   :  { %8778 = vmatprep.subr.bf16.mxu1 %v11799_v8 }
 0x8da   :  { %8779 = vmatpush2.bf16.msra.mxu1 %v11797_v34 }
 0x8db   :  { %8780 = vmatprep.subr.bf16.mxu1 %v11802_v36 }
 0x8de   :  { %8781 = vmatpush2.bf16.msra.mxu1 %v11800_v17 }
 0x8df   :  { %8782 = vmatprep.subr.bf16.mxu1 %v11805_v50  ;;  %v11824_v50 = vld [vmem:[#allocation22] sm:$0xff]  }
 0x8e2   :  { %8783 = vmatpush2.bf16.msra.mxu1 %v11803_v3  ;;  %v11826_v3 = vld [vmem:[%s12810_s21 + $0x30] sm:$0xff]  }
 0x8e3   :  { %8784 = vmatprep.subr.bf16.mxu1 %v11808_v57 }
 0x8e6   :  { %8785 = vmatpush2.bf16.msra.mxu1 %v11806_v62 }
 0x8e9   :  { %v8179_v41 = vpop.f32.mrf.mxu0  ;;  %v8138_v48 = vpop.f32.mrf.mxu1 }
 0x8ea   :  { %v8139_v49 = vadd.f32 %v8138_v48, %v12724_v5  ;;  %v8180_v0 = vadd.f32 %v8179_v41, %v6692_v19  ;;  %v11821_v41 = vld [vmem:[#allocation22 + $0x48] sm:$0xff]  }
 0x8eb   :  { %v8181_v51 = vpop.f32.mrf.mxu0  ;;  %v8140_v32 = vpop.f32.mrf.mxu1 }
 0x8ec   :  { %v8141_v40 = vadd.f32 %v8140_v32, %v8100_v38  ;;  %v8309_v52 = vmax.f32 %v8139_v49, 0.0  ;;  %v8182_v39 = vadd.f32 %v8181_v51, %v6696_v20  ;;  %v11822_v38 = vld [vmem:[#allocation22 + $0x8] sm:$0xff]   ;;  %v12237_v32 = vmov 0.0  }
 0x8ed   :  { %v8183_v56 = vpop.f32.mrf.mxu0  ;;  %v8142_v55 = vpop.f32.mrf.mxu1  ;;  %v11825_v51 = vld [vmem:[%s12810_s21 + $0x38] sm:$0xff]   ;;  %10652 = vmatprep.subr.bf16.mxu1 %v12237_v32 }
 0x8ee   :  { %v8310_v53 = vmax.f32 %v8141_v40, 0.0  ;;  %v8378_v1 = vpack.c.bf16 %v8309_v52, %v8309_v52  ;;  %v11827_v40 = vld [vmem:[%s12810_s21 + $0x28] sm:$0xff]   ;;  %v11828_v52 = vld [vmem:[%s12810_s21 + $0x20] sm:$0xff]   ;;  %v11829_v56 = vld [vmem:[%s12810_s21 + $0x18] sm:$0xff]  }
 0x8ef   :  { %v8184_v58 = vpop.f32.mrf.mxu0  ;;  %v8143_v59 = vpop.f32.mrf.mxu1  ;;  %v8377_v55 = vld [vmem:[#allocation21] sm:$0x3] }
 0x8f0   :  { %v8379_v63 = vpack.c.bf16 %v8310_v53, %v8310_v53  ;;  %v8386_v53 = vrot.slane %v8377_v55, %v12475_v12  ;;  %v8390_v57 = vrot.slane %v8377_v55, %v12481_v15 }
 0x8f2   :  { %8745 = vmatprep.mubr.bf16.mxu0 %v8379_v63 }
 0x8f3   :  { %8746 = vmatmul.mubr.bf16.vlgmr.msra.gmra.mxu0 %v8378_v1 }
 0x8f4   :  { %10617 = vmatpush3.bf16.msra.mxu0 %v11810_v22  ;;  %v10562_v22 = vld [vmem:[#allocation24] ss:$0 sm:$0xff] }
 0x8f5   :  { %10618 = vmatprep.subr.bf16.mxu0 %v11811_v24 }
 0x8f8   :  { %10619 = vmatpush3.bf16.msra.mxu0 %v11812_v14 }
 0x8f9   :  { %10620 = vmatprep.subr.bf16.mxu0 %v11813_v60 }
 0x8fc   :  { %10621 = vmatpush3.bf16.msra.mxu0 %v11814_v13 }
 0x8fd   :  { %10622 = vmatprep.subr.bf16.mxu0 %v11815_v30 }
 0x900   :  { %10623 = vmatpush3.bf16.msra.mxu0 %v11816_v23 }
 0x901   :  { %10624 = vmatprep.subr.bf16.mxu0 %v11817_v37 }
 0x904   :  { %10625 = vmatpush3.bf16.msra.mxu0 %v11818_v25  ;;  %v11835_v25 = vld [vmem:[%s12812_s23 + $0x8] sm:$0xff]  }
 0x905   :  { %10626 = vmatprep.subr.bf16.mxu0 %v11819_v45  ;;  %v11836_v45 = vld [vmem:[%s12812_s23] sm:$0xff]  }
 0x908   :  { %10627 = vmatpush3.bf16.msra.mxu0 %v11820_v35  ;;  %v10579_v35 = vld [vmem:[#allocation25] ss:$0 sm:$0xff] }
 0x909   :  { %10628 = vmatprep.subr.bf16.mxu0 %v11821_v41  ;;  %v9227_v41 = vand.u32 127, %v439_v9 }
 0x90c   :  { %10629 = vmatpush3.bf16.msra.mxu0 %v11822_v38 }
 0x90d   :  { %10630 = vmatprep.subr.bf16.mxu0 %v11823_v47 }
 0x910   :  { %10631 = vmatpush3.bf16.msra.mxu0 %v11824_v50 }
 0x911   :  { %10672 = vmatprep.subr.bf16.mxu0 %v12237_v32 }
 0x929   :  { %v8220_v2 = vpop.f32.mrf.mxu1  ;;  %v8261_v61 = vpop.f32.mrf.mxu0 }
 0x92a   :  { %v8221_v33 = vadd.f32 %v8220_v2, %v8180_v0 }
 0x92b   :  { %v8222_v4 = vpop.f32.mrf.mxu1  ;;  %v8263_v5 = vpop.f32.mrf.mxu0 }
 0x92c   :  { %v8262_v6 = vadd.f32 %v8261_v61, %v8221_v33  ;;  %v8223_v26 = vadd.f32 %v8222_v4, %v8182_v39 }
 0x92d   :  { %v8224_v28 = vpop.f32.mrf.mxu1  ;;  %v8265_v7 = vpop.f32.mrf.mxu0 }
 0x92e   :  { %v8264_v46 = vadd.f32 %v8263_v5, %v8223_v26  ;;  %v11831_v28 = vld [vmem:[%s12810_s21 + $0x8] sm:$0xff]   ;;  %v11832_v7 = vld [vmem:[%s12810_s21] sm:$0xff]  }
 0x92f   :  { %v8225_v43 = vpop.f32.mrf.mxu1  ;;  %v8266_v18 = vpop.f32.mrf.mxu0 }
 0x930   :  { %v11833_v43 = vld [vmem:[%s12812_s23 + $0x18] sm:$0xff]   ;;  %v11834_v18 = vld [vmem:[%s12812_s23 + $0x10] sm:$0xff]  }
 0x969   :  { %v8302_v27 = vpop.f32.mrf.mxu1 }
 0x96a   :  { %v8303_v44 = vadd.f32 %v8302_v27, %v8262_v6  ;;  %v11830_v6 = vld [vmem:[%s12810_s21 + $0x10] sm:$0xff]  }
 0x96b   :  { %v8304_v11 = vpop.f32.mrf.mxu1 }
 0x96c   :  { %v8305_v54 = vadd.f32 %v8304_v11, %v8264_v46  ;;  %v8311_v29 = vmax.f32 %v8303_v44, 0.0 }
 0x96d   :  { %v8306_v42 = vpop.f32.mrf.mxu1 }
 0x96e   :  { %v8312_v31 = vmax.f32 %v8305_v54, 0.0  ;;  %v8380_v36 = vpack.c.bf16 %v8311_v29, %v8311_v29  ;;  %v10588_v54 = vld [vmem:[#allocation27] ss:$0 sm:$0xff] }
 0x96f   :  { %v8307_v8 = vpop.f32.mrf.mxu1 }
 0x970   :  { %v8381_v34 = vpack.c.bf16 %v8312_v31, %v8312_v31 }
 0x972   :  { %8786 = vmatprep.mubr.bf16.mxu1 %v8381_v34 }
 0x973   :  { %8787 = vmatmul.mubr.bf16.vlgmr.msra.gmra.mxu1 %v8380_v36 }
 0x974   :  { %10653 = vmatpush3.bf16.msra.mxu1 %v11825_v51  ;;  %10668 = vmatprep.mubr.msk.bf16.mxu1 %vm12238_vm0, %v12237_v32 }
 0x975   :  { %10654 = vmatprep.subr.bf16.mxu1 %v12237_v32 }
 0x978   :  { %10655 = vmatpush3.bf16.msra.mxu1 %v11826_v3 }
 0x979   :  { %10656 = vmatprep.subr.bf16.mxu1 %v12237_v32 }
 0x97c   :  { %10657 = vmatpush3.bf16.msra.mxu1 %v11827_v40 }
 0x97d   :  { %10658 = vmatprep.subr.bf16.mxu1 %v12237_v32 }
 0x980   :  { %10659 = vmatpush3.bf16.msra.mxu1 %v11828_v52 }
 0x981   :  { %10660 = vmatprep.subr.bf16.mxu1 %v12237_v32 }
 0x984   :  { %10661 = vmatpush3.bf16.msra.mxu1 %v11829_v56 }
 0x985   :  { %10662 = vmatprep.subr.bf16.mxu1 %v12237_v32 }
 0x988   :  { %10663 = vmatpush3.bf16.msra.mxu1 %v11830_v6 }
 0x989   :  { %10664 = vmatprep.subr.bf16.mxu1 %v12237_v32 }
 0x98c   :  { %10665 = vmatpush3.bf16.msra.mxu1 %v11831_v28 }
 0x98d   :  { %10666 = vmatprep.subr.bf16.mxu1 %v12237_v32 }
 0x990   :  { %10667 = vmatpush3.bf16.msra.mxu1 %v11832_v7 }
 0x9b3   :  { %v8747_v17 = vpop.f32.mrf.mxu0 }
 0x9b4   :  { %v8748_v58 = vadd.f32 %v8747_v17, %v8386_v53 }
 0x9b5   :  { %v8749_v48 = vpop.f32.mrf.mxu0 }
 0x9b6   :  { %v8750_v62 = vadd.f32 %v8749_v48, %v8390_v57  ;;  %v9228_v48 = vadd.s32 128, %v9227_v41 }
 0x9b7   :  { %v8751_v16 = vpop.f32.mrf.mxu0 }
 0x9b8   :  { %v9230_v38 = vcvt.s32.f32 %v9228_v48 }
 0x9b9   :  { %v8752_v49 = vpop.f32.mrf.mxu0 }
 0x9ba   :  { %v9232_v16 = vmul.f32 0.0625, %v9230_v38 }
 0x9bc   :  { %v9234_v49 = vfloor.f32 %v9232_v16 }
 0x9be   :  { %v9236_v51 = vmul.f32 16.0, %v9234_v49  ;;  %v9242_v57 = vmul.f32 0.06666667, %v9234_v49 }
 0x9c0   :  { %v9238_v3 = vsub.f32 %v9230_v38, %v9236_v51 }
 0x9c2   :  { %v9240_v55 = vmul.f32 0.06666667, %v9238_v3 }
 0xa33   :  { %v8788_v59 = vpop.f32.mrf.mxu1 }
 0xa34   :  { %v8789_v63 = vadd.f32 %v8788_v59, %v8748_v58 }
 0xa35   :  { %v8790_v1 = vpop.f32.mrf.mxu1 }
 0xa36   :  { %v8791_v19 = vadd.f32 %v8790_v1, %v8750_v62  ;;  %v8795_v0 = vmax.f32 %v8789_v63, 0.0 }
 0xa37   :  { %v8792_v2 = vpop.f32.mrf.mxu1 }
 0xa38   :  { %v8796_v61 = vmax.f32 %v8791_v19, 0.0  ;;  %v8830_v5 = vpack.c.bf16 %v8795_v0, %v8795_v0 }
 0xa39   :  { %v8793_v33 = vpop.f32.mrf.mxu1 }
 0xa3a   :  { %v8831_v4 = vpack.c.bf16 %v8796_v61, %v8796_v61 }
 0xa3c   :  { %8966 = vmatprep.mubr.bf16.mxu0 %v8831_v4 }
 0xa3d   :  { %8967 = vmatmul.mubr.bf16.vlgmr.msra.gmra.mxu0 %v8830_v5 }
 0xa3e   :  { %10680 = vmatprep.mubr.msk.bf16.mxu0 %vm12238_vm0, %v12237_v32  ;;  %10673 = vmatpush3.bf16.msra.mxu0 %v11833_v43 }
 0xa3f   :  { %10674 = vmatprep.subr.bf16.mxu0 %v12237_v32 }
 0xa42   :  { %10675 = vmatpush3.bf16.msra.mxu0 %v11834_v18 }
 0xa43   :  { %10676 = vmatprep.subr.bf16.mxu0 %v12237_v32 }
 0xa46   :  { %10677 = vmatpush3.bf16.msra.mxu0 %v11835_v25 }
 0xa47   :  { %10678 = vmatprep.subr.bf16.mxu0 %v12237_v32 }
 0xa4a   :  { %10679 = vmatpush3.bf16.msra.mxu0 %v11836_v45 }
 0xafd   :  { %v10632_v21 = vpop.f32.mrf.mxu0 }
 0xaff   :  { %v10633_v24 = vpop.f32.mrf.mxu0 }
 0xb00   :  { %v10634_v14 = vadd.f32 %v10633_v24, %v10632_v21 }
 0xb01   :  { %v10635_v60 = vpop.f32.mrf.mxu0 }
 0xb02   :  { %v8969_v13 = vadd.f32 %v10634_v14, %v10562_v22 }
 0xb03   :  { %v10636_v30 = vpop.f32.mrf.mxu0 }
 0xb04   :  { %v8974_v23 = vmax.f32 %v8969_v13, 0.0 }
 0xb06   :  { %v8992_v37 = vpack.c.bf16 %v8974_v23, %v8974_v23 }
 0xb08   :  { %10669 = vmatmul.mubr.bf16.vlgmr.msra.gmra.mxu1 %v8992_v37 }
 0xbc8   :  { %v9081_v20 = vpop.f32.mrf.mxu1 }
 0xbc9   :  { %v9082_v39 = vadd.f32 %v10579_v35, %v9081_v20 }
 0xbca   :  { %v10670_v26 = vpop.f32.mrf.mxu1 }
 0xbcb   :  { %v9087_v27 = vmax.f32 %v9082_v39, 0.0 }
 0xbcc   :  { %v9084_v46 = vpop.f32.mrf.mxu1 }
 0xbcd   :  { %v9088_v44 = vpack.c.bf16 %v9087_v27, %v9087_v27 }
 0xbce   :  { %v10671_v11 = vpop.f32.mrf.mxu1 }
 0xbcf   :  { %10681 = vmatmul.mubr.msk.bf16.vlgmr.msra.gmra.mxu0 %vm9128_vm1, %v9088_v44 }
 0xc8f   :  { %v9166_v29 = vpop.f32.mrf.mxu0 }
 0xc90   :  { %v9167_v42 = vadd.f32 %v10588_v54, %v9166_v29 }
 0xc91   :  { %v10682_v31 = vpop.f32.mrf.mxu0 }
 0xc92   :  { %v9175_v8 = vrot.slane %v9167_v42, %v12475_v12  ;;  %v9182_v34 = vrot.slane %v9167_v42, %v12481_v15  ;;  %v9229_v12 = vcvt.s32.f32 %v9227_v41 }
 0xc93   :  { %v9169_v36 = vpop.f32.mrf.mxu0 }
 0xc94   :  { %9184 = vbcast.lane.b32.xlu0 %v9182_v34, 256  ;;  %9177 = vbcast.lane.b32.xlu1 %v9175_v8, 256  ;;  %v9231_v15 = vmul.f32 0.0625, %v9229_v12 }
 0xc95   :  { %v10683_v17 = vpop.f32.mrf.mxu0 }
 0xc96   :  { %v9233_v47 = vfloor.f32 %v9231_v15 }
 0xc98   :  { %9192 = vbcast.lane.b32.xlu0 %v9182_v34, 260  ;;  %9188 = vbcast.lane.b32.xlu1 %v9175_v8, 260  ;;  %v9235_v50 = vmul.f32 16.0, %v9233_v47  ;;  %v9241_v53 = vmul.f32 0.06666667, %v9233_v47 }
 0xc9a   :  { %v9237_v32 = vsub.f32 %v9229_v12, %v9235_v50 }
 0xc9c   :  { %9216 = vbcast.lane.b32.xlu0 %v9182_v34, 272  ;;  %9224 = vbcast.lane.b32.xlu1 %v9182_v34, 276  ;;  %v9239_v56 = vmul.f32 0.06666667, %v9237_v32 }
 0xca0   :  { %9208 = vbcast.lane.b32.xlu0 %v9182_v34, 268  ;;  %9212 = vbcast.lane.b32.xlu1 %v9175_v8, 272 }
 0xca4   :  { %9220 = vbcast.lane.b32.xlu0 %v9175_v8, 276  ;;  %9204 = vbcast.lane.b32.xlu1 %v9175_v8, 268 }
 0xca8   :  { %9200 = vbcast.lane.b32.xlu0 %v9182_v34, 264  ;;  %9196 = vbcast.lane.b32.xlu1 %v9175_v8, 264 }
 0xd06   :  { %v9185_v40 = vpop.permute.xlu0 %9184  ;;  %v9178_v52 = vpop.permute.xlu1 %9177 }
 0xd07   :  { %v9245_v9 = vsub.f32 %v9239_v56, %v9185_v40  ;;  %v9246_v62 = vsub.f32 %v9240_v55, %v9185_v40  ;;  %v9243_v21 = vsub.f32 %v9239_v56, %v9178_v52  ;;  %v9244_v22 = vsub.f32 %v9240_v55, %v9178_v52 }
 0xd0a   :  { %v9193_v58 = vpop.permute.xlu0 %9192  ;;  %v9189_v59 = vpop.permute.xlu1 %9188 }
 0xd0b   :  { %v9249_v63 = vsub.f32 %v9241_v53, %v9193_v58  ;;  %v9250_v1 = vsub.f32 %v9242_v57, %v9193_v58  ;;  %v9247_v24 = vsub.f32 %v9241_v53, %v9189_v59  ;;  %v9248_v14 = vsub.f32 %v9242_v57, %v9189_v59 }
 0xd0e   :  { %v9217_v19 = vpop.permute.xlu0 %9216  ;;  %v9225_v0 = vpop.permute.xlu1 %9224 }
 0xd0f   :  { %v9257_v2 = vmul.f32 %v9245_v9, %v9217_v19  ;;  %v9258_v61 = vmul.f32 %v9246_v62, %v9217_v19  ;;  %v9261_v33 = vmul.f32 %v9249_v63, %v9225_v0  ;;  %v9262_v4 = vmul.f32 %v9250_v1, %v9225_v0 }
 0xd11   :  { %v9265_v5 = vadd.f32 %v9261_v33, %v9257_v2  ;;  %v9266_v6 = vadd.f32 %v9262_v4, %v9258_v61 }
 0xd12   :  { %v9209_v28 = vpop.permute.xlu0 %9208  ;;  %v9213_v7 = vpop.permute.xlu1 %9212 }
 0xd13   :  { %v9253_v43 = vmul.f32 %v9245_v9, %v9209_v28  ;;  %v9254_v18 = vmul.f32 %v9246_v62, %v9209_v28  ;;  %v9273_v60 = vmul.f32 %v9265_v5, %v9265_v5  ;;  %v9274_v13 = vmul.f32 %v9266_v6, %v9266_v6 }
 0xd14   :  { %v9255_v37 = vmul.f32 %v9243_v21, %v9213_v7  ;;  %v9256_v25 = vmul.f32 %v9244_v22, %v9213_v7 }
 0xd15   :  { %v9269_v30 = vmul.f32 %v9253_v43, %v9253_v43  ;;  %v9270_v23 = vmul.f32 %v9254_v18, %v9254_v18 }
 0xd16   :  { %v9221_v45 = vpop.permute.xlu0 %9220  ;;  %v9205_v35 = vpop.permute.xlu1 %9204 }
 0xd17   :  { %v9277_v20 = vadd.f32 %v9273_v60, %v9269_v30  ;;  %v9278_v39 = vadd.f32 %v9274_v13, %v9270_v23  ;;  %v9259_v26 = vmul.f32 %v9247_v24, %v9221_v45  ;;  %v9260_v27 = vmul.f32 %v9248_v14, %v9221_v45 }
 0xd18   :  { %v9251_v46 = vmul.f32 %v9243_v21, %v9205_v35  ;;  %v9252_v44 = vmul.f32 %v9244_v22, %v9205_v35 }
 0xd19   :  { %v9281_v11 = vmul.f32 -0.5, %v9277_v20  ;;  %v9282_v54 = vmul.f32 -0.5, %v9278_v39  ;;  %v9263_v29 = vadd.f32 %v9259_v26, %v9255_v37  ;;  %v9264_v42 = vadd.f32 %v9260_v27, %v9256_v25 }
 0xd1a   :  { %v9267_v31 = vmul.f32 %v9251_v46, %v9251_v46  ;;  %v9268_v8 = vmul.f32 %v9252_v44, %v9252_v44 }
 0xd1b   :  { %v9298_v34 = vsel %vm9283_vm2, %v9281_v11, -inf  ;;  %v9305_v36 = vsel %vm9283_vm2, %v9282_v54, -inf  ;;  %v9271_v17 = vmul.f32 %v9263_v29, %v9263_v29  ;;  %v9272_v41 = vmul.f32 %v9264_v42, %v9264_v42 }
 0xd1c   :  { %v9299_v48 = vrot.slane %v9298_v34, 4  ;;  %v9306_v12 = vrot.slane %v9305_v36, 4 }
 0xd1d   :  { %v9275_v38 = vadd.f32 %v9271_v17, %v9267_v31  ;;  %v9276_v15 = vadd.f32 %v9272_v41, %v9268_v8 }
 0xd1e   :  { %v9300_v16 = vmax.f32 %v9298_v34, %v9299_v48  ;;  %v9307_v47 = vmax.f32 %v9305_v36, %v9306_v12 }
 0xd1f   :  { %v9279_v49 = vmul.f32 -0.5, %v9275_v38  ;;  %v9280_v50 = vmul.f32 -0.5, %v9276_v15 }
 0xd20   :  { %v9301_v51 = vrot.slane %v9300_v16, 2  ;;  %v9308_v32 = vrot.slane %v9307_v47, 2 }
 0xd21   :  { %v9284_v3 = vsel %vm9283_vm2, %v9279_v49, -inf  ;;  %v9291_v40 = vsel %vm9283_vm2, %v9280_v50, -inf }
 0xd22   :  { %v9302_v52 = vmax.f32 %v9300_v16, %v9301_v51  ;;  %v9309_v56 = vmax.f32 %v9307_v47, %v9308_v32  ;;  %v9285_v55 = vrot.slane %v9284_v3, 4  ;;  %v9292_v53 = vrot.slane %v9291_v40, 4 }
 0xd24   :  { %v9303_v57 = vrot.slane %v9302_v52, 1  ;;  %v9310_v58 = vrot.slane %v9309_v56, 1  ;;  %v9286_v59 = vmax.f32 %v9284_v3, %v9285_v55  ;;  %v9293_v9 = vmax.f32 %v9291_v40, %v9292_v53  ;;  %v9201_v3 = vpop.permute.xlu0 %9200 }
 0xd26   :  { %v9304_v62 = vmax.f32 %v9302_v52, %v9303_v57  ;;  %v9311_v63 = vmax.f32 %v9309_v56, %v9310_v58  ;;  %v9287_v1 = vrot.slane %v9286_v59, 2  ;;  %v9294_v19 = vrot.slane %v9293_v9, 2 }
 0xd28   :  { %v9314_v0 = vsub.f32 %v9281_v11, %v9304_v62  ;;  %v9315_v2 = vsub.f32 %v9282_v54, %v9311_v63  ;;  %v9288_v61 = vmax.f32 %v9286_v59, %v9287_v1  ;;  %v9295_v33 = vmax.f32 %v9293_v9, %v9294_v19  ;;  %v9197_v19 = vpop.permute.xlu1 %9196 }
 0xd2a   :  { %v9320_v4 = vmul.f32 1.442695, %v9314_v0  ;;  %v9322_v5 = vmul.f32 1.442695, %v9315_v2  ;;  %v9289_v6 = vrot.slane %v9288_v61, 1  ;;  %v9296_v28 = vrot.slane %v9295_v33, 1 }
 0xd2c   :  { %11837 = vpow2.f32 %v9320_v4  ;;  %v9290_v7 = vmax.f32 %v9288_v61, %v9289_v6  ;;  %v9297_v43 = vmax.f32 %v9295_v33, %v9296_v28  ;;  %v12239_v4 = vmov 1983009808  }
 0xd2d   :  { %11839 = vpow2.f32 %v9322_v5  ;;  %v9398_v5 = vunpack.c.l.s4 %v12239_v4 }
 0xd2e   :  { %v9312_v18 = vsub.f32 %v9279_v49, %v9290_v7  ;;  %v9313_v21 = vsub.f32 %v9280_v50, %v9297_v43 }
 0xd30   :  { %v9316_v22 = vmul.f32 1.442695, %v9312_v18  ;;  %v9318_v24 = vmul.f32 1.442695, %v9313_v21 }
 0xd32   :  { %11841 = vpow2.f32 %v9316_v22 }
 0xd33   :  { %11843 = vpow2.f32 %v9318_v24 }
 0xd39   :  { %v11838_v14 = vpop.eup %11837 }
 0xd3a   :  { %v11840_v60 = vpop.eup %11839  ;;  %v9338_v13 = vsel %vm9283_vm2, %v11838_v14, 0.0 }
 0xd3b   :  { %v9339_v30 = vrot.slane %v9338_v13, 4  ;;  %v9345_v23 = vsel %vm9283_vm2, %v11840_v60, 0.0 }
 0xd3c   :  { %v9346_v37 = vrot.slane %v9345_v23, 4 }
 0xd3d   :  { %v9340_v25 = vadd.f32 %v9339_v30, %v9338_v13 }
 0xd3e   :  { %v9347_v45 = vadd.f32 %v9346_v37, %v9345_v23 }
 0xd3f   :  { %v11842_v35 = vpop.eup %11841  ;;  %v9341_v20 = vrot.slane %v9340_v25, 2 }
 0xd40   :  { %v11844_v39 = vpop.eup %11843  ;;  %v9324_v26 = vsel %vm9283_vm2, %v11842_v35, 0.0  ;;  %v9348_v27 = vrot.slane %v9347_v45, 2 }
 0xd41   :  { %v9325_v46 = vrot.slane %v9324_v26, 4  ;;  %v9331_v44 = vsel %vm9283_vm2, %v11844_v39, 0.0  ;;  %v9342_v11 = vadd.f32 %v9341_v20, %v9340_v25 }
 0xd42   :  { %v9332_v54 = vrot.slane %v9331_v44, 4  ;;  %v9349_v29 = vadd.f32 %v9348_v27, %v9347_v45 }
 0xd43   :  { %v9343_v42 = vrot.slane %v9342_v11, 1  ;;  %v9326_v31 = vadd.f32 %v9325_v46, %v9324_v26 }
 0xd44   :  { %v9350_v8 = vrot.slane %v9349_v29, 1  ;;  %v9333_v34 = vadd.f32 %v9332_v54, %v9331_v44 }
 0xd45   :  { %v9344_v36 = vadd.f32 %v9343_v42, %v9342_v11  ;;  %v9327_v17 = vrot.slane %v9326_v31, 2 }
 0xd46   :  { %v9351_v41 = vadd.f32 %v9350_v8, %v9349_v29  ;;  %v9334_v48 = vrot.slane %v9333_v34, 2 }
 0xd47   :  { %11845 = vrcp.f32 %v9344_v36  ;;  %v9328_v12 = vadd.f32 %v9327_v17, %v9326_v31 }
 0xd48   :  { %11847 = vrcp.f32 %v9351_v41  ;;  %v9335_v38 = vadd.f32 %v9334_v48, %v9333_v34 }
 0xd49   :  { %v9329_v15 = vrot.slane %v9328_v12, 1 }
 0xd4a   :  { %v9336_v16 = vrot.slane %v9335_v38, 1 }
 0xd4b   :  { %v9330_v47 = vadd.f32 %v9329_v15, %v9328_v12 }
 0xd4c   :  { %v9337_v49 = vadd.f32 %v9336_v16, %v9335_v38 }
 0xd4d   :  { %11849 = vrcp.f32 %v9330_v47 }
 0xd4e   :  { %11851 = vrcp.f32 %v9337_v49 }
 0xd54   :  { %v11846_v50 = vpop.eup %11845 }
 0xd55   :  { %v11848_v51 = vpop.eup %11847  ;;  %v9358_v32 = vmul.f32 %v11846_v50, %v11838_v14 }
 0xd56   :  { %v9359_v40 = vmul.f32 %v11848_v51, %v11840_v60  ;;  %v9399_v60 = vunpack.c.0.s8 %v9398_v5 }
 0xd57   :  { %v9362_v52 = vmul.f32 %v9358_v32, %v9201_v3 }
 0xd58   :  { %v9363_v56 = vmul.f32 %v9359_v40, %v9201_v3  ;;  %v9402_v20 = vsub.s32 %v9399_v60, %v12467_v10 }
 0xd59   :  { %v9378_v55 = vsel %vm9283_vm2, %v9362_v52, 0.0 }
 0xd5a   :  { %v11850_v53 = vpop.eup %11849  ;;  %v9379_v57 = vrot.slane %v9378_v55, 4  ;;  %v9385_v58 = vsel %vm9283_vm2, %v9363_v56, 0.0 }
 0xd5b   :  { %v11852_v59 = vpop.eup %11851  ;;  %v9386_v9 = vrot.slane %v9385_v58, 4  ;;  %v9356_v62 = vmul.f32 %v11850_v53, %v11842_v35 }
 0xd5c   :  { %v9380_v63 = vadd.f32 %v9379_v57, %v9378_v55  ;;  %v9357_v1 = vmul.f32 %v11852_v59, %v11844_v39 }
 0xd5d   :  { %v9387_v0 = vadd.f32 %v9386_v9, %v9385_v58  ;;  %v9360_v2 = vmul.f32 %v9356_v62, %v9197_v19 }
 0xd5e   :  { %v9381_v61 = vrot.slane %v9380_v63, 2  ;;  %v9361_v33 = vmul.f32 %v9357_v1, %v9197_v19 }
 0xd5f   :  { %v9388_v6 = vrot.slane %v9387_v0, 2  ;;  %v9364_v28 = vsel %vm9283_vm2, %v9360_v2, 0.0 }
 0xd60   :  { %v9382_v7 = vadd.f32 %v9381_v61, %v9380_v63  ;;  %v9365_v43 = vrot.slane %v9364_v28, 4  ;;  %v9371_v18 = vsel %vm9283_vm2, %v9361_v33, 0.0 }
 0xd61   :  { %v9389_v21 = vadd.f32 %v9388_v6, %v9387_v0  ;;  %v9372_v22 = vrot.slane %v9371_v18, 4 }
 0xd62   :  { %v9383_v24 = vrot.slane %v9382_v7, 1  ;;  %v9366_v14 = vadd.f32 %v9365_v43, %v9364_v28 }
 0xd63   :  { %v9390_v13 = vrot.slane %v9389_v21, 1  ;;  %v9373_v30 = vadd.f32 %v9372_v22, %v9371_v18 }
 0xd64   :  { %v9384_v23 = vadd.f32 %v9383_v24, %v9382_v7  ;;  %v9367_v37 = vrot.slane %v9366_v14, 2 }
 0xd65   :  { %v9391_v25 = vadd.f32 %v9390_v13, %v9389_v21  ;;  %v9374_v45 = vrot.slane %v9373_v30, 2 }
 0xd66   :  { %v9368_v35 = vadd.f32 %v9367_v37, %v9366_v14 }
 0xd67   :  { %v9404_v39 = vcombine.low %v9384_v23, %v9391_v25  ;;  %v9375_v26 = vadd.f32 %v9374_v45, %v9373_v30 }
 0xd68   :  { %v9369_v27 = vrot.slane %v9368_v35, 1 }
 0xd69   :  { %v9376_v46 = vrot.slane %v9375_v26, 1  ;;  %v9411_v11 = vrot.slane %v9404_v39, %v9402_v20 }
 0xd6a   :  { %v9370_v44 = vadd.f32 %v9369_v27, %v9368_v35 }
 0xd6b   :  { %v9377_v54 = vadd.f32 %v9376_v46, %v9375_v26  ;;  %v9416_v42 = vrot.slane %v9411_v11, 7 }
 0xd6d   :  { %v9396_v29 = vcombine.low %v9370_v44, %v9377_v54 }
 0xd6f   :  { %v9403_v31 = vrot.slane %v9396_v29, %v9402_v20 }
 0xd71   :  { %v9418_v8 = vsel %vm9417_vm3, %v9416_v42, %v9403_v31 }
 0xd72   :  { %v9420_v34 = vsel %vm9419_vm4, %v9416_v42, %v9418_v8 }
 0xd73   :  { %v9422_v36 = vsel %vm9421_vm5, %v9416_v42, %v9420_v34 }
 0xd74   :  { %v9424_v17 = vsel %vm9423_vm6, %v9416_v42, %v9422_v36 }
 0xd75   :  { %9426 = vst [vmem:[%s12814_s25] sm:$0xf] %v9424_v17 }
 0xd76   :  { %9431 = vsyncpa [#allocation3], 1 }
 0xd77   :  { %9432 = vsyncpa [#allocation5], 1 }
 0xd78   :  { %9433 = vsyncpa [#allocation8], 1 }
 0xd79   :  { %9434 = vsyncpa [#allocation11], 1 }
 0xd7a   :  { %9435 = vsyncpa [#allocation14], 1 }
 0xd7b   :  { %9436 = vsyncpa [#allocation17], 1 }
 0xd7c   :  { %9437 = vsyncpa [#allocation20], 1 }
 0xd7d   :  { %9438 = vsyncpa [#allocation23], 1 }
 0xd7e   :  { %9439 = vsyncpa [#allocation26], 1 }

</bundles_post_ra>
